<compile_context>
chip_gen: v7x
topology: tpu7x:2x2x1
jax: 0.10.0
libtpu: 0.0.40
codegen_flags: <defaults>
</compile_context>

<pallas_src>
import functools

import jax
import jax.numpy as jnp
from jax.experimental import pallas as pl
from jax.experimental.pallas import tpu as pltpu


# ---------------------------------------------------------------------------
# Generic fused 3x3 conv kernel
# ---------------------------------------------------------------------------
def _conv3x3_kernel(*refs, relu_in, relu_out, has_residual):
  if has_residual:
    mid_ref, top_ref, bot_ref, res_ref, w_ref, s_ref, out_ref, xt_ref = refs
  else:
    mid_ref, top_ref, bot_ref, w_ref, s_ref, out_ref, xt_ref = refs
    res_ref = None

  _, h_tile, w_out, c_out = out_ref.shape
  i = pl.program_id(1)
  n_row_tiles = pl.num_programs(1)

  # Row tile plus 1-row halos (halo rows are masked to zero at image borders).
  mid = mid_ref[0]                       # (h_tile, W+2, Cin) f32
  top = top_ref[0, 0]                    # (W+2, Cin)
  bot = bot_ref[0, 0]                    # (W+2, Cin)
  top = top * (i > 0).astype(top.dtype)
  bot = bot * (i < n_row_tiles - 1).astype(bot.dtype)
  if relu_in:
    mid = jnp.maximum(mid, 0.0)
    top = jnp.maximum(top, 0.0)
    bot = jnp.maximum(bot, 0.0)

  # Stage the H-padded tile (each row range written exactly once; no zero-fill).
  xt_ref[0] = top
  xt_ref[1:h_tile + 1] = mid
  xt_ref[h_tile + 1] = bot

  # 3x3 conv as 9 MXU matmuls with f32 accumulation; the 3 kx-shifted
  # (sublane-offset) views are hoisted out of the ky loop; MXU operands in bf16.
  acc = jnp.zeros((h_tile, w_out, c_out), jnp.float32)
  for kx in range(3):
    xs = xt_ref[:, kx:kx + w_out, :].astype(jnp.bfloat16)   # (h_tile+2, W, Cin)
    for ky in range(3):
      acc = acc + jnp.einsum(
          "hwc,cd->hwd", xs[ky:ky + h_tile], w_ref[ky, kx],
          preferred_element_type=jnp.float32)

  out = acc + s_ref[...]                 # folded bias + BN shift (+ const mult)
  if has_residual:
    out = out + res_ref[0].astype(jnp.float32)
  if relu_out:
    out = jnp.maximum(out, 0.0)
  out_ref[0] = out.astype(out_ref.dtype)


def _largest_divisor_leq(n, target):
  t = max(1, min(n, target))
  while n % t:
    t -= 1
  return t


def _vmem_limit_bytes(h_tile, wp, w, c_in, c_out, has_res):
  f32, bf16 = 4, 2
  blocks = (h_tile * wp * c_in * f32            # mid block
            + 2 * wp * c_in * f32               # halo rows
            + h_tile * w * c_out * f32          # output block
            + (h_tile * w * c_out * f32 if has_res else 0)
            + 9 * c_in * c_out * bf16 + c_out * f32)
  scratch = (h_tile + 2) * wp * c_in * f32
  live = (2 * h_tile * w * c_out * f32          # accumulator + epilogue temp
          + 3 * (h_tile + 2) * w * c_in * bf16) # bf16 kx views
  total = 2 * blocks + scratch + live + (4 << 20)
  return int(min(max(total, 16 << 20), 64 << 20))


def conv3x3_pallas(x, wk, shift, *, residual=None, relu_in=False,
                   relu_out=False, h_tile_target=64):
  """Fused 3x3 conv (+shift, +optional residual, +optional ReLUs), NHWC f32.

  x:      (N, H, W, Cin)  float32
  wk:     (3, 3, Cin, Cout) bfloat16 (BN/const already folded in)
  shift:  (1, Cout) float32 (folded bias + BN shift, times const mult)
  """
  N, H, W, Cin = x.shape
  Cout = wk.shape[-1]
  h_tile = _largest_divisor_leq(H, h_tile_target)
  n_h = H // h_tile
  Wp = W + 2

  # Pad width only; the H halo comes in through the extra 1-row operands.
  xw = jnp.pad(x, ((0, 0), (0, 0), (1, 1), (0, 0)))

  mid_spec = pl.BlockSpec((1, h_tile, Wp, Cin), lambda n, i: (n, i, 0, 0))
  top_spec = pl.BlockSpec(
      (1, 1, Wp, Cin),
      lambda n, i: (n, jnp.maximum(i * h_tile - 1, 0), 0, 0))
  bot_spec = pl.BlockSpec(
      (1, 1, Wp, Cin),
      lambda n, i: (n, jnp.minimum((i + 1) * h_tile, H - 1), 0, 0))
  w_spec = pl.BlockSpec(wk.shape, lambda n, i: (0, 0, 0, 0))
  s_spec = pl.BlockSpec(shift.shape, lambda n, i: (0, 0))
  out_spec = pl.BlockSpec((1, h_tile, W, Cout), lambda n, i: (n, i, 0, 0))

  has_res = residual is not None
  operands = [xw, xw, xw]
  in_specs = [mid_spec, top_spec, bot_spec]
  if has_res:
    assert residual.shape == (N, H, W, Cout)
    operands.append(residual)
    in_specs.append(pl.BlockSpec((1, h_tile, W, Cout), lambda n, i: (n, i, 0, 0)))
  operands += [wk, shift]
  in_specs += [w_spec, s_spec]

  kernel = functools.partial(
      _conv3x3_kernel, relu_in=relu_in, relu_out=relu_out, has_residual=has_res)

  return pl.pallas_call(
      kernel,
      grid=(N, n_h),
      in_specs=in_specs,
      out_specs=out_spec,
      out_shape=jax.ShapeDtypeStruct((N, H, W, Cout), jnp.float32),
      scratch_shapes=[pltpu.VMEM((h_tile + 2, Wp, Cin), jnp.float32)],
      compiler_params=pltpu.CompilerParams(
          dimension_semantics=("parallel", "parallel"),
          vmem_limit_bytes=_vmem_limit_bytes(h_tile, Wp, W, Cin, Cout, has_res)),
  )(*operands)


# ---------------------------------------------------------------------------
# Pure-JAX reference conv (same bf16-operand / f32-accumulation discipline)
# ---------------------------------------------------------------------------
def conv3x3_reference(x, wk, shift, *, residual=None, relu_in=False,
                      relu_out=False):
  xin = jnp.maximum(x, 0.0) if relu_in else x
  out = jax.lax.conv_general_dilated(
      xin.astype(jnp.bfloat16), wk.astype(jnp.bfloat16),
      window_strides=(1, 1), padding=((1, 1), (1, 1)),
      dimension_numbers=("NHWC", "HWIO", "NHWC"),
      preferred_element_type=jnp.float32)
  out = out + shift
  if residual is not None:
    out = out + residual.astype(jnp.float32)
  if relu_out:
    out = jnp.maximum(out, 0.0)
  return out


# ---------------------------------------------------------------------------
# Host-side parameter folding + model forward
# ---------------------------------------------------------------------------
def fold_conv_bn(w_oihw, bias, gamma=None, beta=None, mean=None, var=None,
                 const_mult=1.0, eps=1e-5):
  """Fold conv bias + eval-mode BN + constant multiplier into (weights, shift)."""
  w = jnp.transpose(w_oihw, (2, 3, 1, 0)).astype(jnp.float32)  # (kh, kw, Cin, Cout)
  if gamma is None:
    scale = jnp.ones_like(bias)
    shift = bias
  else:
    scale = gamma / jnp.sqrt(var + eps)
    shift = (bias - mean) * scale + beta
  w = w * (scale * const_mult)
  shift = shift * const_mult
  return w.astype(jnp.bfloat16), shift.reshape(1, -1).astype(jnp.float32)


def make_model_params(key, c_in=4, c_mid=64, c_out1=4, c_out2=2, n_blocks=15,
                      const_mult=0.1, eps=1e-5):
  def conv_init(k, cout, cin):
    k1, k2 = jax.random.split(k)
    bound = 1.0 / jnp.sqrt(cin * 9.0)
    w = jax.random.uniform(k1, (cout, cin, 3, 3), jnp.float32, -bound, bound)
    b = jax.random.uniform(k2, (cout,), jnp.float32, -bound, bound)
    return w, b

  def bn_init(k, c):
    ks = jax.random.split(k, 4)
    return (1.0 + 0.1 * jax.random.normal(ks[0], (c,), jnp.float32),
            0.1 * jax.random.normal(ks[1], (c,), jnp.float32),
            0.1 * jax.random.normal(ks[2], (c,), jnp.float32),
            1.0 + 0.1 * jax.random.uniform(ks[3], (c,), jnp.float32))

  keys = iter(jax.random.split(key, 3 + 4 * n_blocks))
  p_in = fold_conv_bn(*conv_init(next(keys), c_mid, c_in), eps=eps)

  wa, sa, wb, sb = [], [], [], []
  for _ in range(n_blocks):
    w1, b1 = conv_init(next(keys), c_mid, c_mid)
    bn1 = bn_init(next(keys), c_mid)
    w2, b2 = conv_init(next(keys), c_mid, c_mid)
    bn2 = bn_init(next(keys), c_mid)
    f1 = fold_conv_bn(w1, b1, *bn1, const_mult=1.0, eps=eps)
    f2 = fold_conv_bn(w2, b2, *bn2, const_mult=const_mult, eps=eps)
    wa.append(f1[0]); sa.append(f1[1]); wb.append(f2[0]); sb.append(f2[1])

  p_o1 = fold_conv_bn(*conv_init(next(keys), c_out1, c_mid), eps=eps)
  p_o2 = fold_conv_bn(*conv_init(next(keys), c_out2, c_out1), eps=eps)

  return {"in": p_in,
          "rb": (jnp.stack(wa), jnp.stack(sa), jnp.stack(wb), jnp.stack(sb)),
          "out1": p_o1, "out2": p_o2}


def mri_forward(x_nchw, params, conv_fn):
  """Full MriSelfSupervised forward. x_nchw: (N, 4, H, W) f32 -> (N, 2, H, W)."""
  x = jnp.transpose(x_nchw, (0, 2, 3, 1)).astype(jnp.float32)  # NHWC

  w_in, s_in = params["in"]
  out = conv_fn(x, w_in, s_in, relu_in=True, relu_out=True)

  def rb_body(h, p):
    wa, sa, wb, sb = p
    mid = conv_fn(h, wa, sa, relu_out=True)                    # conv1+bn1+relu
    new = conv_fn(mid, wb, sb, residual=h, relu_out=True)      # conv2+bn2*0.1+skip+relu
    return new, None

  out, _ = jax.lax.scan(rb_body, out, params["rb"])

  w1, s1 = params["out1"]
  out = conv_fn(out, w1, s1, residual=x)                       # mri_out1 then + x
  w2, s2 = params["out2"]
  out = conv_fn(out, w2, s2)                                   # mri_out2
  return jnp.transpose(out, (0, 3, 1, 2))                      # back to NCHW


# ---------------------------------------------------------------------------
# Self-contained test
# ---------------------------------------------------------------------------
if __name__ == "__main__":
  key = jax.random.PRNGKey(0)
  k_x, k_p = jax.random.split(key)

  N, C_IN, H, W = 2, 4, 16, 16
  x = jax.random.normal(k_x, (N, C_IN, H, W), jnp.float32)
  params = make_model_params(k_p)

  # Small h_tile target so the test exercises multiple row-tiles + halo masking.
  conv_pallas = functools.partial(conv3x3_pallas, h_tile_target=8)
  fwd_pallas = jax.jit(lambda xx, pp: mri_forward(xx, pp, conv_fn=conv_pallas))
  fwd_ref = jax.jit(lambda xx, pp: mri_forward(xx, pp, conv_fn=conv3x3_reference))

  out = jax.block_until_ready(fwd_pallas(x, params))
  ref = jax.block_until_ready(fwd_ref(x, params))

  assert out.shape == (N, 2, H, W) and out.dtype == jnp.float32
  assert bool(jnp.isfinite(out).all())
  err = float(jnp.max(jnp.abs(out - ref)))
  scale = float(jnp.max(jnp.abs(ref))) + 1e-6
  assert err <= 0.05 * scale + 0.05, f"pallas vs reference mismatch: {err} (scale {scale})"

  print("KERNEL_OK")
</pallas_src>

<mosaic_0001>
module attributes {stable_mosaic.version = 11 : i64} {
  func.func @_conv3x3_kernel(%arg0: i32, %arg1: i32, %arg2: memref<1x8x18x4xf32, #tpu.memory_space<vmem>>, %arg3: memref<1x1x18x4xf32, #tpu.memory_space<vmem>>, %arg4: memref<1x1x18x4xf32, #tpu.memory_space<vmem>>, %arg5: memref<3x3x4x64xbf16, #tpu.memory_space<vmem>>, %arg6: memref<1x64xf32, #tpu.memory_space<vmem>>, %arg7: memref<1x8x16x64xf32, #tpu.memory_space<vmem>>, %arg8: memref<10x18x4xf32, #tpu.memory_space<vmem>>) attributes {dimension_semantics = [#tpu.dimension_semantics<parallel>, #tpu.dimension_semantics<parallel>], iteration_bounds = array<i64: 2, 2>, scalar_prefetch = 0 : i64, scratch_operands = 1 : i64, tpu.core_type = #tpu.core_type<tc>, window_params = [{transform_indices = @transform_0, window_bounds = array<i64: 1, 8, 18, 4>}, {transform_indices = @transform_1, window_bounds = array<i64: 1, 1, 18, 4>}, {transform_indices = @transform_2, window_bounds = array<i64: 1, 1, 18, 4>}, {pipeline_mode = #tpu.pipeline_mode<synchronous>, transform_indices = @transform_3, window_bounds = array<i64: 3, 3, 4, 64>}, {pipeline_mode = #tpu.pipeline_mode<synchronous>, transform_indices = @transform_4, window_bounds = array<i64: 1, 64>}, {transform_indices = @transform_5, window_bounds = array<i64: 1, 8, 16, 64>}]} {
    %c0 = arith.constant 0 : index
    %c0_0 = arith.constant 0 : index
    %c0_1 = arith.constant 0 : index
    %c0_2 = arith.constant 0 : index
    %0 = vector.load %arg2[%c0, %c0_0, %c0_1, %c0_2] : memref<1x8x18x4xf32, #tpu.memory_space<vmem>>, vector<1x8x18x4xf32>
    %1 = vector.shape_cast %0 : vector<1x8x18x4xf32> to vector<8x18x4xf32>
    %c0_3 = arith.constant 0 : index
    %c0_4 = arith.constant 0 : index
    %c0_5 = arith.constant 0 : index
    %c0_6 = arith.constant 0 : index
    %2 = vector.load %arg3[%c0_3, %c0_4, %c0_5, %c0_6] : memref<1x1x18x4xf32, #tpu.memory_space<vmem>>, vector<1x1x18x4xf32>
    %3 = vector.shape_cast %2 : vector<1x1x18x4xf32> to vector<18x4xf32>
    %c0_7 = arith.constant 0 : index
    %c0_8 = arith.constant 0 : index
    %c0_9 = arith.constant 0 : index
    %c0_10 = arith.constant 0 : index
    %4 = vector.load %arg4[%c0_7, %c0_8, %c0_9, %c0_10] : memref<1x1x18x4xf32, #tpu.memory_space<vmem>>, vector<1x1x18x4xf32>
    %5 = vector.shape_cast %4 : vector<1x1x18x4xf32> to vector<18x4xf32>
    %c0_i32 = arith.constant 0 : i32
    %6 = arith.cmpi sgt, %arg1, %c0_i32 : i32
    %7 = arith.extui %6 : i1 to i32
    %8 = arith.sitofp %7 : i32 to f32
    %9 = vector.broadcast %8 : f32 to vector<18x4xf32>
    %10 = arith.mulf %3, %9 : vector<18x4xf32>
    %c1_i32 = arith.constant 1 : i32
    %11 = arith.cmpi slt, %arg1, %c1_i32 : i32
    %12 = arith.extui %11 : i1 to i32
    %13 = arith.sitofp %12 : i32 to f32
    %14 = vector.broadcast %13 : f32 to vector<18x4xf32>
    %15 = arith.mulf %5, %14 : vector<18x4xf32>
    %cst = arith.constant 0.000000e+00 : f32
    %16 = vector.broadcast %cst : f32 to vector<8x18x4xf32>
    %17 = arith.maximumf %1, %16 : vector<8x18x4xf32>
    %cst_11 = arith.constant 0.000000e+00 : f32
    %18 = vector.broadcast %cst_11 : f32 to vector<18x4xf32>
    %19 = arith.maximumf %10, %18 : vector<18x4xf32>
    %cst_12 = arith.constant 0.000000e+00 : f32
    %20 = vector.broadcast %cst_12 : f32 to vector<18x4xf32>
    %21 = arith.maximumf %15, %20 : vector<18x4xf32>
    %c0_13 = arith.constant 0 : index
    %c0_14 = arith.constant 0 : index
    %c0_15 = arith.constant 0 : index
    %22 = vector.load %arg8[%c0_13, %c0_14, %c0_15] : memref<10x18x4xf32, #tpu.memory_space<vmem>>, vector<1x18x4xf32>
    %23 = vector.shape_cast %22 : vector<1x18x4xf32> to vector<18x4xf32>
    %24 = vector.shape_cast %19 : vector<18x4xf32> to vector<1x18x4xf32>
    tpu.vector_store %arg8[%c0_13, %c0_14, %c0_15], %24 {strides = array<i32>} : memref<10x18x4xf32, #tpu.memory_space<vmem>>, vector<1x18x4xf32>,
    %c1 = arith.constant 1 : index
    %c0_16 = arith.constant 0 : index
    %c0_17 = arith.constant 0 : index
    %25 = vector.load %arg8[%c1, %c0_16, %c0_17] : memref<10x18x4xf32, #tpu.memory_space<vmem>>, vector<8x18x4xf32>
    tpu.vector_store %arg8[%c1, %c0_16, %c0_17], %17 {strides = array<i32>} : memref<10x18x4xf32, #tpu.memory_space<vmem>>, vector<8x18x4xf32>,
    %c9 = arith.constant 9 : index
    %c0_18 = arith.constant 0 : index
    %c0_19 = arith.constant 0 : index
    %26 = vector.load %arg8[%c9, %c0_18, %c0_19] : memref<10x18x4xf32, #tpu.memory_space<vmem>>, vector<1x18x4xf32>
    %27 = vector.shape_cast %26 : vector<1x18x4xf32> to vector<18x4xf32>
    %28 = vector.shape_cast %21 : vector<18x4xf32> to vector<1x18x4xf32>
    tpu.vector_store %arg8[%c9, %c0_18, %c0_19], %28 {strides = array<i32>} : memref<10x18x4xf32, #tpu.memory_space<vmem>>, vector<1x18x4xf32>,
    %cst_20 = arith.constant 0.000000e+00 : f32
    %29 = vector.broadcast %cst_20 : f32 to vector<8x16x64xf32>
    %c0_21 = arith.constant 0 : index
    %c0_22 = arith.constant 0 : index
    %c0_23 = arith.constant 0 : index
    %30 = vector.load %arg8[%c0_21, %c0_22, %c0_23] : memref<10x18x4xf32, #tpu.memory_space<vmem>>, vector<10x16x4xf32>
    %31 = arith.truncf %30 : vector<10x16x4xf32> to vector<10x16x4xbf16>
    %32 = vector.extract_strided_slice %31 {offsets = [0, 0, 0], sizes = [8, 16, 4], strides = [1, 1, 1]} : vector<10x16x4xbf16> to vector<8x16x4xbf16>
    %c0_24 = arith.constant 0 : index
    %c0_25 = arith.constant 0 : index
    %c0_26 = arith.constant 0 : index
    %c0_27 = arith.constant 0 : index
    %33 = vector.load %arg5[%c0_24, %c0_25, %c0_26, %c0_27] : memref<3x3x4x64xbf16, #tpu.memory_space<vmem>>, vector<1x1x4x64xbf16>
    %34 = vector.shape_cast %33 : vector<1x1x4x64xbf16> to vector<4x64xbf16>
    "tpu.trace_start"() <{level = 10 : i32, message = "hwc,cd->hwd"}> : () -> ()
    %cst_28 = arith.constant dense<0.000000e+00> : vector<8x16x64xf32>
    %35 = tpu.matmul %32, %34, %cst_28 {dimension_numbers = #tpu.dot_dimension_numbers<[2], [0], [0, 1], [1], [0, 0, 0, 1, 1, 1], [], []>} : vector<8x16x4xbf16>, vector<4x64xbf16>, vector<8x16x64xf32> -> vector<8x16x64xf32>
    "tpu.trace_stop"() : () -> ()
    %36 = arith.addf %29, %35 : vector<8x16x64xf32>
    %37 = vector.extract_strided_slice %31 {offsets = [1, 0, 0], sizes = [8, 16, 4], strides = [1, 1, 1]} : vector<10x16x4xbf16> to vector<8x16x4xbf16>
    %c1_29 = arith.constant 1 : index
    %c0_30 = arith.constant 0 : index
    %c0_31 = arith.constant 0 : index
    %c0_32 = arith.constant 0 : index
    %38 = vector.load %arg5[%c1_29, %c0_30, %c0_31, %c0_32] : memref<3x3x4x64xbf16, #tpu.memory_space<vmem>>, vector<1x1x4x64xbf16>
    %39 = vector.shape_cast %38 : vector<1x1x4x64xbf16> to vector<4x64xbf16>
    "tpu.trace_start"() <{level = 10 : i32, message = "hwc,cd->hwd"}> : () -> ()
    %cst_33 = arith.constant dense<0.000000e+00> : vector<8x16x64xf32>
    %40 = tpu.matmul %37, %39, %cst_33 {dimension_numbers = #tpu.dot_dimension_numbers<[2], [0], [0, 1], [1], [0, 0, 0, 1, 1, 1], [], []>} : vector<8x16x4xbf16>, vector<4x64xbf16>, vector<8x16x64xf32> -> vector<8x16x64xf32>
    "tpu.trace_stop"() : () -> ()
    %41 = arith.addf %36, %40 : vector<8x16x64xf32>
    %42 = vector.extract_strided_slice %31 {offsets = [2, 0, 0], sizes = [8, 16, 4], strides = [1, 1, 1]} : vector<10x16x4xbf16> to vector<8x16x4xbf16>
    %c2 = arith.constant 2 : index
    %c0_34 = arith.constant 0 : index
    %c0_35 = arith.constant 0 : index
    %c0_36 = arith.constant 0 : index
    %43 = vector.load %arg5[%c2, %c0_34, %c0_35, %c0_36] : memref<3x3x4x64xbf16, #tpu.memory_space<vmem>>, vector<1x1x4x64xbf16>
    %44 = vector.shape_cast %43 : vector<1x1x4x64xbf16> to vector<4x64xbf16>
    "tpu.trace_start"() <{level = 10 : i32, message = "hwc,cd->hwd"}> : () -> ()
    %cst_37 = arith.constant dense<0.000000e+00> : vector<8x16x64xf32>
    %45 = tpu.matmul %42, %44, %cst_37 {dimension_numbers = #tpu.dot_dimension_numbers<[2], [0], [0, 1], [1], [0, 0, 0, 1, 1, 1], [], []>} : vector<8x16x4xbf16>, vector<4x64xbf16>, vector<8x16x64xf32> -> vector<8x16x64xf32>
    "tpu.trace_stop"() : () -> ()
    %46 = arith.addf %41, %45 : vector<8x16x64xf32>
    %c0_38 = arith.constant 0 : index
    %c1_39 = arith.constant 1 : index
    %c0_40 = arith.constant 0 : index
    %47 = vector.load %arg8[%c0_38, %c1_39, %c0_40] : memref<10x18x4xf32, #tpu.memory_space<vmem>>, vector<10x16x4xf32>
    %48 = arith.truncf %47 : vector<10x16x4xf32> to vector<10x16x4xbf16>
    %49 = vector.extract_strided_slice %48 {offsets = [0, 0, 0], sizes = [8, 16, 4], strides = [1, 1, 1]} : vector<10x16x4xbf16> to vector<8x16x4xbf16>
    %c0_41 = arith.constant 0 : index
    %c1_42 = arith.constant 1 : index
    %c0_43 = arith.constant 0 : index
    %c0_44 = arith.constant 0 : index
    %50 = vector.load %arg5[%c0_41, %c1_42, %c0_43, %c0_44] : memref<3x3x4x64xbf16, #tpu.memory_space<vmem>>, vector<1x1x4x64xbf16>
    %51 = vector.shape_cast %50 : vector<1x1x4x64xbf16> to vector<4x64xbf16>
    "tpu.trace_start"() <{level = 10 : i32, message = "hwc,cd->hwd"}> : () -> ()
    %cst_45 = arith.constant dense<0.000000e+00> : vector<8x16x64xf32>
    %52 = tpu.matmul %49, %51, %cst_45 {dimension_numbers = #tpu.dot_dimension_numbers<[2], [0], [0, 1], [1], [0, 0, 0, 1, 1, 1], [], []>} : vector<8x16x4xbf16>, vector<4x64xbf16>, vector<8x16x64xf32> -> vector<8x16x64xf32>
    "tpu.trace_stop"() : () -> ()
    %53 = arith.addf %46, %52 : vector<8x16x64xf32>
    %54 = vector.extract_strided_slice %48 {offsets = [1, 0, 0], sizes = [8, 16, 4], strides = [1, 1, 1]} : vector<10x16x4xbf16> to vector<8x16x4xbf16>
    %c1_46 = arith.constant 1 : index
    %c1_47 = arith.constant 1 : index
    %c0_48 = arith.constant 0 : index
    %c0_49 = arith.constant 0 : index
    %55 = vector.load %arg5[%c1_46, %c1_47, %c0_48, %c0_49] : memref<3x3x4x64xbf16, #tpu.memory_space<vmem>>, vector<1x1x4x64xbf16>
    %56 = vector.shape_cast %55 : vector<1x1x4x64xbf16> to vector<4x64xbf16>
    "tpu.trace_start"() <{level = 10 : i32, message = "hwc,cd->hwd"}> : () -> ()
    %cst_50 = arith.constant dense<0.000000e+00> : vector<8x16x64xf32>
    %57 = tpu.matmul %54, %56, %cst_50 {dimension_numbers = #tpu.dot_dimension_numbers<[2], [0], [0, 1], [1], [0, 0, 0, 1, 1, 1], [], []>} : vector<8x16x4xbf16>, vector<4x64xbf16>, vector<8x16x64xf32> -> vector<8x16x64xf32>
    "tpu.trace_stop"() : () -> ()
    %58 = arith.addf %53, %57 : vector<8x16x64xf32>
    %59 = vector.extract_strided_slice %48 {offsets = [2, 0, 0], sizes = [8, 16, 4], strides = [1, 1, 1]} : vector<10x16x4xbf16> to vector<8x16x4xbf16>
    %c2_51 = arith.constant 2 : index
    %c1_52 = arith.constant 1 : index
    %c0_53 = arith.constant 0 : index
    %c0_54 = arith.constant 0 : index
    %60 = vector.load %arg5[%c2_51, %c1_52, %c0_53, %c0_54] : memref<3x3x4x64xbf16, #tpu.memory_space<vmem>>, vector<1x1x4x64xbf16>
    %61 = vector.shape_cast %60 : vector<1x1x4x64xbf16> to vector<4x64xbf16>
    "tpu.trace_start"() <{level = 10 : i32, message = "hwc,cd->hwd"}> : () -> ()
    %cst_55 = arith.constant dense<0.000000e+00> : vector<8x16x64xf32>
    %62 = tpu.matmul %59, %61, %cst_55 {dimension_numbers = #tpu.dot_dimension_numbers<[2], [0], [0, 1], [1], [0, 0, 0, 1, 1, 1], [], []>} : vector<8x16x4xbf16>, vector<4x64xbf16>, vector<8x16x64xf32> -> vector<8x16x64xf32>
    "tpu.trace_stop"() : () -> ()
    %63 = arith.addf %58, %62 : vector<8x16x64xf32>
    %c0_56 = arith.constant 0 : index
    %c2_57 = arith.constant 2 : index
    %c0_58 = arith.constant 0 : index
    %64 = vector.load %arg8[%c0_56, %c2_57, %c0_58] : memref<10x18x4xf32, #tpu.memory_space<vmem>>, vector<10x16x4xf32>
    %65 = arith.truncf %64 : vector<10x16x4xf32> to vector<10x16x4xbf16>
    %66 = vector.extract_strided_slice %65 {offsets = [0, 0, 0], sizes = [8, 16, 4], strides = [1, 1, 1]} : vector<10x16x4xbf16> to vector<8x16x4xbf16>
    %c0_59 = arith.constant 0 : index
    %c2_60 = arith.constant 2 : index
    %c0_61 = arith.constant 0 : index
    %c0_62 = arith.constant 0 : index
    %67 = vector.load %arg5[%c0_59, %c2_60, %c0_61, %c0_62] : memref<3x3x4x64xbf16, #tpu.memory_space<vmem>>, vector<1x1x4x64xbf16>
    %68 = vector.shape_cast %67 : vector<1x1x4x64xbf16> to vector<4x64xbf16>
    "tpu.trace_start"() <{level = 10 : i32, message = "hwc,cd->hwd"}> : () -> ()
    %cst_63 = arith.constant dense<0.000000e+00> : vector<8x16x64xf32>
    %69 = tpu.matmul %66, %68, %cst_63 {dimension_numbers = #tpu.dot_dimension_numbers<[2], [0], [0, 1], [1], [0, 0, 0, 1, 1, 1], [], []>} : vector<8x16x4xbf16>, vector<4x64xbf16>, vector<8x16x64xf32> -> vector<8x16x64xf32>
    "tpu.trace_stop"() : () -> ()
    %70 = arith.addf %63, %69 : vector<8x16x64xf32>
    %71 = vector.extract_strided_slice %65 {offsets = [1, 0, 0], sizes = [8, 16, 4], strides = [1, 1, 1]} : vector<10x16x4xbf16> to vector<8x16x4xbf16>
    %c1_64 = arith.constant 1 : index
    %c2_65 = arith.constant 2 : index
    %c0_66 = arith.constant 0 : index
    %c0_67 = arith.constant 0 : index
    %72 = vector.load %arg5[%c1_64, %c2_65, %c0_66, %c0_67] : memref<3x3x4x64xbf16, #tpu.memory_space<vmem>>, vector<1x1x4x64xbf16>
    %73 = vector.shape_cast %72 : vector<1x1x4x64xbf16> to vector<4x64xbf16>
    "tpu.trace_start"() <{level = 10 : i32, message = "hwc,cd->hwd"}> : () -> ()
    %cst_68 = arith.constant dense<0.000000e+00> : vector<8x16x64xf32>
    %74 = tpu.matmul %71, %73, %cst_68 {dimension_numbers = #tpu.dot_dimension_numbers<[2], [0], [0, 1], [1], [0, 0, 0, 1, 1, 1], [], []>} : vector<8x16x4xbf16>, vector<4x64xbf16>, vector<8x16x64xf32> -> vector<8x16x64xf32>
    "tpu.trace_stop"() : () -> ()
    %75 = arith.addf %70, %74 : vector<8x16x64xf32>
    %76 = vector.extract_strided_slice %65 {offsets = [2, 0, 0], sizes = [8, 16, 4], strides = [1, 1, 1]} : vector<10x16x4xbf16> to vector<8x16x4xbf16>
    %c2_69 = arith.constant 2 : index
    %c2_70 = arith.constant 2 : index
    %c0_71 = arith.constant 0 : index
    %c0_72 = arith.constant 0 : index
    %77 = vector.load %arg5[%c2_69, %c2_70, %c0_71, %c0_72] : memref<3x3x4x64xbf16, #tpu.memory_space<vmem>>, vector<1x1x4x64xbf16>
    %78 = vector.shape_cast %77 : vector<1x1x4x64xbf16> to vector<4x64xbf16>
    "tpu.trace_start"() <{level = 10 : i32, message = "hwc,cd->hwd"}> : () -> ()
    %cst_73 = arith.constant dense<0.000000e+00> : vector<8x16x64xf32>
    %79 = tpu.matmul %76, %78, %cst_73 {dimension_numbers = #tpu.dot_dimension_numbers<[2], [0], [0, 1], [1], [0, 0, 0, 1, 1, 1], [], []>} : vector<8x16x4xbf16>, vector<4x64xbf16>, vector<8x16x64xf32> -> vector<8x16x64xf32>
    "tpu.trace_stop"() : () -> ()
    %80 = arith.addf %75, %79 : vector<8x16x64xf32>
    %c0_74 = arith.constant 0 : index
    %c0_75 = arith.constant 0 : index
    %81 = vector.load %arg6[%c0_74, %c0_75] : memref<1x64xf32, #tpu.memory_space<vmem>>, vector<1x64xf32>
    %82 = vector.shape_cast %81 : vector<1x64xf32> to vector<1x1x64xf32>
    %83 = vector.broadcast %82 : vector<1x1x64xf32> to vector<8x16x64xf32>
    %84 = arith.addf %80, %83 : vector<8x16x64xf32>
    %cst_76 = arith.constant 0.000000e+00 : f32
    %85 = vector.broadcast %cst_76 : f32 to vector<8x16x64xf32>
    %86 = arith.maximumf %84, %85 : vector<8x16x64xf32>
    %c0_77 = arith.constant 0 : index
    %c0_78 = arith.constant 0 : index
    %c0_79 = arith.constant 0 : index
    %c0_80 = arith.constant 0 : index
    %87 = vector.load %arg7[%c0_77, %c0_78, %c0_79, %c0_80] : memref<1x8x16x64xf32, #tpu.memory_space<vmem>>, vector<1x8x16x64xf32>
    %88 = vector.shape_cast %87 : vector<1x8x16x64xf32> to vector<8x16x64xf32>
    %89 = vector.shape_cast %86 : vector<8x16x64xf32> to vector<1x8x16x64xf32>
    tpu.vector_store %arg7[%c0_77, %c0_78, %c0_79, %c0_80], %89 {strides = array<i32>} : memref<1x8x16x64xf32, #tpu.memory_space<vmem>>, vector<1x8x16x64xf32>,
    return
  }
  func.func @transform_0(%arg0: i32, %arg1: i32) -> (i32, i32, i32, i32) {
    %c0_i32 = arith.constant 0 : i32
    %c0_i32_0 = arith.constant 0 : i32
    %c0_i32_1 = arith.constant 0 : i32
    return %arg0, %arg1, %c0_i32, %c0_i32_0 : i32, i32, i32, i32
  }
  func.func @transform_1(%arg0: i32, %arg1: i32) -> (i32, i32, i32, i32) {
    %c8_i32 = arith.constant 8 : i32
    %0 = arith.muli %arg1, %c8_i32 : i32
    %c1_i32 = arith.constant 1 : i32
    %1 = arith.subi %0, %c1_i32 : i32
    %c0_i32 = arith.constant 0 : i32
    %2 = arith.maxsi %1, %c0_i32 : i32
    %c0_i32_0 = arith.constant 0 : i32
    %c0_i32_1 = arith.constant 0 : i32
    %c0_i32_2 = arith.constant 0 : i32
    return %arg0, %2, %c0_i32_0, %c0_i32_1 : i32, i32, i32, i32
  }
  func.func @transform_2(%arg0: i32, %arg1: i32) -> (i32, i32, i32, i32) {
    %c1_i32 = arith.constant 1 : i32
    %0 = arith.addi %arg1, %c1_i32 : i32
    %c8_i32 = arith.constant 8 : i32
    %1 = arith.muli %0, %c8_i32 : i32
    %c15_i32 = arith.constant 15 : i32
    %2 = arith.minsi %1, %c15_i32 : i32
    %c0_i32 = arith.constant 0 : i32
    %c0_i32_0 = arith.constant 0 : i32
    %c0_i32_1 = arith.constant 0 : i32
    return %arg0, %2, %c0_i32, %c0_i32_0 : i32, i32, i32, i32
  }
  func.func @transform_3(%arg0: i32, %arg1: i32) -> (i32, i32, i32, i32) {
    %c0_i32 = arith.constant 0 : i32
    %c0_i32_0 = arith.constant 0 : i32
    %c0_i32_1 = arith.constant 0 : i32
    %c0_i32_2 = arith.constant 0 : i32
    %c0_i32_3 = arith.constant 0 : i32
    return %c0_i32, %c0_i32_0, %c0_i32_1, %c0_i32_2 : i32, i32, i32, i32
  }
  func.func @transform_4(%arg0: i32, %arg1: i32) -> (i32, i32) {
    %c0_i32 = arith.constant 0 : i32
    %c0_i32_0 = arith.constant 0 : i32
    %c0_i32_1 = arith.constant 0 : i32
    return %c0_i32, %c0_i32_0 : i32, i32
  }
  func.func @transform_5(%arg0: i32, %arg1: i32) -> (i32, i32, i32, i32) {
    %c0_i32 = arith.constant 0 : i32
    %c0_i32_0 = arith.constant 0 : i32
    %c0_i32_1 = arith.constant 0 : i32
    return %arg0, %arg1, %c0_i32, %c0_i32_0 : i32, i32, i32, i32
  }
}

module attributes {stable_mosaic.version = 11 : i64} {
  func.func @_conv3x3_kernel(%arg0: i32, %arg1: i32, %arg2: memref<1x8x18x64xf32, #tpu.memory_space<vmem>>, %arg3: memref<1x1x18x64xf32, #tpu.memory_space<vmem>>, %arg4: memref<1x1x18x64xf32, #tpu.memory_space<vmem>>, %arg5: memref<3x3x64x64xbf16, #tpu.memory_space<vmem>>, %arg6: memref<1x64xf32, #tpu.memory_space<vmem>>, %arg7: memref<1x8x16x64xf32, #tpu.memory_space<vmem>>, %arg8: memref<10x18x64xf32, #tpu.memory_space<vmem>>) attributes {dimension_semantics = [#tpu.dimension_semantics<parallel>, #tpu.dimension_semantics<parallel>], iteration_bounds = array<i64: 2, 2>, scalar_prefetch = 0 : i64, scratch_operands = 1 : i64, tpu.core_type = #tpu.core_type<tc>, window_params = [{transform_indices = @transform_0, window_bounds = array<i64: 1, 8, 18, 64>}, {transform_indices = @transform_1, window_bounds = array<i64: 1, 1, 18, 64>}, {transform_indices = @transform_2, window_bounds = array<i64: 1, 1, 18, 64>}, {pipeline_mode = #tpu.pipeline_mode<synchronous>, transform_indices = @transform_3, window_bounds = array<i64: 3, 3, 64, 64>}, {pipeline_mode = #tpu.pipeline_mode<synchronous>, transform_indices = @transform_4, window_bounds = array<i64: 1, 64>}, {transform_indices = @transform_5, window_bounds = array<i64: 1, 8, 16, 64>}]} {
    %c0 = arith.constant 0 : index
    %c0_0 = arith.constant 0 : index
    %c0_1 = arith.constant 0 : index
    %c0_2 = arith.constant 0 : index
    %0 = vector.load %arg2[%c0, %c0_0, %c0_1, %c0_2] : memref<1x8x18x64xf32, #tpu.memory_space<vmem>>, vector<1x8x18x64xf32>
    %1 = vector.shape_cast %0 : vector<1x8x18x64xf32> to vector<8x18x64xf32>
    %c0_3 = arith.constant 0 : index
    %c0_4 = arith.constant 0 : index
    %c0_5 = arith.constant 0 : index
    %c0_6 = arith.constant 0 : index
    %2 = vector.load %arg3[%c0_3, %c0_4, %c0_5, %c0_6] : memref<1x1x18x64xf32, #tpu.memory_space<vmem>>, vector<1x1x18x64xf32>
    %3 = vector.shape_cast %2 : vector<1x1x18x64xf32> to vector<18x64xf32>
    %c0_7 = arith.constant 0 : index
    %c0_8 = arith.constant 0 : index
    %c0_9 = arith.constant 0 : index
    %c0_10 = arith.constant 0 : index
    %4 = vector.load %arg4[%c0_7, %c0_8, %c0_9, %c0_10] : memref<1x1x18x64xf32, #tpu.memory_space<vmem>>, vector<1x1x18x64xf32>
    %5 = vector.shape_cast %4 : vector<1x1x18x64xf32> to vector<18x64xf32>
    %c0_i32 = arith.constant 0 : i32
    %6 = arith.cmpi sgt, %arg1, %c0_i32 : i32
    %7 = arith.extui %6 : i1 to i32
    %8 = arith.sitofp %7 : i32 to f32
    %9 = vector.broadcast %8 : f32 to vector<18x64xf32>
    %10 = arith.mulf %3, %9 : vector<18x64xf32>
    %c1_i32 = arith.constant 1 : i32
    %11 = arith.cmpi slt, %arg1, %c1_i32 : i32
    %12 = arith.extui %11 : i1 to i32
    %13 = arith.sitofp %12 : i32 to f32
    %14 = vector.broadcast %13 : f32 to vector<18x64xf32>
    %15 = arith.mulf %5, %14 : vector<18x64xf32>
    %c0_11 = arith.constant 0 : index
    %c0_12 = arith.constant 0 : index
    %c0_13 = arith.constant 0 : index
    %16 = vector.load %arg8[%c0_11, %c0_12, %c0_13] : memref<10x18x64xf32, #tpu.memory_space<vmem>>, vector<1x18x64xf32>
    %17 = vector.shape_cast %16 : vector<1x18x64xf32> to vector<18x64xf32>
    %18 = vector.shape_cast %10 : vector<18x64xf32> to vector<1x18x64xf32>
    tpu.vector_store %arg8[%c0_11, %c0_12, %c0_13], %18 {strides = array<i32>} : memref<10x18x64xf32, #tpu.memory_space<vmem>>, vector<1x18x64xf32>,
    %c1 = arith.constant 1 : index
    %c0_14 = arith.constant 0 : index
    %c0_15 = arith.constant 0 : index
    %19 = vector.load %arg8[%c1, %c0_14, %c0_15] : memref<10x18x64xf32, #tpu.memory_space<vmem>>, vector<8x18x64xf32>
    tpu.vector_store %arg8[%c1, %c0_14, %c0_15], %1 {strides = array<i32>} : memref<10x18x64xf32, #tpu.memory_space<vmem>>, vector<8x18x64xf32>,
    %c9 = arith.constant 9 : index
    %c0_16 = arith.constant 0 : index
    %c0_17 = arith.constant 0 : index
    %20 = vector.load %arg8[%c9, %c0_16, %c0_17] : memref<10x18x64xf32, #tpu.memory_space<vmem>>, vector<1x18x64xf32>
    %21 = vector.shape_cast %20 : vector<1x18x64xf32> to vector<18x64xf32>
    %22 = vector.shape_cast %15 : vector<18x64xf32> to vector<1x18x64xf32>
    tpu.vector_store %arg8[%c9, %c0_16, %c0_17], %22 {strides = array<i32>} : memref<10x18x64xf32, #tpu.memory_space<vmem>>, vector<1x18x64xf32>,
    %cst = arith.constant 0.000000e+00 : f32
    %23 = vector.broadcast %cst : f32 to vector<8x16x64xf32>
    %c0_18 = arith.constant 0 : index
    %c0_19 = arith.constant 0 : index
    %c0_20 = arith.constant 0 : index
    %24 = vector.load %arg8[%c0_18, %c0_19, %c0_20] : memref<10x18x64xf32, #tpu.memory_space<vmem>>, vector<10x16x64xf32>
    %25 = arith.truncf %24 : vector<10x16x64xf32> to vector<10x16x64xbf16>
    %26 = vector.extract_strided_slice %25 {offsets = [0, 0, 0], sizes = [8, 16, 64], strides = [1, 1, 1]} : vector<10x16x64xbf16> to vector<8x16x64xbf16>
    %c0_21 = arith.constant 0 : index
    %c0_22 = arith.constant 0 : index
    %c0_23 = arith.constant 0 : index
    %c0_24 = arith.constant 0 : index
    %27 = vector.load %arg5[%c0_21, %c0_22, %c0_23, %c0_24] : memref<3x3x64x64xbf16, #tpu.memory_space<vmem>>, vector<1x1x64x64xbf16>
    %28 = vector.shape_cast %27 : vector<1x1x64x64xbf16> to vector<64x64xbf16>
    "tpu.trace_start"() <{level = 10 : i32, message = "hwc,cd->hwd"}> : () -> ()
    %cst_25 = arith.constant dense<0.000000e+00> : vector<8x16x64xf32>
    %29 = tpu.matmul %26, %28, %cst_25 {dimension_numbers = #tpu.dot_dimension_numbers<[2], [0], [0, 1], [1], [0, 0, 0, 1, 1, 1], [], []>} : vector<8x16x64xbf16>, vector<64x64xbf16>, vector<8x16x64xf32> -> vector<8x16x64xf32>
    "tpu.trace_stop"() : () -> ()
    %30 = arith.addf %23, %29 : vector<8x16x64xf32>
    %31 = vector.extract_strided_slice %25 {offsets = [1, 0, 0], sizes = [8, 16, 64], strides = [1, 1, 1]} : vector<10x16x64xbf16> to vector<8x16x64xbf16>
    %c1_26 = arith.constant 1 : index
    %c0_27 = arith.constant 0 : index
    %c0_28 = arith.constant 0 : index
    %c0_29 = arith.constant 0 : index
    %32 = vector.load %arg5[%c1_26, %c0_27, %c0_28, %c0_29] : memref<3x3x64x64xbf16, #tpu.memory_space<vmem>>, vector<1x1x64x64xbf16>
    %33 = vector.shape_cast %32 : vector<1x1x64x64xbf16> to vector<64x64xbf16>
    "tpu.trace_start"() <{level = 10 : i32, message = "hwc,cd->hwd"}> : () -> ()
    %cst_30 = arith.constant dense<0.000000e+00> : vector<8x16x64xf32>
    %34 = tpu.matmul %31, %33, %cst_30 {dimension_numbers = #tpu.dot_dimension_numbers<[2], [0], [0, 1], [1], [0, 0, 0, 1, 1, 1], [], []>} : vector<8x16x64xbf16>, vector<64x64xbf16>, vector<8x16x64xf32> -> vector<8x16x64xf32>
    "tpu.trace_stop"() : () -> ()
    %35 = arith.addf %30, %34 : vector<8x16x64xf32>
    %36 = vector.extract_strided_slice %25 {offsets = [2, 0, 0], sizes = [8, 16, 64], strides = [1, 1, 1]} : vector<10x16x64xbf16> to vector<8x16x64xbf16>
    %c2 = arith.constant 2 : index
    %c0_31 = arith.constant 0 : index
    %c0_32 = arith.constant 0 : index
    %c0_33 = arith.constant 0 : index
    %37 = vector.load %arg5[%c2, %c0_31, %c0_32, %c0_33] : memref<3x3x64x64xbf16, #tpu.memory_space<vmem>>, vector<1x1x64x64xbf16>
    %38 = vector.shape_cast %37 : vector<1x1x64x64xbf16> to vector<64x64xbf16>
    "tpu.trace_start"() <{level = 10 : i32, message = "hwc,cd->hwd"}> : () -> ()
    %cst_34 = arith.constant dense<0.000000e+00> : vector<8x16x64xf32>
    %39 = tpu.matmul %36, %38, %cst_34 {dimension_numbers = #tpu.dot_dimension_numbers<[2], [0], [0, 1], [1], [0, 0, 0, 1, 1, 1], [], []>} : vector<8x16x64xbf16>, vector<64x64xbf16>, vector<8x16x64xf32> -> vector<8x16x64xf32>
    "tpu.trace_stop"() : () -> ()
    %40 = arith.addf %35, %39 : vector<8x16x64xf32>
    %c0_35 = arith.constant 0 : index
    %c1_36 = arith.constant 1 : index
    %c0_37 = arith.constant 0 : index
    %41 = vector.load %arg8[%c0_35, %c1_36, %c0_37] : memref<10x18x64xf32, #tpu.memory_space<vmem>>, vector<10x16x64xf32>
    %42 = arith.truncf %41 : vector<10x16x64xf32> to vector<10x16x64xbf16>
    %43 = vector.extract_strided_slice %42 {offsets = [0, 0, 0], sizes = [8, 16, 64], strides = [1, 1, 1]} : vector<10x16x64xbf16> to vector<8x16x64xbf16>
    %c0_38 = arith.constant 0 : index
    %c1_39 = arith.constant 1 : index
    %c0_40 = arith.constant 0 : index
    %c0_41 = arith.constant 0 : index
    %44 = vector.load %arg5[%c0_38, %c1_39, %c0_40, %c0_41] : memref<3x3x64x64xbf16, #tpu.memory_space<vmem>>, vector<1x1x64x64xbf16>
    %45 = vector.shape_cast %44 : vector<1x1x64x64xbf16> to vector<64x64xbf16>
    "tpu.trace_start"() <{level = 10 : i32, message = "hwc,cd->hwd"}> : () -> ()
    %cst_42 = arith.constant dense<0.000000e+00> : vector<8x16x64xf32>
    %46 = tpu.matmul %43, %45, %cst_42 {dimension_numbers = #tpu.dot_dimension_numbers<[2], [0], [0, 1], [1], [0, 0, 0, 1, 1, 1], [], []>} : vector<8x16x64xbf16>, vector<64x64xbf16>, vector<8x16x64xf32> -> vector<8x16x64xf32>
    "tpu.trace_stop"() : () -> ()
    %47 = arith.addf %40, %46 : vector<8x16x64xf32>
    %48 = vector.extract_strided_slice %42 {offsets = [1, 0, 0], sizes = [8, 16, 64], strides = [1, 1, 1]} : vector<10x16x64xbf16> to vector<8x16x64xbf16>
    %c1_43 = arith.constant 1 : index
    %c1_44 = arith.constant 1 : index
    %c0_45 = arith.constant 0 : index
    %c0_46 = arith.constant 0 : index
    %49 = vector.load %arg5[%c1_43, %c1_44, %c0_45, %c0_46] : memref<3x3x64x64xbf16, #tpu.memory_space<vmem>>, vector<1x1x64x64xbf16>
    %50 = vector.shape_cast %49 : vector<1x1x64x64xbf16> to vector<64x64xbf16>
    "tpu.trace_start"() <{level = 10 : i32, message = "hwc,cd->hwd"}> : () -> ()
    %cst_47 = arith.constant dense<0.000000e+00> : vector<8x16x64xf32>
    %51 = tpu.matmul %48, %50, %cst_47 {dimension_numbers = #tpu.dot_dimension_numbers<[2], [0], [0, 1], [1], [0, 0, 0, 1, 1, 1], [], []>} : vector<8x16x64xbf16>, vector<64x64xbf16>, vector<8x16x64xf32> -> vector<8x16x64xf32>
    "tpu.trace_stop"() : () -> ()
    %52 = arith.addf %47, %51 : vector<8x16x64xf32>
    %53 = vector.extract_strided_slice %42 {offsets = [2, 0, 0], sizes = [8, 16, 64], strides = [1, 1, 1]} : vector<10x16x64xbf16> to vector<8x16x64xbf16>
    %c2_48 = arith.constant 2 : index
    %c1_49 = arith.constant 1 : index
    %c0_50 = arith.constant 0 : index
    %c0_51 = arith.constant 0 : index
    %54 = vector.load %arg5[%c2_48, %c1_49, %c0_50, %c0_51] : memref<3x3x64x64xbf16, #tpu.memory_space<vmem>>, vector<1x1x64x64xbf16>
    %55 = vector.shape_cast %54 : vector<1x1x64x64xbf16> to vector<64x64xbf16>
    "tpu.trace_start"() <{level = 10 : i32, message = "hwc,cd->hwd"}> : () -> ()
    %cst_52 = arith.constant dense<0.000000e+00> : vector<8x16x64xf32>
    %56 = tpu.matmul %53, %55, %cst_52 {dimension_numbers = #tpu.dot_dimension_numbers<[2], [0], [0, 1], [1], [0, 0, 0, 1, 1, 1], [], []>} : vector<8x16x64xbf16>, vector<64x64xbf16>, vector<8x16x64xf32> -> vector<8x16x64xf32>
    "tpu.trace_stop"() : () -> ()
    %57 = arith.addf %52, %56 : vector<8x16x64xf32>
    %c0_53 = arith.constant 0 : index
    %c2_54 = arith.constant 2 : index
    %c0_55 = arith.constant 0 : index
    %58 = vector.load %arg8[%c0_53, %c2_54, %c0_55] : memref<10x18x64xf32, #tpu.memory_space<vmem>>, vector<10x16x64xf32>
    %59 = arith.truncf %58 : vector<10x16x64xf32> to vector<10x16x64xbf16>
    %60 = vector.extract_strided_slice %59 {offsets = [0, 0, 0], sizes = [8, 16, 64], strides = [1, 1, 1]} : vector<10x16x64xbf16> to vector<8x16x64xbf16>
    %c0_56 = arith.constant 0 : index
    %c2_57 = arith.constant 2 : index
    %c0_58 = arith.constant 0 : index
    %c0_59 = arith.constant 0 : index
    %61 = vector.load %arg5[%c0_56, %c2_57, %c0_58, %c0_59] : memref<3x3x64x64xbf16, #tpu.memory_space<vmem>>, vector<1x1x64x64xbf16>
    %62 = vector.shape_cast %61 : vector<1x1x64x64xbf16> to vector<64x64xbf16>
    "tpu.trace_start"() <{level = 10 : i32, message = "hwc,cd->hwd"}> : () -> ()
    %cst_60 = arith.constant dense<0.000000e+00> : vector<8x16x64xf32>
    %63 = tpu.matmul %60, %62, %cst_60 {dimension_numbers = #tpu.dot_dimension_numbers<[2], [0], [0, 1], [1], [0, 0, 0, 1, 1, 1], [], []>} : vector<8x16x64xbf16>, vector<64x64xbf16>, vector<8x16x64xf32> -> vector<8x16x64xf32>
    "tpu.trace_stop"() : () -> ()
    %64 = arith.addf %57, %63 : vector<8x16x64xf32>
    %65 = vector.extract_strided_slice %59 {offsets = [1, 0, 0], sizes = [8, 16, 64], strides = [1, 1, 1]} : vector<10x16x64xbf16> to vector<8x16x64xbf16>
    %c1_61 = arith.constant 1 : index
    %c2_62 = arith.constant 2 : index
    %c0_63 = arith.constant 0 : index
    %c0_64 = arith.constant 0 : index
    %66 = vector.load %arg5[%c1_61, %c2_62, %c0_63, %c0_64] : memref<3x3x64x64xbf16, #tpu.memory_space<vmem>>, vector<1x1x64x64xbf16>
    %67 = vector.shape_cast %66 : vector<1x1x64x64xbf16> to vector<64x64xbf16>
    "tpu.trace_start"() <{level = 10 : i32, message = "hwc,cd->hwd"}> : () -> ()
    %cst_65 = arith.constant dense<0.000000e+00> : vector<8x16x64xf32>
    %68 = tpu.matmul %65, %67, %cst_65 {dimension_numbers = #tpu.dot_dimension_numbers<[2], [0], [0, 1], [1], [0, 0, 0, 1, 1, 1], [], []>} : vector<8x16x64xbf16>, vector<64x64xbf16>, vector<8x16x64xf32> -> vector<8x16x64xf32>
    "tpu.trace_stop"() : () -> ()
    %69 = arith.addf %64, %68 : vector<8x16x64xf32>
    %70 = vector.extract_strided_slice %59 {offsets = [2, 0, 0], sizes = [8, 16, 64], strides = [1, 1, 1]} : vector<10x16x64xbf16> to vector<8x16x64xbf16>
    %c2_66 = arith.constant 2 : index
    %c2_67 = arith.constant 2 : index
    %c0_68 = arith.constant 0 : index
    %c0_69 = arith.constant 0 : index
    %71 = vector.load %arg5[%c2_66, %c2_67, %c0_68, %c0_69] : memref<3x3x64x64xbf16, #tpu.memory_space<vmem>>, vector<1x1x64x64xbf16>
    %72 = vector.shape_cast %71 : vector<1x1x64x64xbf16> to vector<64x64xbf16>
    "tpu.trace_start"() <{level = 10 : i32, message = "hwc,cd->hwd"}> : () -> ()
    %cst_70 = arith.constant dense<0.000000e+00> : vector<8x16x64xf32>
    %73 = tpu.matmul %70, %72, %cst_70 {dimension_numbers = #tpu.dot_dimension_numbers<[2], [0], [0, 1], [1], [0, 0, 0, 1, 1, 1], [], []>} : vector<8x16x64xbf16>, vector<64x64xbf16>, vector<8x16x64xf32> -> vector<8x16x64xf32>
    "tpu.trace_stop"() : () -> ()
    %74 = arith.addf %69, %73 : vector<8x16x64xf32>
    %c0_71 = arith.constant 0 : index
    %c0_72 = arith.constant 0 : index
    %75 = vector.load %arg6[%c0_71, %c0_72] : memref<1x64xf32, #tpu.memory_space<vmem>>, vector<1x64xf32>
    %76 = vector.shape_cast %75 : vector<1x64xf32> to vector<1x1x64xf32>
    %77 = vector.broadcast %76 : vector<1x1x64xf32> to vector<8x16x64xf32>
    %78 = arith.addf %74, %77 : vector<8x16x64xf32>
    %cst_73 = arith.constant 0.000000e+00 : f32
    %79 = vector.broadcast %cst_73 : f32 to vector<8x16x64xf32>
    %80 = arith.maximumf %78, %79 : vector<8x16x64xf32>
    %c0_74 = arith.constant 0 : index
    %c0_75 = arith.constant 0 : index
    %c0_76 = arith.constant 0 : index
    %c0_77 = arith.constant 0 : index
    %81 = vector.load %arg7[%c0_74, %c0_75, %c0_76, %c0_77] : memref<1x8x16x64xf32, #tpu.memory_space<vmem>>, vector<1x8x16x64xf32>
    %82 = vector.shape_cast %81 : vector<1x8x16x64xf32> to vector<8x16x64xf32>
    %83 = vector.shape_cast %80 : vector<8x16x64xf32> to vector<1x8x16x64xf32>
    tpu.vector_store %arg7[%c0_74, %c0_75, %c0_76, %c0_77], %83 {strides = array<i32>} : memref<1x8x16x64xf32, #tpu.memory_space<vmem>>, vector<1x8x16x64xf32>,
    return
  }
  func.func @transform_0(%arg0: i32, %arg1: i32) -> (i32, i32, i32, i32) {
    %c0_i32 = arith.constant 0 : i32
    %c0_i32_0 = arith.constant 0 : i32
    %c0_i32_1 = arith.constant 0 : i32
    return %arg0, %arg1, %c0_i32, %c0_i32_0 : i32, i32, i32, i32
  }
  func.func @transform_1(%arg0: i32, %arg1: i32) -> (i32, i32, i32, i32) {
    %c8_i32 = arith.constant 8 : i32
    %0 = arith.muli %arg1, %c8_i32 : i32
    %c1_i32 = arith.constant 1 : i32
    %1 = arith.subi %0, %c1_i32 : i32
    %c0_i32 = arith.constant 0 : i32
    %2 = arith.maxsi %1, %c0_i32 : i32
    %c0_i32_0 = arith.constant 0 : i32
    %c0_i32_1 = arith.constant 0 : i32
    %c0_i32_2 = arith.constant 0 : i32
    return %arg0, %2, %c0_i32_0, %c0_i32_1 : i32, i32, i32, i32
  }
  func.func @transform_2(%arg0: i32, %arg1: i32) -> (i32, i32, i32, i32) {
    %c1_i32 = arith.constant 1 : i32
    %0 = arith.addi %arg1, %c1_i32 : i32
    %c8_i32 = arith.constant 8 : i32
    %1 = arith.muli %0, %c8_i32 : i32
    %c15_i32 = arith.constant 15 : i32
    %2 = arith.minsi %1, %c15_i32 : i32
    %c0_i32 = arith.constant 0 : i32
    %c0_i32_0 = arith.constant 0 : i32
    %c0_i32_1 = arith.constant 0 : i32
    return %arg0, %2, %c0_i32, %c0_i32_0 : i32, i32, i32, i32
  }
  func.func @transform_3(%arg0: i32, %arg1: i32) -> (i32, i32, i32, i32) {
    %c0_i32 = arith.constant 0 : i32
    %c0_i32_0 = arith.constant 0 : i32
    %c0_i32_1 = arith.constant 0 : i32
    %c0_i32_2 = arith.constant 0 : i32
    %c0_i32_3 = arith.constant 0 : i32
    return %c0_i32, %c0_i32_0, %c0_i32_1, %c0_i32_2 : i32, i32, i32, i32
  }
  func.func @transform_4(%arg0: i32, %arg1: i32) -> (i32, i32) {
    %c0_i32 = arith.constant 0 : i32
    %c0_i32_0 = arith.constant 0 : i32
    %c0_i32_1 = arith.constant 0 : i32
    return %c0_i32, %c0_i32_0 : i32, i32
  }
  func.func @transform_5(%arg0: i32, %arg1: i32) -> (i32, i32, i32, i32) {
    %c0_i32 = arith.constant 0 : i32
    %c0_i32_0 = arith.constant 0 : i32
    %c0_i32_1 = arith.constant 0 : i32
    return %arg0, %arg1, %c0_i32, %c0_i32_0 : i32, i32, i32, i32
  }
}

module attributes {stable_mosaic.version = 11 : i64} {
  func.func @_conv3x3_kernel(%arg0: i32, %arg1: i32, %arg2: memref<1x8x18x64xf32, #tpu.memory_space<vmem>>, %arg3: memref<1x1x18x64xf32, #tpu.memory_space<vmem>>, %arg4: memref<1x1x18x64xf32, #tpu.memory_space<vmem>>, %arg5: memref<1x8x16x64xf32, #tpu.memory_space<vmem>>, %arg6: memref<3x3x64x64xbf16, #tpu.memory_space<vmem>>, %arg7: memref<1x64xf32, #tpu.memory_space<vmem>>, %arg8: memref<1x8x16x64xf32, #tpu.memory_space<vmem>>, %arg9: memref<10x18x64xf32, #tpu.memory_space<vmem>>) attributes {dimension_semantics = [#tpu.dimension_semantics<parallel>, #tpu.dimension_semantics<parallel>], iteration_bounds = array<i64: 2, 2>, scalar_prefetch = 0 : i64, scratch_operands = 1 : i64, tpu.core_type = #tpu.core_type<tc>, window_params = [{transform_indices = @transform_0, window_bounds = array<i64: 1, 8, 18, 64>}, {transform_indices = @transform_1, window_bounds = array<i64: 1, 1, 18, 64>}, {transform_indices = @transform_2, window_bounds = array<i64: 1, 1, 18, 64>}, {transform_indices = @transform_3, window_bounds = array<i64: 1, 8, 16, 64>}, {pipeline_mode = #tpu.pipeline_mode<synchronous>, transform_indices = @transform_4, window_bounds = array<i64: 3, 3, 64, 64>}, {pipeline_mode = #tpu.pipeline_mode<synchronous>, transform_indices = @transform_5, window_bounds = array<i64: 1, 64>}, {transform_indices = @transform_6, window_bounds = array<i64: 1, 8, 16, 64>}]} {
    %c0 = arith.constant 0 : index
    %c0_0 = arith.constant 0 : index
    %c0_1 = arith.constant 0 : index
    %c0_2 = arith.constant 0 : index
    %0 = vector.load %arg2[%c0, %c0_0, %c0_1, %c0_2] : memref<1x8x18x64xf32, #tpu.memory_space<vmem>>, vector<1x8x18x64xf32>
    %1 = vector.shape_cast %0 : vector<1x8x18x64xf32> to vector<8x18x64xf32>
    %c0_3 = arith.constant 0 : index
    %c0_4 = arith.constant 0 : index
    %c0_5 = arith.constant 0 : index
    %c0_6 = arith.constant 0 : index
    %2 = vector.load %arg3[%c0_3, %c0_4, %c0_5, %c0_6] : memref<1x1x18x64xf32, #tpu.memory_space<vmem>>, vector<1x1x18x64xf32>
    %3 = vector.shape_cast %2 : vector<1x1x18x64xf32> to vector<18x64xf32>
    %c0_7 = arith.constant 0 : index
    %c0_8 = arith.constant 0 : index
    %c0_9 = arith.constant 0 : index
    %c0_10 = arith.constant 0 : index
    %4 = vector.load %arg4[%c0_7, %c0_8, %c0_9, %c0_10] : memref<1x1x18x64xf32, #tpu.memory_space<vmem>>, vector<1x1x18x64xf32>
    %5 = vector.shape_cast %4 : vector<1x1x18x64xf32> to vector<18x64xf32>
    %c0_i32 = arith.constant 0 : i32
    %6 = arith.cmpi sgt, %arg1, %c0_i32 : i32
    %7 = arith.extui %6 : i1 to i32
    %8 = arith.sitofp %7 : i32 to f32
    %9 = vector.broadcast %8 : f32 to vector<18x64xf32>
    %10 = arith.mulf %3, %9 : vector<18x64xf32>
    %c1_i32 = arith.constant 1 : i32
    %11 = arith.cmpi slt, %arg1, %c1_i32 : i32
    %12 = arith.extui %11 : i1 to i32
    %13 = arith.sitofp %12 : i32 to f32
    %14 = vector.broadcast %13 : f32 to vector<18x64xf32>
    %15 = arith.mulf %5, %14 : vector<18x64xf32>
    %c0_11 = arith.constant 0 : index
    %c0_12 = arith.constant 0 : index
    %c0_13 = arith.constant 0 : index
    %16 = vector.load %arg9[%c0_11, %c0_12, %c0_13] : memref<10x18x64xf32, #tpu.memory_space<vmem>>, vector<1x18x64xf32>
    %17 = vector.shape_cast %16 : vector<1x18x64xf32> to vector<18x64xf32>
    %18 = vector.shape_cast %10 : vector<18x64xf32> to vector<1x18x64xf32>
    tpu.vector_store %arg9[%c0_11, %c0_12, %c0_13], %18 {strides = array<i32>} : memref<10x18x64xf32, #tpu.memory_space<vmem>>, vector<1x18x64xf32>,
    %c1 = arith.constant 1 : index
    %c0_14 = arith.constant 0 : index
    %c0_15 = arith.constant 0 : index
    %19 = vector.load %arg9[%c1, %c0_14, %c0_15] : memref<10x18x64xf32, #tpu.memory_space<vmem>>, vector<8x18x64xf32>
    tpu.vector_store %arg9[%c1, %c0_14, %c0_15], %1 {strides = array<i32>} : memref<10x18x64xf32, #tpu.memory_space<vmem>>, vector<8x18x64xf32>,
    %c9 = arith.constant 9 : index
    %c0_16 = arith.constant 0 : index
    %c0_17 = arith.constant 0 : index
    %20 = vector.load %arg9[%c9, %c0_16, %c0_17] : memref<10x18x64xf32, #tpu.memory_space<vmem>>, vector<1x18x64xf32>
    %21 = vector.shape_cast %20 : vector<1x18x64xf32> to vector<18x64xf32>
    %22 = vector.shape_cast %15 : vector<18x64xf32> to vector<1x18x64xf32>
    tpu.vector_store %arg9[%c9, %c0_16, %c0_17], %22 {strides = array<i32>} : memref<10x18x64xf32, #tpu.memory_space<vmem>>, vector<1x18x64xf32>,
    %cst = arith.constant 0.000000e+00 : f32
    %23 = vector.broadcast %cst : f32 to vector<8x16x64xf32>
    %c0_18 = arith.constant 0 : index
    %c0_19 = arith.constant 0 : index
    %c0_20 = arith.constant 0 : index
    %24 = vector.load %arg9[%c0_18, %c0_19, %c0_20] : memref<10x18x64xf32, #tpu.memory_space<vmem>>, vector<10x16x64xf32>
    %25 = arith.truncf %24 : vector<10x16x64xf32> to vector<10x16x64xbf16>
    %26 = vector.extract_strided_slice %25 {offsets = [0, 0, 0], sizes = [8, 16, 64], strides = [1, 1, 1]} : vector<10x16x64xbf16> to vector<8x16x64xbf16>
    %c0_21 = arith.constant 0 : index
    %c0_22 = arith.constant 0 : index
    %c0_23 = arith.constant 0 : index
    %c0_24 = arith.constant 0 : index
    %27 = vector.load %arg6[%c0_21, %c0_22, %c0_23, %c0_24] : memref<3x3x64x64xbf16, #tpu.memory_space<vmem>>, vector<1x1x64x64xbf16>
    %28 = vector.shape_cast %27 : vector<1x1x64x64xbf16> to vector<64x64xbf16>
    "tpu.trace_start"() <{level = 10 : i32, message = "hwc,cd->hwd"}> : () -> ()
    %cst_25 = arith.constant dense<0.000000e+00> : vector<8x16x64xf32>
    %29 = tpu.matmul %26, %28, %cst_25 {dimension_numbers = #tpu.dot_dimension_numbers<[2], [0], [0, 1], [1], [0, 0, 0, 1, 1, 1], [], []>} : vector<8x16x64xbf16>, vector<64x64xbf16>, vector<8x16x64xf32> -> vector<8x16x64xf32>
    "tpu.trace_stop"() : () -> ()
    %30 = arith.addf %23, %29 : vector<8x16x64xf32>
    %31 = vector.extract_strided_slice %25 {offsets = [1, 0, 0], sizes = [8, 16, 64], strides = [1, 1, 1]} : vector<10x16x64xbf16> to vector<8x16x64xbf16>
    %c1_26 = arith.constant 1 : index
    %c0_27 = arith.constant 0 : index
    %c0_28 = arith.constant 0 : index
    %c0_29 = arith.constant 0 : index
    %32 = vector.load %arg6[%c1_26, %c0_27, %c0_28, %c0_29] : memref<3x3x64x64xbf16, #tpu.memory_space<vmem>>, vector<1x1x64x64xbf16>
    %33 = vector.shape_cast %32 : vector<1x1x64x64xbf16> to vector<64x64xbf16>
    "tpu.trace_start"() <{level = 10 : i32, message = "hwc,cd->hwd"}> : () -> ()
    %cst_30 = arith.constant dense<0.000000e+00> : vector<8x16x64xf32>
    %34 = tpu.matmul %31, %33, %cst_30 {dimension_numbers = #tpu.dot_dimension_numbers<[2], [0], [0, 1], [1], [0, 0, 0, 1, 1, 1], [], []>} : vector<8x16x64xbf16>, vector<64x64xbf16>, vector<8x16x64xf32> -> vector<8x16x64xf32>
    "tpu.trace_stop"() : () -> ()
    %35 = arith.addf %30, %34 : vector<8x16x64xf32>
    %36 = vector.extract_strided_slice %25 {offsets = [2, 0, 0], sizes = [8, 16, 64], strides = [1, 1, 1]} : vector<10x16x64xbf16> to vector<8x16x64xbf16>
    %c2 = arith.constant 2 : index
    %c0_31 = arith.constant 0 : index
    %c0_32 = arith.constant 0 : index
    %c0_33 = arith.constant 0 : index
    %37 = vector.load %arg6[%c2, %c0_31, %c0_32, %c0_33] : memref<3x3x64x64xbf16, #tpu.memory_space<vmem>>, vector<1x1x64x64xbf16>
    %38 = vector.shape_cast %37 : vector<1x1x64x64xbf16> to vector<64x64xbf16>
    "tpu.trace_start"() <{level = 10 : i32, message = "hwc,cd->hwd"}> : () -> ()
    %cst_34 = arith.constant dense<0.000000e+00> : vector<8x16x64xf32>
    %39 = tpu.matmul %36, %38, %cst_34 {dimension_numbers = #tpu.dot_dimension_numbers<[2], [0], [0, 1], [1], [0, 0, 0, 1, 1, 1], [], []>} : vector<8x16x64xbf16>, vector<64x64xbf16>, vector<8x16x64xf32> -> vector<8x16x64xf32>
    "tpu.trace_stop"() : () -> ()
    %40 = arith.addf %35, %39 : vector<8x16x64xf32>
    %c0_35 = arith.constant 0 : index
    %c1_36 = arith.constant 1 : index
    %c0_37 = arith.constant 0 : index
    %41 = vector.load %arg9[%c0_35, %c1_36, %c0_37] : memref<10x18x64xf32, #tpu.memory_space<vmem>>, vector<10x16x64xf32>
    %42 = arith.truncf %41 : vector<10x16x64xf32> to vector<10x16x64xbf16>
    %43 = vector.extract_strided_slice %42 {offsets = [0, 0, 0], sizes = [8, 16, 64], strides = [1, 1, 1]} : vector<10x16x64xbf16> to vector<8x16x64xbf16>
    %c0_38 = arith.constant 0 : index
    %c1_39 = arith.constant 1 : index
    %c0_40 = arith.constant 0 : index
    %c0_41 = arith.constant 0 : index
    %44 = vector.load %arg6[%c0_38, %c1_39, %c0_40, %c0_41] : memref<3x3x64x64xbf16, #tpu.memory_space<vmem>>, vector<1x1x64x64xbf16>
    %45 = vector.shape_cast %44 : vector<1x1x64x64xbf16> to vector<64x64xbf16>
    "tpu.trace_start"() <{level = 10 : i32, message = "hwc,cd->hwd"}> : () -> ()
    %cst_42 = arith.constant dense<0.000000e+00> : vector<8x16x64xf32>
    %46 = tpu.matmul %43, %45, %cst_42 {dimension_numbers = #tpu.dot_dimension_numbers<[2], [0], [0, 1], [1], [0, 0, 0, 1, 1, 1], [], []>} : vector<8x16x64xbf16>, vector<64x64xbf16>, vector<8x16x64xf32> -> vector<8x16x64xf32>
    "tpu.trace_stop"() : () -> ()
    %47 = arith.addf %40, %46 : vector<8x16x64xf32>
    %48 = vector.extract_strided_slice %42 {offsets = [1, 0, 0], sizes = [8, 16, 64], strides = [1, 1, 1]} : vector<10x16x64xbf16> to vector<8x16x64xbf16>
    %c1_43 = arith.constant 1 : index
    %c1_44 = arith.constant 1 : index
    %c0_45 = arith.constant 0 : index
    %c0_46 = arith.constant 0 : index
    %49 = vector.load %arg6[%c1_43, %c1_44, %c0_45, %c0_46] : memref<3x3x64x64xbf16, #tpu.memory_space<vmem>>, vector<1x1x64x64xbf16>
    %50 = vector.shape_cast %49 : vector<1x1x64x64xbf16> to vector<64x64xbf16>
    "tpu.trace_start"() <{level = 10 : i32, message = "hwc,cd->hwd"}> : () -> ()
    %cst_47 = arith.constant dense<0.000000e+00> : vector<8x16x64xf32>
    %51 = tpu.matmul %48, %50, %cst_47 {dimension_numbers = #tpu.dot_dimension_numbers<[2], [0], [0, 1], [1], [0, 0, 0, 1, 1, 1], [], []>} : vector<8x16x64xbf16>, vector<64x64xbf16>, vector<8x16x64xf32> -> vector<8x16x64xf32>
    "tpu.trace_stop"() : () -> ()
    %52 = arith.addf %47, %51 : vector<8x16x64xf32>
    %53 = vector.extract_strided_slice %42 {offsets = [2, 0, 0], sizes = [8, 16, 64], strides = [1, 1, 1]} : vector<10x16x64xbf16> to vector<8x16x64xbf16>
    %c2_48 = arith.constant 2 : index
    %c1_49 = arith.constant 1 : index
    %c0_50 = arith.constant 0 : index
    %c0_51 = arith.constant 0 : index
    %54 = vector.load %arg6[%c2_48, %c1_49, %c0_50, %c0_51] : memref<3x3x64x64xbf16, #tpu.memory_space<vmem>>, vector<1x1x64x64xbf16>
    %55 = vector.shape_cast %54 : vector<1x1x64x64xbf16> to vector<64x64xbf16>
    "tpu.trace_start"() <{level = 10 : i32, message = "hwc,cd->hwd"}> : () -> ()
    %cst_52 = arith.constant dense<0.000000e+00> : vector<8x16x64xf32>
    %56 = tpu.matmul %53, %55, %cst_52 {dimension_numbers = #tpu.dot_dimension_numbers<[2], [0], [0, 1], [1], [0, 0, 0, 1, 1, 1], [], []>} : vector<8x16x64xbf16>, vector<64x64xbf16>, vector<8x16x64xf32> -> vector<8x16x64xf32>
    "tpu.trace_stop"() : () -> ()
    %57 = arith.addf %52, %56 : vector<8x16x64xf32>
    %c0_53 = arith.constant 0 : index
    %c2_54 = arith.constant 2 : index
    %c0_55 = arith.constant 0 : index
    %58 = vector.load %arg9[%c0_53, %c2_54, %c0_55] : memref<10x18x64xf32, #tpu.memory_space<vmem>>, vector<10x16x64xf32>
    %59 = arith.truncf %58 : vector<10x16x64xf32> to vector<10x16x64xbf16>
    %60 = vector.extract_strided_slice %59 {offsets = [0, 0, 0], sizes = [8, 16, 64], strides = [1, 1, 1]} : vector<10x16x64xbf16> to vector<8x16x64xbf16>
    %c0_56 = arith.constant 0 : index
    %c2_57 = arith.constant 2 : index
    %c0_58 = arith.constant 0 : index
    %c0_59 = arith.constant 0 : index
    %61 = vector.load %arg6[%c0_56, %c2_57, %c0_58, %c0_59] : memref<3x3x64x64xbf16, #tpu.memory_space<vmem>>, vector<1x1x64x64xbf16>
    %62 = vector.shape_cast %61 : vector<1x1x64x64xbf16> to vector<64x64xbf16>
    "tpu.trace_start"() <{level = 10 : i32, message = "hwc,cd->hwd"}> : () -> ()
    %cst_60 = arith.constant dense<0.000000e+00> : vector<8x16x64xf32>
    %63 = tpu.matmul %60, %62, %cst_60 {dimension_numbers = #tpu.dot_dimension_numbers<[2], [0], [0, 1], [1], [0, 0, 0, 1, 1, 1], [], []>} : vector<8x16x64xbf16>, vector<64x64xbf16>, vector<8x16x64xf32> -> vector<8x16x64xf32>
    "tpu.trace_stop"() : () -> ()
    %64 = arith.addf %57, %63 : vector<8x16x64xf32>
    %65 = vector.extract_strided_slice %59 {offsets = [1, 0, 0], sizes = [8, 16, 64], strides = [1, 1, 1]} : vector<10x16x64xbf16> to vector<8x16x64xbf16>
    %c1_61 = arith.constant 1 : index
    %c2_62 = arith.constant 2 : index
    %c0_63 = arith.constant 0 : index
    %c0_64 = arith.constant 0 : index
    %66 = vector.load %arg6[%c1_61, %c2_62, %c0_63, %c0_64] : memref<3x3x64x64xbf16, #tpu.memory_space<vmem>>, vector<1x1x64x64xbf16>
    %67 = vector.shape_cast %66 : vector<1x1x64x64xbf16> to vector<64x64xbf16>
    "tpu.trace_start"() <{level = 10 : i32, message = "hwc,cd->hwd"}> : () -> ()
    %cst_65 = arith.constant dense<0.000000e+00> : vector<8x16x64xf32>
    %68 = tpu.matmul %65, %67, %cst_65 {dimension_numbers = #tpu.dot_dimension_numbers<[2], [0], [0, 1], [1], [0, 0, 0, 1, 1, 1], [], []>} : vector<8x16x64xbf16>, vector<64x64xbf16>, vector<8x16x64xf32> -> vector<8x16x64xf32>
    "tpu.trace_stop"() : () -> ()
    %69 = arith.addf %64, %68 : vector<8x16x64xf32>
    %70 = vector.extract_strided_slice %59 {offsets = [2, 0, 0], sizes = [8, 16, 64], strides = [1, 1, 1]} : vector<10x16x64xbf16> to vector<8x16x64xbf16>
    %c2_66 = arith.constant 2 : index
    %c2_67 = arith.constant 2 : index
    %c0_68 = arith.constant 0 : index
    %c0_69 = arith.constant 0 : index
    %71 = vector.load %arg6[%c2_66, %c2_67, %c0_68, %c0_69] : memref<3x3x64x64xbf16, #tpu.memory_space<vmem>>, vector<1x1x64x64xbf16>
    %72 = vector.shape_cast %71 : vector<1x1x64x64xbf16> to vector<64x64xbf16>
    "tpu.trace_start"() <{level = 10 : i32, message = "hwc,cd->hwd"}> : () -> ()
    %cst_70 = arith.constant dense<0.000000e+00> : vector<8x16x64xf32>
    %73 = tpu.matmul %70, %72, %cst_70 {dimension_numbers = #tpu.dot_dimension_numbers<[2], [0], [0, 1], [1], [0, 0, 0, 1, 1, 1], [], []>} : vector<8x16x64xbf16>, vector<64x64xbf16>, vector<8x16x64xf32> -> vector<8x16x64xf32>
    "tpu.trace_stop"() : () -> ()
    %74 = arith.addf %69, %73 : vector<8x16x64xf32>
    %c0_71 = arith.constant 0 : index
    %c0_72 = arith.constant 0 : index
    %75 = vector.load %arg7[%c0_71, %c0_72] : memref<1x64xf32, #tpu.memory_space<vmem>>, vector<1x64xf32>
    %76 = vector.shape_cast %75 : vector<1x64xf32> to vector<1x1x64xf32>
    %77 = vector.broadcast %76 : vector<1x1x64xf32> to vector<8x16x64xf32>
    %78 = arith.addf %74, %77 : vector<8x16x64xf32>
    %c0_73 = arith.constant 0 : index
    %c0_74 = arith.constant 0 : index
    %c0_75 = arith.constant 0 : index
    %c0_76 = arith.constant 0 : index
    %79 = vector.load %arg5[%c0_73, %c0_74, %c0_75, %c0_76] : memref<1x8x16x64xf32, #tpu.memory_space<vmem>>, vector<1x8x16x64xf32>
    %80 = vector.shape_cast %79 : vector<1x8x16x64xf32> to vector<8x16x64xf32>
    %81 = arith.addf %78, %80 : vector<8x16x64xf32>
    %cst_77 = arith.constant 0.000000e+00 : f32
    %82 = vector.broadcast %cst_77 : f32 to vector<8x16x64xf32>
    %83 = arith.maximumf %81, %82 : vector<8x16x64xf32>
    %c0_78 = arith.constant 0 : index
    %c0_79 = arith.constant 0 : index
    %c0_80 = arith.constant 0 : index
    %c0_81 = arith.constant 0 : index
    %84 = vector.load %arg8[%c0_78, %c0_79, %c0_80, %c0_81] : memref<1x8x16x64xf32, #tpu.memory_space<vmem>>, vector<1x8x16x64xf32>
    %85 = vector.shape_cast %84 : vector<1x8x16x64xf32> to vector<8x16x64xf32>
    %86 = vector.shape_cast %83 : vector<8x16x64xf32> to vector<1x8x16x64xf32>
    tpu.vector_store %arg8[%c0_78, %c0_79, %c0_80, %c0_81], %86 {strides = array<i32>} : memref<1x8x16x64xf32, #tpu.memory_space<vmem>>, vector<1x8x16x64xf32>,
    return
  }
  func.func @transform_0(%arg0: i32, %arg1: i32) -> (i32, i32, i32, i32) {
    %c0_i32 = arith.constant 0 : i32
    %c0_i32_0 = arith.constant 0 : i32
    %c0_i32_1 = arith.constant 0 : i32
    return %arg0, %arg1, %c0_i32, %c0_i32_0 : i32, i32, i32, i32
  }
  func.func @transform_1(%arg0: i32, %arg1: i32) -> (i32, i32, i32, i32) {
    %c8_i32 = arith.constant 8 : i32
    %0 = arith.muli %arg1, %c8_i32 : i32
    %c1_i32 = arith.constant 1 : i32
    %1 = arith.subi %0, %c1_i32 : i32
    %c0_i32 = arith.constant 0 : i32
    %2 = arith.maxsi %1, %c0_i32 : i32
    %c0_i32_0 = arith.constant 0 : i32
    %c0_i32_1 = arith.constant 0 : i32
    %c0_i32_2 = arith.constant 0 : i32
    return %arg0, %2, %c0_i32_0, %c0_i32_1 : i32, i32, i32, i32
  }
  func.func @transform_2(%arg0: i32, %arg1: i32) -> (i32, i32, i32, i32) {
    %c1_i32 = arith.constant 1 : i32
    %0 = arith.addi %arg1, %c1_i32 : i32
    %c8_i32 = arith.constant 8 : i32
    %1 = arith.muli %0, %c8_i32 : i32
    %c15_i32 = arith.constant 15 : i32
    %2 = arith.minsi %1, %c15_i32 : i32
    %c0_i32 = arith.constant 0 : i32
    %c0_i32_0 = arith.constant 0 : i32
    %c0_i32_1 = arith.constant 0 : i32
    return %arg0, %2, %c0_i32, %c0_i32_0 : i32, i32, i32, i32
  }
  func.func @transform_3(%arg0: i32, %arg1: i32) -> (i32, i32, i32, i32) {
    %c0_i32 = arith.constant 0 : i32
    %c0_i32_0 = arith.constant 0 : i32
    %c0_i32_1 = arith.constant 0 : i32
    return %arg0, %arg1, %c0_i32, %c0_i32_0 : i32, i32, i32, i32
  }
  func.func @transform_4(%arg0: i32, %arg1: i32) -> (i32, i32, i32, i32) {
    %c0_i32 = arith.constant 0 : i32
    %c0_i32_0 = arith.constant 0 : i32
    %c0_i32_1 = arith.constant 0 : i32
    %c0_i32_2 = arith.constant 0 : i32
    %c0_i32_3 = arith.constant 0 : i32
    return %c0_i32, %c0_i32_0, %c0_i32_1, %c0_i32_2 : i32, i32, i32, i32
  }
  func.func @transform_5(%arg0: i32, %arg1: i32) -> (i32, i32) {
    %c0_i32 = arith.constant 0 : i32
    %c0_i32_0 = arith.constant 0 : i32
    %c0_i32_1 = arith.constant 0 : i32
    return %c0_i32, %c0_i32_0 : i32, i32
  }
  func.func @transform_6(%arg0: i32, %arg1: i32) -> (i32, i32, i32, i32) {
    %c0_i32 = arith.constant 0 : i32
    %c0_i32_0 = arith.constant 0 : i32
    %c0_i32_1 = arith.constant 0 : i32
    return %arg0, %arg1, %c0_i32, %c0_i32_0 : i32, i32, i32, i32
  }
}

module attributes {stable_mosaic.version = 11 : i64} {
  func.func @_conv3x3_kernel(%arg0: i32, %arg1: i32, %arg2: memref<1x8x18x64xf32, #tpu.memory_space<vmem>>, %arg3: memref<1x1x18x64xf32, #tpu.memory_space<vmem>>, %arg4: memref<1x1x18x64xf32, #tpu.memory_space<vmem>>, %arg5: memref<1x8x16x4xf32, #tpu.memory_space<vmem>>, %arg6: memref<3x3x64x4xbf16, #tpu.memory_space<vmem>>, %arg7: memref<1x4xf32, #tpu.memory_space<vmem>>, %arg8: memref<1x8x16x4xf32, #tpu.memory_space<vmem>>, %arg9: memref<10x18x64xf32, #tpu.memory_space<vmem>>) attributes {dimension_semantics = [#tpu.dimension_semantics<parallel>, #tpu.dimension_semantics<parallel>], iteration_bounds = array<i64: 2, 2>, scalar_prefetch = 0 : i64, scratch_operands = 1 : i64, tpu.core_type = #tpu.core_type<tc>, window_params = [{transform_indices = @transform_0, window_bounds = array<i64: 1, 8, 18, 64>}, {transform_indices = @transform_1, window_bounds = array<i64: 1, 1, 18, 64>}, {transform_indices = @transform_2, window_bounds = array<i64: 1, 1, 18, 64>}, {transform_indices = @transform_3, window_bounds = array<i64: 1, 8, 16, 4>}, {pipeline_mode = #tpu.pipeline_mode<synchronous>, transform_indices = @transform_4, window_bounds = array<i64: 3, 3, 64, 4>}, {pipeline_mode = #tpu.pipeline_mode<synchronous>, transform_indices = @transform_5, window_bounds = array<i64: 1, 4>}, {transform_indices = @transform_6, window_bounds = array<i64: 1, 8, 16, 4>}]} {
    %c0 = arith.constant 0 : index
    %c0_0 = arith.constant 0 : index
    %c0_1 = arith.constant 0 : index
    %c0_2 = arith.constant 0 : index
    %0 = vector.load %arg2[%c0, %c0_0, %c0_1, %c0_2] : memref<1x8x18x64xf32, #tpu.memory_space<vmem>>, vector<1x8x18x64xf32>
    %1 = vector.shape_cast %0 : vector<1x8x18x64xf32> to vector<8x18x64xf32>
    %c0_3 = arith.constant 0 : index
    %c0_4 = arith.constant 0 : index
    %c0_5 = arith.constant 0 : index
    %c0_6 = arith.constant 0 : index
    %2 = vector.load %arg3[%c0_3, %c0_4, %c0_5, %c0_6] : memref<1x1x18x64xf32, #tpu.memory_space<vmem>>, vector<1x1x18x64xf32>
    %3 = vector.shape_cast %2 : vector<1x1x18x64xf32> to vector<18x64xf32>
    %c0_7 = arith.constant 0 : index
    %c0_8 = arith.constant 0 : index
    %c0_9 = arith.constant 0 : index
    %c0_10 = arith.constant 0 : index
    %4 = vector.load %arg4[%c0_7, %c0_8, %c0_9, %c0_10] : memref<1x1x18x64xf32, #tpu.memory_space<vmem>>, vector<1x1x18x64xf32>
    %5 = vector.shape_cast %4 : vector<1x1x18x64xf32> to vector<18x64xf32>
    %c0_i32 = arith.constant 0 : i32
    %6 = arith.cmpi sgt, %arg1, %c0_i32 : i32
    %7 = arith.extui %6 : i1 to i32
    %8 = arith.sitofp %7 : i32 to f32
    %9 = vector.broadcast %8 : f32 to vector<18x64xf32>
    %10 = arith.mulf %3, %9 : vector<18x64xf32>
    %c1_i32 = arith.constant 1 : i32
    %11 = arith.cmpi slt, %arg1, %c1_i32 : i32
    %12 = arith.extui %11 : i1 to i32
    %13 = arith.sitofp %12 : i32 to f32
    %14 = vector.broadcast %13 : f32 to vector<18x64xf32>
    %15 = arith.mulf %5, %14 : vector<18x64xf32>
    %c0_11 = arith.constant 0 : index
    %c0_12 = arith.constant 0 : index
    %c0_13 = arith.constant 0 : index
    %16 = vector.load %arg9[%c0_11, %c0_12, %c0_13] : memref<10x18x64xf32, #tpu.memory_space<vmem>>, vector<1x18x64xf32>
    %17 = vector.shape_cast %16 : vector<1x18x64xf32> to vector<18x64xf32>
    %18 = vector.shape_cast %10 : vector<18x64xf32> to vector<1x18x64xf32>
    tpu.vector_store %arg9[%c0_11, %c0_12, %c0_13], %18 {strides = array<i32>} : memref<10x18x64xf32, #tpu.memory_space<vmem>>, vector<1x18x64xf32>,
    %c1 = arith.constant 1 : index
    %c0_14 = arith.constant 0 : index
    %c0_15 = arith.constant 0 : index
    %19 = vector.load %arg9[%c1, %c0_14, %c0_15] : memref<10x18x64xf32, #tpu.memory_space<vmem>>, vector<8x18x64xf32>
    tpu.vector_store %arg9[%c1, %c0_14, %c0_15], %1 {strides = array<i32>} : memref<10x18x64xf32, #tpu.memory_space<vmem>>, vector<8x18x64xf32>,
    %c9 = arith.constant 9 : index
    %c0_16 = arith.constant 0 : index
    %c0_17 = arith.constant 0 : index
    %20 = vector.load %arg9[%c9, %c0_16, %c0_17] : memref<10x18x64xf32, #tpu.memory_space<vmem>>, vector<1x18x64xf32>
    %21 = vector.shape_cast %20 : vector<1x18x64xf32> to vector<18x64xf32>
    %22 = vector.shape_cast %15 : vector<18x64xf32> to vector<1x18x64xf32>
    tpu.vector_store %arg9[%c9, %c0_16, %c0_17], %22 {strides = array<i32>} : memref<10x18x64xf32, #tpu.memory_space<vmem>>, vector<1x18x64xf32>,
    %cst = arith.constant 0.000000e+00 : f32
    %23 = vector.broadcast %cst : f32 to vector<8x16x4xf32>
    %c0_18 = arith.constant 0 : index
    %c0_19 = arith.constant 0 : index
    %c0_20 = arith.constant 0 : index
    %24 = vector.load %arg9[%c0_18, %c0_19, %c0_20] : memref<10x18x64xf32, #tpu.memory_space<vmem>>, vector<10x16x64xf32>
    %25 = arith.truncf %24 : vector<10x16x64xf32> to vector<10x16x64xbf16>
    %26 = vector.extract_strided_slice %25 {offsets = [0, 0, 0], sizes = [8, 16, 64], strides = [1, 1, 1]} : vector<10x16x64xbf16> to vector<8x16x64xbf16>
    %c0_21 = arith.constant 0 : index
    %c0_22 = arith.constant 0 : index
    %c0_23 = arith.constant 0 : index
    %c0_24 = arith.constant 0 : index
    %27 = vector.load %arg6[%c0_21, %c0_22, %c0_23, %c0_24] : memref<3x3x64x4xbf16, #tpu.memory_space<vmem>>, vector<1x1x64x4xbf16>
    %28 = vector.shape_cast %27 : vector<1x1x64x4xbf16> to vector<64x4xbf16>
    "tpu.trace_start"() <{level = 10 : i32, message = "hwc,cd->hwd"}> : () -> ()
    %cst_25 = arith.constant dense<0.000000e+00> : vector<8x16x4xf32>
    %29 = tpu.matmul %26, %28, %cst_25 {dimension_numbers = #tpu.dot_dimension_numbers<[2], [0], [0, 1], [1], [0, 0, 0, 1, 1, 1], [], []>} : vector<8x16x64xbf16>, vector<64x4xbf16>, vector<8x16x4xf32> -> vector<8x16x4xf32>
    "tpu.trace_stop"() : () -> ()
    %30 = arith.addf %23, %29 : vector<8x16x4xf32>
    %31 = vector.extract_strided_slice %25 {offsets = [1, 0, 0], sizes = [8, 16, 64], strides = [1, 1, 1]} : vector<10x16x64xbf16> to vector<8x16x64xbf16>
    %c1_26 = arith.constant 1 : index
    %c0_27 = arith.constant 0 : index
    %c0_28 = arith.constant 0 : index
    %c0_29 = arith.constant 0 : index
    %32 = vector.load %arg6[%c1_26, %c0_27, %c0_28, %c0_29] : memref<3x3x64x4xbf16, #tpu.memory_space<vmem>>, vector<1x1x64x4xbf16>
    %33 = vector.shape_cast %32 : vector<1x1x64x4xbf16> to vector<64x4xbf16>
    "tpu.trace_start"() <{level = 10 : i32, message = "hwc,cd->hwd"}> : () -> ()
    %cst_30 = arith.constant dense<0.000000e+00> : vector<8x16x4xf32>
    %34 = tpu.matmul %31, %33, %cst_30 {dimension_numbers = #tpu.dot_dimension_numbers<[2], [0], [0, 1], [1], [0, 0, 0, 1, 1, 1], [], []>} : vector<8x16x64xbf16>, vector<64x4xbf16>, vector<8x16x4xf32> -> vector<8x16x4xf32>
    "tpu.trace_stop"() : () -> ()
    %35 = arith.addf %30, %34 : vector<8x16x4xf32>
    %36 = vector.extract_strided_slice %25 {offsets = [2, 0, 0], sizes = [8, 16, 64], strides = [1, 1, 1]} : vector<10x16x64xbf16> to vector<8x16x64xbf16>
    %c2 = arith.constant 2 : index
    %c0_31 = arith.constant 0 : index
    %c0_32 = arith.constant 0 : index
    %c0_33 = arith.constant 0 : index
    %37 = vector.load %arg6[%c2, %c0_31, %c0_32, %c0_33] : memref<3x3x64x4xbf16, #tpu.memory_space<vmem>>, vector<1x1x64x4xbf16>
    %38 = vector.shape_cast %37 : vector<1x1x64x4xbf16> to vector<64x4xbf16>
    "tpu.trace_start"() <{level = 10 : i32, message = "hwc,cd->hwd"}> : () -> ()
    %cst_34 = arith.constant dense<0.000000e+00> : vector<8x16x4xf32>
    %39 = tpu.matmul %36, %38, %cst_34 {dimension_numbers = #tpu.dot_dimension_numbers<[2], [0], [0, 1], [1], [0, 0, 0, 1, 1, 1], [], []>} : vector<8x16x64xbf16>, vector<64x4xbf16>, vector<8x16x4xf32> -> vector<8x16x4xf32>
    "tpu.trace_stop"() : () -> ()
    %40 = arith.addf %35, %39 : vector<8x16x4xf32>
    %c0_35 = arith.constant 0 : index
    %c1_36 = arith.constant 1 : index
    %c0_37 = arith.constant 0 : index
    %41 = vector.load %arg9[%c0_35, %c1_36, %c0_37] : memref<10x18x64xf32, #tpu.memory_space<vmem>>, vector<10x16x64xf32>
    %42 = arith.truncf %41 : vector<10x16x64xf32> to vector<10x16x64xbf16>
    %43 = vector.extract_strided_slice %42 {offsets = [0, 0, 0], sizes = [8, 16, 64], strides = [1, 1, 1]} : vector<10x16x64xbf16> to vector<8x16x64xbf16>
    %c0_38 = arith.constant 0 : index
    %c1_39 = arith.constant 1 : index
    %c0_40 = arith.constant 0 : index
    %c0_41 = arith.constant 0 : index
    %44 = vector.load %arg6[%c0_38, %c1_39, %c0_40, %c0_41] : memref<3x3x64x4xbf16, #tpu.memory_space<vmem>>, vector<1x1x64x4xbf16>
    %45 = vector.shape_cast %44 : vector<1x1x64x4xbf16> to vector<64x4xbf16>
    "tpu.trace_start"() <{level = 10 : i32, message = "hwc,cd->hwd"}> : () -> ()
    %cst_42 = arith.constant dense<0.000000e+00> : vector<8x16x4xf32>
    %46 = tpu.matmul %43, %45, %cst_42 {dimension_numbers = #tpu.dot_dimension_numbers<[2], [0], [0, 1], [1], [0, 0, 0, 1, 1, 1], [], []>} : vector<8x16x64xbf16>, vector<64x4xbf16>, vector<8x16x4xf32> -> vector<8x16x4xf32>
    "tpu.trace_stop"() : () -> ()
    %47 = arith.addf %40, %46 : vector<8x16x4xf32>
    %48 = vector.extract_strided_slice %42 {offsets = [1, 0, 0], sizes = [8, 16, 64], strides = [1, 1, 1]} : vector<10x16x64xbf16> to vector<8x16x64xbf16>
    %c1_43 = arith.constant 1 : index
    %c1_44 = arith.constant 1 : index
    %c0_45 = arith.constant 0 : index
    %c0_46 = arith.constant 0 : index
    %49 = vector.load %arg6[%c1_43, %c1_44, %c0_45, %c0_46] : memref<3x3x64x4xbf16, #tpu.memory_space<vmem>>, vector<1x1x64x4xbf16>
    %50 = vector.shape_cast %49 : vector<1x1x64x4xbf16> to vector<64x4xbf16>
    "tpu.trace_start"() <{level = 10 : i32, message = "hwc,cd->hwd"}> : () -> ()
    %cst_47 = arith.constant dense<0.000000e+00> : vector<8x16x4xf32>
    %51 = tpu.matmul %48, %50, %cst_47 {dimension_numbers = #tpu.dot_dimension_numbers<[2], [0], [0, 1], [1], [0, 0, 0, 1, 1, 1], [], []>} : vector<8x16x64xbf16>, vector<64x4xbf16>, vector<8x16x4xf32> -> vector<8x16x4xf32>
    "tpu.trace_stop"() : () -> ()
    %52 = arith.addf %47, %51 : vector<8x16x4xf32>
    %53 = vector.extract_strided_slice %42 {offsets = [2, 0, 0], sizes = [8, 16, 64], strides = [1, 1, 1]} : vector<10x16x64xbf16> to vector<8x16x64xbf16>
    %c2_48 = arith.constant 2 : index
    %c1_49 = arith.constant 1 : index
    %c0_50 = arith.constant 0 : index
    %c0_51 = arith.constant 0 : index
    %54 = vector.load %arg6[%c2_48, %c1_49, %c0_50, %c0_51] : memref<3x3x64x4xbf16, #tpu.memory_space<vmem>>, vector<1x1x64x4xbf16>
    %55 = vector.shape_cast %54 : vector<1x1x64x4xbf16> to vector<64x4xbf16>
    "tpu.trace_start"() <{level = 10 : i32, message = "hwc,cd->hwd"}> : () -> ()
    %cst_52 = arith.constant dense<0.000000e+00> : vector<8x16x4xf32>
    %56 = tpu.matmul %53, %55, %cst_52 {dimension_numbers = #tpu.dot_dimension_numbers<[2], [0], [0, 1], [1], [0, 0, 0, 1, 1, 1], [], []>} : vector<8x16x64xbf16>, vector<64x4xbf16>, vector<8x16x4xf32> -> vector<8x16x4xf32>
    "tpu.trace_stop"() : () -> ()
    %57 = arith.addf %52, %56 : vector<8x16x4xf32>
    %c0_53 = arith.constant 0 : index
    %c2_54 = arith.constant 2 : index
    %c0_55 = arith.constant 0 : index
    %58 = vector.load %arg9[%c0_53, %c2_54, %c0_55] : memref<10x18x64xf32, #tpu.memory_space<vmem>>, vector<10x16x64xf32>
    %59 = arith.truncf %58 : vector<10x16x64xf32> to vector<10x16x64xbf16>
    %60 = vector.extract_strided_slice %59 {offsets = [0, 0, 0], sizes = [8, 16, 64], strides = [1, 1, 1]} : vector<10x16x64xbf16> to vector<8x16x64xbf16>
    %c0_56 = arith.constant 0 : index
    %c2_57 = arith.constant 2 : index
    %c0_58 = arith.constant 0 : index
    %c0_59 = arith.constant 0 : index
    %61 = vector.load %arg6[%c0_56, %c2_57, %c0_58, %c0_59] : memref<3x3x64x4xbf16, #tpu.memory_space<vmem>>, vector<1x1x64x4xbf16>
    %62 = vector.shape_cast %61 : vector<1x1x64x4xbf16> to vector<64x4xbf16>
    "tpu.trace_start"() <{level = 10 : i32, message = "hwc,cd->hwd"}> : () -> ()
    %cst_60 = arith.constant dense<0.000000e+00> : vector<8x16x4xf32>
    %63 = tpu.matmul %60, %62, %cst_60 {dimension_numbers = #tpu.dot_dimension_numbers<[2], [0], [0, 1], [1], [0, 0, 0, 1, 1, 1], [], []>} : vector<8x16x64xbf16>, vector<64x4xbf16>, vector<8x16x4xf32> -> vector<8x16x4xf32>
    "tpu.trace_stop"() : () -> ()
    %64 = arith.addf %57, %63 : vector<8x16x4xf32>
    %65 = vector.extract_strided_slice %59 {offsets = [1, 0, 0], sizes = [8, 16, 64], strides = [1, 1, 1]} : vector<10x16x64xbf16> to vector<8x16x64xbf16>
    %c1_61 = arith.constant 1 : index
    %c2_62 = arith.constant 2 : index
    %c0_63 = arith.constant 0 : index
    %c0_64 = arith.constant 0 : index
    %66 = vector.load %arg6[%c1_61, %c2_62, %c0_63, %c0_64] : memref<3x3x64x4xbf16, #tpu.memory_space<vmem>>, vector<1x1x64x4xbf16>
    %67 = vector.shape_cast %66 : vector<1x1x64x4xbf16> to vector<64x4xbf16>
    "tpu.trace_start"() <{level = 10 : i32, message = "hwc,cd->hwd"}> : () -> ()
    %cst_65 = arith.constant dense<0.000000e+00> : vector<8x16x4xf32>
    %68 = tpu.matmul %65, %67, %cst_65 {dimension_numbers = #tpu.dot_dimension_numbers<[2], [0], [0, 1], [1], [0, 0, 0, 1, 1, 1], [], []>} : vector<8x16x64xbf16>, vector<64x4xbf16>, vector<8x16x4xf32> -> vector<8x16x4xf32>
    "tpu.trace_stop"() : () -> ()
    %69 = arith.addf %64, %68 : vector<8x16x4xf32>
    %70 = vector.extract_strided_slice %59 {offsets = [2, 0, 0], sizes = [8, 16, 64], strides = [1, 1, 1]} : vector<10x16x64xbf16> to vector<8x16x64xbf16>
    %c2_66 = arith.constant 2 : index
    %c2_67 = arith.constant 2 : index
    %c0_68 = arith.constant 0 : index
    %c0_69 = arith.constant 0 : index
    %71 = vector.load %arg6[%c2_66, %c2_67, %c0_68, %c0_69] : memref<3x3x64x4xbf16, #tpu.memory_space<vmem>>, vector<1x1x64x4xbf16>
    %72 = vector.shape_cast %71 : vector<1x1x64x4xbf16> to vector<64x4xbf16>
    "tpu.trace_start"() <{level = 10 : i32, message = "hwc,cd->hwd"}> : () -> ()
    %cst_70 = arith.constant dense<0.000000e+00> : vector<8x16x4xf32>
    %73 = tpu.matmul %70, %72, %cst_70 {dimension_numbers = #tpu.dot_dimension_numbers<[2], [0], [0, 1], [1], [0, 0, 0, 1, 1, 1], [], []>} : vector<8x16x64xbf16>, vector<64x4xbf16>, vector<8x16x4xf32> -> vector<8x16x4xf32>
    "tpu.trace_stop"() : () -> ()
    %74 = arith.addf %69, %73 : vector<8x16x4xf32>
    %c0_71 = arith.constant 0 : index
    %c0_72 = arith.constant 0 : index
    %75 = vector.load %arg7[%c0_71, %c0_72] : memref<1x4xf32, #tpu.memory_space<vmem>>, vector<1x4xf32>
    %76 = vector.shape_cast %75 : vector<1x4xf32> to vector<1x1x4xf32>
    %77 = vector.broadcast %76 : vector<1x1x4xf32> to vector<8x16x4xf32>
    %78 = arith.addf %74, %77 : vector<8x16x4xf32>
    %c0_73 = arith.constant 0 : index
    %c0_74 = arith.constant 0 : index
    %c0_75 = arith.constant 0 : index
    %c0_76 = arith.constant 0 : index
    %79 = vector.load %arg5[%c0_73, %c0_74, %c0_75, %c0_76] : memref<1x8x16x4xf32, #tpu.memory_space<vmem>>, vector<1x8x16x4xf32>
    %80 = vector.shape_cast %79 : vector<1x8x16x4xf32> to vector<8x16x4xf32>
    %81 = arith.addf %78, %80 : vector<8x16x4xf32>
    %c0_77 = arith.constant 0 : index
    %c0_78 = arith.constant 0 : index
    %c0_79 = arith.constant 0 : index
    %c0_80 = arith.constant 0 : index
    %82 = vector.load %arg8[%c0_77, %c0_78, %c0_79, %c0_80] : memref<1x8x16x4xf32, #tpu.memory_space<vmem>>, vector<1x8x16x4xf32>
    %83 = vector.shape_cast %82 : vector<1x8x16x4xf32> to vector<8x16x4xf32>
    %84 = vector.shape_cast %81 : vector<8x16x4xf32> to vector<1x8x16x4xf32>
    tpu.vector_store %arg8[%c0_77, %c0_78, %c0_79, %c0_80], %84 {strides = array<i32>} : memref<1x8x16x4xf32, #tpu.memory_space<vmem>>, vector<1x8x16x4xf32>,
    return
  }
  func.func @transform_0(%arg0: i32, %arg1: i32) -> (i32, i32, i32, i32) {
    %c0_i32 = arith.constant 0 : i32
    %c0_i32_0 = arith.constant 0 : i32
    %c0_i32_1 = arith.constant 0 : i32
    return %arg0, %arg1, %c0_i32, %c0_i32_0 : i32, i32, i32, i32
  }
  func.func @transform_1(%arg0: i32, %arg1: i32) -> (i32, i32, i32, i32) {
    %c8_i32 = arith.constant 8 : i32
    %0 = arith.muli %arg1, %c8_i32 : i32
    %c1_i32 = arith.constant 1 : i32
    %1 = arith.subi %0, %c1_i32 : i32
    %c0_i32 = arith.constant 0 : i32
    %2 = arith.maxsi %1, %c0_i32 : i32
    %c0_i32_0 = arith.constant 0 : i32
    %c0_i32_1 = arith.constant 0 : i32
    %c0_i32_2 = arith.constant 0 : i32
    return %arg0, %2, %c0_i32_0, %c0_i32_1 : i32, i32, i32, i32
  }
  func.func @transform_2(%arg0: i32, %arg1: i32) -> (i32, i32, i32, i32) {
    %c1_i32 = arith.constant 1 : i32
    %0 = arith.addi %arg1, %c1_i32 : i32
    %c8_i32 = arith.constant 8 : i32
    %1 = arith.muli %0, %c8_i32 : i32
    %c15_i32 = arith.constant 15 : i32
    %2 = arith.minsi %1, %c15_i32 : i32
    %c0_i32 = arith.constant 0 : i32
    %c0_i32_0 = arith.constant 0 : i32
    %c0_i32_1 = arith.constant 0 : i32
    return %arg0, %2, %c0_i32, %c0_i32_0 : i32, i32, i32, i32
  }
  func.func @transform_3(%arg0: i32, %arg1: i32) -> (i32, i32, i32, i32) {
    %c0_i32 = arith.constant 0 : i32
    %c0_i32_0 = arith.constant 0 : i32
    %c0_i32_1 = arith.constant 0 : i32
    return %arg0, %arg1, %c0_i32, %c0_i32_0 : i32, i32, i32, i32
  }
  func.func @transform_4(%arg0: i32, %arg1: i32) -> (i32, i32, i32, i32) {
    %c0_i32 = arith.constant 0 : i32
    %c0_i32_0 = arith.constant 0 : i32
    %c0_i32_1 = arith.constant 0 : i32
    %c0_i32_2 = arith.constant 0 : i32
    %c0_i32_3 = arith.constant 0 : i32
    return %c0_i32, %c0_i32_0, %c0_i32_1, %c0_i32_2 : i32, i32, i32, i32
  }
  func.func @transform_5(%arg0: i32, %arg1: i32) -> (i32, i32) {
    %c0_i32 = arith.constant 0 : i32
    %c0_i32_0 = arith.constant 0 : i32
    %c0_i32_1 = arith.constant 0 : i32
    return %c0_i32, %c0_i32_0 : i32, i32
  }
  func.func @transform_6(%arg0: i32, %arg1: i32) -> (i32, i32, i32, i32) {
    %c0_i32 = arith.constant 0 : i32
    %c0_i32_0 = arith.constant 0 : i32
    %c0_i32_1 = arith.constant 0 : i32
    return %arg0, %arg1, %c0_i32, %c0_i32_0 : i32, i32, i32, i32
  }
}

module attributes {stable_mosaic.version = 11 : i64} {
  func.func @_conv3x3_kernel(%arg0: i32, %arg1: i32, %arg2: memref<1x8x18x4xf32, #tpu.memory_space<vmem>>, %arg3: memref<1x1x18x4xf32, #tpu.memory_space<vmem>>, %arg4: memref<1x1x18x4xf32, #tpu.memory_space<vmem>>, %arg5: memref<3x3x4x2xbf16, #tpu.memory_space<vmem>>, %arg6: memref<1x2xf32, #tpu.memory_space<vmem>>, %arg7: memref<1x8x16x2xf32, #tpu.memory_space<vmem>>, %arg8: memref<10x18x4xf32, #tpu.memory_space<vmem>>) attributes {dimension_semantics = [#tpu.dimension_semantics<parallel>, #tpu.dimension_semantics<parallel>], iteration_bounds = array<i64: 2, 2>, scalar_prefetch = 0 : i64, scratch_operands = 1 : i64, tpu.core_type = #tpu.core_type<tc>, window_params = [{transform_indices = @transform_0, window_bounds = array<i64: 1, 8, 18, 4>}, {transform_indices = @transform_1, window_bounds = array<i64: 1, 1, 18, 4>}, {transform_indices = @transform_2, window_bounds = array<i64: 1, 1, 18, 4>}, {pipeline_mode = #tpu.pipeline_mode<synchronous>, transform_indices = @transform_3, window_bounds = array<i64: 3, 3, 4, 2>}, {pipeline_mode = #tpu.pipeline_mode<synchronous>, transform_indices = @transform_4, window_bounds = array<i64: 1, 2>}, {transform_indices = @transform_5, window_bounds = array<i64: 1, 8, 16, 2>}]} {
    %c0 = arith.constant 0 : index
    %c0_0 = arith.constant 0 : index
    %c0_1 = arith.constant 0 : index
    %c0_2 = arith.constant 0 : index
    %0 = vector.load %arg2[%c0, %c0_0, %c0_1, %c0_2] : memref<1x8x18x4xf32, #tpu.memory_space<vmem>>, vector<1x8x18x4xf32>
    %1 = vector.shape_cast %0 : vector<1x8x18x4xf32> to vector<8x18x4xf32>
    %c0_3 = arith.constant 0 : index
    %c0_4 = arith.constant 0 : index
    %c0_5 = arith.constant 0 : index
    %c0_6 = arith.constant 0 : index
    %2 = vector.load %arg3[%c0_3, %c0_4, %c0_5, %c0_6] : memref<1x1x18x4xf32, #tpu.memory_space<vmem>>, vector<1x1x18x4xf32>
    %3 = vector.shape_cast %2 : vector<1x1x18x4xf32> to vector<18x4xf32>
    %c0_7 = arith.constant 0 : index
    %c0_8 = arith.constant 0 : index
    %c0_9 = arith.constant 0 : index
    %c0_10 = arith.constant 0 : index
    %4 = vector.load %arg4[%c0_7, %c0_8, %c0_9, %c0_10] : memref<1x1x18x4xf32, #tpu.memory_space<vmem>>, vector<1x1x18x4xf32>
    %5 = vector.shape_cast %4 : vector<1x1x18x4xf32> to vector<18x4xf32>
    %c0_i32 = arith.constant 0 : i32
    %6 = arith.cmpi sgt, %arg1, %c0_i32 : i32
    %7 = arith.extui %6 : i1 to i32
    %8 = arith.sitofp %7 : i32 to f32
    %9 = vector.broadcast %8 : f32 to vector<18x4xf32>
    %10 = arith.mulf %3, %9 : vector<18x4xf32>
    %c1_i32 = arith.constant 1 : i32
    %11 = arith.cmpi slt, %arg1, %c1_i32 : i32
    %12 = arith.extui %11 : i1 to i32
    %13 = arith.sitofp %12 : i32 to f32
    %14 = vector.broadcast %13 : f32 to vector<18x4xf32>
    %15 = arith.mulf %5, %14 : vector<18x4xf32>
    %c0_11 = arith.constant 0 : index
    %c0_12 = arith.constant 0 : index
    %c0_13 = arith.constant 0 : index
    %16 = vector.load %arg8[%c0_11, %c0_12, %c0_13] : memref<10x18x4xf32, #tpu.memory_space<vmem>>, vector<1x18x4xf32>
    %17 = vector.shape_cast %16 : vector<1x18x4xf32> to vector<18x4xf32>
    %18 = vector.shape_cast %10 : vector<18x4xf32> to vector<1x18x4xf32>
    tpu.vector_store %arg8[%c0_11, %c0_12, %c0_13], %18 {strides = array<i32>} : memref<10x18x4xf32, #tpu.memory_space<vmem>>, vector<1x18x4xf32>,
    %c1 = arith.constant 1 : index
    %c0_14 = arith.constant 0 : index
    %c0_15 = arith.constant 0 : index
    %19 = vector.load %arg8[%c1, %c0_14, %c0_15] : memref<10x18x4xf32, #tpu.memory_space<vmem>>, vector<8x18x4xf32>
    tpu.vector_store %arg8[%c1, %c0_14, %c0_15], %1 {strides = array<i32>} : memref<10x18x4xf32, #tpu.memory_space<vmem>>, vector<8x18x4xf32>,
    %c9 = arith.constant 9 : index
    %c0_16 = arith.constant 0 : index
    %c0_17 = arith.constant 0 : index
    %20 = vector.load %arg8[%c9, %c0_16, %c0_17] : memref<10x18x4xf32, #tpu.memory_space<vmem>>, vector<1x18x4xf32>
    %21 = vector.shape_cast %20 : vector<1x18x4xf32> to vector<18x4xf32>
    %22 = vector.shape_cast %15 : vector<18x4xf32> to vector<1x18x4xf32>
    tpu.vector_store %arg8[%c9, %c0_16, %c0_17], %22 {strides = array<i32>} : memref<10x18x4xf32, #tpu.memory_space<vmem>>, vector<1x18x4xf32>,
    %cst = arith.constant 0.000000e+00 : f32
    %23 = vector.broadcast %cst : f32 to vector<8x16x2xf32>
    %c0_18 = arith.constant 0 : index
    %c0_19 = arith.constant 0 : index
    %c0_20 = arith.constant 0 : index
    %24 = vector.load %arg8[%c0_18, %c0_19, %c0_20] : memref<10x18x4xf32, #tpu.memory_space<vmem>>, vector<10x16x4xf32>
    %25 = arith.truncf %24 : vector<10x16x4xf32> to vector<10x16x4xbf16>
    %26 = vector.extract_strided_slice %25 {offsets = [0, 0, 0], sizes = [8, 16, 4], strides = [1, 1, 1]} : vector<10x16x4xbf16> to vector<8x16x4xbf16>
    %c0_21 = arith.constant 0 : index
    %c0_22 = arith.constant 0 : index
    %c0_23 = arith.constant 0 : index
    %c0_24 = arith.constant 0 : index
    %27 = vector.load %arg5[%c0_21, %c0_22, %c0_23, %c0_24] : memref<3x3x4x2xbf16, #tpu.memory_space<vmem>>, vector<1x1x4x2xbf16>
    %28 = vector.shape_cast %27 : vector<1x1x4x2xbf16> to vector<4x2xbf16>
    "tpu.trace_start"() <{level = 10 : i32, message = "hwc,cd->hwd"}> : () -> ()
    %cst_25 = arith.constant dense<0.000000e+00> : vector<8x16x2xf32>
    %29 = tpu.matmul %26, %28, %cst_25 {dimension_numbers = #tpu.dot_dimension_numbers<[2], [0], [0, 1], [1], [0, 0, 0, 1, 1, 1], [], []>} : vector<8x16x4xbf16>, vector<4x2xbf16>, vector<8x16x2xf32> -> vector<8x16x2xf32>
    "tpu.trace_stop"() : () -> ()
    %30 = arith.addf %23, %29 : vector<8x16x2xf32>
    %31 = vector.extract_strided_slice %25 {offsets = [1, 0, 0], sizes = [8, 16, 4], strides = [1, 1, 1]} : vector<10x16x4xbf16> to vector<8x16x4xbf16>
    %c1_26 = arith.constant 1 : index
    %c0_27 = arith.constant 0 : index
    %c0_28 = arith.constant 0 : index
    %c0_29 = arith.constant 0 : index
    %32 = vector.load %arg5[%c1_26, %c0_27, %c0_28, %c0_29] : memref<3x3x4x2xbf16, #tpu.memory_space<vmem>>, vector<1x1x4x2xbf16>
    %33 = vector.shape_cast %32 : vector<1x1x4x2xbf16> to vector<4x2xbf16>
    "tpu.trace_start"() <{level = 10 : i32, message = "hwc,cd->hwd"}> : () -> ()
    %cst_30 = arith.constant dense<0.000000e+00> : vector<8x16x2xf32>
    %34 = tpu.matmul %31, %33, %cst_30 {dimension_numbers = #tpu.dot_dimension_numbers<[2], [0], [0, 1], [1], [0, 0, 0, 1, 1, 1], [], []>} : vector<8x16x4xbf16>, vector<4x2xbf16>, vector<8x16x2xf32> -> vector<8x16x2xf32>
    "tpu.trace_stop"() : () -> ()
    %35 = arith.addf %30, %34 : vector<8x16x2xf32>
    %36 = vector.extract_strided_slice %25 {offsets = [2, 0, 0], sizes = [8, 16, 4], strides = [1, 1, 1]} : vector<10x16x4xbf16> to vector<8x16x4xbf16>
    %c2 = arith.constant 2 : index
    %c0_31 = arith.constant 0 : index
    %c0_32 = arith.constant 0 : index
    %c0_33 = arith.constant 0 : index
    %37 = vector.load %arg5[%c2, %c0_31, %c0_32, %c0_33] : memref<3x3x4x2xbf16, #tpu.memory_space<vmem>>, vector<1x1x4x2xbf16>
    %38 = vector.shape_cast %37 : vector<1x1x4x2xbf16> to vector<4x2xbf16>
    "tpu.trace_start"() <{level = 10 : i32, message = "hwc,cd->hwd"}> : () -> ()
    %cst_34 = arith.constant dense<0.000000e+00> : vector<8x16x2xf32>
    %39 = tpu.matmul %36, %38, %cst_34 {dimension_numbers = #tpu.dot_dimension_numbers<[2], [0], [0, 1], [1], [0, 0, 0, 1, 1, 1], [], []>} : vector<8x16x4xbf16>, vector<4x2xbf16>, vector<8x16x2xf32> -> vector<8x16x2xf32>
    "tpu.trace_stop"() : () -> ()
    %40 = arith.addf %35, %39 : vector<8x16x2xf32>
    %c0_35 = arith.constant 0 : index
    %c1_36 = arith.constant 1 : index
    %c0_37 = arith.constant 0 : index
    %41 = vector.load %arg8[%c0_35, %c1_36, %c0_37] : memref<10x18x4xf32, #tpu.memory_space<vmem>>, vector<10x16x4xf32>
    %42 = arith.truncf %41 : vector<10x16x4xf32> to vector<10x16x4xbf16>
    %43 = vector.extract_strided_slice %42 {offsets = [0, 0, 0], sizes = [8, 16, 4], strides = [1, 1, 1]} : vector<10x16x4xbf16> to vector<8x16x4xbf16>
    %c0_38 = arith.constant 0 : index
    %c1_39 = arith.constant 1 : index
    %c0_40 = arith.constant 0 : index
    %c0_41 = arith.constant 0 : index
    %44 = vector.load %arg5[%c0_38, %c1_39, %c0_40, %c0_41] : memref<3x3x4x2xbf16, #tpu.memory_space<vmem>>, vector<1x1x4x2xbf16>
    %45 = vector.shape_cast %44 : vector<1x1x4x2xbf16> to vector<4x2xbf16>
    "tpu.trace_start"() <{level = 10 : i32, message = "hwc,cd->hwd"}> : () -> ()
    %cst_42 = arith.constant dense<0.000000e+00> : vector<8x16x2xf32>
    %46 = tpu.matmul %43, %45, %cst_42 {dimension_numbers = #tpu.dot_dimension_numbers<[2], [0], [0, 1], [1], [0, 0, 0, 1, 1, 1], [], []>} : vector<8x16x4xbf16>, vector<4x2xbf16>, vector<8x16x2xf32> -> vector<8x16x2xf32>
    "tpu.trace_stop"() : () -> ()
    %47 = arith.addf %40, %46 : vector<8x16x2xf32>
    %48 = vector.extract_strided_slice %42 {offsets = [1, 0, 0], sizes = [8, 16, 4], strides = [1, 1, 1]} : vector<10x16x4xbf16> to vector<8x16x4xbf16>
    %c1_43 = arith.constant 1 : index
    %c1_44 = arith.constant 1 : index
    %c0_45 = arith.constant 0 : index
    %c0_46 = arith.constant 0 : index
    %49 = vector.load %arg5[%c1_43, %c1_44, %c0_45, %c0_46] : memref<3x3x4x2xbf16, #tpu.memory_space<vmem>>, vector<1x1x4x2xbf16>
    %50 = vector.shape_cast %49 : vector<1x1x4x2xbf16> to vector<4x2xbf16>
    "tpu.trace_start"() <{level = 10 : i32, message = "hwc,cd->hwd"}> : () -> ()
    %cst_47 = arith.constant dense<0.000000e+00> : vector<8x16x2xf32>
    %51 = tpu.matmul %48, %50, %cst_47 {dimension_numbers = #tpu.dot_dimension_numbers<[2], [0], [0, 1], [1], [0, 0, 0, 1, 1, 1], [], []>} : vector<8x16x4xbf16>, vector<4x2xbf16>, vector<8x16x2xf32> -> vector<8x16x2xf32>
    "tpu.trace_stop"() : () -> ()
    %52 = arith.addf %47, %51 : vector<8x16x2xf32>
    %53 = vector.extract_strided_slice %42 {offsets = [2, 0, 0], sizes = [8, 16, 4], strides = [1, 1, 1]} : vector<10x16x4xbf16> to vector<8x16x4xbf16>
    %c2_48 = arith.constant 2 : index
    %c1_49 = arith.constant 1 : index
    %c0_50 = arith.constant 0 : index
    %c0_51 = arith.constant 0 : index
    %54 = vector.load %arg5[%c2_48, %c1_49, %c0_50, %c0_51] : memref<3x3x4x2xbf16, #tpu.memory_space<vmem>>, vector<1x1x4x2xbf16>
    %55 = vector.shape_cast %54 : vector<1x1x4x2xbf16> to vector<4x2xbf16>
    "tpu.trace_start"() <{level = 10 : i32, message = "hwc,cd->hwd"}> : () -> ()
    %cst_52 = arith.constant dense<0.000000e+00> : vector<8x16x2xf32>
    %56 = tpu.matmul %53, %55, %cst_52 {dimension_numbers = #tpu.dot_dimension_numbers<[2], [0], [0, 1], [1], [0, 0, 0, 1, 1, 1], [], []>} : vector<8x16x4xbf16>, vector<4x2xbf16>, vector<8x16x2xf32> -> vector<8x16x2xf32>
    "tpu.trace_stop"() : () -> ()
    %57 = arith.addf %52, %56 : vector<8x16x2xf32>
    %c0_53 = arith.constant 0 : index
    %c2_54 = arith.constant 2 : index
    %c0_55 = arith.constant 0 : index
    %58 = vector.load %arg8[%c0_53, %c2_54, %c0_55] : memref<10x18x4xf32, #tpu.memory_space<vmem>>, vector<10x16x4xf32>
    %59 = arith.truncf %58 : vector<10x16x4xf32> to vector<10x16x4xbf16>
    %60 = vector.extract_strided_slice %59 {offsets = [0, 0, 0], sizes = [8, 16, 4], strides = [1, 1, 1]} : vector<10x16x4xbf16> to vector<8x16x4xbf16>
    %c0_56 = arith.constant 0 : index
    %c2_57 = arith.constant 2 : index
    %c0_58 = arith.constant 0 : index
    %c0_59 = arith.constant 0 : index
    %61 = vector.load %arg5[%c0_56, %c2_57, %c0_58, %c0_59] : memref<3x3x4x2xbf16, #tpu.memory_space<vmem>>, vector<1x1x4x2xbf16>
    %62 = vector.shape_cast %61 : vector<1x1x4x2xbf16> to vector<4x2xbf16>
    "tpu.trace_start"() <{level = 10 : i32, message = "hwc,cd->hwd"}> : () -> ()
    %cst_60 = arith.constant dense<0.000000e+00> : vector<8x16x2xf32>
    %63 = tpu.matmul %60, %62, %cst_60 {dimension_numbers = #tpu.dot_dimension_numbers<[2], [0], [0, 1], [1], [0, 0, 0, 1, 1, 1], [], []>} : vector<8x16x4xbf16>, vector<4x2xbf16>, vector<8x16x2xf32> -> vector<8x16x2xf32>
    "tpu.trace_stop"() : () -> ()
    %64 = arith.addf %57, %63 : vector<8x16x2xf32>
    %65 = vector.extract_strided_slice %59 {offsets = [1, 0, 0], sizes = [8, 16, 4], strides = [1, 1, 1]} : vector<10x16x4xbf16> to vector<8x16x4xbf16>
    %c1_61 = arith.constant 1 : index
    %c2_62 = arith.constant 2 : index
    %c0_63 = arith.constant 0 : index
    %c0_64 = arith.constant 0 : index
    %66 = vector.load %arg5[%c1_61, %c2_62, %c0_63, %c0_64] : memref<3x3x4x2xbf16, #tpu.memory_space<vmem>>, vector<1x1x4x2xbf16>
    %67 = vector.shape_cast %66 : vector<1x1x4x2xbf16> to vector<4x2xbf16>
    "tpu.trace_start"() <{level = 10 : i32, message = "hwc,cd->hwd"}> : () -> ()
    %cst_65 = arith.constant dense<0.000000e+00> : vector<8x16x2xf32>
    %68 = tpu.matmul %65, %67, %cst_65 {dimension_numbers = #tpu.dot_dimension_numbers<[2], [0], [0, 1], [1], [0, 0, 0, 1, 1, 1], [], []>} : vector<8x16x4xbf16>, vector<4x2xbf16>, vector<8x16x2xf32> -> vector<8x16x2xf32>
    "tpu.trace_stop"() : () -> ()
    %69 = arith.addf %64, %68 : vector<8x16x2xf32>
    %70 = vector.extract_strided_slice %59 {offsets = [2, 0, 0], sizes = [8, 16, 4], strides = [1, 1, 1]} : vector<10x16x4xbf16> to vector<8x16x4xbf16>
    %c2_66 = arith.constant 2 : index
    %c2_67 = arith.constant 2 : index
    %c0_68 = arith.constant 0 : index
    %c0_69 = arith.constant 0 : index
    %71 = vector.load %arg5[%c2_66, %c2_67, %c0_68, %c0_69] : memref<3x3x4x2xbf16, #tpu.memory_space<vmem>>, vector<1x1x4x2xbf16>
    %72 = vector.shape_cast %71 : vector<1x1x4x2xbf16> to vector<4x2xbf16>
    "tpu.trace_start"() <{level = 10 : i32, message = "hwc,cd->hwd"}> : () -> ()
    %cst_70 = arith.constant dense<0.000000e+00> : vector<8x16x2xf32>
    %73 = tpu.matmul %70, %72, %cst_70 {dimension_numbers = #tpu.dot_dimension_numbers<[2], [0], [0, 1], [1], [0, 0, 0, 1, 1, 1], [], []>} : vector<8x16x4xbf16>, vector<4x2xbf16>, vector<8x16x2xf32> -> vector<8x16x2xf32>
    "tpu.trace_stop"() : () -> ()
    %74 = arith.addf %69, %73 : vector<8x16x2xf32>
    %c0_71 = arith.constant 0 : index
    %c0_72 = arith.constant 0 : index
    %75 = vector.load %arg6[%c0_71, %c0_72] : memref<1x2xf32, #tpu.memory_space<vmem>>, vector<1x2xf32>
    %76 = vector.shape_cast %75 : vector<1x2xf32> to vector<1x1x2xf32>
    %77 = vector.broadcast %76 : vector<1x1x2xf32> to vector<8x16x2xf32>
    %78 = arith.addf %74, %77 : vector<8x16x2xf32>
    %c0_73 = arith.constant 0 : index
    %c0_74 = arith.constant 0 : index
    %c0_75 = arith.constant 0 : index
    %c0_76 = arith.constant 0 : index
    %79 = vector.load %arg7[%c0_73, %c0_74, %c0_75, %c0_76] : memref<1x8x16x2xf32, #tpu.memory_space<vmem>>, vector<1x8x16x2xf32>
    %80 = vector.shape_cast %79 : vector<1x8x16x2xf32> to vector<8x16x2xf32>
    %81 = vector.shape_cast %78 : vector<8x16x2xf32> to vector<1x8x16x2xf32>
    tpu.vector_store %arg7[%c0_73, %c0_74, %c0_75, %c0_76], %81 {strides = array<i32>} : memref<1x8x16x2xf32, #tpu.memory_space<vmem>>, vector<1x8x16x2xf32>,
    return
  }
  func.func @transform_0(%arg0: i32, %arg1: i32) -> (i32, i32, i32, i32) {
    %c0_i32 = arith.constant 0 : i32
    %c0_i32_0 = arith.constant 0 : i32
    %c0_i32_1 = arith.constant 0 : i32
    return %arg0, %arg1, %c0_i32, %c0_i32_0 : i32, i32, i32, i32
  }
  func.func @transform_1(%arg0: i32, %arg1: i32) -> (i32, i32, i32, i32) {
    %c8_i32 = arith.constant 8 : i32
    %0 = arith.muli %arg1, %c8_i32 : i32
    %c1_i32 = arith.constant 1 : i32
    %1 = arith.subi %0, %c1_i32 : i32
    %c0_i32 = arith.constant 0 : i32
    %2 = arith.maxsi %1, %c0_i32 : i32
    %c0_i32_0 = arith.constant 0 : i32
    %c0_i32_1 = arith.constant 0 : i32
    %c0_i32_2 = arith.constant 0 : i32
    return %arg0, %2, %c0_i32_0, %c0_i32_1 : i32, i32, i32, i32
  }
  func.func @transform_2(%arg0: i32, %arg1: i32) -> (i32, i32, i32, i32) {
    %c1_i32 = arith.constant 1 : i32
    %0 = arith.addi %arg1, %c1_i32 : i32
    %c8_i32 = arith.constant 8 : i32
    %1 = arith.muli %0, %c8_i32 : i32
    %c15_i32 = arith.constant 15 : i32
    %2 = arith.minsi %1, %c15_i32 : i32
    %c0_i32 = arith.constant 0 : i32
    %c0_i32_0 = arith.constant 0 : i32
    %c0_i32_1 = arith.constant 0 : i32
    return %arg0, %2, %c0_i32, %c0_i32_0 : i32, i32, i32, i32
  }
  func.func @transform_3(%arg0: i32, %arg1: i32) -> (i32, i32, i32, i32) {
    %c0_i32 = arith.constant 0 : i32
    %c0_i32_0 = arith.constant 0 : i32
    %c0_i32_1 = arith.constant 0 : i32
    %c0_i32_2 = arith.constant 0 : i32
    %c0_i32_3 = arith.constant 0 : i32
    return %c0_i32, %c0_i32_0, %c0_i32_1, %c0_i32_2 : i32, i32, i32, i32
  }
  func.func @transform_4(%arg0: i32, %arg1: i32) -> (i32, i32) {
    %c0_i32 = arith.constant 0 : i32
    %c0_i32_0 = arith.constant 0 : i32
    %c0_i32_1 = arith.constant 0 : i32
    return %c0_i32, %c0_i32_0 : i32, i32
  }
  func.func @transform_5(%arg0: i32, %arg1: i32) -> (i32, i32, i32, i32) {
    %c0_i32 = arith.constant 0 : i32
    %c0_i32_0 = arith.constant 0 : i32
    %c0_i32_1 = arith.constant 0 : i32
    return %arg0, %arg1, %c0_i32, %c0_i32_0 : i32, i32, i32, i32
  }
}

</mosaic_0001>

<bundles_post_ra>
// kernel: _lambda_.3
= control target key start
LH: loop header
LB: loop body
LE: loop exit
PB: predicated region body
PF: predicated region fallthrough
CT: control target
= control target key end

     0   :  { %10 = vsyncpa [#allocation4], 0  ;;  %s3158_s0 = inlined_call_operand.vmem [shape: f32[2,16,18,4], index: 0, kind: input, shape index: {}, may-alias: {0,1,2}]   ;;  %s3159_s1 = inlined_call_operand.vmem [shape: f32[2,16,18,4], index: 1, kind: input, shape index: {}, may-alias: {0,1,2}]   ;;  %s3160_s2 = inlined_call_operand.vmem [shape: f32[2,16,18,4], index: 2, kind: input, shape index: {}, may-alias: {0,1,2}]   ;;  %s3161_s3 = inlined_call_operand.hbm [shape: bf16[3,3,4,64], index: 3, kind: input, shape index: {}]   ;;  %s3162_s4 = inlined_call_operand.hbm [shape: f32[1,64], index: 4, kind: input, shape index: {}]   ;;  %s3163_s5 = inlined_call_operand.vmem [shape: f32[2,16,16,64], index: 5, kind: output, shape index: {}]  }
   0x1   :  { %11 = vsyncpa [#allocation6], 0  ;;  %s2664_s18 = smov 0   ;;  %s2666_s19 = smov 0  }
   0x2   :  { %s2668_s20 = smov 0   ;;  %s2670_s21 = smov 0  }
   0x3   :  { %s2672_s22 = smov 0  }
   0x4 LB: > { %s1959_s23 = sadd.s32 4294967295, %s2628_s22   ;;  %s26_s24 = sadd.s32 1, %s2620_s20  ;;  %s2628_s22 = sphi %s2672_s22, %s17_s22   ;;  %s2624_s21 = sphi %s2670_s21, %s3176_s21   ;;  %s2620_s20 = sphi %s2668_s20, %s3175_s20   ;;  %s2616_s19 = sphi %s2666_s19, %s3174_s19   ;;  %s2612_s18 = sphi %s2664_s18, %s3173_s18  }
   0x5   : > { %p27_p0 = scmp.ge.s32.totalorder %s26_s24, 2  ;;  %s29_s25 = sadd.s32 1, %s2624_s21 }
   0x6   : > { %p1967_p1 = scmp.ge.s32.totalorder %s2628_s22, 1  ;;  %p204_p2 = scmp.lt.s32.totalorder %s2628_s22, 5 }
   0x7   : > { %s3178_s24 = smov (%p27_p0, %s26_s24), 0  ;;  %s3180_s25 = smov (!%p27_p0, %s29_s25), %s2624_s21 }
   0x8   : > { %p2697_p3 = pnand %p1967_p1, %p204_p2  ;;  %p31_p4 = scmp.ge.s32.totalorder %s3180_s25, 2 }
   0x9   : > { %p2701_p5 = scmp.eq.s32.totalorder %s1959_s23, 0  ;;  %s2630_s28 = smov [#allocation3]  }
   0xa   : > { %s3167_s26 = scalar_select %p2697_p3, 1, 0 }
   0xb   : > { %s3168_s27 = scalar_select %p2701_p5, 1, 0 }
   0xc   : > { %p2471_p6 = pneg %p2697_p3  ;;  %s3182_s25 = smov (%p31_p4, %s3180_s25), 0 }
   0xd   : > { %s216_s29 = sshll.u32 %s2630_s28, 4  ;;  %s2526_s8 = scalar_lea.hbm %s3161_s3, 288  ;;  %s217_s29 = int_to_ptr.vmem [resolvable:$true] %s216_s29 }
   0xe   : > { %p2711_p7 = pnand %p2701_p5, %p2471_p6  ;;  %p2527_p8 = scmp.ne.s32.totalorder %s3161_s3, %s2526_s8 }
   0xf   : > { %p2533_p12 = scmp.lt.u32.totalorder %s2526_s8, %s3161_s3 }
  0x10   : > { %p2528_p9 = pneg %p2711_p7 }
  0x12   : > { %p2529_p10 = pnand %p2528_p9, %p2527_p8 }
  0x14   : > { %p2530_p11 = pneg %p2529_p10 }
  0x16   : > { %p2535_p13 = pnand %p2533_p12, %p2530_p11 }
  0x18   : > { %2538 = shalt.err (!%p2535_p13)
}
  0x19   : > { %s2539_s13 = scalar_lea.vmem %s217_s29, 288  ;;  %p2547_p4 = scmp.lt.s32.totalorder %s217_s29, %s217_s29 }
  0x1a   : > { %p2540_p0 = scmp.ne.s32.totalorder %s217_s29, %s2539_s13  ;;  %p2548_p6 = scmp.lt.s32.totalorder %s2539_s13, %s2539_s13 }
  0x1c   : > { %p2542_p1 = pnand %p2540_p0, %p2528_p9  ;;  %p2549_p5 = por %p2548_p6, %p2547_p4 }
  0x1e   : > { %p2543_p2 = pneg %p2542_p1 }
  0x20   : > { %p2550_p3 = pnand %p2549_p5, %p2543_p2 }
  0x22   : > { %2553 = shalt.err (!%p2550_p3)
}
  0x23   : > { %s2631_s14 = smov 32   ;;  %s2632_s15 = smov 2  }
  0x24   : > { %2474 = dma.hbm_to_vmem [thread:$0]  (!%p2711_p7), %s3161_s3, 288, %s217_s29, [#allocation4], %s2631_s14, %s2631_s14, %s2632_s15  }
  0x25   : > { %s2633_s23 = smov [#allocation5]   ;;  %s2554_s8 = scalar_lea.hbm %s3162_s4, 16 }
  0x26   : > { %s230_s28 = sshll.u32 %s2633_s23, 4  ;;  %p2555_p3 = scmp.ne.s32.totalorder %s3162_s4, %s2554_s8  ;;  %s231_s28 = int_to_ptr.vmem [resolvable:$true] %s230_s28 }
  0x27   : > { %p2561_p10 = scmp.lt.u32.totalorder %s2554_s8, %s3162_s4 }
  0x28   : > { %p2557_p5 = pnand %p2555_p3, %p2528_p9 }
  0x2a   : > { %p2558_p8 = pneg %p2557_p5 }
  0x2c   : > { %p2563_p11 = pnand %p2561_p10, %p2558_p8 }
  0x2e   : > { %2566 = shalt.err (!%p2563_p11)
}
  0x2f   : > { %s2567_s29 = scalar_lea.vmem %s231_s28, 16  ;;  %s2574_s13 = scalar_lea.vmem %s231_s28, 32 }
  0x30   : > { %p2568_p12 = scmp.ne.s32.totalorder %s231_s28, %s2567_s29  ;;  %p2575_p1 = scmp.lt.s32.totalorder %s231_s28, %s231_s28 }
  0x31   : > { %p2576_p2 = scmp.lt.s32.totalorder %s2574_s13, %s2567_s29 }
  0x32   : > { %p2570_p13 = pnand %p2568_p12, %p2528_p9 }
  0x33   : > { %p2577_p4 = por %p2576_p2, %p2575_p1 }
  0x34   : > { %p2571_p0 = pneg %p2570_p13 }
  0x36   : > { %p2578_p6 = pnand %p2577_p4, %p2571_p0 }
  0x38   : > { %2581 = shalt.err (!%p2578_p6)
}
  0x39   : > { %2477 = dma.hbm_to_vmem [thread:$0]  (!%p2711_p7), %s3162_s4, 16, %s231_s28, [#allocation6]  }
  0x3a   : > { %p3170_p3 = scmp.ne.s32.totalorder %s3167_s26, 0 }
  0x3b   : > { %p3171_p5 = scmp.ne.s32.totalorder (!%p3170_p3), %s3168_s27, 0 }
  0x3c   : > { %297 = sbr.rel (%p3170_p3) target bundleno = 457 (0x1c9), region = 40 }
  0x43   : > { %2603 = dma.done.wait (%p3171_p5), [#allocation4], 288  }
  0x44   : > { %2605 = vsyncadd (%p3171_p5), [#allocation4], 4294967008 }
  0x45   : > { %2607 = dma.done.wait (%p3171_p5), [#allocation6], 16  }
  0x46   : > { %2609 = vsyncadd (%p3171_p5), [#allocation6], 4294967280  ;;  %s2768_s30 = sshll.u32 %s2612_s18, 3  ;;  %p366_p7 = scmp.lt.s32.totalorder %s2616_s19, 1  ;;  %vm587_vm0 = vcmask 1041408   ;;  %vm496_vm1 = vcmask 31744  }
  0x47   : > { %p368_p9 = scmp.lt.s32.totalorder %s2768_s30, 15  ;;  %s2773_s26 = sadd.s32 4294967295, %s2768_s30  ;;  %v562_v0 = vld [vmem:[#allocation3 + $0x6] sm:$0x3]  ;;  %v2788_v1 = vld [vmem:[#allocation3 + $0x8] sm:$0x3] }
  0x48   : > { %s3184_s19 = smov (!%p366_p7, %s2616_s19), 1  ;;  %p378_p8 = scmp.gt.s32.totalorder %s2773_s26, 0  ;;  %v2791_v2 = vld [vmem:[#allocation3] sm:$0x3]  ;;  %2449 = vmatprep.subr.msk.bf16.mxu1 %vm587_vm0, %v562_v0  ;;  %2453 = vmatprep.subr.msk.bf16.mxu0 %vm587_vm0, %v2788_v1  ;;  %v589_v3 = vsel %vm587_vm0, %v562_v0, 0  ;;  %v2799_v4 = vsel %vm587_vm0, %v2788_v1, 0 }
  0x49   : > { %s2779_s27 = scalar_select %p368_p9, %s2768_s30, 15  ;;  %v2801_v5 = vld [vmem:[#allocation3 + $0xe] sm:$0x3]  ;;  %2158 = vmatpush3.bf16.msra.mxu1 %v589_v3  ;;  %2230 = vmatpush3.bf16.msra.mxu0 %v2799_v4  ;;  %vm499_vm2 = vcmask 25600   ;;  %v692_v63 = vsel %vm587_vm0, %v2791_v2, 0  ;;  %vm1779_vm3 = vcmask 523264  }
  0x4a   : > { %s2782_s16 = smul.u32 48, %s3184_s19  ;;  %p1978_p10 = scmp.lt.s32.totalorder %s2773_s26, 15  ;;  %2450 = vmatprep.subr.msk.bf16.mxu1 %vm587_vm0, %v2791_v2  ;;  %2455 = vmatprep.subr.msk.bf16.mxu0 %vm587_vm0, %v2801_v5  ;;  %v1211_v2 = vsel %vm587_vm0, %v2801_v5, 0  ;;  %v1357_v5 = vld [vmem:[#allocation3 + $0x4] sm:$0x3] }
  0x4b   : > { %s2459_s17 = smul.u32 3, %s2779_s27  ;;  %p452_p11 = scmp.gt.s32.totalorder %s2612_s18, 0 }
  0x4c   : > { %s379_s23 = scalar_select %p378_p8, %s2773_s26, 0 }
  0x4d   : > { %s372_s28 = sadd.s32 %s2782_s16, %s2459_s17  ;;  %s2075_s29 = sadd.s32 8, %s2768_s30 }
  0x4e   : > { %s1975_s6 = sshll.u32 %s372_s28, 3  ;;  %s3186_s23 = smov (!%p1978_p10, %s379_s23), 15 }
  0x4f   : > { %s2807_s9 = scalar_lea.vmem %s3158_s0, %s1975_s6  ;;  %s2461_s10 = smul.u32 3, %s3186_s23 }
  0x50   : > { %v422_v6 = vld [vmem:[%s2807_s9] sm:$0xff]  ;;  %v423_v7 = vld [vmem:[%s2807_s9 + $0x8] sm:$0xff]  ;;  %v424_v8 = vld [vmem:[%s2807_s9 + $0x10] sm:$0x3]  ;;  %s2871_s13 = scalar_select %p452_p11, 1, 0 }
  0x51   : > { %v466_v9 = vmax.f32 %v422_v6, 0.0  ;;  %v467_v10 = vmax.f32 %v423_v7, 0.0  ;;  %v468_v11 = vmax.f32 %v424_v8, 0.0  ;;  %v425_v12 = vld [vmem:[%s2807_s9 + $0x18] sm:$0xff]  ;;  %v426_v13 = vld [vmem:[%s2807_s9 + $0x20] sm:$0xff]  ;;  %v428_v14 = vld [vmem:[%s2807_s9 + $0x30] sm:$0xff]  ;;  %s2854_s11 = sadd.s32 %s2461_s10, %s2782_s16 }
  0x52   : > { %v469_v15 = vmax.f32 %v425_v12, 0.0  ;;  %v470_v16 = vmax.f32 %v426_v13, 0.0  ;;  %v427_v17 = vld [vmem:[%s2807_s9 + $0x28] sm:$0x3]  ;;  %v429_v18 = vld [vmem:[%s2807_s9 + $0x38] sm:$0xff]  ;;  %v472_v19 = vmax.f32 %v428_v14, 0.0  ;;  %s454_s23 = scvt.s32.f32 %s2871_s13 }
  0x53   : > { %502 = vst.msk [vmem:[#allocation2 + $0x18] sm:$0xff] %vm496_vm1, %v466_v9  ;;  %503 = vst.msk [vmem:[#allocation2 + $0x20] sm:$0xff] %vm496_vm1, %v467_v10  ;;  %v471_v20 = vmax.f32 %v427_v17, 0.0  ;;  %v473_v21 = vmax.f32 %v429_v18, 0.0  ;;  %v430_v22 = vld [vmem:[%s2807_s9 + $0x40] sm:$0x3] }
  0x54   : > { %504 = vst.msk [vmem:[#allocation2 + $0x28] sm:$0x3] %vm499_vm2, %v468_v11  ;;  %v431_v23 = vld [vmem:[%s2807_s9 + $0x48] sm:$0xff]  ;;  %v432_v24 = vld [vmem:[%s2807_s9 + $0x50] sm:$0xff]  ;;  %v474_v25 = vmax.f32 %v430_v22, 0.0  ;;  %v434_v29 = vld [vmem:[%s2807_s9 + $0x60] sm:$0xff] }
  0x55   : > { %505 = vst.msk [vmem:[#allocation2 + $0x30] sm:$0xff] %vm496_vm1, %v469_v15  ;;  %506 = vst.msk [vmem:[#allocation2 + $0x38] sm:$0xff] %vm496_vm1, %v470_v16  ;;  %v475_v26 = vmax.f32 %v431_v23, 0.0  ;;  %v476_v27 = vmax.f32 %v432_v24, 0.0  ;;  %v433_v28 = vld [vmem:[%s2807_s9 + $0x58] sm:$0x3] }
  0x56   : > { %508 = vst.msk [vmem:[#allocation2 + $0x48] sm:$0xff] %vm496_vm1, %v472_v19  ;;  %509 = vst.msk [vmem:[#allocation2 + $0x50] sm:$0xff] %vm496_vm1, %v473_v21  ;;  %v477_v30 = vmax.f32 %v433_v28, 0.0  ;;  %v435_v31 = vld [vmem:[%s2807_s9 + $0x68] sm:$0xff]  ;;  %v478_v32 = vmax.f32 %v434_v29, 0.0  ;;  %v437_v33 = vld [vmem:[%s2807_s9 + $0x78] sm:$0xff] }
  0x57   : > { %507 = vst.msk [vmem:[#allocation2 + $0x40] sm:$0x3] %vm499_vm2, %v471_v20  ;;  %v438_v34 = vld [vmem:[%s2807_s9 + $0x80] sm:$0xff]  ;;  %510 = vst.msk [vmem:[#allocation2 + $0x58] sm:$0x3] %vm499_vm2, %v474_v25  ;;  %v479_v35 = vmax.f32 %v435_v31, 0.0  ;;  %v455_v20 = vstv %s454_s23 }
  0x58   : > { %511 = vst.msk [vmem:[#allocation2 + $0x60] sm:$0xff] %vm496_vm1, %v475_v26  ;;  %512 = vst.msk [vmem:[#allocation2 + $0x68] sm:$0xff] %vm496_vm1, %v476_v27  ;;  %v481_v36 = vmax.f32 %v437_v33, 0.0  ;;  %v482_v37 = vmax.f32 %v438_v34, 0.0  ;;  %v440_v38 = vld [vmem:[%s2807_s9 + $0x90] sm:$0xff]  ;;  %v441_v39 = vld [vmem:[%s2807_s9 + $0x98] sm:$0xff] }
  0x59   : > { %v443_v40 = vld [vmem:[%s2807_s9 + $0xa8] sm:$0xff]  ;;  %513 = vst.msk [vmem:[#allocation2 + $0x70] sm:$0x3] %vm499_vm2, %v477_v30  ;;  %v484_v41 = vmax.f32 %v440_v38, 0.0  ;;  %v485_v42 = vmax.f32 %v441_v39, 0.0  ;;  %v444_v43 = vld [vmem:[%s2807_s9 + $0xb0] sm:$0xff] }
  0x5a   : > { %514 = vst.msk [vmem:[#allocation2 + $0x78] sm:$0xff] %vm496_vm1, %v478_v32  ;;  %v487_v44 = vmax.f32 %v443_v40, 0.0  ;;  %v436_v45 = vld [vmem:[%s2807_s9 + $0x70] sm:$0x3]  ;;  %515 = vst.msk [vmem:[#allocation2 + $0x80] sm:$0xff] %vm496_vm1, %v479_v35  ;;  %v488_v46 = vmax.f32 %v444_v43, 0.0 }
  0x5b   : > { %517 = vst.msk [vmem:[#allocation2 + $0x90] sm:$0xff] %vm496_vm1, %v481_v36  ;;  %518 = vst.msk [vmem:[#allocation2 + $0x98] sm:$0xff] %vm496_vm1, %v482_v37  ;;  %v480_v47 = vmax.f32 %v436_v45, 0.0  ;;  %s1983_s12 = sshll.u32 %s2854_s11, 3  ;;  %v439_v48 = vld [vmem:[%s2807_s9 + $0x88] sm:$0x3] }
  0x5c   : > { %520 = vst.msk [vmem:[#allocation2 + $0xa8] sm:$0xff] %vm496_vm1, %v484_v41  ;;  %521 = vst.msk [vmem:[#allocation2 + $0xb0] sm:$0xff] %vm496_vm1, %v485_v42  ;;  %v483_v49 = vmax.f32 %v439_v48, 0.0  ;;  %v442_v50 = vld [vmem:[%s2807_s9 + $0xa0] sm:$0x3]  ;;  %v532_v52 = vld [vmem:[#allocation2 + $0x18] sm:$0xff]  ;;  %s2894_s17 = scalar_lea.vmem %s3159_s1, %s1983_s12 }
  0x5d   : > { %523 = vst.msk [vmem:[#allocation2 + $0xc0] sm:$0xff] %vm496_vm1, %v487_v44  ;;  %v445_v51 = vld [vmem:[%s2807_s9 + $0xb8] sm:$0x3]  ;;  %v533_v53 = vld [vmem:[#allocation2 + $0x20] sm:$0xff]  ;;  %524 = vst.msk [vmem:[#allocation2 + $0xc8] sm:$0xff] %vm496_vm1, %v488_v46  ;;  %v486_v55 = vmax.f32 %v442_v50, 0.0 }
  0x5e   : > { %v914_v54 = vld [vmem:[#allocation2 + $0x19] sm:$0xff]  ;;  %516 = vst.msk [vmem:[#allocation2 + $0x88] sm:$0x3] %vm499_vm2, %v480_v47  ;;  %v2873_v56 = vpack.c.bf16 %v533_v53, %v532_v52  ;;  %v915_v57 = vld [vmem:[#allocation2 + $0x21] sm:$0xff]  ;;  %v534_v58 = vld [vmem:[#allocation2 + $0x30] sm:$0xff]  ;;  %v489_v60 = vmax.f32 %v445_v51, 0.0 }
  0x5f   : > { %v535_v59 = vld [vmem:[#allocation2 + $0x38] sm:$0xff]  ;;  %519 = vst.msk [vmem:[#allocation2 + $0xa0] sm:$0x3] %vm499_vm2, %v483_v49  ;;  %p2878_p12 = scmp.lt.s32.totalorder %s2075_s29, 15  ;;  %p459_p13 = scmp.lt.s32.totalorder %s2612_s18, 1  ;;  %v2883_v61 = vpack.c.bf16 %v915_v57, %v914_v54  ;;  %v536_v6 = vld [vmem:[#allocation2 + $0x48] sm:$0xff] }
  0x60   : > { %v2885_v62 = vpack.c.bf16 %v535_v59, %v534_v58  ;;  %v916_v0 = vld [vmem:[#allocation2 + $0x31] sm:$0xff]  ;;  %v917_v3 = vld [vmem:[#allocation2 + $0x39] sm:$0xff]  ;;  %522 = vst.msk [vmem:[#allocation2 + $0xb8] sm:$0x3] %vm499_vm2, %v486_v55  ;;  %2159 = vmatprep.mubr.msk.bf16.mxu1 %vm496_vm1, %v2873_v56  ;;  %v918_v9 = vld [vmem:[#allocation2 + $0x49] sm:$0xff]  ;;  %v1383_v49 = vsel %vm587_vm0, %v1357_v5, 0 }
  0x61   : > { %v2900_v7 = vpack.c.bf16 %v917_v3, %v916_v0  ;;  %v537_v8 = vld [vmem:[#allocation2 + $0x50] sm:$0xff]  ;;  %525 = vst.msk [vmem:[#allocation2 + $0xd0] sm:$0x3] %vm499_vm2, %v489_v60  ;;  %s3188_s29 = smov (!%p2878_p12, %s2075_s29), 15  ;;  %2231 = vmatprep.mubr.msk.bf16.mxu0 %vm496_vm1, %v2883_v61  ;;  %v2917_v13 = vld [vmem:[#allocation3 + $0xc] sm:$0x3] }
  0x62   : > { %v919_v10 = vld [vmem:[#allocation2 + $0x51] sm:$0xff]  ;;  %2160 = vmatmul.mubr.msk.bf16.vlgmr.msra.gmra.mrb[0].mxu1 %vm496_vm1, %v2885_v62  ;;  %v2913_v11 = vpack.c.bf16 %v537_v8, %v536_v6  ;;  %s460_s28 = scalar_select %p459_p13, 1, 0  ;;  %v538_v14 = vld [vmem:[#allocation2 + $0x60] sm:$0xff]  ;;  %v539_v15 = vld [vmem:[#allocation2 + $0x68] sm:$0xff] }
  0x63   : > { %v2915_v12 = vpack.c.bf16 %v919_v10, %v918_v9  ;;  %2176 = vmatpush3.bf16.msra.mxu1 %v692_v63  ;;  %2232 = vmatmul.mubr.msk.bf16.vlgmr.msra.gmra.mrb[0].mxu0 %vm496_vm1, %v2900_v7  ;;  %v920_v16 = vld [vmem:[#allocation2 + $0x61] sm:$0xff]  ;;  %s3190_s29 = smov (!%p2878_p12, %s3188_s29), 15  ;;  %v921_v17 = vld [vmem:[#allocation2 + $0x69] sm:$0xff]  ;;  %v540_v18 = vld [vmem:[#allocation2 + $0x78] sm:$0xff]  ;;  %v2930_v21 = vpack.c.bf16 %v539_v15, %v538_v14  ;;  %s1991_s11 = sshll.u32 %s3184_s19, 5 }
  0x64   : > { %2248 = vmatpush3.bf16.msra.mxu0 %v1211_v2  ;;  %2163 = vmatprep.mubr.msk.bf16.mxu1 %vm496_vm1, %v2913_v11  ;;  %v541_v19 = vld [vmem:[#allocation2 + $0x80] sm:$0xff]  ;;  %s461_s18 = scvt.s32.f32 %s460_s28  ;;  %s2462_s30 = smul.u32 3, %s3190_s29  ;;  %v2935_v23 = vpack.c.bf16 %v921_v17, %v920_v16  ;;  %v447_v25 = vld [vmem:[%s2894_s17 + $0x8] sm:$0xff]  ;;  %v448_v30 = vld [vmem:[%s2894_s17 + $0x10] sm:$0x3] }
  0x65   : > { %2235 = vmatprep.mubr.msk.bf16.mxu0 %vm496_vm1, %v2915_v12  ;;  %2456 = vmatprep.subr.msk.bf16.mxu0 %vm587_vm0, %v1357_v5  ;;  %v446_v22 = vld [vmem:[%s2894_s17] sm:$0xff]  ;;  %v2937_v24 = vpack.c.bf16 %v541_v19, %v540_v18  ;;  %v457_v27 = vmul.f32 %v455_v20, %v447_v25  ;;  %v458_v35 = vmul.f32 %v455_v20, %v448_v30  ;;  %v542_v36 = vld [vmem:[#allocation2 + $0x90] sm:$0xff]  ;;  %v543_v37 = vld [vmem:[#allocation2 + $0x98] sm:$0xff]  ;;  %v797_v5 = vsel %vm587_vm0, %v2917_v13, 0 }
  0x66   : > { %2451 = vmatprep.subr.msk.bf16.mxu1 %vm587_vm0, %v2917_v13  ;;  %v456_v26 = vmul.f32 %v455_v20, %v446_v22  ;;  %s403_s6 = sadd.s32 %s2462_s30, %s2782_s16  ;;  %v462_v28 = vstv %s461_s18  ;;  %v544_v41 = vld [vmem:[#allocation2 + $0xa8] sm:$0xff]  ;;  %v545_v42 = vld [vmem:[#allocation2 + $0xb0] sm:$0xff]  ;;  %v2955_v47 = vpack.c.bf16 %v543_v37, %v542_v36  ;;  %v1499_v50 = vld [vmem:[#allocation3 + $0xa] sm:$0x3]  ;;  %s1990_s16 = sshll.u32 %s2779_s27, 1 }
  0x67   : > { %s1988_s7 = sshll.u32 %s403_s6, 3  ;;  %v491_v31 = vmax.f32 %v457_v27, 0.0  ;;  %v492_v43 = vmax.f32 %v458_v35, 0.0  ;;  %v2958_v48 = vpack.c.bf16 %v545_v42, %v544_v41  ;;  %v546_v51 = vld [vmem:[#allocation2 + $0xc0] sm:$0xff]  ;;  %v547_v52 = vld [vmem:[#allocation2 + $0xc8] sm:$0xff]  ;;  %v924_v58 = vld [vmem:[#allocation2 + $0x91] sm:$0xff]  ;;  %s417_s12 = sadd.s32 %s1991_s11, %s1990_s16 }
  0x68   : > { %v490_v29 = vmax.f32 %v456_v26, 0.0  ;;  %s405_s10 = scalar_lea.vmem %s3160_s2, %s1988_s7  ;;  %v922_v53 = vld [vmem:[#allocation2 + $0x79] sm:$0xff]  ;;  %v923_v54 = vld [vmem:[#allocation2 + $0x81] sm:$0xff]  ;;  %v2973_v60 = vpack.c.bf16 %v547_v52, %v546_v51  ;;  %v926_v6 = vld [vmem:[#allocation2 + $0xa9] sm:$0xff]  ;;  %s1992_s29 = sshll.u32 %s417_s12, 3 }
  0x69   : > { %v449_v32 = vld [vmem:[%s405_s10] sm:$0xff]  ;;  %v450_v33 = vld [vmem:[%s405_s10 + $0x8] sm:$0xff]  ;;  %v451_v34 = vld [vmem:[%s405_s10 + $0x10] sm:$0x3]  ;;  %498 = vst.msk [vmem:[#allocation2 + $0x8] sm:$0xff] %vm496_vm1, %v491_v31  ;;  %v2975_v63 = vpack.c.bf16 %v923_v54, %v922_v53  ;;  %s3094_s15 = scalar_lea.vmem %s3163_s5, %s1992_s29 }
  0x6a   : > { %2164 = vmatmul.mubr.msk.bf16.gmra.mrb[4].mxu1 %vm496_vm1, %v2930_v21  ;;  %497 = vst.msk [vmem:[#allocation2] sm:$0xff] %vm496_vm1, %v490_v29  ;;  %v463_v38 = vmul.f32 %v462_v28, %v449_v32  ;;  %v464_v39 = vmul.f32 %v462_v28, %v450_v33  ;;  %v465_v40 = vmul.f32 %v462_v28, %v451_v34  ;;  %v925_v59 = vld [vmem:[#allocation2 + $0x99] sm:$0xff]  ;;  %v927_v2 = vld [vmem:[#allocation2 + $0xb1] sm:$0xff]  ;;  %v928_v8 = vld [vmem:[#allocation2 + $0xc1] sm:$0xff]  ;;  %v1504_v29 = vsel %vm587_vm0, %v1499_v50, 0 }
  0x6b   : > { %2236 = vmatmul.mubr.msk.bf16.gmra.mrb[4].mxu0 %vm496_vm1, %v2935_v23  ;;  %2167 = vmatprep.mubr.msk.bf16.mxu1 %vm496_vm1, %v2937_v24  ;;  %500 = vst.msk [vmem:[#allocation2 + $0x10] sm:$0x3] %vm499_vm2, %v492_v43  ;;  %v2977_v3 = vpack.c.bf16 %v925_v59, %v924_v58  ;;  %v929_v9 = vld [vmem:[#allocation2 + $0xc9] sm:$0xff]  ;;  %v2986_v10 = vpack.c.bf16 %v927_v2, %v926_v6  ;;  %v943_v15 = vld [vmem:[#allocation3 + $0x2] sm:$0x3]  ;;  %v1331_v26 = vld [vmem:[#allocation2 + $0x3a] sm:$0xff] }
  0x6c   : > { %2249 = vmatprep.mubr.msk.bf16.mxu0 %vm496_vm1, %v2900_v7  ;;  %v493_v44 = vmax.f32 %v463_v38, 0.0  ;;  %v494_v45 = vmax.f32 %v464_v39, 0.0  ;;  %v495_v46 = vmax.f32 %v465_v40, 0.0  ;;  %v2990_v14 = vpack.c.bf16 %v929_v9, %v928_v8  ;;  %v1329_v22 = vld [vmem:[#allocation2 + $0x22] sm:$0xff]  ;;  %v1330_v25 = vld [vmem:[#allocation2 + $0x32] sm:$0xff]  ;;  %v1332_v31 = vld [vmem:[#allocation2 + $0x4a] sm:$0xff] }
  0x6d   : > { %v3007_v28 = vpack.c.bf16 %v1331_v26, %v1330_v25  ;;  %v1620_v30 = vld [vmem:[#allocation3 + $0x10] sm:$0x3]  ;;  %v1333_v32 = vld [vmem:[#allocation2 + $0x52] sm:$0xff]  ;;  %v1334_v33 = vld [vmem:[#allocation2 + $0x62] sm:$0xff]  ;;  %v969_v42 = vsel %vm587_vm0, %v943_v15, 0 }
  0x6e   : > { %527 = vst.msk [vmem:[#allocation2 + $0xd8] sm:$0xff] %vm496_vm1, %v493_v44  ;;  %528 = vst.msk [vmem:[#allocation2 + $0xe0] sm:$0xff] %vm496_vm1, %v494_v45  ;;  %v1335_v34 = vld [vmem:[#allocation2 + $0x6a] sm:$0xff]  ;;  %v1349_v35 = vpack.c.bf16 %v1333_v32, %v1332_v31  ;;  %v1336_v37 = vld [vmem:[#allocation2 + $0x7a] sm:$0xff] }
  0x6f   : > { %529 = vst.msk [vmem:[#allocation2 + $0xe8] sm:$0x3] %vm499_vm2, %v495_v46  ;;  %v1350_v36 = vpack.c.bf16 %v1335_v34, %v1334_v33  ;;  %v1337_v38 = vld [vmem:[#allocation2 + $0x82] sm:$0xff]  ;;  %v1338_v39 = vld [vmem:[#allocation2 + $0x92] sm:$0xff]  ;;  %v1339_v40 = vld [vmem:[#allocation2 + $0x9a] sm:$0xff] }
  0x70   : > { %v531_v57 = vld [vmem:[#allocation2 + $0x8] sm:$0xff]  ;;  %v1351_v41 = vpack.c.bf16 %v1337_v38, %v1336_v37  ;;  %v1352_v43 = vpack.c.bf16 %v1339_v40, %v1338_v39  ;;  %v1341_v44 = vld [vmem:[#allocation2 + $0xb2] sm:$0xff] }
  0x71   : > { %v530_v55 = vld [vmem:[#allocation2] sm:$0xff] }
  0x72   : > { %2168 = vmatmul.mubr.msk.bf16.gmra.mrb[8].mxu1 %vm496_vm1, %v2955_v47  ;;  %v550_v0 = vpack.c.bf16 %v531_v57, %v530_v55  ;;  %v1326_v18 = vld [vmem:[#allocation2 + $0x2] sm:$0xff]  ;;  %v1327_v13 = vld [vmem:[#allocation2 + $0xa] sm:$0xff] }
  0x73   : > { %2250 = vmatmul.mubr.msk.bf16.vlgmr.msra.gmra.mrb[0].mxu0 %vm496_vm1, %v2915_v12  ;;  %2171 = vmatprep.mubr.msk.bf16.mxu1 %vm496_vm1, %v2958_v48  ;;  %v1346_v20 = vpack.c.bf16 %v1327_v13, %v1326_v18  ;;  %v913_v46 = vld [vmem:[#allocation2 + $0x9] sm:$0xff] }
  0x74   : > { %2266 = vmatpush3.bf16.msra.mxu0 %v1383_v49  ;;  %2253 = vmatprep.mubr.msk.bf16.mxu0 %vm496_vm1, %v2935_v23 }
  0x75   : > { %2457 = vmatprep.subr.msk.bf16.mxu0 %vm587_vm0, %v1499_v50  ;;  %v930_v16 = vld [vmem:[#allocation2 + $0xd9] sm:$0xff]  ;;  %v1343_v50 = vld [vmem:[#allocation2 + $0xca] sm:$0xff] }
  0x76   : > { %v931_v17 = vld [vmem:[#allocation2 + $0xe1] sm:$0xff] }
  0x77   : > { %v941_v19 = vpack.c.bf16 %v931_v17, %v930_v16 }
  0x7a   : > { %2172 = vmatmul.mubr.msk.bf16.gmra.mrb[12].mxu1 %vm496_vm1, %v2973_v60 }
  0x7b   : > { %2254 = vmatmul.mubr.msk.bf16.gmra.mrb[4].mxu0 %vm496_vm1, %v2975_v63  ;;  %2177 = vmatprep.mubr.msk.bf16.mxu1 %vm496_vm1, %v550_v0 }
  0x7c   : > { %2257 = vmatprep.mubr.msk.bf16.mxu0 %vm496_vm1, %v2977_v3 }
  0x82   : > { %2178 = vmatmul.mubr.msk.bf16.vlgmr.msra.gmra.mrb[0].mxu1 %vm496_vm1, %v2873_v56  ;;  %v1328_v56 = vld [vmem:[#allocation2 + $0x1a] sm:$0xff] }
  0x83   : > { %2194 = vmatpush3.bf16.msra.mxu1 %v797_v5  ;;  %2258 = vmatmul.mubr.msk.bf16.gmra.mrb[8].mxu0 %vm496_vm1, %v2986_v10  ;;  %v1347_v27 = vpack.c.bf16 %v1329_v22, %v1328_v56 }
  0x84   : > { %2181 = vmatprep.mubr.msk.bf16.mxu1 %vm496_vm1, %v2885_v62  ;;  %2261 = vmatprep.mubr.msk.bf16.mxu0 %vm496_vm1, %v2990_v14 }
  0x85   : > { %2452 = vmatprep.subr.msk.bf16.mxu1 %vm587_vm0, %v943_v15 }
  0x8a   : > { %2182 = vmatmul.mubr.msk.bf16.gmra.mrb[4].mxu1 %vm496_vm1, %v2913_v11 }
  0x8b   : > { %2262 = vmatmul.mubr.msk.bf16.gmra.mrb[12].mxu0 %vm496_vm1, %v941_v19  ;;  %2185 = vmatprep.mubr.msk.bf16.mxu1 %vm496_vm1, %v2930_v21 }
  0x8c   : > { %2267 = vmatprep.mubr.msk.bf16.mxu0 %vm496_vm1, %v1346_v20 }
  0x92   : > { %2186 = vmatmul.mubr.msk.bf16.gmra.mrb[8].mxu1 %vm496_vm1, %v2937_v24 }
  0x93   : > { %2268 = vmatmul.mubr.msk.bf16.vlgmr.msra.gmra.mrb[0].mxu0 %vm496_vm1, %v1347_v27  ;;  %2189 = vmatprep.mubr.msk.bf16.mxu1 %vm496_vm1, %v2955_v47 }
  0x94   : > { %2284 = vmatpush3.bf16.msra.mxu0 %v1504_v29  ;;  %2271 = vmatprep.mubr.msk.bf16.mxu0 %vm496_vm1, %v3007_v28 }
  0x95   : > { %2458 = vmatprep.subr.msk.bf16.mxu0 %vm587_vm0, %v1620_v30 }
  0x9a   : > { %2190 = vmatmul.mubr.msk.bf16.gmra.mrb[12].mxu1 %vm496_vm1, %v2958_v48 }
  0x9b   : > { %2272 = vmatmul.mubr.msk.bf16.gmra.mrb[4].mxu0 %vm496_vm1, %v1349_v35  ;;  %2195 = vmatprep.mubr.msk.bf16.mxu1 %vm496_vm1, %v2885_v62  ;;  %v1340_v62 = vld [vmem:[#allocation2 + $0xaa] sm:$0xff] }
  0x9c   : > { %2275 = vmatprep.mubr.msk.bf16.mxu0 %vm496_vm1, %v1350_v36  ;;  %v1353_v45 = vpack.c.bf16 %v1341_v44, %v1340_v62 }
  0xa2   : > { %2196 = vmatmul.mubr.msk.bf16.vlgmr.msra.gmra.mrb[0].mxu1 %vm496_vm1, %v2913_v11  ;;  %v1625_v11 = vsel %vm587_vm0, %v1620_v30, 0 }
  0xa3   : > { %2212 = vmatpush3.bf16.msra.mxu1 %v969_v42  ;;  %2276 = vmatmul.mubr.msk.bf16.gmra.mrb[8].mxu0 %vm496_vm1, %v1351_v41 }
  0xa4   : > { %2199 = vmatprep.mubr.msk.bf16.mxu1 %vm496_vm1, %v2930_v21  ;;  %2279 = vmatprep.mubr.msk.bf16.mxu0 %vm496_vm1, %v1352_v43  ;;  %v549_v21 = vld [vmem:[#allocation2 + $0xe0] sm:$0xff] }
  0xa5   : > { %2454 = vmatprep.subr.msk.bf16.mxu1 %vm587_vm0, %v2788_v1  ;;  %v548_v1 = vld [vmem:[#allocation2 + $0xd8] sm:$0xff] }
  0xaa   : > { %2200 = vmatmul.mubr.msk.bf16.gmra.mrb[4].mxu1 %vm496_vm1, %v2937_v24  ;;  %v912_v24 = vld [vmem:[#allocation2 + $0x1] sm:$0xff] }
  0xab   : > { %2280 = vmatmul.mubr.msk.bf16.gmra.mrb[12].mxu0 %vm496_vm1, %v1353_v45  ;;  %2203 = vmatprep.mubr.msk.bf16.mxu1 %vm496_vm1, %v2955_v47  ;;  %v559_v47 = vpack.c.bf16 %v549_v21, %v548_v1  ;;  %v932_v49 = vpack.c.bf16 %v913_v46, %v912_v24 }
  0xac   : > { %2285 = vmatprep.mubr.msk.bf16.mxu0 %vm496_vm1, %v1347_v27 }
  0xb2   : > { %2204 = vmatmul.mubr.msk.bf16.gmra.mrb[8].mxu1 %vm496_vm1, %v2958_v48  ;;  %v1342_v48 = vld [vmem:[#allocation2 + $0xc2] sm:$0xff] }
  0xb3   : > { %2286 = vmatmul.mubr.msk.bf16.vlgmr.msra.gmra.mrb[0].mxu0 %vm496_vm1, %v3007_v28  ;;  %2207 = vmatprep.mubr.msk.bf16.mxu1 %vm496_vm1, %v2973_v60  ;;  %v1354_v51 = vpack.c.bf16 %v1343_v50, %v1342_v48  ;;  %v3088_v60 = vld [vmem:[#allocation5] ss:$0 sm:$0xff] }
  0xb4   : > { %2302 = vmatpush3.bf16.msra.mxu0 %v1625_v11  ;;  %2289 = vmatprep.mubr.msk.bf16.mxu0 %vm496_vm1, %v1349_v35 }
  0xba   : > { %2208 = vmatmul.mubr.msk.bf16.gmra.mrb[12].mxu1 %vm496_vm1, %v559_v47 }
  0xbb   : > { %2290 = vmatmul.mubr.msk.bf16.gmra.mrb[4].mxu0 %vm496_vm1, %v1350_v36  ;;  %2213 = vmatprep.mubr.msk.bf16.mxu1 %vm496_vm1, %v932_v49 }
  0xbc   : > { %2293 = vmatprep.mubr.msk.bf16.mxu0 %vm496_vm1, %v1351_v41 }
  0xc2   : > { %2214 = vmatmul.mubr.msk.bf16.vlgmr.msra.gmra.mrb[0].mxu1 %vm496_vm1, %v2883_v61  ;;  %v1345_v61 = vld [vmem:[#allocation2 + $0xe2] sm:$0xff] }
  0xc3   : > { %2320 = vmatpush3.bf16.msra.mxu1 %v2799_v4  ;;  %2294 = vmatmul.mubr.msk.bf16.gmra.mrb[8].mxu0 %vm496_vm1, %v1352_v43  ;;  %v1344_v4 = vld [vmem:[#allocation2 + $0xda] sm:$0xff] }
  0xc4   : > { %2217 = vmatprep.mubr.msk.bf16.mxu1 %vm496_vm1, %v2900_v7  ;;  %2297 = vmatprep.mubr.msk.bf16.mxu0 %vm496_vm1, %v1353_v45  ;;  %v1355_v7 = vpack.c.bf16 %v1345_v61, %v1344_v4 }
  0xca   : > { %2218 = vmatmul.mubr.msk.bf16.gmra.mrb[4].mxu1 %vm496_vm1, %v2915_v12 }
  0xcb   : > { %2298 = vmatmul.mubr.msk.bf16.gmra.mrb[12].mxu0 %vm496_vm1, %v1354_v51  ;;  %2221 = vmatprep.mubr.msk.bf16.mxu1 %vm496_vm1, %v2935_v23 }
  0xcc   : > { %2303 = vmatprep.mubr.msk.bf16.mxu0 %vm496_vm1, %v3007_v28 }
  0xd2   : > { %2222 = vmatmul.mubr.msk.bf16.gmra.mrb[8].mxu1 %vm496_vm1, %v2975_v63 }
  0xd3   : > { %2304 = vmatmul.mubr.msk.bf16.vlgmr.msra.gmra.mrb[0].mxu0 %vm496_vm1, %v1349_v35  ;;  %2225 = vmatprep.mubr.msk.bf16.mxu1 %vm496_vm1, %v2977_v3 }
  0xd4   : > { %2307 = vmatprep.mubr.msk.bf16.mxu0 %vm496_vm1, %v1350_v36 }
  0xda   : > { %2226 = vmatmul.mubr.msk.bf16.gmra.mrb[12].mxu1 %vm496_vm1, %v2986_v10 }
  0xdb   : > { %2308 = vmatmul.mubr.msk.bf16.gmra.mrb[4].mxu0 %vm496_vm1, %v1351_v41  ;;  %2239 = vmatprep.mubr.msk.bf16.mxu1 %vm496_vm1, %v2975_v63 }
  0xdc   : > { %2311 = vmatprep.mubr.msk.bf16.mxu0 %vm496_vm1, %v1352_v43 }
  0xe2   : > { %2240 = vmatmul.mubr.msk.bf16.vlgmr.msra.gmra.mrb[8].mxu1 %vm496_vm1, %v2977_v3 }
  0xe3   : > { %2312 = vmatmul.mubr.msk.bf16.gmra.mrb[8].mxu0 %vm496_vm1, %v1353_v45  ;;  %2243 = vmatprep.mubr.msk.bf16.mxu1 %vm496_vm1, %v2986_v10 }
  0xe4   : > { %2315 = vmatprep.mubr.msk.bf16.mxu0 %vm496_vm1, %v1354_v51 }
  0xea   : > { %2244 = vmatmul.mubr.msk.bf16.gmra.mrb[12].mxu1 %vm496_vm1, %v2990_v14 }
  0xeb   : > { %2316 = vmatmul.mubr.msk.bf16.gmra.mrb[12].mxu0 %vm496_vm1, %v1355_v7 }
 0x195   : > { %v2215_v12 = vpop.f32.mrb[0].mxu1 }
 0x196   : > { %v1005_v23 = vpop.f32.mrb[1].mxu1 }
 0x197   : > { %v2216_v52 = vpop.f32.mrb[2].mxu1 }
 0x198   : > { %v1008_v53 = vpop.f32.mrb[3].mxu1 }
 0x19d   : > { %v2219_v54 = vpop.f32.mrb[4].mxu1 }
 0x19e   : > { %v1021_v55 = vpop.f32.mrb[5].mxu1 }
 0x19f   : > { %v2220_v57 = vpop.f32.mrb[6].mxu1 }
 0x1a0   : > { %v1024_v58 = vpop.f32.mrb[7].mxu1 }
 0x1a6   : > { %v2305_v59 = vpop.f32.mrb[0].mxu0 }
 0x1a7   : > { %v2321_v63 = vadd.f32 %v2305_v59, %v2215_v12  ;;  %v1661_v0 = vpop.f32.mrb[1].mxu0 }
 0x1a8   : > { %v2322_v3 = vadd.f32 %v1661_v0, %v1005_v23  ;;  %v2306_v6 = vpop.f32.mrb[2].mxu0 }
 0x1a9   : > { %v1749_v2 = vadd.f32 %v2321_v63, %v3088_v60  ;;  %v2323_v8 = vadd.f32 %v2306_v6, %v2216_v52  ;;  %v1664_v9 = vpop.f32.mrb[3].mxu0 }
 0x1aa   : > { %v1747_v10 = vadd.f32 %v2322_v3, %v3088_v60  ;;  %v2324_v5 = vadd.f32 %v1664_v9, %v1008_v53 }
 0x1ab   : > { %v1765_v14 = vmax.f32 %v1749_v2, 0.0  ;;  %v1750_v15 = vadd.f32 %v2323_v8, %v3088_v60 }
 0x1ac   : > { %v1763_v16 = vmax.f32 %v1747_v10, 0.0  ;;  %v1748_v17 = vadd.f32 %v2324_v5, %v3088_v60 }
 0x1ad   : > { %1782 = vst.msk [vmem:[%s3094_s15 + $0x10] sm:$0xff] %vm1779_vm3, %v1765_v14  ;;  %v1766_v18 = vmax.f32 %v1750_v15, 0.0 }
 0x1ae   : > { %1780 = vst.msk [vmem:[%s3094_s15] sm:$0xff] %vm1779_vm3, %v1763_v16  ;;  %v1764_v13 = vmax.f32 %v1748_v17, 0.0  ;;  %v2309_v19 = vpop.f32.mrb[4].mxu0 }
 0x1af   : > { %1783 = vst.msk [vmem:[%s3094_s15 + $0x18] sm:$0xff] %vm1779_vm3, %v1766_v18  ;;  %v2325_v20 = vadd.f32 %v2309_v19, %v2219_v54  ;;  %v1677_v56 = vpop.f32.mrb[5].mxu0 }
 0x1b0   : > { %1781 = vst.msk [vmem:[%s3094_s15 + $0x8] sm:$0xff] %vm1779_vm3, %v1764_v13  ;;  %v2326_v22 = vadd.f32 %v1677_v56, %v1021_v55  ;;  %v2310_v25 = vpop.f32.mrb[6].mxu0 }
 0x1b1   : > { %v1753_v26 = vadd.f32 %v2325_v20, %v3088_v60  ;;  %v2327_v27 = vadd.f32 %v2310_v25, %v2220_v57  ;;  %v1680_v28 = vpop.f32.mrb[7].mxu0 }
 0x1b2   : > { %v1751_v29 = vadd.f32 %v2326_v22, %v3088_v60  ;;  %v2328_v30 = vadd.f32 %v1680_v28, %v1024_v58 }
 0x1b3   : > { %v1769_v31 = vmax.f32 %v1753_v26, 0.0  ;;  %v1754_v32 = vadd.f32 %v2327_v27, %v3088_v60 }
 0x1b4   : > { %v1767_v33 = vmax.f32 %v1751_v29, 0.0  ;;  %v1752_v34 = vadd.f32 %v2328_v30, %v3088_v60 }
 0x1b5   : > { %1786 = vst.msk [vmem:[%s3094_s15 + $0x30] sm:$0xff] %vm1779_vm3, %v1769_v31  ;;  %v1770_v35 = vmax.f32 %v1754_v32, 0.0  ;;  %v2241_v36 = vpop.f32.mrb[8].mxu1 }
 0x1b6   : > { %1784 = vst.msk [vmem:[%s3094_s15 + $0x20] sm:$0xff] %vm1779_vm3, %v1767_v33  ;;  %v1768_v37 = vmax.f32 %v1752_v34, 0.0  ;;  %v2313_v38 = vpop.f32.mrb[8].mxu0  ;;  %v1158_v39 = vpop.f32.mrb[9].mxu1 }
 0x1b7   : > { %1787 = vst.msk [vmem:[%s3094_s15 + $0x38] sm:$0xff] %vm1779_vm3, %v1770_v35  ;;  %v2329_v40 = vadd.f32 %v2313_v38, %v2241_v36  ;;  %v1693_v41 = vpop.f32.mrb[9].mxu0  ;;  %v2242_v42 = vpop.f32.mrb[10].mxu1 }
 0x1b8   : > { %1785 = vst.msk [vmem:[%s3094_s15 + $0x28] sm:$0xff] %vm1779_vm3, %v1768_v37  ;;  %v2330_v43 = vadd.f32 %v1693_v41, %v1158_v39  ;;  %v2314_v62 = vpop.f32.mrb[10].mxu0  ;;  %v1161_v44 = vpop.f32.mrb[11].mxu1 }
 0x1b9   : > { %v1757_v45 = vadd.f32 %v2329_v40, %v3088_v60  ;;  %v2331_v11 = vadd.f32 %v2314_v62, %v2242_v42  ;;  %v1696_v1 = vpop.f32.mrb[11].mxu0 }
 0x1ba   : > { %v1755_v21 = vadd.f32 %v2330_v43, %v3088_v60  ;;  %v2332_v24 = vadd.f32 %v1696_v1, %v1161_v44 }
 0x1bb   : > { %v1773_v46 = vmax.f32 %v1757_v45, 0.0  ;;  %v1758_v47 = vadd.f32 %v2331_v11, %v3088_v60 }
 0x1bc   : > { %v1771_v49 = vmax.f32 %v1755_v21, 0.0  ;;  %v1756_v48 = vadd.f32 %v2332_v24, %v3088_v60 }
 0x1bd   : > { %1790 = vst.msk [vmem:[%s3094_s15 + $0x50] sm:$0xff] %vm1779_vm3, %v1773_v46  ;;  %v1774_v50 = vmax.f32 %v1758_v47, 0.0  ;;  %v2245_v51 = vpop.f32.mrb[12].mxu1 }
 0x1be   : > { %1788 = vst.msk [vmem:[%s3094_s15 + $0x40] sm:$0xff] %vm1779_vm3, %v1771_v49  ;;  %v1772_v4 = vmax.f32 %v1756_v48, 0.0  ;;  %v2317_v61 = vpop.f32.mrb[12].mxu0  ;;  %v1174_v7 = vpop.f32.mrb[13].mxu1 }
 0x1bf   : > { %1791 = vst.msk [vmem:[%s3094_s15 + $0x58] sm:$0xff] %vm1779_vm3, %v1774_v50  ;;  %v2333_v12 = vadd.f32 %v2317_v61, %v2245_v51  ;;  %v1709_v23 = vpop.f32.mrb[13].mxu0  ;;  %v2246_v52 = vpop.f32.mrb[14].mxu1 }
 0x1c0   : > { %1789 = vst.msk [vmem:[%s3094_s15 + $0x48] sm:$0xff] %vm1779_vm3, %v1772_v4  ;;  %v2334_v53 = vadd.f32 %v1709_v23, %v1174_v7  ;;  %v2318_v54 = vpop.f32.mrb[14].mxu0  ;;  %v1177_v55 = vpop.f32.mrb[15].mxu1 }
 0x1c1   : > { %v1761_v57 = vadd.f32 %v2333_v12, %v3088_v60  ;;  %v2335_v58 = vadd.f32 %v2318_v54, %v2246_v52  ;;  %v1712_v59 = vpop.f32.mrb[15].mxu0 }
 0x1c2   : > { %v1759_v63 = vadd.f32 %v2334_v53, %v3088_v60  ;;  %v2336_v0 = vadd.f32 %v1712_v59, %v1177_v55 }
 0x1c3   : > { %v1777_v3 = vmax.f32 %v1761_v57, 0.0  ;;  %v1762_v6 = vadd.f32 %v2335_v58, %v3088_v60 }
 0x1c4   : > { %v1775_v2 = vmax.f32 %v1759_v63, 0.0  ;;  %v1760_v8 = vadd.f32 %v2336_v0, %v3088_v60 }
 0x1c5   : > { %1794 = vst.msk [vmem:[%s3094_s15 + $0x70] sm:$0xff] %vm1779_vm3, %v1777_v3  ;;  %v1778_v9 = vmax.f32 %v1762_v6, 0.0 }
 0x1c6   : > { %1792 = vst.msk [vmem:[%s3094_s15 + $0x60] sm:$0xff] %vm1779_vm3, %v1775_v2  ;;  %v1776_v10 = vmax.f32 %v1760_v8, 0.0 }
 0x1c7   : > { %1795 = vst.msk [vmem:[%s3094_s15 + $0x78] sm:$0xff] %vm1779_vm3, %v1778_v9 }
 0x1c8   : > { %1793 = vst.msk [vmem:[%s3094_s15 + $0x68] sm:$0xff] %vm1779_vm3, %v1776_v10 }
 0x1c9 PF: > { %s17_s22 = sadd.s32 1, %s2628_s22   ;;  %s3173_s18 = smov %s2620_s20 }
 0x1ca   : > { %p14_p0 = scmp.ge.s32.totalorder %s17_s22, 6   ;;  %s3174_s19 = smov %s2624_s21 }
 0x1cb   : > { %s3175_s20 = smov %s3178_s24  ;;  %s3176_s21 = smov %s3182_s25 }
 0x1cc   :  { %16 = sbr.rel (!%p14_p0) target bundleno = 4 (0x4), region = 95 }
 0x1d3   :  { %1828 = vsyncpa [#allocation4], 1 }
 0x1d4   :  { %1830 = vsyncpa [#allocation4 + $0x1], 1 }
 0x1d5   :  { %1831 = vsyncpa [#allocation6], 1 }

// kernel: closed_call.13
= control target key start
LH: loop header
LB: loop body
LE: loop exit
PB: predicated region body
PF: predicated region fallthrough
CT: control target
= control target key end

     0   :  { %s2952_s18 = smov 0   ;;  %s2954_s19 = smov 0   ;;  %s3514_s0 = inlined_call_operand.vmem [shape: f32[2,16,18,64], index: 0, kind: input, shape index: {}, may-alias: {0,1,2}]   ;;  %s3515_s1 = inlined_call_operand.vmem [shape: f32[2,16,18,64], index: 1, kind: input, shape index: {}, may-alias: {0,1,2}]   ;;  %s3516_s2 = inlined_call_operand.vmem [shape: f32[2,16,18,64], index: 2, kind: input, shape index: {}, may-alias: {0,1,2}]   ;;  %s3517_s3 = inlined_call_operand.vmem [shape: bf16[3,3,64,64], index: 3, kind: input, shape index: {}]   ;;  %s3518_s4 = inlined_call_operand.vmem [shape: f32[1,64], index: 4, kind: input, shape index: {}]   ;;  %s3519_s5 = inlined_call_operand.vmem [shape: f32[2,16,16,64], index: 5, kind: output, shape index: {}]  }
   0x1   :  { %s2956_s20 = smov 0   ;;  %s2958_s21 = smov 0  }
   0x2   :  { %s2960_s22 = smov 0  }
   0x3 LB: > { %s24_s23 = sadd.s32 1, %s2912_s20  ;;  %s27_s24 = sadd.s32 1, %s2916_s21  ;;  %s2920_s22 = sphi %s2960_s22, %s15_s22   ;;  %s2916_s21 = sphi %s2958_s21, %s3524_s21   ;;  %s2912_s20 = sphi %s2956_s20, %s3523_s20   ;;  %s2908_s19 = sphi %s2954_s19, %s3522_s19   ;;  %s2904_s18 = sphi %s2952_s18, %s3521_s18  }
   0x4   : > { %p25_p0 = scmp.ge.s32.totalorder %s24_s23, 2  ;;  %p2139_p1 = scmp.ge.s32.totalorder %s2920_s22, 1 }
   0x5   : > { %p273_p2 = scmp.lt.s32.totalorder %s2920_s22, 5 }
   0x6   : > { %s3526_s23 = smov (%p25_p0, %s24_s23), 0  ;;  %s3528_s24 = smov (!%p25_p0, %s27_s24), %s2916_s21 }
   0x7   : > { %p274_p3 = pnand %p2139_p1, %p273_p2  ;;  %p29_p4 = scmp.ge.s32.totalorder %s3528_s24, 2 }
   0x8   : > { %v2846_v0 = vld [vmem:[%s3517_s3 + $0x60] sm:$0xff] (!%p274_p3)   ;;  %s2988_s27 = sshll.u32 (!%p274_p3), %s2904_s18, 3  ;;  %p338_p5 = scmp.lt.s32.totalorder (!%p274_p3), %s2908_s19, 1  ;;  %v2848_v2 = vld [vmem:[%s3517_s3 + $0x68] sm:$0xff] (!%p274_p3)   ;;  %v2850_v4 = vld [vmem:[%s3517_s3 + $0x70] sm:$0xff] (!%p274_p3)   ;;  %vm438_vm0 = vcmask (!%p274_p3), 523264  }
   0x9   : > { %s3530_s24 = smov (%p29_p4, %s3528_s24), 0  ;;  %277 = sbr.rel (%p274_p3) target bundleno = 396 (0x18c), region = 40 }
   0xa   : > { %v2993_v1 = vld [vmem:[%s3517_s3 + $0x80] sm:$0xff] (!%p274_p3)   ;;  %2450 = vmatprep.subr.bf16.mxu1 (!%p274_p3), %v2846_v0  ;;  %p340_p6 = scmp.lt.s32.totalorder (!%p274_p3), %s2988_s27, 15  ;;  %v3003_v3 = vld [vmem:[%s3517_s3 + $0x88] sm:$0xff] (!%p274_p3)   ;;  %v3018_v5 = vld [vmem:[%s3517_s3 + $0x90] sm:$0xff] (!%p274_p3)   ;;  %vm441_vm1 = vcmask (!%p274_p3), 517120   ;;  %s3046_s10 = sadd.s32 (!%p274_p3), 4294967295, %s2988_s27 }
   0xb   : > { %2546 = vmatprep.subr.bf16.mxu0 (!%p274_p3), %v2993_v1  ;;  %2451 = vmatpush3.bf16.msra.mxu1 (!%p274_p3), %v2846_v0  ;;  %v2852_v6 = vld [vmem:[%s3517_s3 + $0x78] sm:$0xff] (!%p274_p3)   ;;  %v3043_v8 = vld [vmem:[%s3517_s3] sm:$0xff] (!%p274_p3)   ;;  %p350_p7 = scmp.gt.s32.totalorder (!%p274_p3), %s3046_s10, 0  ;;  %p2144_p8 = scmp.lt.s32.totalorder (!%p274_p3), %s3046_s10, 15  ;;  %v2856_v31 = vld [vmem:[%s3517_s3 + $0xe8] sm:$0xff] (!%p274_p3)  }
   0xc   : > { %2547 = vmatpush3.bf16.msra.mxu0 (!%p274_p3), %v2993_v1  ;;  %2452 = vmatprep.subr.bf16.mxu1 (!%p274_p3), %v2848_v2  ;;  %v3031_v7 = vld [vmem:[%s3517_s3 + $0x98] sm:$0xff] (!%p274_p3)   ;;  %v3054_v12 = vld [vmem:[%s3517_s3 + $0xe0] sm:$0xff] (!%p274_p3)   ;;  %s2341_s16 = sadd.s32 (!%p274_p3), 8, %s2988_s27  ;;  %p424_p9 = scmp.gt.s32.totalorder (!%p274_p3), %s2904_s18, 0  ;;  %v2857_v32 = vld [vmem:[%s3517_s3 + $0x8] sm:$0xff] (!%p274_p3)  }
   0xd   : > { %2548 = vmatprep.subr.bf16.mxu0 (!%p274_p3), %v3003_v3  ;;  %p3098_p10 = scmp.lt.s32.totalorder (!%p274_p3), %s2341_s16, 15  ;;  %v2858_v44 = vld [vmem:[%s3517_s3 + $0xf0] sm:$0xff] (!%p274_p3)   ;;  %p431_p11 = scmp.lt.s32.totalorder (!%p274_p3), %s2904_s18, 1  ;;  %v2859_v59 = vld [vmem:[%s3517_s3 + $0xf8] sm:$0xff] (!%p274_p3)  }
   0xe   : > { %v2860_v47 = vld [vmem:[%s3517_s3 + $0x10] sm:$0xff] (!%p274_p3)   ;;  %v2862_v0 = vld [vmem:[%s3517_s3 + $0x18] sm:$0xff] (!%p274_p3)  }
   0xf   : > { %2453 = vmatpush3.bf16.msra.mxu1 (!%p274_p3), %v2848_v2 }
  0x10   : > { %s3532_s19 = smov (!%p338_p5, %s2908_s19), 1  ;;  %2549 = vmatpush3.bf16.msra.mxu0 %v3003_v3  ;;  %2454 = vmatprep.subr.bf16.mxu1 %v2850_v4  ;;  %s3536_s16 = smov (!%p3098_p10, %s2341_s16), 15 }
  0x11   : > { %s3012_s11 = scalar_select %p340_p6, %s2988_s27, 15  ;;  %2550 = vmatprep.subr.bf16.mxu0 %v3018_v5 }
  0x12   : > { %s3021_s14 = smul.u32 48, %s3532_s19  ;;  %s3538_s16 = smov (!%p3098_p10, %s3536_s16), 15 }
  0x13   : > { %s2802_s15 = smul.u32 3, %s3012_s11  ;;  %2455 = vmatpush3.bf16.msra.mxu1 %v2850_v4  ;;  %s2156_s26 = sshll.u32 %s3012_s11, 1 }
  0x14   : > { %2551 = vmatpush3.bf16.msra.mxu0 %v3018_v5  ;;  %2456 = vmatprep.subr.bf16.mxu1 %v2852_v6  ;;  %s3114_s6 = scalar_select %p424_p9, 1, 0 }
  0x15   : > { %s344_s28 = sadd.s32 %s3021_s14, %s2802_s15  ;;  %2552 = vmatprep.subr.bf16.mxu0 %v3031_v7 }
  0x16   : > { %s2141_s29 = sshll.u32 %s344_s28, 3 }
  0x17   : > { %s3038_s7 = scalar_lea.vmem %s3514_s0, %s2141_s29  ;;  %2457 = vmatpush3.bf16.msra.mxu1 %v2852_v6  ;;  %v2861_v6 = vld [vmem:[%s3517_s3 + $0x40] sm:$0xff]  }
  0x18   : > { %v394_v9 = vld [vmem:[%s3038_s7] sm:$0xff]  ;;  %v395_v10 = vld [vmem:[%s3038_s7 + $0x8] sm:$0xff]  ;;  %v396_v11 = vld [vmem:[%s3038_s7 + $0x10] sm:$0x3]  ;;  %s351_s15 = scalar_select %p350_p7, %s3046_s10, 0  ;;  %2553 = vmatpush3.bf16.msra.mxu0 %v3031_v7  ;;  %2474 = vmatprep.subr.bf16.mxu1 %v3043_v8 }
  0x19   : > { %444 = vst.msk [vmem:[#allocation2 + $0x18] sm:$0xff] %vm438_vm0, %v394_v9  ;;  %445 = vst.msk [vmem:[#allocation2 + $0x20] sm:$0xff] %vm438_vm0, %v395_v10  ;;  %v397_v13 = vld [vmem:[%s3038_s7 + $0x18] sm:$0xff]  ;;  %v398_v14 = vld [vmem:[%s3038_s7 + $0x20] sm:$0xff]  ;;  %2570 = vmatprep.subr.bf16.mxu0 %v3054_v12  ;;  %s3192_s30 = scalar_select %p431_p11, 1, 0 }
  0x1a   : > { %446 = vst.msk [vmem:[#allocation2 + $0x28] sm:$0x3] %vm441_vm1, %v396_v11  ;;  %v399_v15 = vld [vmem:[%s3038_s7 + $0x28] sm:$0x3]  ;;  %v400_v16 = vld [vmem:[%s3038_s7 + $0x30] sm:$0xff]  ;;  %v401_v17 = vld [vmem:[%s3038_s7 + $0x38] sm:$0xff] }
  0x1b   : > { %447 = vst.msk [vmem:[#allocation2 + $0x30] sm:$0xff] %vm438_vm0, %v397_v13  ;;  %448 = vst.msk [vmem:[#allocation2 + $0x38] sm:$0xff] %vm438_vm0, %v398_v14  ;;  %v402_v18 = vld [vmem:[%s3038_s7 + $0x40] sm:$0x3]  ;;  %s3534_s15 = smov (!%p2144_p8, %s351_s15), 15  ;;  %v403_v19 = vld [vmem:[%s3038_s7 + $0x48] sm:$0xff] }
  0x1c   : > { %449 = vst.msk [vmem:[#allocation2 + $0x40] sm:$0x3] %vm441_vm1, %v399_v15  ;;  %452 = vst.msk [vmem:[#allocation2 + $0x58] sm:$0x3] %vm441_vm1, %v402_v18  ;;  %v404_v20 = vld [vmem:[%s3038_s7 + $0x50] sm:$0xff]  ;;  %s2804_s17 = smul.u32 3, %s3534_s15  ;;  %s426_s15 = scvt.s32.f32 %s3114_s6 }
  0x1d   : > { %450 = vst.msk [vmem:[#allocation2 + $0x48] sm:$0xff] %vm438_vm0, %v400_v16  ;;  %451 = vst.msk [vmem:[#allocation2 + $0x50] sm:$0xff] %vm438_vm0, %v401_v17  ;;  %v405_v21 = vld [vmem:[%s3038_s7 + $0x58] sm:$0x3]  ;;  %v406_v22 = vld [vmem:[%s3038_s7 + $0x60] sm:$0xff] }
  0x1e   : > { %453 = vst.msk [vmem:[#allocation2 + $0x60] sm:$0xff] %vm438_vm0, %v403_v19  ;;  %454 = vst.msk [vmem:[#allocation2 + $0x68] sm:$0xff] %vm438_vm0, %v404_v20  ;;  %v407_v23 = vld [vmem:[%s3038_s7 + $0x68] sm:$0xff]  ;;  %s3121_s8 = sadd.s32 %s2804_s17, %s3021_s14  ;;  %v409_v52 = vld [vmem:[%s3038_s7 + $0x78] sm:$0xff]  ;;  %s3168_s17 = smul.u32 3, %s3538_s16  ;;  %v3185_v60 = vstv %s426_s15 }
  0x1f   : > { %455 = vst.msk [vmem:[#allocation2 + $0x70] sm:$0x3] %vm441_vm1, %v405_v21  ;;  %s2149_s13 = sshll.u32 %s3121_s8, 3  ;;  %v410_v54 = vld [vmem:[%s3038_s7 + $0x80] sm:$0xff]  ;;  %v412_v55 = vld [vmem:[%s3038_s7 + $0x90] sm:$0xff]  ;;  %v413_v56 = vld [vmem:[%s3038_s7 + $0x98] sm:$0xff] }
  0x20   : > { %v474_v24 = vld [vmem:[#allocation2 + $0x18] sm:$0xff]  ;;  %v475_v25 = vld [vmem:[#allocation2 + $0x20] sm:$0xff]  ;;  %456 = vst.msk [vmem:[#allocation2 + $0x78] sm:$0xff] %vm438_vm0, %v406_v22  ;;  %457 = vst.msk [vmem:[#allocation2 + $0x80] sm:$0xff] %vm438_vm0, %v407_v23  ;;  %s3180_s28 = scalar_lea.vmem %s3515_s1, %s2149_s13  ;;  %s375_s27 = sadd.s32 %s3168_s17, %s3021_s14 }
  0x21   : > { %v939_v26 = vld [vmem:[#allocation2 + $0x19] sm:$0xff]  ;;  %v3104_v27 = vpack.c.bf16 %v475_v25, %v474_v24  ;;  %v940_v28 = vld [vmem:[#allocation2 + $0x21] sm:$0xff]  ;;  %459 = vst.msk [vmem:[#allocation2 + $0x90] sm:$0xff] %vm438_vm0, %v409_v52  ;;  %460 = vst.msk [vmem:[#allocation2 + $0x98] sm:$0xff] %vm438_vm0, %v410_v54  ;;  %s2154_s12 = sshll.u32 %s375_s27, 3  ;;  %s433_s13 = scvt.s32.f32 %s3192_s30 }
  0x22   : > { %v476_v29 = vld [vmem:[#allocation2 + $0x30] sm:$0xff]  ;;  %v477_v30 = vld [vmem:[#allocation2 + $0x38] sm:$0xff]  ;;  %v3116_v33 = vpack.c.bf16 %v940_v28, %v939_v26  ;;  %462 = vst.msk [vmem:[#allocation2 + $0xa8] sm:$0xff] %vm438_vm0, %v412_v55  ;;  %463 = vst.msk [vmem:[#allocation2 + $0xb0] sm:$0xff] %vm438_vm0, %v413_v56  ;;  %s377_s25 = scalar_lea.vmem %s3516_s2, %s2154_s12  ;;  %s2157_s16 = sshll.u32 %s3532_s19, 5 }
  0x23   : > { %v3118_v34 = vpack.c.bf16 %v477_v30, %v476_v29  ;;  %v941_v35 = vld [vmem:[#allocation2 + $0x31] sm:$0xff]  ;;  %v942_v36 = vld [vmem:[#allocation2 + $0x39] sm:$0xff]  ;;  %2458 = vmatprep.mubr.msk.bf16.mxu1 %vm438_vm0, %v3104_v27  ;;  %v415_v61 = vld [vmem:[%s3038_s7 + $0xa8] sm:$0xff]  ;;  %v434_v21 = vstv %s433_s13 }
  0x24   : > { %v478_v37 = vld [vmem:[#allocation2 + $0x48] sm:$0xff]  ;;  %v3125_v38 = vpack.c.bf16 %v942_v36, %v941_v35  ;;  %v479_v39 = vld [vmem:[#allocation2 + $0x50] sm:$0xff]  ;;  %2554 = vmatprep.mubr.msk.bf16.mxu0 %vm438_vm0, %v3116_v33  ;;  %465 = vst.msk [vmem:[#allocation2 + $0xc0] sm:$0xff] %vm438_vm0, %v415_v61  ;;  %v418_v2 = vld [vmem:[%s3180_s28] sm:$0xff] }
  0x25   : > { %v943_v40 = vld [vmem:[#allocation2 + $0x49] sm:$0xff]  ;;  %v944_v41 = vld [vmem:[#allocation2 + $0x51] sm:$0xff]  ;;  %2459 = vmatmul.mubr.msk.bf16.vlgmr.msra.gmra.mrb[0].mxu1 %vm438_vm0, %v3118_v34  ;;  %v3137_v42 = vpack.c.bf16 %v479_v39, %v478_v37  ;;  %v480_v45 = vld [vmem:[#allocation2 + $0x60] sm:$0xff] }
  0x26   : > { %v3139_v43 = vpack.c.bf16 %v944_v41, %v943_v40  ;;  %2475 = vmatpush3.bf16.msra.mxu1 %v3043_v8  ;;  %2555 = vmatmul.mubr.msk.bf16.vlgmr.msra.gmra.mrb[0].mxu0 %vm438_vm0, %v3125_v38  ;;  %v481_v46 = vld [vmem:[#allocation2 + $0x68] sm:$0xff]  ;;  %v416_v62 = vld [vmem:[%s3038_s7 + $0xb0] sm:$0xff]  ;;  %v428_v8 = vmul.f32 %v3185_v60, %v418_v2  ;;  %v414_v13 = vld [vmem:[%s3038_s7 + $0xa0] sm:$0x3] }
  0x27   : > { %2571 = vmatpush3.bf16.msra.mxu0 %v3054_v12  ;;  %2462 = vmatprep.mubr.msk.bf16.mxu1 %vm438_vm0, %v3137_v42  ;;  %v945_v48 = vld [vmem:[#allocation2 + $0x61] sm:$0xff]  ;;  %v946_v49 = vld [vmem:[#allocation2 + $0x69] sm:$0xff]  ;;  %v482_v50 = vld [vmem:[#allocation2 + $0x78] sm:$0xff]  ;;  %v3162_v53 = vpack.c.bf16 %v481_v46, %v480_v45  ;;  %466 = vst.msk [vmem:[#allocation2 + $0xc8] sm:$0xff] %vm438_vm0, %v416_v62 }
  0x28   : > { %2572 = vmatprep.subr.bf16.mxu0 %v2856_v31  ;;  %2476 = vmatprep.subr.bf16.mxu1 %v2857_v32  ;;  %v483_v51 = vld [vmem:[#allocation2 + $0x80] sm:$0xff]  ;;  %v3170_v57 = vpack.c.bf16 %v946_v49, %v945_v48  ;;  %v408_v63 = vld [vmem:[%s3038_s7 + $0x70] sm:$0x3]  ;;  %v419_v4 = vld [vmem:[%s3180_s28 + $0x8] sm:$0xff]  ;;  %439 = vst.msk [vmem:[#allocation2] sm:$0xff] %vm438_vm0, %v428_v8 }
  0x29   : > { %2558 = vmatprep.mubr.msk.bf16.mxu0 %vm438_vm0, %v3139_v43  ;;  %v3172_v58 = vpack.c.bf16 %v483_v51, %v482_v50  ;;  %458 = vst.msk [vmem:[#allocation2 + $0x88] sm:$0x3] %vm441_vm1, %v408_v63  ;;  %v429_v9 = vmul.f32 %v3185_v60, %v419_v4  ;;  %v411_v10 = vld [vmem:[%s3038_s7 + $0x88] sm:$0x3]  ;;  %v484_v11 = vld [vmem:[#allocation2 + $0x90] sm:$0xff]  ;;  %v3223_v12 = vld [vmem:[%s3517_s3 + $0xc0] sm:$0xff]  }
  0x2a   : > { %2477 = vmatpush3.bf16.msra.mxu1 %v2857_v32  ;;  %461 = vst.msk [vmem:[#allocation2 + $0xa0] sm:$0x3] %vm441_vm1, %v411_v10  ;;  %v485_v14 = vld [vmem:[#allocation2 + $0x98] sm:$0xff]  ;;  %v486_v15 = vld [vmem:[#allocation2 + $0xa8] sm:$0xff]  ;;  %v487_v16 = vld [vmem:[#allocation2 + $0xb0] sm:$0xff] }
  0x2b   : > { %2573 = vmatpush3.bf16.msra.mxu0 %v2856_v31  ;;  %2478 = vmatprep.subr.bf16.mxu1 %v2860_v47  ;;  %440 = vst.msk [vmem:[#allocation2 + $0x8] sm:$0xff] %vm438_vm0, %v429_v9  ;;  %v3229_v17 = vpack.c.bf16 %v485_v14, %v484_v11  ;;  %v3231_v18 = vpack.c.bf16 %v487_v16, %v486_v15  ;;  %v417_v19 = vld [vmem:[%s3038_s7 + $0xb8] sm:$0x3]  ;;  %v2863_v20 = vld [vmem:[%s3517_s3 + $0x48] sm:$0xff]   ;;  %v488_v22 = vld [vmem:[#allocation2 + $0xc0] sm:$0xff]  ;;  %s389_s7 = sadd.s32 %s2157_s16, %s2156_s26 }
  0x2c   : > { %2574 = vmatprep.subr.bf16.mxu0 %v2858_v44  ;;  %464 = vst.msk [vmem:[#allocation2 + $0xb8] sm:$0x3] %vm441_vm1, %v414_v13  ;;  %467 = vst.msk [vmem:[#allocation2 + $0xd0] sm:$0x3] %vm441_vm1, %v417_v19  ;;  %v947_v23 = vld [vmem:[#allocation2 + $0x79] sm:$0xff]  ;;  %v949_v25 = vld [vmem:[#allocation2 + $0x91] sm:$0xff] }
  0x2d   : > { %2463 = vmatmul.mubr.msk.bf16.gmra.mrb[4].mxu1 %vm438_vm0, %v3162_v53  ;;  %v2865_v26 = vld [vmem:[%s3517_s3 + $0x50] sm:$0xff]   ;;  %v421_v28 = vld [vmem:[%s377_s25] sm:$0xff]  ;;  %v422_v29 = vld [vmem:[%s377_s25 + $0x8] sm:$0xff]  ;;  %s2158_s6 = sshll.u32 %s389_s7, 3 }
  0x2e   : > { %2559 = vmatmul.mubr.msk.bf16.gmra.mrb[4].mxu0 %vm438_vm0, %v3170_v57  ;;  %2466 = vmatprep.mubr.msk.bf16.mxu1 %vm438_vm0, %v3172_v58  ;;  %v489_v24 = vld [vmem:[#allocation2 + $0xc8] sm:$0xff]  ;;  %v435_v35 = vmul.f32 %v434_v21, %v421_v28  ;;  %v436_v36 = vmul.f32 %v434_v21, %v422_v29  ;;  %v423_v39 = vld [vmem:[%s377_s25 + $0x10] sm:$0x3]  ;;  %v2867_v49 = vld [vmem:[%s3517_s3 + $0x58] sm:$0xff]   ;;  %s3450_s19 = scalar_lea.vmem %s3519_s5, %s2158_s6 }
  0x2f   : > { %2575 = vmatpush3.bf16.msra.mxu0 %v2858_v44  ;;  %2578 = vmatprep.mubr.msk.bf16.mxu0 %vm438_vm0, %v3125_v38  ;;  %v472_v31 = vld [vmem:[#allocation2] sm:$0xff]  ;;  %v3253_v40 = vpack.c.bf16 %v489_v24, %v488_v22  ;;  %v437_v41 = vmul.f32 %v434_v21, %v423_v39  ;;  %v420_v44 = vld [vmem:[%s3180_s28 + $0x10] sm:$0x3]  ;;  %v1439_v10 = vld [vmem:[#allocation2 + $0x32] sm:$0xff] }
  0x30   : > { %2576 = vmatprep.subr.bf16.mxu0 %v2859_v59  ;;  %2479 = vmatpush3.bf16.msra.mxu1 %v2860_v47  ;;  %v948_v30 = vld [vmem:[#allocation2 + $0x81] sm:$0xff]  ;;  %469 = vst.msk [vmem:[#allocation2 + $0xd8] sm:$0xff] %vm438_vm0, %v435_v35  ;;  %470 = vst.msk [vmem:[#allocation2 + $0xe0] sm:$0xff] %vm438_vm0, %v436_v36  ;;  %v430_v47 = vmul.f32 %v3185_v60, %v420_v44  ;;  %v951_v50 = vld [vmem:[#allocation2 + $0xa9] sm:$0xff] }
  0x31   : > { %2480 = vmatprep.subr.bf16.mxu1 %v2862_v0  ;;  %v950_v37 = vld [vmem:[#allocation2 + $0x99] sm:$0xff]  ;;  %v3258_v45 = vpack.c.bf16 %v948_v30, %v947_v23  ;;  %471 = vst.msk [vmem:[#allocation2 + $0xe8] sm:$0x3] %vm441_vm1, %v437_v41  ;;  %v953_v54 = vld [vmem:[#allocation2 + $0xc1] sm:$0xff]  ;;  %v2868_v61 = vld [vmem:[%s3517_s3 + $0xd0] sm:$0xff]  }
  0x32   : > { %v473_v32 = vld [vmem:[#allocation2 + $0x8] sm:$0xff]  ;;  %v3261_v48 = vpack.c.bf16 %v950_v37, %v949_v25  ;;  %442 = vst.msk [vmem:[#allocation2 + $0x10] sm:$0x3] %vm441_vm1, %v430_v47  ;;  %v2869_v52 = vld [vmem:[%s3517_s3 + $0xa0] sm:$0xff]   ;;  %v1442_v19 = vld [vmem:[#allocation2 + $0x52] sm:$0xff] }
  0x33   : > { %2577 = vmatpush3.bf16.msra.mxu0 %v2859_v59  ;;  %v492_v46 = vpack.c.bf16 %v473_v32, %v472_v31  ;;  %v952_v51 = vld [vmem:[#allocation2 + $0xb1] sm:$0xff]  ;;  %v954_v55 = vld [vmem:[#allocation2 + $0xc9] sm:$0xff]  ;;  %v1437_v8 = vld [vmem:[#allocation2 + $0x1a] sm:$0xff] }
  0x34   : > { %2594 = vmatprep.subr.bf16.mxu0 %v2861_v6  ;;  %2481 = vmatpush3.bf16.msra.mxu1 %v2862_v0  ;;  %v3278_v56 = vpack.c.bf16 %v952_v51, %v951_v50  ;;  %v2866_v59 = vld [vmem:[%s3517_s3 + $0xc8] sm:$0xff]   ;;  %v3283_v60 = vpack.c.bf16 %v954_v55, %v953_v54  ;;  %v1440_v11 = vld [vmem:[#allocation2 + $0x3a] sm:$0xff]  ;;  %v2873_v22 = vld [vmem:[%s3517_s3 + $0xb0] sm:$0xff]  }
  0x35   : > { %2467 = vmatmul.mubr.msk.bf16.gmra.mrb[8].mxu1 %vm438_vm0, %v3229_v17  ;;  %2498 = vmatprep.subr.bf16.mxu1 %v3223_v12  ;;  %v1435_v63 = vld [vmem:[#allocation2 + $0x2] sm:$0xff]  ;;  %v3309_v14 = vpack.c.bf16 %v1440_v11, %v1439_v10  ;;  %v1441_v16 = vld [vmem:[#allocation2 + $0x4a] sm:$0xff]  ;;  %v2875_v25 = vld [vmem:[%s3517_s3 + $0xb8] sm:$0xff]  }
  0x36   : > { %2579 = vmatmul.mubr.msk.bf16.vlgmr.msra.gmra.mrb[0].mxu0 %vm438_vm0, %v3139_v43  ;;  %2470 = vmatprep.mubr.msk.bf16.mxu1 %vm438_vm0, %v3231_v18  ;;  %v1438_v9 = vld [vmem:[#allocation2 + $0x22] sm:$0xff]  ;;  %v1444_v21 = vld [vmem:[#allocation2 + $0x6a] sm:$0xff]  ;;  %v3324_v23 = vpack.c.bf16 %v1442_v19, %v1441_v16  ;;  %v1447_v30 = vld [vmem:[#allocation2 + $0x92] sm:$0xff] }
  0x37   : > { %2595 = vmatpush3.bf16.msra.mxu0 %v2861_v6  ;;  %2582 = vmatprep.mubr.msk.bf16.mxu0 %vm438_vm0, %v3170_v57  ;;  %v955_v62 = vld [vmem:[#allocation2 + $0xd9] sm:$0xff]  ;;  %v1456_v13 = vpack.c.bf16 %v1438_v9, %v1437_v8  ;;  %v2871_v15 = vld [vmem:[%s3517_s3 + $0xa8] sm:$0xff]   ;;  %v2876_v39 = vld [vmem:[%s3517_s3 + $0x30] sm:$0xff]  }
  0x38   : > { %2596 = vmatprep.subr.bf16.mxu0 %v2863_v20  ;;  %v956_v0 = vld [vmem:[#allocation2 + $0xe1] sm:$0xff]  ;;  %v2870_v6 = vld [vmem:[%s3517_s3 + $0xd8] sm:$0xff]   ;;  %v1449_v36 = vld [vmem:[#allocation2 + $0xaa] sm:$0xff] }
  0x39   : > { %v966_v2 = vpack.c.bf16 %v956_v0, %v955_v62  ;;  %v1446_v28 = vld [vmem:[#allocation2 + $0x82] sm:$0xff]  ;;  %v1448_v31 = vld [vmem:[#allocation2 + $0x9a] sm:$0xff]  ;;  %v1450_v37 = vld [vmem:[#allocation2 + $0xb2] sm:$0xff] }
  0x3a   : > { %v2877_v29 = vld [vmem:[%s3517_s3 + $0x100] sm:$0xff]   ;;  %v2874_v35 = vld [vmem:[%s3517_s3 + $0x28] sm:$0xff]   ;;  %v1462_v41 = vpack.c.bf16 %v1450_v37, %v1449_v36  ;;  %v2880_v47 = vld [vmem:[%s3517_s3 + $0x110] sm:$0xff]  }
  0x3b   : > { %2597 = vmatpush3.bf16.msra.mxu0 %v2863_v20  ;;  %v1443_v20 = vld [vmem:[#allocation2 + $0x62] sm:$0xff]  ;;  %v1452_v51 = vld [vmem:[#allocation2 + $0xca] sm:$0xff] }
  0x3c   : > { %2598 = vmatprep.subr.bf16.mxu0 %v2865_v26  ;;  %v3326_v24 = vpack.c.bf16 %v1444_v21, %v1443_v20  ;;  %v937_v44 = vld [vmem:[#allocation2 + $0x1] sm:$0xff] }
  0x3d   : > { %2471 = vmatmul.mubr.msk.bf16.gmra.mrb[12].mxu1 %vm438_vm0, %v3253_v40  ;;  %v1451_v50 = vld [vmem:[#allocation2 + $0xc2] sm:$0xff] }
  0x3e   : > { %2583 = vmatmul.mubr.msk.bf16.gmra.mrb[4].mxu0 %vm438_vm0, %v3258_v45  ;;  %2482 = vmatprep.mubr.msk.bf16.mxu1 %vm438_vm0, %v492_v46  ;;  %v938_v46 = vld [vmem:[#allocation2 + $0x9] sm:$0xff] }
  0x3f   : > { %2586 = vmatprep.mubr.msk.bf16.mxu0 %vm438_vm0, %v3261_v48  ;;  %2599 = vmatpush3.bf16.msra.mxu0 %v2865_v26  ;;  %v1445_v26 = vld [vmem:[#allocation2 + $0x7a] sm:$0xff] }
  0x40   : > { %2600 = vmatprep.subr.bf16.mxu0 %v2867_v49  ;;  %v3342_v32 = vpack.c.bf16 %v1446_v28, %v1445_v26 }
  0x43   : > { %2601 = vmatpush3.bf16.msra.mxu0 %v2867_v49  ;;  %v957_v49 = vpack.c.bf16 %v938_v46, %v937_v44 }
  0x44   : > { %2618 = vmatprep.subr.bf16.mxu0 %v2869_v52 }
  0x45   : > { %2483 = vmatmul.mubr.msk.bf16.vlgmr.msra.gmra.mrb[0].mxu1 %vm438_vm0, %v3104_v27  ;;  %v1436_v27 = vld [vmem:[#allocation2 + $0xa] sm:$0xff] }
  0x46   : > { %2499 = vmatpush3.bf16.msra.mxu1 %v3223_v12  ;;  %2587 = vmatmul.mubr.msk.bf16.gmra.mrb[8].mxu0 %vm438_vm0, %v3278_v56  ;;  %v1455_v4 = vpack.c.bf16 %v1436_v27, %v1435_v63  ;;  %v2872_v12 = vld [vmem:[%s3517_s3 + $0x20] sm:$0xff]  }
  0x47   : > { %2486 = vmatprep.mubr.msk.bf16.mxu1 %vm438_vm0, %v3118_v34  ;;  %2500 = vmatprep.subr.bf16.mxu1 %v2866_v59 }
  0x48   : > { %2590 = vmatprep.mubr.msk.bf16.mxu0 %vm438_vm0, %v3283_v60 }
  0x4a   : > { %2501 = vmatpush3.bf16.msra.mxu1 %v2866_v59 }
  0x4b   : > { %2502 = vmatprep.subr.bf16.mxu1 %v2868_v61 }
  0x4d   : > { %2487 = vmatmul.mubr.msk.bf16.gmra.mrb[4].mxu1 %vm438_vm0, %v3137_v42 }
  0x4e   : > { %2591 = vmatmul.mubr.msk.bf16.gmra.mrb[12].mxu0 %vm438_vm0, %v966_v2  ;;  %2490 = vmatprep.mubr.msk.bf16.mxu1 %vm438_vm0, %v3162_v53 }
  0x4f   : > { %2602 = vmatprep.mubr.msk.bf16.mxu0 %vm438_vm0, %v1455_v4  ;;  %2503 = vmatpush3.bf16.msra.mxu1 %v2868_v61 }
  0x50   : > { %2504 = vmatprep.subr.bf16.mxu1 %v2870_v6 }
  0x53   : > { %2505 = vmatpush3.bf16.msra.mxu1 %v2870_v6 }
  0x54   : > { %2522 = vmatprep.subr.bf16.mxu1 %v2872_v12 }
  0x55   : > { %2491 = vmatmul.mubr.msk.bf16.gmra.mrb[8].mxu1 %vm438_vm0, %v3172_v58 }
  0x56   : > { %2603 = vmatmul.mubr.msk.bf16.vlgmr.msra.gmra.mrb[0].mxu0 %vm438_vm0, %v1456_v13  ;;  %2494 = vmatprep.mubr.msk.bf16.mxu1 %vm438_vm0, %v3229_v17 }
  0x57   : > { %2619 = vmatpush3.bf16.msra.mxu0 %v2869_v52  ;;  %2606 = vmatprep.mubr.msk.bf16.mxu0 %vm438_vm0, %v3309_v14  ;;  %v1463_v52 = vpack.c.bf16 %v1452_v51, %v1451_v50 }
  0x58   : > { %2620 = vmatprep.subr.bf16.mxu0 %v2871_v15 }
  0x5b   : > { %2621 = vmatpush3.bf16.msra.mxu0 %v2871_v15 }
  0x5c   : > { %2622 = vmatprep.subr.bf16.mxu0 %v2873_v22 }
  0x5d   : > { %2495 = vmatmul.mubr.msk.bf16.gmra.mrb[12].mxu1 %vm438_vm0, %v3231_v18 }
  0x5e   : > { %2607 = vmatmul.mubr.msk.bf16.gmra.mrb[4].mxu0 %vm438_vm0, %v3324_v23  ;;  %2506 = vmatprep.mubr.msk.bf16.mxu1 %vm438_vm0, %v3118_v34  ;;  %v3347_v34 = vpack.c.bf16 %v1448_v31, %v1447_v30 }
  0x5f   : > { %2610 = vmatprep.mubr.msk.bf16.mxu0 %vm438_vm0, %v3326_v24  ;;  %2623 = vmatpush3.bf16.msra.mxu0 %v2873_v22 }
  0x60   : > { %2624 = vmatprep.subr.bf16.mxu0 %v2875_v25 }
  0x63   : > { %2625 = vmatpush3.bf16.msra.mxu0 %v2875_v25 }
  0x64   : > { %2642 = vmatprep.subr.bf16.mxu0 %v2877_v29 }
  0x65   : > { %2507 = vmatmul.mubr.msk.bf16.vlgmr.msra.gmra.mrb[0].mxu1 %vm438_vm0, %v3137_v42  ;;  %v2878_v42 = vld [vmem:[%s3517_s3 + $0x38] sm:$0xff]  }
  0x66   : > { %2523 = vmatpush3.bf16.msra.mxu1 %v2872_v12  ;;  %2611 = vmatmul.mubr.msk.bf16.gmra.mrb[8].mxu0 %vm438_vm0, %v3342_v32 }
  0x67   : > { %2510 = vmatprep.mubr.msk.bf16.mxu1 %vm438_vm0, %v3162_v53  ;;  %2524 = vmatprep.subr.bf16.mxu1 %v2874_v35  ;;  %v2879_v53 = vld [vmem:[%s3517_s3 + $0x108] sm:$0xff]  }
  0x68   : > { %2614 = vmatprep.mubr.msk.bf16.mxu0 %vm438_vm0, %v3347_v34 }
  0x6a   : > { %2525 = vmatpush3.bf16.msra.mxu1 %v2874_v35 }
  0x6b   : > { %2526 = vmatprep.subr.bf16.mxu1 %v2876_v39 }
  0x6d   : > { %2511 = vmatmul.mubr.msk.bf16.gmra.mrb[4].mxu1 %vm438_vm0, %v3172_v58  ;;  %v490_v58 = vld [vmem:[#allocation2 + $0xd8] sm:$0xff] }
  0x6e   : > { %2615 = vmatmul.mubr.msk.bf16.gmra.mrb[12].mxu0 %vm438_vm0, %v1462_v41  ;;  %2514 = vmatprep.mubr.msk.bf16.mxu1 %vm438_vm0, %v3229_v17  ;;  %v491_v17 = vld [vmem:[#allocation2 + $0xe0] sm:$0xff] }
  0x6f   : > { %2626 = vmatprep.mubr.msk.bf16.mxu0 %vm438_vm0, %v1456_v13  ;;  %2527 = vmatpush3.bf16.msra.mxu1 %v2876_v39 }
  0x70   : > { %2528 = vmatprep.subr.bf16.mxu1 %v2878_v42 }
  0x73   : > { %2529 = vmatpush3.bf16.msra.mxu1 %v2878_v42 }
  0x74   : > { %2666 = vmatprep.subr.bf16.mxu1 %v2993_v1 }
  0x75   : > { %2515 = vmatmul.mubr.msk.bf16.gmra.mrb[8].mxu1 %vm438_vm0, %v3231_v18  ;;  %v501_v18 = vpack.c.bf16 %v491_v17, %v490_v58 }
  0x76   : > { %2627 = vmatmul.mubr.msk.bf16.vlgmr.msra.gmra.mrb[0].mxu0 %vm438_vm0, %v3309_v14  ;;  %2518 = vmatprep.mubr.msk.bf16.mxu1 %vm438_vm0, %v3253_v40  ;;  %v2881_v40 = vld [vmem:[%s3517_s3 + $0x118] sm:$0xff]  }
  0x77   : > { %2643 = vmatpush3.bf16.msra.mxu0 %v2877_v29  ;;  %2630 = vmatprep.mubr.msk.bf16.mxu0 %vm438_vm0, %v3324_v23 }
  0x78   : > { %2644 = vmatprep.subr.bf16.mxu0 %v2879_v53 }
  0x7b   : > { %2645 = vmatpush3.bf16.msra.mxu0 %v2879_v53 }
  0x7c   : > { %2646 = vmatprep.subr.bf16.mxu0 %v2880_v47 }
  0x7d   : > { %2519 = vmatmul.mubr.msk.bf16.gmra.mrb[12].mxu1 %vm438_vm0, %v501_v18 }
  0x7e   : > { %2631 = vmatmul.mubr.msk.bf16.gmra.mrb[4].mxu0 %vm438_vm0, %v3326_v24  ;;  %2530 = vmatprep.mubr.msk.bf16.mxu1 %vm438_vm0, %v957_v49 }
  0x7f   : > { %2634 = vmatprep.mubr.msk.bf16.mxu0 %vm438_vm0, %v3342_v32  ;;  %2647 = vmatpush3.bf16.msra.mxu0 %v2880_v47 }
  0x80   : > { %2648 = vmatprep.subr.bf16.mxu0 %v2881_v40 }
  0x83   : > { %2649 = vmatpush3.bf16.msra.mxu0 %v2881_v40 }
  0x85   : > { %2531 = vmatmul.mubr.msk.bf16.vlgmr.msra.gmra.mrb[0].mxu1 %vm438_vm0, %v3116_v33 }
  0x86   : > { %2670 = vmatpush3.bf16.msra.mxu1 %v2993_v1  ;;  %2635 = vmatmul.mubr.msk.bf16.gmra.mrb[8].mxu0 %vm438_vm0, %v3347_v34  ;;  %v1453_v1 = vld [vmem:[#allocation2 + $0xda] sm:$0xff] }
  0x87   : > { %2534 = vmatprep.mubr.msk.bf16.mxu1 %vm438_vm0, %v3125_v38  ;;  %2667 = vmatprep.subr.bf16.mxu1 %v3003_v3 }
  0x88   : > { %2638 = vmatprep.mubr.msk.bf16.mxu0 %vm438_vm0, %v1462_v41 }
  0x8a   : > { %2671 = vmatpush3.bf16.msra.mxu1 %v3003_v3  ;;  %v1454_v3 = vld [vmem:[#allocation2 + $0xe2] sm:$0xff] }
  0x8b   : > { %2668 = vmatprep.subr.bf16.mxu1 %v3018_v5 }
  0x8d   : > { %2535 = vmatmul.mubr.msk.bf16.gmra.mrb[4].mxu1 %vm438_vm0, %v3139_v43 }
  0x8e   : > { %2639 = vmatmul.mubr.msk.bf16.gmra.mrb[12].mxu0 %vm438_vm0, %v1463_v52  ;;  %2538 = vmatprep.mubr.msk.bf16.mxu1 %vm438_vm0, %v3170_v57 }
  0x8f   : > { %2650 = vmatprep.mubr.msk.bf16.mxu0 %vm438_vm0, %v3309_v14  ;;  %2672 = vmatpush3.bf16.msra.mxu1 %v3018_v5  ;;  %v1464_v5 = vpack.c.bf16 %v1454_v3, %v1453_v1 }
  0x90   : > { %2669 = vmatprep.subr.bf16.mxu1 %v3031_v7 }
  0x93   : > { %2673 = vmatpush3.bf16.msra.mxu1 %v3031_v7 }
  0x95   : > { %2539 = vmatmul.mubr.msk.bf16.gmra.mrb[8].mxu1 %vm438_vm0, %v3258_v45 }
  0x96   : > { %2651 = vmatmul.mubr.msk.bf16.vlgmr.msra.gmra.mrb[0].mxu0 %vm438_vm0, %v3324_v23  ;;  %2542 = vmatprep.mubr.msk.bf16.mxu1 %vm438_vm0, %v3261_v48 }
  0x97   : > { %2654 = vmatprep.mubr.msk.bf16.mxu0 %vm438_vm0, %v3326_v24 }
  0x9d   : > { %2543 = vmatmul.mubr.msk.bf16.gmra.mrb[12].mxu1 %vm438_vm0, %v3278_v56 }
  0x9e   : > { %2655 = vmatmul.mubr.msk.bf16.gmra.mrb[4].mxu0 %vm438_vm0, %v3342_v32  ;;  %2562 = vmatprep.mubr.msk.bf16.mxu1 %vm438_vm0, %v3258_v45 }
  0x9f   : > { %2658 = vmatprep.mubr.msk.bf16.mxu0 %vm438_vm0, %v3347_v34 }
  0xa5   : > { %2563 = vmatmul.mubr.msk.bf16.vlgmr.msra.gmra.mrb[8].mxu1 %vm438_vm0, %v3261_v48 }
  0xa6   : > { %2659 = vmatmul.mubr.msk.bf16.gmra.mrb[8].mxu0 %vm438_vm0, %v1462_v41  ;;  %2566 = vmatprep.mubr.msk.bf16.mxu1 %vm438_vm0, %v3278_v56  ;;  %v3444_v56 = vld [vmem:[%s3518_s4] ss:$0 sm:$0xff] }
  0xa7   : > { %2662 = vmatprep.mubr.msk.bf16.mxu0 %vm438_vm0, %v1463_v52 }
  0xad   : > { %2567 = vmatmul.mubr.msk.bf16.gmra.mrb[12].mxu1 %vm438_vm0, %v3283_v60 }
  0xae   : > { %2663 = vmatmul.mubr.msk.bf16.gmra.mrb[12].mxu0 %vm438_vm0, %v1464_v5 }
 0x158   : > { %v2532_v7 = vpop.f32.mrb[0].mxu1 }
 0x159   : > { %v1058_v33 = vpop.f32.mrb[1].mxu1 }
 0x15a   : > { %v2533_v38 = vpop.f32.mrb[2].mxu1 }
 0x15b   : > { %v1061_v43 = vpop.f32.mrb[3].mxu1 }
 0x160   : > { %v2536_v57 = vpop.f32.mrb[4].mxu1 }
 0x161   : > { %v1074_v45 = vpop.f32.mrb[5].mxu1 }
 0x162   : > { %v2537_v48 = vpop.f32.mrb[6].mxu1 }
 0x163   : > { %v1077_v54 = vpop.f32.mrb[7].mxu1 }
 0x169   : > { %v2652_v55 = vpop.f32.mrb[0].mxu0 }
 0x16a   : > { %v2674_v59 = vadd.f32 %v2652_v55, %v2532_v7  ;;  %v1854_v60 = vpop.f32.mrb[1].mxu0 }
 0x16b   : > { %v2675_v61 = vadd.f32 %v1854_v60, %v1058_v33  ;;  %v2653_v62 = vpop.f32.mrb[2].mxu0 }
 0x16c   : > { %v1942_v63 = vadd.f32 %v2674_v59, %v3444_v56  ;;  %v2676_v0 = vadd.f32 %v2653_v62, %v2533_v38  ;;  %v1857_v27 = vpop.f32.mrb[3].mxu0 }
 0x16d   : > { %v1940_v2 = vadd.f32 %v2675_v61, %v3444_v56  ;;  %v2677_v4 = vadd.f32 %v1857_v27, %v1061_v43 }
 0x16e   : > { %v1958_v6 = vmax.f32 %v1942_v63, 0.0  ;;  %v1943_v8 = vadd.f32 %v2676_v0, %v3444_v56 }
 0x16f   : > { %v1956_v9 = vmax.f32 %v1940_v2, 0.0  ;;  %v1941_v10 = vadd.f32 %v2677_v4, %v3444_v56 }
 0x170   : > { %1974 = vst.msk [vmem:[%s3450_s19 + $0x10] sm:$0xff] %vm438_vm0, %v1958_v6  ;;  %v1959_v11 = vmax.f32 %v1943_v8, 0.0 }
 0x171   : > { %1972 = vst.msk [vmem:[%s3450_s19] sm:$0xff] %vm438_vm0, %v1956_v9  ;;  %v1957_v12 = vmax.f32 %v1941_v10, 0.0  ;;  %v2656_v13 = vpop.f32.mrb[4].mxu0 }
 0x172   : > { %1975 = vst.msk [vmem:[%s3450_s19 + $0x18] sm:$0xff] %vm438_vm0, %v1959_v11  ;;  %v2678_v14 = vadd.f32 %v2656_v13, %v2536_v57  ;;  %v1870_v15 = vpop.f32.mrb[5].mxu0 }
 0x173   : > { %1973 = vst.msk [vmem:[%s3450_s19 + $0x8] sm:$0xff] %vm438_vm0, %v1957_v12  ;;  %v2679_v16 = vadd.f32 %v1870_v15, %v1074_v45  ;;  %v2657_v19 = vpop.f32.mrb[6].mxu0 }
 0x174   : > { %v1946_v20 = vadd.f32 %v2678_v14, %v3444_v56  ;;  %v2680_v21 = vadd.f32 %v2657_v19, %v2537_v48  ;;  %v1873_v22 = vpop.f32.mrb[7].mxu0 }
 0x175   : > { %v1944_v23 = vadd.f32 %v2679_v16, %v3444_v56  ;;  %v2681_v24 = vadd.f32 %v1873_v22, %v1077_v54 }
 0x176   : > { %v1962_v25 = vmax.f32 %v1946_v20, 0.0  ;;  %v1947_v26 = vadd.f32 %v2680_v21, %v3444_v56 }
 0x177   : > { %v1960_v28 = vmax.f32 %v1944_v23, 0.0  ;;  %v1945_v29 = vadd.f32 %v2681_v24, %v3444_v56 }
 0x178   : > { %1978 = vst.msk [vmem:[%s3450_s19 + $0x30] sm:$0xff] %vm438_vm0, %v1962_v25  ;;  %v1963_v30 = vmax.f32 %v1947_v26, 0.0  ;;  %v2564_v31 = vpop.f32.mrb[8].mxu1 }
 0x179   : > { %1976 = vst.msk [vmem:[%s3450_s19 + $0x20] sm:$0xff] %vm438_vm0, %v1960_v28  ;;  %v1961_v32 = vmax.f32 %v1945_v29, 0.0  ;;  %v2660_v35 = vpop.f32.mrb[8].mxu0  ;;  %v1239_v34 = vpop.f32.mrb[9].mxu1 }
 0x17a   : > { %1979 = vst.msk [vmem:[%s3450_s19 + $0x38] sm:$0xff] %vm438_vm0, %v1963_v30  ;;  %v2682_v36 = vadd.f32 %v2660_v35, %v2564_v31  ;;  %v1886_v37 = vpop.f32.mrb[9].mxu0  ;;  %v2565_v39 = vpop.f32.mrb[10].mxu1 }
 0x17b   : > { %1977 = vst.msk [vmem:[%s3450_s19 + $0x28] sm:$0xff] %vm438_vm0, %v1961_v32  ;;  %v2683_v41 = vadd.f32 %v1886_v37, %v1239_v34  ;;  %v2661_v42 = vpop.f32.mrb[10].mxu0  ;;  %v1242_v53 = vpop.f32.mrb[11].mxu1 }
 0x17c   : > { %v1950_v58 = vadd.f32 %v2682_v36, %v3444_v56  ;;  %v2684_v17 = vadd.f32 %v2661_v42, %v2565_v39  ;;  %v1889_v44 = vpop.f32.mrb[11].mxu0 }
 0x17d   : > { %v1948_v46 = vadd.f32 %v2683_v41, %v3444_v56  ;;  %v2685_v47 = vadd.f32 %v1889_v44, %v1242_v53 }
 0x17e   : > { %v1966_v18 = vmax.f32 %v1950_v58, 0.0  ;;  %v1951_v49 = vadd.f32 %v2684_v17, %v3444_v56 }
 0x17f   : > { %v1964_v40 = vmax.f32 %v1948_v46, 0.0  ;;  %v1949_v50 = vadd.f32 %v2685_v47, %v3444_v56 }
 0x180   : > { %1982 = vst.msk [vmem:[%s3450_s19 + $0x50] sm:$0xff] %vm438_vm0, %v1966_v18  ;;  %v1967_v51 = vmax.f32 %v1951_v49, 0.0  ;;  %v2568_v52 = vpop.f32.mrb[12].mxu1 }
 0x181   : > { %1980 = vst.msk [vmem:[%s3450_s19 + $0x40] sm:$0xff] %vm438_vm0, %v1964_v40  ;;  %v1965_v1 = vmax.f32 %v1949_v50, 0.0  ;;  %v2664_v3 = vpop.f32.mrb[12].mxu0  ;;  %v1255_v5 = vpop.f32.mrb[13].mxu1 }
 0x182   : > { %1983 = vst.msk [vmem:[%s3450_s19 + $0x58] sm:$0xff] %vm438_vm0, %v1967_v51  ;;  %v2686_v7 = vadd.f32 %v2664_v3, %v2568_v52  ;;  %v1902_v33 = vpop.f32.mrb[13].mxu0  ;;  %v2569_v38 = vpop.f32.mrb[14].mxu1 }
 0x183   : > { %1981 = vst.msk [vmem:[%s3450_s19 + $0x48] sm:$0xff] %vm438_vm0, %v1965_v1  ;;  %v2687_v43 = vadd.f32 %v1902_v33, %v1255_v5  ;;  %v2665_v57 = vpop.f32.mrb[14].mxu0  ;;  %v1258_v45 = vpop.f32.mrb[15].mxu1 }
 0x184   : > { %v1954_v48 = vadd.f32 %v2686_v7, %v3444_v56  ;;  %v2688_v54 = vadd.f32 %v2665_v57, %v2569_v38  ;;  %v1905_v55 = vpop.f32.mrb[15].mxu0 }
 0x185   : > { %v1952_v59 = vadd.f32 %v2687_v43, %v3444_v56  ;;  %v2689_v60 = vadd.f32 %v1905_v55, %v1258_v45 }
 0x186   : > { %v1970_v61 = vmax.f32 %v1954_v48, 0.0  ;;  %v1955_v62 = vadd.f32 %v2688_v54, %v3444_v56 }
 0x187   : > { %v1968_v63 = vmax.f32 %v1952_v59, 0.0  ;;  %v1953_v0 = vadd.f32 %v2689_v60, %v3444_v56 }
 0x188   : > { %1986 = vst.msk [vmem:[%s3450_s19 + $0x70] sm:$0xff] %vm438_vm0, %v1970_v61  ;;  %v1971_v27 = vmax.f32 %v1955_v62, 0.0 }
 0x189   : > { %1984 = vst.msk [vmem:[%s3450_s19 + $0x60] sm:$0xff] %vm438_vm0, %v1968_v63  ;;  %v1969_v2 = vmax.f32 %v1953_v0, 0.0 }
 0x18a   : > { %1987 = vst.msk [vmem:[%s3450_s19 + $0x78] sm:$0xff] %vm438_vm0, %v1971_v27 }
 0x18b   : > { %1985 = vst.msk [vmem:[%s3450_s19 + $0x68] sm:$0xff] %vm438_vm0, %v1969_v2 }
 0x18c PF: > { %s15_s22 = sadd.s32 1, %s2920_s22   ;;  %s3521_s18 = smov %s2912_s20 }
 0x18d   : > { %p12_p12 = scmp.ge.s32.totalorder %s15_s22, 6   ;;  %s3522_s19 = smov %s2916_s21 }
 0x18e   : > { %s3523_s20 = smov %s3526_s23  ;;  %s3524_s21 = smov %s3530_s24 }
 0x18f   :  { %14 = sbr.rel (!%p12_p12) target bundleno = 3 (0x3), region = 86 }

// kernel: closed_call.14
= control target key start
LH: loop header
LB: loop body
LE: loop exit
PB: predicated region body
PF: predicated region fallthrough
CT: control target
= control target key end

     0   :  { %s3080_s21 = smov 0   ;;  %s3082_s22 = smov 0   ;;  %s3663_s0 = inlined_call_operand.vmem [shape: f32[2,16,18,64], index: 0, kind: input, shape index: {}, may-alias: {0,1,2}]   ;;  %s3664_s1 = inlined_call_operand.vmem [shape: f32[2,16,18,64], index: 1, kind: input, shape index: {}, may-alias: {0,1,2}]   ;;  %s3665_s2 = inlined_call_operand.vmem [shape: f32[2,16,18,64], index: 2, kind: input, shape index: {}, may-alias: {0,1,2}]   ;;  %s3666_s3 = inlined_call_operand.vmem [shape: f32[2,16,16,64], index: 3, kind: input, shape index: {}]   ;;  %s3667_s4 = inlined_call_operand.vmem [shape: bf16[3,3,64,64], index: 4, kind: input, shape index: {}]   ;;  %s3668_s5 = inlined_call_operand.vmem [shape: f32[1,64], index: 5, kind: input, shape index: {}]   ;;  %s3669_s6 = inlined_call_operand.vmem [shape: f32[2,16,16,64], index: 6, kind: output, shape index: {}]  }
   0x1   :  { %s3084_s23 = smov 0   ;;  %s3086_s24 = smov 0  }
   0x2   :  { %s3088_s25 = smov 0  }
   0x3 LB: > { %s25_s26 = sadd.s32 1, %s3035_s23  ;;  %s28_s27 = sadd.s32 1, %s3039_s24  ;;  %s3043_s25 = sphi %s3088_s25, %s16_s25   ;;  %s3039_s24 = sphi %s3086_s24, %s3674_s24   ;;  %s3035_s23 = sphi %s3084_s23, %s3673_s23   ;;  %s3031_s22 = sphi %s3082_s22, %s3672_s22   ;;  %s3027_s21 = sphi %s3080_s21, %s3671_s21  }
   0x4   : > { %p26_p0 = scmp.ge.s32.totalorder %s25_s26, 2  ;;  %p2258_p1 = scmp.ge.s32.totalorder %s3043_s25, 1 }
   0x5   : > { %p316_p2 = scmp.lt.s32.totalorder %s3043_s25, 5 }
   0x6   : > { %s3676_s26 = smov (%p26_p0, %s25_s26), 0  ;;  %s3678_s27 = smov (!%p26_p0, %s28_s27), %s3039_s24 }
   0x7   : > { %p317_p3 = pnand %p2258_p1, %p316_p2  ;;  %p30_p4 = scmp.ge.s32.totalorder %s3678_s27, 2 }
   0x8   : > { %v2969_v0 = vld [vmem:[%s3667_s4 + $0x60] sm:$0xff] (!%p317_p3)   ;;  %s3116_s30 = sshll.u32 (!%p317_p3), %s3027_s21, 3  ;;  %p393_p5 = scmp.lt.s32.totalorder (!%p317_p3), %s3031_s22, 1  ;;  %v2971_v2 = vld [vmem:[%s3667_s4 + $0x68] sm:$0xff] (!%p317_p3)   ;;  %v2973_v4 = vld [vmem:[%s3667_s4 + $0x70] sm:$0xff] (!%p317_p3)   ;;  %vm504_vm0 = vcmask (!%p317_p3), 523264  }
   0x9   : > { %s3680_s27 = smov (%p30_p4, %s3678_s27), 0  ;;  %320 = sbr.rel (%p317_p3) target bundleno = 398 (0x18e), region = 44 }
   0xa   : > { %v3121_v1 = vld [vmem:[%s3667_s4 + $0x80] sm:$0xff] (!%p317_p3)   ;;  %2573 = vmatprep.subr.bf16.mxu1 (!%p317_p3), %v2969_v0  ;;  %p395_p6 = scmp.lt.s32.totalorder (!%p317_p3), %s3116_s30, 15  ;;  %v3131_v3 = vld [vmem:[%s3667_s4 + $0x88] sm:$0xff] (!%p317_p3)   ;;  %v3146_v5 = vld [vmem:[%s3667_s4 + $0x90] sm:$0xff] (!%p317_p3)   ;;  %vm507_vm1 = vcmask (!%p317_p3), 517120   ;;  %s3174_s16 = sadd.s32 (!%p317_p3), 4294967295, %s3116_s30 }
   0xb   : > { %2669 = vmatprep.subr.bf16.mxu0 (!%p317_p3), %v3121_v1  ;;  %2574 = vmatpush3.bf16.msra.mxu1 (!%p317_p3), %v2969_v0  ;;  %v2975_v6 = vld [vmem:[%s3667_s4 + $0x78] sm:$0xff] (!%p317_p3)   ;;  %v3171_v8 = vld [vmem:[%s3667_s4] sm:$0xff] (!%p317_p3)   ;;  %p405_p7 = scmp.gt.s32.totalorder (!%p317_p3), %s3174_s16, 0  ;;  %p2263_p8 = scmp.lt.s32.totalorder (!%p317_p3), %s3174_s16, 15  ;;  %v2979_v31 = vld [vmem:[%s3667_s4 + $0xe8] sm:$0xff] (!%p317_p3)  }
   0xc   : > { %2670 = vmatpush3.bf16.msra.mxu0 (!%p317_p3), %v3121_v1  ;;  %2575 = vmatprep.subr.bf16.mxu1 (!%p317_p3), %v2971_v2  ;;  %v3159_v7 = vld [vmem:[%s3667_s4 + $0x98] sm:$0xff] (!%p317_p3)   ;;  %v3182_v12 = vld [vmem:[%s3667_s4 + $0xe0] sm:$0xff] (!%p317_p3)   ;;  %s2464_s28 = sadd.s32 (!%p317_p3), 8, %s3116_s30  ;;  %p490_p9 = scmp.gt.s32.totalorder (!%p317_p3), %s3027_s21, 0  ;;  %v2980_v32 = vld [vmem:[%s3667_s4 + $0x8] sm:$0xff] (!%p317_p3)  }
   0xd   : > { %2671 = vmatprep.subr.bf16.mxu0 (!%p317_p3), %v3131_v3  ;;  %p3226_p10 = scmp.lt.s32.totalorder (!%p317_p3), %s2464_s28, 15  ;;  %v2981_v44 = vld [vmem:[%s3667_s4 + $0xf0] sm:$0xff] (!%p317_p3)   ;;  %p497_p11 = scmp.lt.s32.totalorder (!%p317_p3), %s3027_s21, 1  ;;  %v2982_v59 = vld [vmem:[%s3667_s4 + $0xf8] sm:$0xff] (!%p317_p3)  }
   0xe   : > { %v2983_v47 = vld [vmem:[%s3667_s4 + $0x10] sm:$0xff] (!%p317_p3)   ;;  %v2985_v0 = vld [vmem:[%s3667_s4 + $0x18] sm:$0xff] (!%p317_p3)  }
   0xf   : > { %2576 = vmatpush3.bf16.msra.mxu1 (!%p317_p3), %v2971_v2 }
  0x10   : > { %s3682_s22 = smov (!%p393_p5, %s3031_s22), 1  ;;  %2672 = vmatpush3.bf16.msra.mxu0 %v3131_v3  ;;  %2577 = vmatprep.subr.bf16.mxu1 %v2973_v4  ;;  %s3686_s28 = smov (!%p3226_p10, %s2464_s28), 15 }
  0x11   : > { %s3140_s15 = scalar_select %p395_p6, %s3116_s30, 15  ;;  %2673 = vmatprep.subr.bf16.mxu0 %v3146_v5 }
  0x12   : > { %s3149_s18 = smul.u32 48, %s3682_s22  ;;  %s3688_s28 = smov (!%p3226_p10, %s3686_s28), 15 }
  0x13   : > { %s2925_s19 = smul.u32 3, %s3140_s15  ;;  %2578 = vmatpush3.bf16.msra.mxu1 %v2973_v4 }
  0x14   : > { %2674 = vmatpush3.bf16.msra.mxu0 %v3146_v5  ;;  %2579 = vmatprep.subr.bf16.mxu1 %v2975_v6  ;;  %s406_s20 = scalar_select %p405_p7, %s3174_s16, 0 }
  0x15   : > { %s399_s8 = sadd.s32 %s3149_s18, %s2925_s19  ;;  %2675 = vmatprep.subr.bf16.mxu0 %v3159_v7  ;;  %s3296_s7 = smul.u32 3, %s3688_s28 }
  0x16   : > { %s2260_s9 = sshll.u32 %s399_s8, 3  ;;  %s3684_s20 = smov (!%p2263_p8, %s406_s20), 15 }
  0x17   : > { %s3166_s12 = scalar_lea.vmem %s3663_s0, %s2260_s9  ;;  %2580 = vmatpush3.bf16.msra.mxu1 %v2975_v6  ;;  %s2927_s29 = smul.u32 3, %s3684_s20  ;;  %v2984_v6 = vld [vmem:[%s3667_s4 + $0x40] sm:$0xff]  }
  0x18   : > { %v460_v9 = vld [vmem:[%s3166_s12] sm:$0xff]  ;;  %v461_v10 = vld [vmem:[%s3166_s12 + $0x8] sm:$0xff]  ;;  %v462_v11 = vld [vmem:[%s3166_s12 + $0x10] sm:$0x3]  ;;  %2676 = vmatpush3.bf16.msra.mxu0 %v3159_v7  ;;  %2597 = vmatprep.subr.bf16.mxu1 %v3171_v8  ;;  %s3242_s13 = scalar_select %p490_p9, 1, 0 }
  0x19   : > { %510 = vst.msk [vmem:[#allocation2 + $0x18] sm:$0xff] %vm504_vm0, %v460_v9  ;;  %511 = vst.msk [vmem:[#allocation2 + $0x20] sm:$0xff] %vm504_vm0, %v461_v10  ;;  %v463_v13 = vld [vmem:[%s3166_s12 + $0x18] sm:$0xff]  ;;  %v464_v14 = vld [vmem:[%s3166_s12 + $0x20] sm:$0xff]  ;;  %2693 = vmatprep.subr.bf16.mxu0 %v3182_v12  ;;  %s3249_s14 = sadd.s32 %s2927_s29, %s3149_s18  ;;  %s430_s16 = sadd.s32 %s3296_s7, %s3149_s18 }
  0x1a   : > { %512 = vst.msk [vmem:[#allocation2 + $0x28] sm:$0x3] %vm507_vm1, %v462_v11  ;;  %v465_v15 = vld [vmem:[%s3166_s12 + $0x28] sm:$0x3]  ;;  %v466_v16 = vld [vmem:[%s3166_s12 + $0x30] sm:$0xff]  ;;  %v467_v17 = vld [vmem:[%s3166_s12 + $0x38] sm:$0xff]  ;;  %s492_s29 = scvt.s32.f32 %s3242_s13 }
  0x1b   : > { %513 = vst.msk [vmem:[#allocation2 + $0x30] sm:$0xff] %vm504_vm0, %v463_v13  ;;  %514 = vst.msk [vmem:[#allocation2 + $0x38] sm:$0xff] %vm504_vm0, %v464_v14  ;;  %v468_v18 = vld [vmem:[%s3166_s12 + $0x40] sm:$0x3]  ;;  %v469_v19 = vld [vmem:[%s3166_s12 + $0x48] sm:$0xff]  ;;  %s2268_s20 = sshll.u32 %s3249_s14, 3 }
  0x1c   : > { %515 = vst.msk [vmem:[#allocation2 + $0x40] sm:$0x3] %vm507_vm1, %v465_v15  ;;  %518 = vst.msk [vmem:[#allocation2 + $0x58] sm:$0x3] %vm507_vm1, %v468_v18  ;;  %v470_v20 = vld [vmem:[%s3166_s12 + $0x50] sm:$0xff]  ;;  %v472_v22 = vld [vmem:[%s3166_s12 + $0x60] sm:$0xff]  ;;  %s3308_s10 = scalar_lea.vmem %s3664_s1, %s2268_s20  ;;  %v3313_v60 = vstv %s492_s29 }
  0x1d   : > { %516 = vst.msk [vmem:[#allocation2 + $0x48] sm:$0xff] %vm504_vm0, %v466_v16  ;;  %517 = vst.msk [vmem:[#allocation2 + $0x50] sm:$0xff] %vm504_vm0, %v467_v17  ;;  %v471_v21 = vld [vmem:[%s3166_s12 + $0x58] sm:$0x3]  ;;  %v473_v23 = vld [vmem:[%s3166_s12 + $0x68] sm:$0xff]  ;;  %s2273_s20 = sshll.u32 %s430_s16, 3 }
  0x1e   : > { %519 = vst.msk [vmem:[#allocation2 + $0x60] sm:$0xff] %vm504_vm0, %v469_v19  ;;  %520 = vst.msk [vmem:[#allocation2 + $0x68] sm:$0xff] %vm504_vm0, %v470_v20  ;;  %v475_v52 = vld [vmem:[%s3166_s12 + $0x78] sm:$0xff]  ;;  %v476_v54 = vld [vmem:[%s3166_s12 + $0x80] sm:$0xff]  ;;  %s3320_s13 = scalar_select %p497_p11, 1, 0 }
  0x1f   : > { %521 = vst.msk [vmem:[#allocation2 + $0x70] sm:$0x3] %vm507_vm1, %v471_v21  ;;  %v478_v55 = vld [vmem:[%s3166_s12 + $0x90] sm:$0xff]  ;;  %v479_v56 = vld [vmem:[%s3166_s12 + $0x98] sm:$0xff]  ;;  %v481_v61 = vld [vmem:[%s3166_s12 + $0xa8] sm:$0xff]  ;;  %s432_s9 = scalar_lea.vmem %s3665_s2, %s2273_s20 }
  0x20   : > { %v540_v24 = vld [vmem:[#allocation2 + $0x18] sm:$0xff]  ;;  %v541_v25 = vld [vmem:[#allocation2 + $0x20] sm:$0xff]  ;;  %522 = vst.msk [vmem:[#allocation2 + $0x78] sm:$0xff] %vm504_vm0, %v472_v22  ;;  %523 = vst.msk [vmem:[#allocation2 + $0x80] sm:$0xff] %vm504_vm0, %v473_v23  ;;  %s499_s29 = scvt.s32.f32 %s3320_s13  ;;  %s2276_s13 = sshll.u32 %s3682_s22, 5 }
  0x21   : > { %v1005_v26 = vld [vmem:[#allocation2 + $0x19] sm:$0xff]  ;;  %v3232_v27 = vpack.c.bf16 %v541_v25, %v540_v24  ;;  %v1006_v28 = vld [vmem:[#allocation2 + $0x21] sm:$0xff]  ;;  %525 = vst.msk [vmem:[#allocation2 + $0x90] sm:$0xff] %vm504_vm0, %v475_v52  ;;  %526 = vst.msk [vmem:[#allocation2 + $0x98] sm:$0xff] %vm504_vm0, %v476_v54 }
  0x22   : > { %v542_v29 = vld [vmem:[#allocation2 + $0x30] sm:$0xff]  ;;  %v543_v30 = vld [vmem:[#allocation2 + $0x38] sm:$0xff]  ;;  %v3244_v33 = vpack.c.bf16 %v1006_v28, %v1005_v26  ;;  %528 = vst.msk [vmem:[#allocation2 + $0xa8] sm:$0xff] %vm504_vm0, %v478_v55  ;;  %529 = vst.msk [vmem:[#allocation2 + $0xb0] sm:$0xff] %vm504_vm0, %v479_v56  ;;  %v500_v21 = vstv %s499_s29 }
  0x23   : > { %v3246_v34 = vpack.c.bf16 %v543_v30, %v542_v29  ;;  %v1007_v35 = vld [vmem:[#allocation2 + $0x31] sm:$0xff]  ;;  %v1008_v36 = vld [vmem:[#allocation2 + $0x39] sm:$0xff]  ;;  %2581 = vmatprep.mubr.msk.bf16.mxu1 %vm504_vm0, %v3232_v27  ;;  %531 = vst.msk [vmem:[#allocation2 + $0xc0] sm:$0xff] %vm504_vm0, %v481_v61  ;;  %v485_v4 = vld [vmem:[%s3308_s10 + $0x8] sm:$0xff] }
  0x24   : > { %v544_v37 = vld [vmem:[#allocation2 + $0x48] sm:$0xff]  ;;  %v3253_v38 = vpack.c.bf16 %v1008_v36, %v1007_v35  ;;  %v545_v39 = vld [vmem:[#allocation2 + $0x50] sm:$0xff]  ;;  %2677 = vmatprep.mubr.msk.bf16.mxu0 %vm504_vm0, %v3244_v33  ;;  %v484_v2 = vld [vmem:[%s3308_s10] sm:$0xff]  ;;  %v495_v9 = vmul.f32 %v3313_v60, %v485_v4 }
  0x25   : > { %v1009_v40 = vld [vmem:[#allocation2 + $0x49] sm:$0xff]  ;;  %v1010_v41 = vld [vmem:[#allocation2 + $0x51] sm:$0xff]  ;;  %2582 = vmatmul.mubr.msk.bf16.vlgmr.msra.gmra.mrb[0].mxu1 %vm504_vm0, %v3246_v34  ;;  %v3265_v42 = vpack.c.bf16 %v545_v39, %v544_v37  ;;  %v546_v45 = vld [vmem:[#allocation2 + $0x60] sm:$0xff] }
  0x26   : > { %v3267_v43 = vpack.c.bf16 %v1010_v41, %v1009_v40  ;;  %2598 = vmatpush3.bf16.msra.mxu1 %v3171_v8  ;;  %2678 = vmatmul.mubr.msk.bf16.vlgmr.msra.gmra.mrb[0].mxu0 %vm504_vm0, %v3253_v38  ;;  %v547_v46 = vld [vmem:[#allocation2 + $0x68] sm:$0xff]  ;;  %v482_v62 = vld [vmem:[%s3166_s12 + $0xb0] sm:$0xff]  ;;  %v494_v8 = vmul.f32 %v3313_v60, %v484_v2  ;;  %506 = vst.msk [vmem:[#allocation2 + $0x8] sm:$0xff] %vm504_vm0, %v495_v9  ;;  %v480_v13 = vld [vmem:[%s3166_s12 + $0xa0] sm:$0x3] }
  0x27   : > { %2694 = vmatpush3.bf16.msra.mxu0 %v3182_v12  ;;  %2585 = vmatprep.mubr.msk.bf16.mxu1 %vm504_vm0, %v3265_v42  ;;  %v1011_v48 = vld [vmem:[#allocation2 + $0x61] sm:$0xff]  ;;  %v1012_v49 = vld [vmem:[#allocation2 + $0x69] sm:$0xff]  ;;  %v548_v50 = vld [vmem:[#allocation2 + $0x78] sm:$0xff]  ;;  %v3290_v53 = vpack.c.bf16 %v547_v46, %v546_v45  ;;  %532 = vst.msk [vmem:[#allocation2 + $0xc8] sm:$0xff] %vm504_vm0, %v482_v62 }
  0x28   : > { %2695 = vmatprep.subr.bf16.mxu0 %v2979_v31  ;;  %2599 = vmatprep.subr.bf16.mxu1 %v2980_v32  ;;  %v549_v51 = vld [vmem:[#allocation2 + $0x80] sm:$0xff]  ;;  %v3298_v57 = vpack.c.bf16 %v1012_v49, %v1011_v48  ;;  %v474_v63 = vld [vmem:[%s3166_s12 + $0x70] sm:$0x3]  ;;  %v477_v10 = vld [vmem:[%s3166_s12 + $0x88] sm:$0x3]  ;;  %505 = vst.msk [vmem:[#allocation2] sm:$0xff] %vm504_vm0, %v494_v8 }
  0x29   : > { %2681 = vmatprep.mubr.msk.bf16.mxu0 %vm504_vm0, %v3267_v43  ;;  %v3300_v58 = vpack.c.bf16 %v549_v51, %v548_v50  ;;  %524 = vst.msk [vmem:[#allocation2 + $0x88] sm:$0x3] %vm507_vm1, %v474_v63  ;;  %v550_v11 = vld [vmem:[#allocation2 + $0x90] sm:$0xff]  ;;  %v3351_v12 = vld [vmem:[%s3667_s4 + $0xc0] sm:$0xff]   ;;  %527 = vst.msk [vmem:[#allocation2 + $0xa0] sm:$0x3] %vm507_vm1, %v477_v10 }
  0x2a   : > { %2600 = vmatpush3.bf16.msra.mxu1 %v2980_v32  ;;  %v551_v14 = vld [vmem:[#allocation2 + $0x98] sm:$0xff]  ;;  %v552_v15 = vld [vmem:[#allocation2 + $0xa8] sm:$0xff]  ;;  %v553_v16 = vld [vmem:[#allocation2 + $0xb0] sm:$0xff]  ;;  %530 = vst.msk [vmem:[#allocation2 + $0xb8] sm:$0x3] %vm507_vm1, %v480_v13 }
  0x2b   : > { %2696 = vmatpush3.bf16.msra.mxu0 %v2979_v31  ;;  %2601 = vmatprep.subr.bf16.mxu1 %v2983_v47  ;;  %v3357_v17 = vpack.c.bf16 %v551_v14, %v550_v11  ;;  %v3359_v18 = vpack.c.bf16 %v553_v16, %v552_v15  ;;  %v483_v19 = vld [vmem:[%s3166_s12 + $0xb8] sm:$0x3]  ;;  %v2986_v20 = vld [vmem:[%s3667_s4 + $0x48] sm:$0xff]   ;;  %v554_v22 = vld [vmem:[#allocation2 + $0xc0] sm:$0xff]  ;;  %s2275_s12 = sshll.u32 %s3140_s15, 1 }
  0x2c   : > { %2697 = vmatprep.subr.bf16.mxu0 %v2981_v44  ;;  %533 = vst.msk [vmem:[#allocation2 + $0xd0] sm:$0x3] %vm507_vm1, %v483_v19  ;;  %v1013_v23 = vld [vmem:[#allocation2 + $0x79] sm:$0xff]  ;;  %v1015_v25 = vld [vmem:[#allocation2 + $0x91] sm:$0xff]  ;;  %v488_v29 = vld [vmem:[%s432_s9 + $0x8] sm:$0xff]  ;;  %s444_s14 = sadd.s32 %s2276_s13, %s2275_s12 }
  0x2d   : > { %2586 = vmatmul.mubr.msk.bf16.gmra.mrb[4].mxu1 %vm504_vm0, %v3290_v53  ;;  %v2988_v26 = vld [vmem:[%s3667_s4 + $0x50] sm:$0xff]   ;;  %v487_v28 = vld [vmem:[%s432_s9] sm:$0xff]  ;;  %v539_v32 = vld [vmem:[#allocation2 + $0x8] sm:$0xff]  ;;  %v502_v36 = vmul.f32 %v500_v21, %v488_v29  ;;  %s2277_s30 = sshll.u32 %s444_s14, 3 }
  0x2e   : > { %2682 = vmatmul.mubr.msk.bf16.gmra.mrb[4].mxu0 %vm504_vm0, %v3298_v57  ;;  %2589 = vmatprep.mubr.msk.bf16.mxu1 %vm504_vm0, %v3300_v58  ;;  %v555_v24 = vld [vmem:[#allocation2 + $0xc8] sm:$0xff]  ;;  %v501_v35 = vmul.f32 %v500_v21, %v487_v28  ;;  %v489_v39 = vld [vmem:[%s432_s9 + $0x10] sm:$0x3]  ;;  %v2990_v49 = vld [vmem:[%s3667_s4 + $0x58] sm:$0xff]   ;;  %s3572_s21 = scalar_lea.vmem %s3666_s3, %s2277_s30  ;;  %s3589_s19 = scalar_lea.vmem %s3669_s6, %s2277_s30 }
  0x2f   : > { %2698 = vmatpush3.bf16.msra.mxu0 %v2981_v44  ;;  %2701 = vmatprep.mubr.msk.bf16.mxu0 %vm504_vm0, %v3253_v38  ;;  %v538_v31 = vld [vmem:[#allocation2] sm:$0xff]  ;;  %v3381_v40 = vpack.c.bf16 %v555_v24, %v554_v22  ;;  %v503_v41 = vmul.f32 %v500_v21, %v489_v39  ;;  %536 = vst.msk [vmem:[#allocation2 + $0xe0] sm:$0xff] %vm504_vm0, %v502_v36  ;;  %v486_v44 = vld [vmem:[%s3308_s10 + $0x10] sm:$0x3]  ;;  %v1505_v10 = vld [vmem:[#allocation2 + $0x32] sm:$0xff] }
  0x30   : > { %2699 = vmatprep.subr.bf16.mxu0 %v2982_v59  ;;  %2602 = vmatpush3.bf16.msra.mxu1 %v2983_v47  ;;  %v1014_v30 = vld [vmem:[#allocation2 + $0x81] sm:$0xff]  ;;  %v1016_v37 = vld [vmem:[#allocation2 + $0x99] sm:$0xff]  ;;  %535 = vst.msk [vmem:[#allocation2 + $0xd8] sm:$0xff] %vm504_vm0, %v501_v35  ;;  %v558_v46 = vpack.c.bf16 %v539_v32, %v538_v31  ;;  %v496_v47 = vmul.f32 %v3313_v60, %v486_v44  ;;  %v1017_v50 = vld [vmem:[#allocation2 + $0xa9] sm:$0xff] }
  0x31   : > { %2603 = vmatprep.subr.bf16.mxu1 %v2985_v0  ;;  %v3386_v45 = vpack.c.bf16 %v1014_v30, %v1013_v23  ;;  %v3389_v48 = vpack.c.bf16 %v1016_v37, %v1015_v25  ;;  %537 = vst.msk [vmem:[#allocation2 + $0xe8] sm:$0x3] %vm507_vm1, %v503_v41  ;;  %v1018_v51 = vld [vmem:[#allocation2 + $0xb1] sm:$0xff]  ;;  %v2992_v52 = vld [vmem:[%s3667_s4 + $0xa0] sm:$0xff]   ;;  %v2994_v15 = vld [vmem:[%s3667_s4 + $0xa8] sm:$0xff]  }
  0x32   : > { %508 = vst.msk [vmem:[#allocation2 + $0x10] sm:$0x3] %vm507_vm1, %v496_v47  ;;  %v1019_v54 = vld [vmem:[#allocation2 + $0xc1] sm:$0xff]  ;;  %v3406_v56 = vpack.c.bf16 %v1018_v51, %v1017_v50  ;;  %v2991_v61 = vld [vmem:[%s3667_s4 + $0xd0] sm:$0xff]   ;;  %v2998_v25 = vld [vmem:[%s3667_s4 + $0xb8] sm:$0xff]  }
  0x33   : > { %2700 = vmatpush3.bf16.msra.mxu0 %v2982_v59  ;;  %v1020_v55 = vld [vmem:[#allocation2 + $0xc9] sm:$0xff]  ;;  %v1503_v8 = vld [vmem:[#allocation2 + $0x1a] sm:$0xff]  ;;  %v1508_v19 = vld [vmem:[#allocation2 + $0x52] sm:$0xff] }
  0x34   : > { %2717 = vmatprep.subr.bf16.mxu0 %v2984_v6  ;;  %2604 = vmatpush3.bf16.msra.mxu1 %v2985_v0  ;;  %v2989_v59 = vld [vmem:[%s3667_s4 + $0xc8] sm:$0xff]   ;;  %v3411_v60 = vpack.c.bf16 %v1020_v55, %v1019_v54  ;;  %v1506_v11 = vld [vmem:[#allocation2 + $0x3a] sm:$0xff]  ;;  %v2996_v22 = vld [vmem:[%s3667_s4 + $0xb0] sm:$0xff]  }
  0x35   : > { %2590 = vmatmul.mubr.msk.bf16.gmra.mrb[8].mxu1 %vm504_vm0, %v3357_v17  ;;  %2621 = vmatprep.subr.bf16.mxu1 %v3351_v12  ;;  %v1501_v63 = vld [vmem:[#allocation2 + $0x2] sm:$0xff]  ;;  %v3437_v14 = vpack.c.bf16 %v1506_v11, %v1505_v10  ;;  %v1507_v16 = vld [vmem:[#allocation2 + $0x4a] sm:$0xff]  ;;  %v1513_v30 = vld [vmem:[#allocation2 + $0x92] sm:$0xff] }
  0x36   : > { %2702 = vmatmul.mubr.msk.bf16.vlgmr.msra.gmra.mrb[0].mxu0 %vm504_vm0, %v3267_v43  ;;  %2593 = vmatprep.mubr.msk.bf16.mxu1 %vm504_vm0, %v3359_v18  ;;  %v1504_v9 = vld [vmem:[#allocation2 + $0x22] sm:$0xff]  ;;  %v1510_v21 = vld [vmem:[#allocation2 + $0x6a] sm:$0xff]  ;;  %v3452_v23 = vpack.c.bf16 %v1508_v19, %v1507_v16  ;;  %v1514_v31 = vld [vmem:[#allocation2 + $0x9a] sm:$0xff] }
  0x37   : > { %2718 = vmatpush3.bf16.msra.mxu0 %v2984_v6  ;;  %2705 = vmatprep.mubr.msk.bf16.mxu0 %vm504_vm0, %v3298_v57  ;;  %v1021_v62 = vld [vmem:[#allocation2 + $0xd9] sm:$0xff]  ;;  %v1522_v13 = vpack.c.bf16 %v1504_v9, %v1503_v8  ;;  %v1512_v28 = vld [vmem:[#allocation2 + $0x82] sm:$0xff]  ;;  %v1515_v36 = vld [vmem:[#allocation2 + $0xaa] sm:$0xff] }
  0x38   : > { %2719 = vmatprep.subr.bf16.mxu0 %v2986_v20  ;;  %v1022_v0 = vld [vmem:[#allocation2 + $0xe1] sm:$0xff]  ;;  %v2993_v6 = vld [vmem:[%s3667_s4 + $0xd8] sm:$0xff]   ;;  %v2999_v39 = vld [vmem:[%s3667_s4 + $0x30] sm:$0xff]  }
  0x39   : > { %v1032_v2 = vpack.c.bf16 %v1022_v0, %v1021_v62  ;;  %v3000_v29 = vld [vmem:[%s3667_s4 + $0x100] sm:$0xff]   ;;  %v2997_v35 = vld [vmem:[%s3667_s4 + $0x28] sm:$0xff]   ;;  %v1516_v37 = vld [vmem:[#allocation2 + $0xb2] sm:$0xff] }
  0x3a   : > { %v1528_v41 = vpack.c.bf16 %v1516_v37, %v1515_v36  ;;  %v1003_v44 = vld [vmem:[#allocation2 + $0x1] sm:$0xff]  ;;  %v3003_v47 = vld [vmem:[%s3667_s4 + $0x110] sm:$0xff]   ;;  %v2025_v8 = vld [vmem:[%s3572_s21 + $0x18] sm:$0xff] }
  0x3b   : > { %2720 = vmatpush3.bf16.msra.mxu0 %v2986_v20  ;;  %v1509_v20 = vld [vmem:[#allocation2 + $0x62] sm:$0xff]  ;;  %v1518_v51 = vld [vmem:[#allocation2 + $0xca] sm:$0xff]  ;;  %v2029_v36 = vld [vmem:[%s3572_s21 + $0x38] sm:$0xff] }
  0x3c   : > { %2721 = vmatprep.subr.bf16.mxu0 %v2988_v26  ;;  %v3454_v24 = vpack.c.bf16 %v1510_v21, %v1509_v20  ;;  %v1517_v50 = vld [vmem:[#allocation2 + $0xc2] sm:$0xff] }
  0x3d   : > { %2594 = vmatmul.mubr.msk.bf16.gmra.mrb[12].mxu1 %vm504_vm0, %v3381_v40 }
  0x3e   : > { %2706 = vmatmul.mubr.msk.bf16.gmra.mrb[4].mxu0 %vm504_vm0, %v3386_v45  ;;  %2605 = vmatprep.mubr.msk.bf16.mxu1 %vm504_vm0, %v558_v46  ;;  %v1004_v46 = vld [vmem:[#allocation2 + $0x9] sm:$0xff] }
  0x3f   : > { %2709 = vmatprep.mubr.msk.bf16.mxu0 %vm504_vm0, %v3389_v48  ;;  %2722 = vmatpush3.bf16.msra.mxu0 %v2988_v26  ;;  %v1511_v26 = vld [vmem:[#allocation2 + $0x7a] sm:$0xff] }
  0x40   : > { %2723 = vmatprep.subr.bf16.mxu0 %v2990_v49  ;;  %v3470_v32 = vpack.c.bf16 %v1512_v28, %v1511_v26  ;;  %v2028_v26 = vld [vmem:[%s3572_s21 + $0x30] sm:$0xff] }
  0x43   : > { %2724 = vmatpush3.bf16.msra.mxu0 %v2990_v49  ;;  %v1023_v49 = vpack.c.bf16 %v1004_v46, %v1003_v44 }
  0x44   : > { %2741 = vmatprep.subr.bf16.mxu0 %v2992_v52 }
  0x45   : > { %2606 = vmatmul.mubr.msk.bf16.vlgmr.msra.gmra.mrb[0].mxu1 %vm504_vm0, %v3232_v27  ;;  %v1502_v27 = vld [vmem:[#allocation2 + $0xa] sm:$0xff] }
  0x46   : > { %2622 = vmatpush3.bf16.msra.mxu1 %v3351_v12  ;;  %2710 = vmatmul.mubr.msk.bf16.gmra.mrb[8].mxu0 %vm504_vm0, %v3406_v56  ;;  %v1521_v4 = vpack.c.bf16 %v1502_v27, %v1501_v63  ;;  %v2995_v12 = vld [vmem:[%s3667_s4 + $0x20] sm:$0xff]  }
  0x47   : > { %2609 = vmatprep.mubr.msk.bf16.mxu1 %vm504_vm0, %v3246_v34  ;;  %2623 = vmatprep.subr.bf16.mxu1 %v2989_v59  ;;  %v2022_v27 = vld [vmem:[%s3572_s21] sm:$0xff] }
  0x48   : > { %2713 = vmatprep.mubr.msk.bf16.mxu0 %vm504_vm0, %v3411_v60 }
  0x4a   : > { %2624 = vmatpush3.bf16.msra.mxu1 %v2989_v59 }
  0x4b   : > { %2625 = vmatprep.subr.bf16.mxu1 %v2991_v61 }
  0x4d   : > { %2610 = vmatmul.mubr.msk.bf16.gmra.mrb[4].mxu1 %vm504_vm0, %v3265_v42 }
  0x4e   : > { %2714 = vmatmul.mubr.msk.bf16.gmra.mrb[12].mxu0 %vm504_vm0, %v1032_v2  ;;  %2613 = vmatprep.mubr.msk.bf16.mxu1 %vm504_vm0, %v3290_v53 }
  0x4f   : > { %2725 = vmatprep.mubr.msk.bf16.mxu0 %vm504_vm0, %v1521_v4  ;;  %2626 = vmatpush3.bf16.msra.mxu1 %v2991_v61  ;;  %v2024_v61 = vld [vmem:[%s3572_s21 + $0x10] sm:$0xff] }
  0x50   : > { %2627 = vmatprep.subr.bf16.mxu1 %v2993_v6 }
  0x53   : > { %2628 = vmatpush3.bf16.msra.mxu1 %v2993_v6 }
  0x54   : > { %2645 = vmatprep.subr.bf16.mxu1 %v2995_v12 }
  0x55   : > { %2614 = vmatmul.mubr.msk.bf16.gmra.mrb[8].mxu1 %vm504_vm0, %v3300_v58 }
  0x56   : > { %2726 = vmatmul.mubr.msk.bf16.vlgmr.msra.gmra.mrb[0].mxu0 %vm504_vm0, %v1522_v13  ;;  %2617 = vmatprep.mubr.msk.bf16.mxu1 %vm504_vm0, %v3357_v17 }
  0x57   : > { %2742 = vmatpush3.bf16.msra.mxu0 %v2992_v52  ;;  %2729 = vmatprep.mubr.msk.bf16.mxu0 %vm504_vm0, %v3437_v14  ;;  %v1529_v52 = vpack.c.bf16 %v1518_v51, %v1517_v50 }
  0x58   : > { %2743 = vmatprep.subr.bf16.mxu0 %v2994_v15 }
  0x5b   : > { %2744 = vmatpush3.bf16.msra.mxu0 %v2994_v15 }
  0x5c   : > { %2745 = vmatprep.subr.bf16.mxu0 %v2996_v22 }
  0x5d   : > { %2618 = vmatmul.mubr.msk.bf16.gmra.mrb[12].mxu1 %vm504_vm0, %v3359_v18 }
  0x5e   : > { %2730 = vmatmul.mubr.msk.bf16.gmra.mrb[4].mxu0 %vm504_vm0, %v3452_v23  ;;  %2629 = vmatprep.mubr.msk.bf16.mxu1 %vm504_vm0, %v3246_v34  ;;  %v3475_v34 = vpack.c.bf16 %v1514_v31, %v1513_v30  ;;  %v2026_v31 = vld [vmem:[%s3572_s21 + $0x20] sm:$0xff] }
  0x5f   : > { %2733 = vmatprep.mubr.msk.bf16.mxu0 %vm504_vm0, %v3454_v24  ;;  %2746 = vmatpush3.bf16.msra.mxu0 %v2996_v22 }
  0x60   : > { %2747 = vmatprep.subr.bf16.mxu0 %v2998_v25 }
  0x63   : > { %2748 = vmatpush3.bf16.msra.mxu0 %v2998_v25 }
  0x64   : > { %2765 = vmatprep.subr.bf16.mxu0 %v3000_v29 }
  0x65   : > { %2630 = vmatmul.mubr.msk.bf16.vlgmr.msra.gmra.mrb[0].mxu1 %vm504_vm0, %v3265_v42  ;;  %v3001_v42 = vld [vmem:[%s3667_s4 + $0x38] sm:$0xff]  }
  0x66   : > { %2646 = vmatpush3.bf16.msra.mxu1 %v2995_v12  ;;  %2734 = vmatmul.mubr.msk.bf16.gmra.mrb[8].mxu0 %vm504_vm0, %v3470_v32  ;;  %v2023_v12 = vld [vmem:[%s3572_s21 + $0x8] sm:$0xff] }
  0x67   : > { %2633 = vmatprep.mubr.msk.bf16.mxu1 %vm504_vm0, %v3290_v53  ;;  %2647 = vmatprep.subr.bf16.mxu1 %v2997_v35  ;;  %v3002_v53 = vld [vmem:[%s3667_s4 + $0x108] sm:$0xff]  }
  0x68   : > { %2737 = vmatprep.mubr.msk.bf16.mxu0 %vm504_vm0, %v3475_v34 }
  0x6a   : > { %2648 = vmatpush3.bf16.msra.mxu1 %v2997_v35 }
  0x6b   : > { %2649 = vmatprep.subr.bf16.mxu1 %v2999_v39 }
  0x6d   : > { %2634 = vmatmul.mubr.msk.bf16.gmra.mrb[4].mxu1 %vm504_vm0, %v3300_v58  ;;  %v556_v58 = vld [vmem:[#allocation2 + $0xd8] sm:$0xff] }
  0x6e   : > { %2738 = vmatmul.mubr.msk.bf16.gmra.mrb[12].mxu0 %vm504_vm0, %v1528_v41  ;;  %2637 = vmatprep.mubr.msk.bf16.mxu1 %vm504_vm0, %v3357_v17  ;;  %v557_v17 = vld [vmem:[#allocation2 + $0xe0] sm:$0xff] }
  0x6f   : > { %2749 = vmatprep.mubr.msk.bf16.mxu0 %vm504_vm0, %v1522_v13  ;;  %2650 = vmatpush3.bf16.msra.mxu1 %v2999_v39 }
  0x70   : > { %2651 = vmatprep.subr.bf16.mxu1 %v3001_v42 }
  0x73   : > { %2652 = vmatpush3.bf16.msra.mxu1 %v3001_v42  ;;  %v2027_v42 = vld [vmem:[%s3572_s21 + $0x28] sm:$0xff] }
  0x74   : > { %2789 = vmatprep.subr.bf16.mxu1 %v3121_v1 }
  0x75   : > { %2638 = vmatmul.mubr.msk.bf16.gmra.mrb[8].mxu1 %vm504_vm0, %v3359_v18  ;;  %v567_v18 = vpack.c.bf16 %v557_v17, %v556_v58 }
  0x76   : > { %2750 = vmatmul.mubr.msk.bf16.vlgmr.msra.gmra.mrb[0].mxu0 %vm504_vm0, %v3437_v14  ;;  %2641 = vmatprep.mubr.msk.bf16.mxu1 %vm504_vm0, %v3381_v40  ;;  %v3004_v40 = vld [vmem:[%s3667_s4 + $0x118] sm:$0xff]  }
  0x77   : > { %2766 = vmatpush3.bf16.msra.mxu0 %v3000_v29  ;;  %2753 = vmatprep.mubr.msk.bf16.mxu0 %vm504_vm0, %v3452_v23 }
  0x78   : > { %2767 = vmatprep.subr.bf16.mxu0 %v3002_v53 }
  0x7b   : > { %2768 = vmatpush3.bf16.msra.mxu0 %v3002_v53 }
  0x7c   : > { %2769 = vmatprep.subr.bf16.mxu0 %v3003_v47 }
  0x7d   : > { %2642 = vmatmul.mubr.msk.bf16.gmra.mrb[12].mxu1 %vm504_vm0, %v567_v18 }
  0x7e   : > { %2754 = vmatmul.mubr.msk.bf16.gmra.mrb[4].mxu0 %vm504_vm0, %v3454_v24  ;;  %2653 = vmatprep.mubr.msk.bf16.mxu1 %vm504_vm0, %v1023_v49 }
  0x7f   : > { %2757 = vmatprep.mubr.msk.bf16.mxu0 %vm504_vm0, %v3470_v32  ;;  %2770 = vmatpush3.bf16.msra.mxu0 %v3003_v47 }
  0x80   : > { %2771 = vmatprep.subr.bf16.mxu0 %v3004_v40 }
  0x83   : > { %2772 = vmatpush3.bf16.msra.mxu0 %v3004_v40 }
  0x85   : > { %2654 = vmatmul.mubr.msk.bf16.vlgmr.msra.gmra.mrb[0].mxu1 %vm504_vm0, %v3244_v33 }
  0x86   : > { %2793 = vmatpush3.bf16.msra.mxu1 %v3121_v1  ;;  %2758 = vmatmul.mubr.msk.bf16.gmra.mrb[8].mxu0 %vm504_vm0, %v3475_v34  ;;  %v1519_v1 = vld [vmem:[#allocation2 + $0xda] sm:$0xff] }
  0x87   : > { %2657 = vmatprep.mubr.msk.bf16.mxu1 %vm504_vm0, %v3253_v38  ;;  %2790 = vmatprep.subr.bf16.mxu1 %v3131_v3 }
  0x88   : > { %2761 = vmatprep.mubr.msk.bf16.mxu0 %vm504_vm0, %v1528_v41 }
  0x8a   : > { %2794 = vmatpush3.bf16.msra.mxu1 %v3131_v3  ;;  %v1520_v3 = vld [vmem:[#allocation2 + $0xe2] sm:$0xff] }
  0x8b   : > { %2791 = vmatprep.subr.bf16.mxu1 %v3146_v5 }
  0x8d   : > { %2658 = vmatmul.mubr.msk.bf16.gmra.mrb[4].mxu1 %vm504_vm0, %v3267_v43 }
  0x8e   : > { %2762 = vmatmul.mubr.msk.bf16.gmra.mrb[12].mxu0 %vm504_vm0, %v1529_v52  ;;  %2661 = vmatprep.mubr.msk.bf16.mxu1 %vm504_vm0, %v3298_v57 }
  0x8f   : > { %2773 = vmatprep.mubr.msk.bf16.mxu0 %vm504_vm0, %v3437_v14  ;;  %2795 = vmatpush3.bf16.msra.mxu1 %v3146_v5  ;;  %v1530_v5 = vpack.c.bf16 %v1520_v3, %v1519_v1 }
  0x90   : > { %2792 = vmatprep.subr.bf16.mxu1 %v3159_v7 }
  0x93   : > { %2796 = vmatpush3.bf16.msra.mxu1 %v3159_v7 }
  0x95   : > { %2662 = vmatmul.mubr.msk.bf16.gmra.mrb[8].mxu1 %vm504_vm0, %v3386_v45 }
  0x96   : > { %2774 = vmatmul.mubr.msk.bf16.vlgmr.msra.gmra.mrb[0].mxu0 %vm504_vm0, %v3452_v23  ;;  %2665 = vmatprep.mubr.msk.bf16.mxu1 %vm504_vm0, %v3389_v48 }
  0x97   : > { %2777 = vmatprep.mubr.msk.bf16.mxu0 %vm504_vm0, %v3454_v24 }
  0x9d   : > { %2666 = vmatmul.mubr.msk.bf16.gmra.mrb[12].mxu1 %vm504_vm0, %v3406_v56 }
  0x9e   : > { %2778 = vmatmul.mubr.msk.bf16.gmra.mrb[4].mxu0 %vm504_vm0, %v3470_v32  ;;  %2685 = vmatprep.mubr.msk.bf16.mxu1 %vm504_vm0, %v3386_v45 }
  0x9f   : > { %2781 = vmatprep.mubr.msk.bf16.mxu0 %vm504_vm0, %v3475_v34 }
  0xa5   : > { %2686 = vmatmul.mubr.msk.bf16.vlgmr.msra.gmra.mrb[8].mxu1 %vm504_vm0, %v3389_v48 }
  0xa6   : > { %2782 = vmatmul.mubr.msk.bf16.gmra.mrb[8].mxu0 %vm504_vm0, %v1528_v41  ;;  %2689 = vmatprep.mubr.msk.bf16.mxu1 %vm504_vm0, %v3406_v56  ;;  %v3577_v56 = vld [vmem:[%s3668_s5] ss:$0 sm:$0xff] }
  0xa7   : > { %2785 = vmatprep.mubr.msk.bf16.mxu0 %vm504_vm0, %v1529_v52 }
  0xad   : > { %2690 = vmatmul.mubr.msk.bf16.gmra.mrb[12].mxu1 %vm504_vm0, %v3411_v60 }
  0xae   : > { %2786 = vmatmul.mubr.msk.bf16.gmra.mrb[12].mxu0 %vm504_vm0, %v1530_v5  ;;  %v2032_v5 = vld [vmem:[%s3572_s21 + $0x50] sm:$0xff] }
 0x158   : > { %v2655_v7 = vpop.f32.mrb[0].mxu1 }
 0x159   : > { %v1124_v33 = vpop.f32.mrb[1].mxu1 }
 0x15a   : > { %v2656_v38 = vpop.f32.mrb[2].mxu1 }
 0x15b   : > { %v1127_v43 = vpop.f32.mrb[3].mxu1 }
 0x160   : > { %v2659_v57 = vpop.f32.mrb[4].mxu1 }
 0x161   : > { %v1140_v45 = vpop.f32.mrb[5].mxu1 }
 0x162   : > { %v2660_v48 = vpop.f32.mrb[6].mxu1 }
 0x163   : > { %v1143_v54 = vpop.f32.mrb[7].mxu1 }
 0x169   : > { %v2775_v55 = vpop.f32.mrb[0].mxu0 }
 0x16a   : > { %v2797_v59 = vadd.f32 %v2775_v55, %v2655_v7  ;;  %v1920_v60 = vpop.f32.mrb[1].mxu0  ;;  %v2033_v55 = vld [vmem:[%s3572_s21 + $0x58] sm:$0xff] }
 0x16b   : > { %v2798_v62 = vadd.f32 %v1920_v60, %v1124_v33  ;;  %v2776_v63 = vpop.f32.mrb[2].mxu0 }
 0x16c   : > { %v2008_v0 = vadd.f32 %v2797_v59, %v3577_v56  ;;  %v2799_v2 = vadd.f32 %v2776_v63, %v2656_v38  ;;  %v1923_v4 = vpop.f32.mrb[3].mxu0 }
 0x16d   : > { %v2006_v6 = vadd.f32 %v2798_v62, %v3577_v56  ;;  %v2800_v9 = vadd.f32 %v1923_v4, %v1127_v43  ;;  %v2031_v62 = vld [vmem:[%s3572_s21 + $0x48] sm:$0xff] }
 0x16e   : > { %v2040_v10 = vadd.f32 %v2024_v61, %v2008_v0  ;;  %v2009_v11 = vadd.f32 %v2799_v2, %v3577_v56 }
 0x16f   : > { %v2038_v13 = vadd.f32 %v2022_v27, %v2006_v6  ;;  %v2007_v14 = vadd.f32 %v2800_v9, %v3577_v56 }
 0x170   : > { %v2056_v15 = vmax.f32 %v2040_v10, 0.0  ;;  %v2041_v16 = vadd.f32 %v2025_v8, %v2009_v11 }
 0x171   : > { %v2054_v19 = vmax.f32 %v2038_v13, 0.0  ;;  %v2039_v20 = vadd.f32 %v2023_v12, %v2007_v14  ;;  %v2779_v21 = vpop.f32.mrb[4].mxu0 }
 0x172   : > { %2072 = vst.msk [vmem:[%s3589_s19 + $0x10] sm:$0xff] %vm504_vm0, %v2056_v15  ;;  %v2057_v22 = vmax.f32 %v2041_v16, 0.0  ;;  %v2801_v23 = vadd.f32 %v2779_v21, %v2659_v57  ;;  %v1936_v24 = vpop.f32.mrb[5].mxu0  ;;  %v2030_v57 = vld [vmem:[%s3572_s21 + $0x40] sm:$0xff]  ;;  %v2036_v16 = vld [vmem:[%s3572_s21 + $0x70] sm:$0xff] }
 0x173   : > { %2070 = vst.msk [vmem:[%s3589_s19] sm:$0xff] %vm504_vm0, %v2054_v19  ;;  %v2055_v25 = vmax.f32 %v2039_v20, 0.0  ;;  %v2802_v28 = vadd.f32 %v1936_v24, %v1140_v45  ;;  %v2780_v29 = vpop.f32.mrb[6].mxu0 }
 0x174   : > { %2073 = vst.msk [vmem:[%s3589_s19 + $0x18] sm:$0xff] %vm504_vm0, %v2057_v22  ;;  %v2012_v30 = vadd.f32 %v2801_v23, %v3577_v56  ;;  %v2803_v32 = vadd.f32 %v2780_v29, %v2660_v48  ;;  %v1939_v35 = vpop.f32.mrb[7].mxu0  ;;  %v2034_v23 = vld [vmem:[%s3572_s21 + $0x60] sm:$0xff] }
 0x175   : > { %2071 = vst.msk [vmem:[%s3589_s19 + $0x8] sm:$0xff] %vm504_vm0, %v2055_v25  ;;  %v2010_v34 = vadd.f32 %v2802_v28, %v3577_v56  ;;  %v2804_v37 = vadd.f32 %v1939_v35, %v1143_v54  ;;  %v2037_v28 = vld [vmem:[%s3572_s21 + $0x78] sm:$0xff] }
 0x176   : > { %v2044_v39 = vadd.f32 %v2028_v26, %v2012_v30  ;;  %v2013_v41 = vadd.f32 %v2803_v32, %v3577_v56  ;;  %v2035_v32 = vld [vmem:[%s3572_s21 + $0x68] sm:$0xff] }
 0x177   : > { %v2042_v53 = vadd.f32 %v2026_v31, %v2010_v34  ;;  %v2011_v58 = vadd.f32 %v2804_v37, %v3577_v56 }
 0x178   : > { %v2060_v17 = vmax.f32 %v2044_v39, 0.0  ;;  %v2045_v44 = vadd.f32 %v2029_v36, %v2013_v41  ;;  %v2687_v46 = vpop.f32.mrb[8].mxu1 }
 0x179   : > { %v2058_v47 = vmax.f32 %v2042_v53, 0.0  ;;  %v2043_v18 = vadd.f32 %v2027_v42, %v2011_v58  ;;  %v2783_v49 = vpop.f32.mrb[8].mxu0  ;;  %v1305_v40 = vpop.f32.mrb[9].mxu1 }
 0x17a   : > { %2076 = vst.msk [vmem:[%s3589_s19 + $0x30] sm:$0xff] %vm504_vm0, %v2060_v17  ;;  %v2061_v50 = vmax.f32 %v2045_v44, 0.0  ;;  %v2805_v51 = vadd.f32 %v2783_v49, %v2687_v46  ;;  %v1952_v52 = vpop.f32.mrb[9].mxu0  ;;  %v2688_v1 = vpop.f32.mrb[10].mxu1 }
 0x17b   : > { %2074 = vst.msk [vmem:[%s3589_s19 + $0x20] sm:$0xff] %vm504_vm0, %v2058_v47  ;;  %v2059_v3 = vmax.f32 %v2043_v18, 0.0  ;;  %v2806_v7 = vadd.f32 %v1952_v52, %v1305_v40  ;;  %v2784_v33 = vpop.f32.mrb[10].mxu0  ;;  %v1308_v38 = vpop.f32.mrb[11].mxu1 }
 0x17c   : > { %2077 = vst.msk [vmem:[%s3589_s19 + $0x38] sm:$0xff] %vm504_vm0, %v2061_v50  ;;  %v2016_v43 = vadd.f32 %v2805_v51, %v3577_v56  ;;  %v2807_v45 = vadd.f32 %v2784_v33, %v2688_v1  ;;  %v1955_v48 = vpop.f32.mrb[11].mxu0 }
 0x17d   : > { %2075 = vst.msk [vmem:[%s3589_s19 + $0x28] sm:$0xff] %vm504_vm0, %v2059_v3  ;;  %v2014_v54 = vadd.f32 %v2806_v7, %v3577_v56  ;;  %v2808_v59 = vadd.f32 %v1955_v48, %v1308_v38 }
 0x17e   : > { %v2048_v60 = vadd.f32 %v2032_v5, %v2016_v43  ;;  %v2017_v61 = vadd.f32 %v2807_v45, %v3577_v56 }
 0x17f   : > { %v2046_v63 = vadd.f32 %v2030_v57, %v2014_v54  ;;  %v2015_v0 = vadd.f32 %v2808_v59, %v3577_v56 }
 0x180   : > { %v2064_v27 = vmax.f32 %v2048_v60, 0.0  ;;  %v2049_v2 = vadd.f32 %v2033_v55, %v2017_v61  ;;  %v2691_v4 = vpop.f32.mrb[12].mxu1 }
 0x181   : > { %v2062_v6 = vmax.f32 %v2046_v63, 0.0  ;;  %v2047_v8 = vadd.f32 %v2031_v62, %v2015_v0  ;;  %v2787_v9 = vpop.f32.mrb[12].mxu0  ;;  %v1321_v10 = vpop.f32.mrb[13].mxu1 }
 0x182   : > { %2080 = vst.msk [vmem:[%s3589_s19 + $0x50] sm:$0xff] %vm504_vm0, %v2064_v27  ;;  %v2065_v11 = vmax.f32 %v2049_v2, 0.0  ;;  %v2809_v12 = vadd.f32 %v2787_v9, %v2691_v4  ;;  %v1968_v13 = vpop.f32.mrb[13].mxu0  ;;  %v2692_v14 = vpop.f32.mrb[14].mxu1 }
 0x183   : > { %2078 = vst.msk [vmem:[%s3589_s19 + $0x40] sm:$0xff] %vm504_vm0, %v2062_v6  ;;  %v2063_v15 = vmax.f32 %v2047_v8, 0.0  ;;  %v2810_v19 = vadd.f32 %v1968_v13, %v1321_v10  ;;  %v2788_v20 = vpop.f32.mrb[14].mxu0  ;;  %v1324_v21 = vpop.f32.mrb[15].mxu1 }
 0x184   : > { %2081 = vst.msk [vmem:[%s3589_s19 + $0x58] sm:$0xff] %vm504_vm0, %v2065_v11  ;;  %v2020_v22 = vadd.f32 %v2809_v12, %v3577_v56  ;;  %v2811_v24 = vadd.f32 %v2788_v20, %v2692_v14  ;;  %v1971_v25 = vpop.f32.mrb[15].mxu0 }
 0x185   : > { %2079 = vst.msk [vmem:[%s3589_s19 + $0x48] sm:$0xff] %vm504_vm0, %v2063_v15  ;;  %v2018_v26 = vadd.f32 %v2810_v19, %v3577_v56  ;;  %v2812_v29 = vadd.f32 %v1971_v25, %v1324_v21 }
 0x186   : > { %v2052_v30 = vadd.f32 %v2036_v16, %v2020_v22  ;;  %v2021_v31 = vadd.f32 %v2811_v24, %v3577_v56 }
 0x187   : > { %v2050_v35 = vadd.f32 %v2034_v23, %v2018_v26  ;;  %v2019_v34 = vadd.f32 %v2812_v29, %v3577_v56 }
 0x188   : > { %v2068_v36 = vmax.f32 %v2052_v30, 0.0  ;;  %v2053_v37 = vadd.f32 %v2037_v28, %v2021_v31 }
 0x189   : > { %v2066_v39 = vmax.f32 %v2050_v35, 0.0  ;;  %v2051_v41 = vadd.f32 %v2035_v32, %v2019_v34 }
 0x18a   : > { %2084 = vst.msk [vmem:[%s3589_s19 + $0x70] sm:$0xff] %vm504_vm0, %v2068_v36  ;;  %v2069_v42 = vmax.f32 %v2053_v37, 0.0 }
 0x18b   : > { %2082 = vst.msk [vmem:[%s3589_s19 + $0x60] sm:$0xff] %vm504_vm0, %v2066_v39  ;;  %v2067_v53 = vmax.f32 %v2051_v41, 0.0 }
 0x18c   : > { %2085 = vst.msk [vmem:[%s3589_s19 + $0x78] sm:$0xff] %vm504_vm0, %v2069_v42 }
 0x18d   : > { %2083 = vst.msk [vmem:[%s3589_s19 + $0x68] sm:$0xff] %vm504_vm0, %v2067_v53 }
 0x18e PF: > { %s16_s25 = sadd.s32 1, %s3043_s25   ;;  %s3671_s21 = smov %s3035_s23 }
 0x18f   : > { %p13_p12 = scmp.ge.s32.totalorder %s16_s25, 6   ;;  %s3672_s22 = smov %s3039_s24 }
 0x190   : > { %s3673_s23 = smov %s3676_s26  ;;  %s3674_s24 = smov %s3680_s27 }
 0x191   :  { %15 = sbr.rel (!%p13_p12) target bundleno = 3 (0x3), region = 93 }

// kernel: _lambda_.4
= control target key start
LH: loop header
LB: loop body
LE: loop exit
PB: predicated region body
PF: predicated region fallthrough
CT: control target
= control target key end

     0   :  { %s3065_s21 = smov 0   ;;  %s3067_s22 = smov 0   ;;  %s3648_s0 = inlined_call_operand.vmem [shape: f32[2,16,18,64], index: 0, kind: input, shape index: {}, may-alias: {0,1,2}]   ;;  %s3649_s1 = inlined_call_operand.vmem [shape: f32[2,16,18,64], index: 1, kind: input, shape index: {}, may-alias: {0,1,2}]   ;;  %s3650_s2 = inlined_call_operand.vmem [shape: f32[2,16,18,64], index: 2, kind: input, shape index: {}, may-alias: {0,1,2}]   ;;  %s3651_s3 = inlined_call_operand.vmem [shape: f32[2,16,16,4], index: 3, kind: input, shape index: {}]   ;;  %s3652_s4 = inlined_call_operand.vmem [shape: bf16[3,3,64,4], index: 4, kind: input, shape index: {}]   ;;  %s3653_s5 = inlined_call_operand.vmem [shape: f32[1,4], index: 5, kind: input, shape index: {}]   ;;  %s3654_s6 = inlined_call_operand.vmem [shape: f32[2,16,16,4], index: 6, kind: output, shape index: {}]  }
   0x1   :  { %s3069_s23 = smov 0   ;;  %s3071_s24 = smov 0  }
   0x2   :  { %s3073_s25 = smov 0  }
   0x3 LB: > { %s25_s26 = sadd.s32 1, %s3020_s23  ;;  %s28_s27 = sadd.s32 1, %s3024_s24  ;;  %s3028_s25 = sphi %s3073_s25, %s16_s25   ;;  %s3024_s24 = sphi %s3071_s24, %s3659_s24   ;;  %s3020_s23 = sphi %s3069_s23, %s3658_s23   ;;  %s3016_s22 = sphi %s3067_s22, %s3657_s22   ;;  %s3012_s21 = sphi %s3065_s21, %s3656_s21  }
   0x4   : > { %p26_p0 = scmp.ge.s32.totalorder %s25_s26, 2  ;;  %p2243_p1 = scmp.ge.s32.totalorder %s3028_s25, 1 }
   0x5   : > { %p316_p2 = scmp.lt.s32.totalorder %s3028_s25, 5 }
   0x6   : > { %s3661_s26 = smov (%p26_p0, %s25_s26), 0  ;;  %s3663_s27 = smov (!%p26_p0, %s28_s27), %s3024_s24 }
   0x7   : > { %p317_p3 = pnand %p2243_p1, %p316_p2  ;;  %p30_p4 = scmp.ge.s32.totalorder %s3663_s27, 2 }
   0x8   : > { %v2954_v0 = vld [vmem:[%s3652_s4 + $0x60] sm:$0xff] (!%p317_p3)   ;;  %s3101_s30 = sshll.u32 (!%p317_p3), %s3012_s21, 3  ;;  %p393_p5 = scmp.lt.s32.totalorder (!%p317_p3), %s3016_s22, 1  ;;  %v2956_v2 = vld [vmem:[%s3652_s4 + $0x68] sm:$0xff] (!%p317_p3)   ;;  %v2958_v4 = vld [vmem:[%s3652_s4 + $0x70] sm:$0xff] (!%p317_p3)   ;;  %vm504_vm0 = vcmask (!%p317_p3), 523264  }
   0x9   : > { %s3665_s27 = smov (%p30_p4, %s3663_s27), 0  ;;  %320 = sbr.rel (%p317_p3) target bundleno = 396 (0x18c), region = 44 }
   0xa   : > { %v3106_v1 = vld [vmem:[%s3652_s4 + $0x80] sm:$0xff] (!%p317_p3)   ;;  %2558 = vmatprep.subr.bf16.mxu1 (!%p317_p3), %v2954_v0  ;;  %p395_p6 = scmp.lt.s32.totalorder (!%p317_p3), %s3101_s30, 15  ;;  %v3116_v3 = vld [vmem:[%s3652_s4 + $0x88] sm:$0xff] (!%p317_p3)   ;;  %v3131_v5 = vld [vmem:[%s3652_s4 + $0x90] sm:$0xff] (!%p317_p3)   ;;  %vm507_vm1 = vcmask (!%p317_p3), 517120   ;;  %s3159_s16 = sadd.s32 (!%p317_p3), 4294967295, %s3101_s30 }
   0xb   : > { %2654 = vmatprep.subr.bf16.mxu0 (!%p317_p3), %v3106_v1  ;;  %2559 = vmatpush3.bf16.msra.mxu1 (!%p317_p3), %v2954_v0  ;;  %v2960_v6 = vld [vmem:[%s3652_s4 + $0x78] sm:$0xff] (!%p317_p3)   ;;  %v3156_v8 = vld [vmem:[%s3652_s4] sm:$0xff] (!%p317_p3)   ;;  %p405_p7 = scmp.gt.s32.totalorder (!%p317_p3), %s3159_s16, 0  ;;  %p2248_p8 = scmp.lt.s32.totalorder (!%p317_p3), %s3159_s16, 15  ;;  %v2964_v31 = vld [vmem:[%s3652_s4 + $0xe8] sm:$0xff] (!%p317_p3)   ;;  %vm2054_vm2 = vcmask (!%p317_p3), 31744  }
   0xc   : > { %2655 = vmatpush3.bf16.msra.mxu0 (!%p317_p3), %v3106_v1  ;;  %2560 = vmatprep.subr.bf16.mxu1 (!%p317_p3), %v2956_v2  ;;  %v3144_v7 = vld [vmem:[%s3652_s4 + $0x98] sm:$0xff] (!%p317_p3)   ;;  %v3167_v12 = vld [vmem:[%s3652_s4 + $0xe0] sm:$0xff] (!%p317_p3)   ;;  %s2449_s28 = sadd.s32 (!%p317_p3), 8, %s3101_s30  ;;  %p490_p9 = scmp.gt.s32.totalorder (!%p317_p3), %s3012_s21, 0  ;;  %v2965_v32 = vld [vmem:[%s3652_s4 + $0x8] sm:$0xff] (!%p317_p3)  }
   0xd   : > { %2656 = vmatprep.subr.bf16.mxu0 (!%p317_p3), %v3116_v3  ;;  %p3211_p10 = scmp.lt.s32.totalorder (!%p317_p3), %s2449_s28, 15  ;;  %v2966_v44 = vld [vmem:[%s3652_s4 + $0xf0] sm:$0xff] (!%p317_p3)   ;;  %p497_p11 = scmp.lt.s32.totalorder (!%p317_p3), %s3012_s21, 1  ;;  %v2967_v59 = vld [vmem:[%s3652_s4 + $0xf8] sm:$0xff] (!%p317_p3)  }
   0xe   : > { %v2968_v47 = vld [vmem:[%s3652_s4 + $0x10] sm:$0xff] (!%p317_p3)   ;;  %v2970_v0 = vld [vmem:[%s3652_s4 + $0x18] sm:$0xff] (!%p317_p3)  }
   0xf   : > { %2561 = vmatpush3.bf16.msra.mxu1 (!%p317_p3), %v2956_v2 }
  0x10   : > { %s3667_s22 = smov (!%p393_p5, %s3016_s22), 1  ;;  %2657 = vmatpush3.bf16.msra.mxu0 %v3116_v3  ;;  %2562 = vmatprep.subr.bf16.mxu1 %v2958_v4  ;;  %s3671_s28 = smov (!%p3211_p10, %s2449_s28), 15 }
  0x11   : > { %s3125_s15 = scalar_select %p395_p6, %s3101_s30, 15  ;;  %2658 = vmatprep.subr.bf16.mxu0 %v3131_v5 }
  0x12   : > { %s3134_s18 = smul.u32 48, %s3667_s22  ;;  %s3673_s28 = smov (!%p3211_p10, %s3671_s28), 15 }
  0x13   : > { %s2910_s19 = smul.u32 3, %s3125_s15  ;;  %2563 = vmatpush3.bf16.msra.mxu1 %v2958_v4 }
  0x14   : > { %2659 = vmatpush3.bf16.msra.mxu0 %v3131_v5  ;;  %2564 = vmatprep.subr.bf16.mxu1 %v2960_v6  ;;  %s406_s20 = scalar_select %p405_p7, %s3159_s16, 0 }
  0x15   : > { %s399_s8 = sadd.s32 %s3134_s18, %s2910_s19  ;;  %2660 = vmatprep.subr.bf16.mxu0 %v3144_v7  ;;  %s3281_s7 = smul.u32 3, %s3673_s28 }
  0x16   : > { %s2245_s9 = sshll.u32 %s399_s8, 3  ;;  %s3669_s20 = smov (!%p2248_p8, %s406_s20), 15 }
  0x17   : > { %s3151_s12 = scalar_lea.vmem %s3648_s0, %s2245_s9  ;;  %2565 = vmatpush3.bf16.msra.mxu1 %v2960_v6  ;;  %s2912_s29 = smul.u32 3, %s3669_s20  ;;  %v2969_v6 = vld [vmem:[%s3652_s4 + $0x40] sm:$0xff]  }
  0x18   : > { %v460_v9 = vld [vmem:[%s3151_s12] sm:$0xff]  ;;  %v461_v10 = vld [vmem:[%s3151_s12 + $0x8] sm:$0xff]  ;;  %v462_v11 = vld [vmem:[%s3151_s12 + $0x10] sm:$0x3]  ;;  %2661 = vmatpush3.bf16.msra.mxu0 %v3144_v7  ;;  %2582 = vmatprep.subr.bf16.mxu1 %v3156_v8  ;;  %s3227_s13 = scalar_select %p490_p9, 1, 0 }
  0x19   : > { %510 = vst.msk [vmem:[#allocation2 + $0x18] sm:$0xff] %vm504_vm0, %v460_v9  ;;  %511 = vst.msk [vmem:[#allocation2 + $0x20] sm:$0xff] %vm504_vm0, %v461_v10  ;;  %v463_v13 = vld [vmem:[%s3151_s12 + $0x18] sm:$0xff]  ;;  %v464_v14 = vld [vmem:[%s3151_s12 + $0x20] sm:$0xff]  ;;  %2678 = vmatprep.subr.bf16.mxu0 %v3167_v12  ;;  %s3234_s14 = sadd.s32 %s2912_s29, %s3134_s18  ;;  %s430_s16 = sadd.s32 %s3281_s7, %s3134_s18 }
  0x1a   : > { %512 = vst.msk [vmem:[#allocation2 + $0x28] sm:$0x3] %vm507_vm1, %v462_v11  ;;  %v465_v15 = vld [vmem:[%s3151_s12 + $0x28] sm:$0x3]  ;;  %v466_v16 = vld [vmem:[%s3151_s12 + $0x30] sm:$0xff]  ;;  %v467_v17 = vld [vmem:[%s3151_s12 + $0x38] sm:$0xff]  ;;  %s492_s29 = scvt.s32.f32 %s3227_s13 }
  0x1b   : > { %513 = vst.msk [vmem:[#allocation2 + $0x30] sm:$0xff] %vm504_vm0, %v463_v13  ;;  %514 = vst.msk [vmem:[#allocation2 + $0x38] sm:$0xff] %vm504_vm0, %v464_v14  ;;  %v468_v18 = vld [vmem:[%s3151_s12 + $0x40] sm:$0x3]  ;;  %v469_v19 = vld [vmem:[%s3151_s12 + $0x48] sm:$0xff]  ;;  %s2253_s20 = sshll.u32 %s3234_s14, 3 }
  0x1c   : > { %515 = vst.msk [vmem:[#allocation2 + $0x40] sm:$0x3] %vm507_vm1, %v465_v15  ;;  %518 = vst.msk [vmem:[#allocation2 + $0x58] sm:$0x3] %vm507_vm1, %v468_v18  ;;  %v470_v20 = vld [vmem:[%s3151_s12 + $0x50] sm:$0xff]  ;;  %v472_v22 = vld [vmem:[%s3151_s12 + $0x60] sm:$0xff]  ;;  %s3293_s10 = scalar_lea.vmem %s3649_s1, %s2253_s20  ;;  %v3298_v60 = vstv %s492_s29 }
  0x1d   : > { %516 = vst.msk [vmem:[#allocation2 + $0x48] sm:$0xff] %vm504_vm0, %v466_v16  ;;  %517 = vst.msk [vmem:[#allocation2 + $0x50] sm:$0xff] %vm504_vm0, %v467_v17  ;;  %v471_v21 = vld [vmem:[%s3151_s12 + $0x58] sm:$0x3]  ;;  %v473_v23 = vld [vmem:[%s3151_s12 + $0x68] sm:$0xff]  ;;  %s2258_s20 = sshll.u32 %s430_s16, 3 }
  0x1e   : > { %519 = vst.msk [vmem:[#allocation2 + $0x60] sm:$0xff] %vm504_vm0, %v469_v19  ;;  %520 = vst.msk [vmem:[#allocation2 + $0x68] sm:$0xff] %vm504_vm0, %v470_v20  ;;  %v475_v52 = vld [vmem:[%s3151_s12 + $0x78] sm:$0xff]  ;;  %v476_v54 = vld [vmem:[%s3151_s12 + $0x80] sm:$0xff]  ;;  %s3305_s13 = scalar_select %p497_p11, 1, 0 }
  0x1f   : > { %521 = vst.msk [vmem:[#allocation2 + $0x70] sm:$0x3] %vm507_vm1, %v471_v21  ;;  %v478_v55 = vld [vmem:[%s3151_s12 + $0x90] sm:$0xff]  ;;  %v479_v56 = vld [vmem:[%s3151_s12 + $0x98] sm:$0xff]  ;;  %v481_v61 = vld [vmem:[%s3151_s12 + $0xa8] sm:$0xff]  ;;  %s432_s9 = scalar_lea.vmem %s3650_s2, %s2258_s20 }
  0x20   : > { %v540_v24 = vld [vmem:[#allocation2 + $0x18] sm:$0xff]  ;;  %v541_v25 = vld [vmem:[#allocation2 + $0x20] sm:$0xff]  ;;  %522 = vst.msk [vmem:[#allocation2 + $0x78] sm:$0xff] %vm504_vm0, %v472_v22  ;;  %523 = vst.msk [vmem:[#allocation2 + $0x80] sm:$0xff] %vm504_vm0, %v473_v23  ;;  %s499_s29 = scvt.s32.f32 %s3305_s13  ;;  %s2261_s13 = sshll.u32 %s3667_s22, 5 }
  0x21   : > { %v1005_v26 = vld [vmem:[#allocation2 + $0x19] sm:$0xff]  ;;  %v3217_v27 = vpack.c.bf16 %v541_v25, %v540_v24  ;;  %v1006_v28 = vld [vmem:[#allocation2 + $0x21] sm:$0xff]  ;;  %525 = vst.msk [vmem:[#allocation2 + $0x90] sm:$0xff] %vm504_vm0, %v475_v52  ;;  %526 = vst.msk [vmem:[#allocation2 + $0x98] sm:$0xff] %vm504_vm0, %v476_v54 }
  0x22   : > { %v542_v29 = vld [vmem:[#allocation2 + $0x30] sm:$0xff]  ;;  %v543_v30 = vld [vmem:[#allocation2 + $0x38] sm:$0xff]  ;;  %v3229_v33 = vpack.c.bf16 %v1006_v28, %v1005_v26  ;;  %528 = vst.msk [vmem:[#allocation2 + $0xa8] sm:$0xff] %vm504_vm0, %v478_v55  ;;  %529 = vst.msk [vmem:[#allocation2 + $0xb0] sm:$0xff] %vm504_vm0, %v479_v56  ;;  %v500_v21 = vstv %s499_s29 }
  0x23   : > { %v3231_v34 = vpack.c.bf16 %v543_v30, %v542_v29  ;;  %v1007_v35 = vld [vmem:[#allocation2 + $0x31] sm:$0xff]  ;;  %v1008_v36 = vld [vmem:[#allocation2 + $0x39] sm:$0xff]  ;;  %2566 = vmatprep.mubr.msk.bf16.mxu1 %vm504_vm0, %v3217_v27  ;;  %531 = vst.msk [vmem:[#allocation2 + $0xc0] sm:$0xff] %vm504_vm0, %v481_v61  ;;  %v485_v4 = vld [vmem:[%s3293_s10 + $0x8] sm:$0xff] }
  0x24   : > { %v544_v37 = vld [vmem:[#allocation2 + $0x48] sm:$0xff]  ;;  %v3238_v38 = vpack.c.bf16 %v1008_v36, %v1007_v35  ;;  %v545_v39 = vld [vmem:[#allocation2 + $0x50] sm:$0xff]  ;;  %2662 = vmatprep.mubr.msk.bf16.mxu0 %vm504_vm0, %v3229_v33  ;;  %v484_v2 = vld [vmem:[%s3293_s10] sm:$0xff]  ;;  %v495_v9 = vmul.f32 %v3298_v60, %v485_v4 }
  0x25   : > { %v1009_v40 = vld [vmem:[#allocation2 + $0x49] sm:$0xff]  ;;  %v1010_v41 = vld [vmem:[#allocation2 + $0x51] sm:$0xff]  ;;  %2567 = vmatmul.mubr.msk.bf16.vlgmr.msra.gmra.mrb[0].mxu1 %vm504_vm0, %v3231_v34  ;;  %v3250_v42 = vpack.c.bf16 %v545_v39, %v544_v37  ;;  %v546_v45 = vld [vmem:[#allocation2 + $0x60] sm:$0xff] }
  0x26   : > { %v3252_v43 = vpack.c.bf16 %v1010_v41, %v1009_v40  ;;  %2583 = vmatpush3.bf16.msra.mxu1 %v3156_v8  ;;  %2663 = vmatmul.mubr.msk.bf16.vlgmr.msra.gmra.mrb[0].mxu0 %vm504_vm0, %v3238_v38  ;;  %v547_v46 = vld [vmem:[#allocation2 + $0x68] sm:$0xff]  ;;  %v482_v62 = vld [vmem:[%s3151_s12 + $0xb0] sm:$0xff]  ;;  %v494_v8 = vmul.f32 %v3298_v60, %v484_v2  ;;  %506 = vst.msk [vmem:[#allocation2 + $0x8] sm:$0xff] %vm504_vm0, %v495_v9  ;;  %v480_v13 = vld [vmem:[%s3151_s12 + $0xa0] sm:$0x3] }
  0x27   : > { %2679 = vmatpush3.bf16.msra.mxu0 %v3167_v12  ;;  %2570 = vmatprep.mubr.msk.bf16.mxu1 %vm504_vm0, %v3250_v42  ;;  %v1011_v48 = vld [vmem:[#allocation2 + $0x61] sm:$0xff]  ;;  %v1012_v49 = vld [vmem:[#allocation2 + $0x69] sm:$0xff]  ;;  %v548_v50 = vld [vmem:[#allocation2 + $0x78] sm:$0xff]  ;;  %v3275_v53 = vpack.c.bf16 %v547_v46, %v546_v45  ;;  %532 = vst.msk [vmem:[#allocation2 + $0xc8] sm:$0xff] %vm504_vm0, %v482_v62 }
  0x28   : > { %2680 = vmatprep.subr.bf16.mxu0 %v2964_v31  ;;  %2584 = vmatprep.subr.bf16.mxu1 %v2965_v32  ;;  %v549_v51 = vld [vmem:[#allocation2 + $0x80] sm:$0xff]  ;;  %v3283_v57 = vpack.c.bf16 %v1012_v49, %v1011_v48  ;;  %v474_v63 = vld [vmem:[%s3151_s12 + $0x70] sm:$0x3]  ;;  %v477_v10 = vld [vmem:[%s3151_s12 + $0x88] sm:$0x3]  ;;  %505 = vst.msk [vmem:[#allocation2] sm:$0xff] %vm504_vm0, %v494_v8 }
  0x29   : > { %2666 = vmatprep.mubr.msk.bf16.mxu0 %vm504_vm0, %v3252_v43  ;;  %v3285_v58 = vpack.c.bf16 %v549_v51, %v548_v50  ;;  %524 = vst.msk [vmem:[#allocation2 + $0x88] sm:$0x3] %vm507_vm1, %v474_v63  ;;  %v550_v11 = vld [vmem:[#allocation2 + $0x90] sm:$0xff]  ;;  %v3336_v12 = vld [vmem:[%s3652_s4 + $0xc0] sm:$0xff]   ;;  %527 = vst.msk [vmem:[#allocation2 + $0xa0] sm:$0x3] %vm507_vm1, %v477_v10 }
  0x2a   : > { %2585 = vmatpush3.bf16.msra.mxu1 %v2965_v32  ;;  %v551_v14 = vld [vmem:[#allocation2 + $0x98] sm:$0xff]  ;;  %v552_v15 = vld [vmem:[#allocation2 + $0xa8] sm:$0xff]  ;;  %v553_v16 = vld [vmem:[#allocation2 + $0xb0] sm:$0xff]  ;;  %530 = vst.msk [vmem:[#allocation2 + $0xb8] sm:$0x3] %vm507_vm1, %v480_v13 }
  0x2b   : > { %2681 = vmatpush3.bf16.msra.mxu0 %v2964_v31  ;;  %2586 = vmatprep.subr.bf16.mxu1 %v2968_v47  ;;  %v3342_v17 = vpack.c.bf16 %v551_v14, %v550_v11  ;;  %v3344_v18 = vpack.c.bf16 %v553_v16, %v552_v15  ;;  %v483_v19 = vld [vmem:[%s3151_s12 + $0xb8] sm:$0x3]  ;;  %v2971_v20 = vld [vmem:[%s3652_s4 + $0x48] sm:$0xff]   ;;  %v554_v22 = vld [vmem:[#allocation2 + $0xc0] sm:$0xff]  ;;  %s2260_s12 = sshll.u32 %s3125_s15, 1 }
  0x2c   : > { %2682 = vmatprep.subr.bf16.mxu0 %v2966_v44  ;;  %533 = vst.msk [vmem:[#allocation2 + $0xd0] sm:$0x3] %vm507_vm1, %v483_v19  ;;  %v1013_v23 = vld [vmem:[#allocation2 + $0x79] sm:$0xff]  ;;  %v1015_v25 = vld [vmem:[#allocation2 + $0x91] sm:$0xff]  ;;  %v488_v29 = vld [vmem:[%s432_s9 + $0x8] sm:$0xff]  ;;  %s444_s14 = sadd.s32 %s2261_s13, %s2260_s12 }
  0x2d   : > { %2571 = vmatmul.mubr.msk.bf16.gmra.mrb[4].mxu1 %vm504_vm0, %v3275_v53  ;;  %v2973_v26 = vld [vmem:[%s3652_s4 + $0x50] sm:$0xff]   ;;  %v487_v28 = vld [vmem:[%s432_s9] sm:$0xff]  ;;  %v539_v32 = vld [vmem:[#allocation2 + $0x8] sm:$0xff]  ;;  %v502_v36 = vmul.f32 %v500_v21, %v488_v29  ;;  %s2262_s30 = sshll.u32 %s444_s14, 3 }
  0x2e   : > { %2667 = vmatmul.mubr.msk.bf16.gmra.mrb[4].mxu0 %vm504_vm0, %v3283_v57  ;;  %2574 = vmatprep.mubr.msk.bf16.mxu1 %vm504_vm0, %v3285_v58  ;;  %v555_v24 = vld [vmem:[#allocation2 + $0xc8] sm:$0xff]  ;;  %v501_v35 = vmul.f32 %v500_v21, %v487_v28  ;;  %v489_v39 = vld [vmem:[%s432_s9 + $0x10] sm:$0x3]  ;;  %v2975_v49 = vld [vmem:[%s3652_s4 + $0x58] sm:$0xff]   ;;  %s3557_s21 = scalar_lea.vmem %s3651_s3, %s2262_s30  ;;  %s3570_s19 = scalar_lea.vmem %s3654_s6, %s2262_s30 }
  0x2f   : > { %2683 = vmatpush3.bf16.msra.mxu0 %v2966_v44  ;;  %2686 = vmatprep.mubr.msk.bf16.mxu0 %vm504_vm0, %v3238_v38  ;;  %v538_v31 = vld [vmem:[#allocation2] sm:$0xff]  ;;  %v3366_v40 = vpack.c.bf16 %v555_v24, %v554_v22  ;;  %v503_v41 = vmul.f32 %v500_v21, %v489_v39  ;;  %536 = vst.msk [vmem:[#allocation2 + $0xe0] sm:$0xff] %vm504_vm0, %v502_v36  ;;  %v486_v44 = vld [vmem:[%s3293_s10 + $0x10] sm:$0x3]  ;;  %v1505_v10 = vld [vmem:[#allocation2 + $0x32] sm:$0xff] }
  0x30   : > { %2684 = vmatprep.subr.bf16.mxu0 %v2967_v59  ;;  %2587 = vmatpush3.bf16.msra.mxu1 %v2968_v47  ;;  %v1014_v30 = vld [vmem:[#allocation2 + $0x81] sm:$0xff]  ;;  %v1016_v37 = vld [vmem:[#allocation2 + $0x99] sm:$0xff]  ;;  %535 = vst.msk [vmem:[#allocation2 + $0xd8] sm:$0xff] %vm504_vm0, %v501_v35  ;;  %v558_v46 = vpack.c.bf16 %v539_v32, %v538_v31  ;;  %v496_v47 = vmul.f32 %v3298_v60, %v486_v44  ;;  %v1017_v50 = vld [vmem:[#allocation2 + $0xa9] sm:$0xff] }
  0x31   : > { %2588 = vmatprep.subr.bf16.mxu1 %v2970_v0  ;;  %v3371_v45 = vpack.c.bf16 %v1014_v30, %v1013_v23  ;;  %v3374_v48 = vpack.c.bf16 %v1016_v37, %v1015_v25  ;;  %537 = vst.msk [vmem:[#allocation2 + $0xe8] sm:$0x3] %vm507_vm1, %v503_v41  ;;  %v1018_v51 = vld [vmem:[#allocation2 + $0xb1] sm:$0xff]  ;;  %v2977_v52 = vld [vmem:[%s3652_s4 + $0xa0] sm:$0xff]   ;;  %v2979_v15 = vld [vmem:[%s3652_s4 + $0xa8] sm:$0xff]  }
  0x32   : > { %508 = vst.msk [vmem:[#allocation2 + $0x10] sm:$0x3] %vm507_vm1, %v496_v47  ;;  %v1019_v54 = vld [vmem:[#allocation2 + $0xc1] sm:$0xff]  ;;  %v3391_v56 = vpack.c.bf16 %v1018_v51, %v1017_v50  ;;  %v2976_v61 = vld [vmem:[%s3652_s4 + $0xd0] sm:$0xff]   ;;  %v2983_v25 = vld [vmem:[%s3652_s4 + $0xb8] sm:$0xff]  }
  0x33   : > { %2685 = vmatpush3.bf16.msra.mxu0 %v2967_v59  ;;  %v1020_v55 = vld [vmem:[#allocation2 + $0xc9] sm:$0xff]  ;;  %v1503_v8 = vld [vmem:[#allocation2 + $0x1a] sm:$0xff]  ;;  %v1508_v19 = vld [vmem:[#allocation2 + $0x52] sm:$0xff] }
  0x34   : > { %2702 = vmatprep.subr.bf16.mxu0 %v2969_v6  ;;  %2589 = vmatpush3.bf16.msra.mxu1 %v2970_v0  ;;  %v2974_v59 = vld [vmem:[%s3652_s4 + $0xc8] sm:$0xff]   ;;  %v3396_v60 = vpack.c.bf16 %v1020_v55, %v1019_v54  ;;  %v1506_v11 = vld [vmem:[#allocation2 + $0x3a] sm:$0xff]  ;;  %v2981_v22 = vld [vmem:[%s3652_s4 + $0xb0] sm:$0xff]  }
  0x35   : > { %2575 = vmatmul.mubr.msk.bf16.gmra.mrb[8].mxu1 %vm504_vm0, %v3342_v17  ;;  %2606 = vmatprep.subr.bf16.mxu1 %v3336_v12  ;;  %v1501_v63 = vld [vmem:[#allocation2 + $0x2] sm:$0xff]  ;;  %v3422_v14 = vpack.c.bf16 %v1506_v11, %v1505_v10  ;;  %v1507_v16 = vld [vmem:[#allocation2 + $0x4a] sm:$0xff]  ;;  %v1513_v30 = vld [vmem:[#allocation2 + $0x92] sm:$0xff] }
  0x36   : > { %2687 = vmatmul.mubr.msk.bf16.vlgmr.msra.gmra.mrb[0].mxu0 %vm504_vm0, %v3252_v43  ;;  %2578 = vmatprep.mubr.msk.bf16.mxu1 %vm504_vm0, %v3344_v18  ;;  %v1504_v9 = vld [vmem:[#allocation2 + $0x22] sm:$0xff]  ;;  %v1510_v21 = vld [vmem:[#allocation2 + $0x6a] sm:$0xff]  ;;  %v3437_v23 = vpack.c.bf16 %v1508_v19, %v1507_v16  ;;  %v1514_v31 = vld [vmem:[#allocation2 + $0x9a] sm:$0xff] }
  0x37   : > { %2703 = vmatpush3.bf16.msra.mxu0 %v2969_v6  ;;  %2690 = vmatprep.mubr.msk.bf16.mxu0 %vm504_vm0, %v3283_v57  ;;  %v1021_v62 = vld [vmem:[#allocation2 + $0xd9] sm:$0xff]  ;;  %v1522_v13 = vpack.c.bf16 %v1504_v9, %v1503_v8  ;;  %v1512_v28 = vld [vmem:[#allocation2 + $0x82] sm:$0xff]  ;;  %v1515_v36 = vld [vmem:[#allocation2 + $0xaa] sm:$0xff] }
  0x38   : > { %2704 = vmatprep.subr.bf16.mxu0 %v2971_v20  ;;  %v1022_v0 = vld [vmem:[#allocation2 + $0xe1] sm:$0xff]  ;;  %v2978_v6 = vld [vmem:[%s3652_s4 + $0xd8] sm:$0xff]   ;;  %v2984_v39 = vld [vmem:[%s3652_s4 + $0x30] sm:$0xff]  }
  0x39   : > { %v1032_v2 = vpack.c.bf16 %v1022_v0, %v1021_v62  ;;  %v2985_v29 = vld [vmem:[%s3652_s4 + $0x100] sm:$0xff]   ;;  %v2982_v35 = vld [vmem:[%s3652_s4 + $0x28] sm:$0xff]   ;;  %v1516_v37 = vld [vmem:[#allocation2 + $0xb2] sm:$0xff] }
  0x3a   : > { %v1528_v41 = vpack.c.bf16 %v1516_v37, %v1515_v36  ;;  %v1003_v44 = vld [vmem:[#allocation2 + $0x1] sm:$0xff]  ;;  %v2988_v47 = vld [vmem:[%s3652_s4 + $0x110] sm:$0xff]   ;;  %v2025_v8 = vld [vmem:[%s3557_s21 + $0x18] sm:$0xff] }
  0x3b   : > { %2705 = vmatpush3.bf16.msra.mxu0 %v2971_v20  ;;  %v1509_v20 = vld [vmem:[#allocation2 + $0x62] sm:$0xff]  ;;  %v1518_v51 = vld [vmem:[#allocation2 + $0xca] sm:$0xff] }
  0x3c   : > { %2706 = vmatprep.subr.bf16.mxu0 %v2973_v26  ;;  %v3439_v24 = vpack.c.bf16 %v1510_v21, %v1509_v20  ;;  %v1517_v50 = vld [vmem:[#allocation2 + $0xc2] sm:$0xff] }
  0x3d   : > { %2579 = vmatmul.mubr.msk.bf16.gmra.mrb[12].mxu1 %vm504_vm0, %v3366_v40  ;;  %v2027_v36 = vld [vmem:[%s3557_s21 + $0x28] sm:$0xff] }
  0x3e   : > { %2691 = vmatmul.mubr.msk.bf16.gmra.mrb[4].mxu0 %vm504_vm0, %v3371_v45  ;;  %2590 = vmatprep.mubr.msk.bf16.mxu1 %vm504_vm0, %v558_v46  ;;  %v1004_v46 = vld [vmem:[#allocation2 + $0x9] sm:$0xff] }
  0x3f   : > { %2694 = vmatprep.mubr.msk.bf16.mxu0 %vm504_vm0, %v3374_v48  ;;  %2707 = vmatpush3.bf16.msra.mxu0 %v2973_v26  ;;  %v1511_v26 = vld [vmem:[#allocation2 + $0x7a] sm:$0xff] }
  0x40   : > { %2708 = vmatprep.subr.bf16.mxu0 %v2975_v49  ;;  %v3455_v32 = vpack.c.bf16 %v1512_v28, %v1511_v26  ;;  %v2026_v26 = vld [vmem:[%s3557_s21 + $0x20] sm:$0xff] }
  0x43   : > { %2709 = vmatpush3.bf16.msra.mxu0 %v2975_v49  ;;  %v1023_v49 = vpack.c.bf16 %v1004_v46, %v1003_v44 }
  0x44   : > { %2726 = vmatprep.subr.bf16.mxu0 %v2977_v52 }
  0x45   : > { %2591 = vmatmul.mubr.msk.bf16.vlgmr.msra.gmra.mrb[0].mxu1 %vm504_vm0, %v3217_v27  ;;  %v1502_v27 = vld [vmem:[#allocation2 + $0xa] sm:$0xff] }
  0x46   : > { %2607 = vmatpush3.bf16.msra.mxu1 %v3336_v12  ;;  %2695 = vmatmul.mubr.msk.bf16.gmra.mrb[8].mxu0 %vm504_vm0, %v3391_v56  ;;  %v1521_v4 = vpack.c.bf16 %v1502_v27, %v1501_v63  ;;  %v2980_v12 = vld [vmem:[%s3652_s4 + $0x20] sm:$0xff]  }
  0x47   : > { %2594 = vmatprep.mubr.msk.bf16.mxu1 %vm504_vm0, %v3231_v34  ;;  %2608 = vmatprep.subr.bf16.mxu1 %v2974_v59  ;;  %v2022_v27 = vld [vmem:[%s3557_s21] sm:$0xff] }
  0x48   : > { %2698 = vmatprep.mubr.msk.bf16.mxu0 %vm504_vm0, %v3396_v60 }
  0x4a   : > { %2609 = vmatpush3.bf16.msra.mxu1 %v2974_v59 }
  0x4b   : > { %2610 = vmatprep.subr.bf16.mxu1 %v2976_v61 }
  0x4d   : > { %2595 = vmatmul.mubr.msk.bf16.gmra.mrb[4].mxu1 %vm504_vm0, %v3250_v42 }
  0x4e   : > { %2699 = vmatmul.mubr.msk.bf16.gmra.mrb[12].mxu0 %vm504_vm0, %v1032_v2  ;;  %2598 = vmatprep.mubr.msk.bf16.mxu1 %vm504_vm0, %v3275_v53 }
  0x4f   : > { %2710 = vmatprep.mubr.msk.bf16.mxu0 %vm504_vm0, %v1521_v4  ;;  %2611 = vmatpush3.bf16.msra.mxu1 %v2976_v61  ;;  %v2024_v61 = vld [vmem:[%s3557_s21 + $0x10] sm:$0xff] }
  0x50   : > { %2612 = vmatprep.subr.bf16.mxu1 %v2978_v6 }
  0x53   : > { %2613 = vmatpush3.bf16.msra.mxu1 %v2978_v6 }
  0x54   : > { %2630 = vmatprep.subr.bf16.mxu1 %v2980_v12 }
  0x55   : > { %2599 = vmatmul.mubr.msk.bf16.gmra.mrb[8].mxu1 %vm504_vm0, %v3285_v58 }
  0x56   : > { %2711 = vmatmul.mubr.msk.bf16.vlgmr.msra.gmra.mrb[0].mxu0 %vm504_vm0, %v1522_v13  ;;  %2602 = vmatprep.mubr.msk.bf16.mxu1 %vm504_vm0, %v3342_v17 }
  0x57   : > { %2727 = vmatpush3.bf16.msra.mxu0 %v2977_v52  ;;  %2714 = vmatprep.mubr.msk.bf16.mxu0 %vm504_vm0, %v3422_v14  ;;  %v1529_v52 = vpack.c.bf16 %v1518_v51, %v1517_v50 }
  0x58   : > { %2728 = vmatprep.subr.bf16.mxu0 %v2979_v15 }
  0x5b   : > { %2729 = vmatpush3.bf16.msra.mxu0 %v2979_v15 }
  0x5c   : > { %2730 = vmatprep.subr.bf16.mxu0 %v2981_v22 }
  0x5d   : > { %2603 = vmatmul.mubr.msk.bf16.gmra.mrb[12].mxu1 %vm504_vm0, %v3344_v18 }
  0x5e   : > { %2715 = vmatmul.mubr.msk.bf16.gmra.mrb[4].mxu0 %vm504_vm0, %v3437_v23  ;;  %2614 = vmatprep.mubr.msk.bf16.mxu1 %vm504_vm0, %v3231_v34  ;;  %v3460_v34 = vpack.c.bf16 %v1514_v31, %v1513_v30  ;;  %v2029_v31 = vld [vmem:[%s3557_s21 + $0x38] sm:$0xff] }
  0x5f   : > { %2718 = vmatprep.mubr.msk.bf16.mxu0 %vm504_vm0, %v3439_v24  ;;  %2731 = vmatpush3.bf16.msra.mxu0 %v2981_v22  ;;  %v2028_v22 = vld [vmem:[%s3557_s21 + $0x30] sm:$0xff] }
  0x60   : > { %2732 = vmatprep.subr.bf16.mxu0 %v2983_v25 }
  0x63   : > { %2733 = vmatpush3.bf16.msra.mxu0 %v2983_v25 }
  0x64   : > { %2750 = vmatprep.subr.bf16.mxu0 %v2985_v29 }
  0x65   : > { %2615 = vmatmul.mubr.msk.bf16.vlgmr.msra.gmra.mrb[0].mxu1 %vm504_vm0, %v3250_v42  ;;  %v2986_v42 = vld [vmem:[%s3652_s4 + $0x38] sm:$0xff]  }
  0x66   : > { %2631 = vmatpush3.bf16.msra.mxu1 %v2980_v12  ;;  %2719 = vmatmul.mubr.msk.bf16.gmra.mrb[8].mxu0 %vm504_vm0, %v3455_v32  ;;  %v2023_v12 = vld [vmem:[%s3557_s21 + $0x8] sm:$0xff] }
  0x67   : > { %2618 = vmatprep.mubr.msk.bf16.mxu1 %vm504_vm0, %v3275_v53  ;;  %2632 = vmatprep.subr.bf16.mxu1 %v2982_v35  ;;  %v2987_v53 = vld [vmem:[%s3652_s4 + $0x108] sm:$0xff]  }
  0x68   : > { %2722 = vmatprep.mubr.msk.bf16.mxu0 %vm504_vm0, %v3460_v34 }
  0x6a   : > { %2633 = vmatpush3.bf16.msra.mxu1 %v2982_v35 }
  0x6b   : > { %2634 = vmatprep.subr.bf16.mxu1 %v2984_v39 }
  0x6d   : > { %2619 = vmatmul.mubr.msk.bf16.gmra.mrb[4].mxu1 %vm504_vm0, %v3285_v58  ;;  %v556_v58 = vld [vmem:[#allocation2 + $0xd8] sm:$0xff] }
  0x6e   : > { %2723 = vmatmul.mubr.msk.bf16.gmra.mrb[12].mxu0 %vm504_vm0, %v1528_v41  ;;  %2622 = vmatprep.mubr.msk.bf16.mxu1 %vm504_vm0, %v3342_v17  ;;  %v557_v17 = vld [vmem:[#allocation2 + $0xe0] sm:$0xff] }
  0x6f   : > { %2734 = vmatprep.mubr.msk.bf16.mxu0 %vm504_vm0, %v1522_v13  ;;  %2635 = vmatpush3.bf16.msra.mxu1 %v2984_v39 }
  0x70   : > { %2636 = vmatprep.subr.bf16.mxu1 %v2986_v42 }
  0x73   : > { %2637 = vmatpush3.bf16.msra.mxu1 %v2986_v42 }
  0x74   : > { %2774 = vmatprep.subr.bf16.mxu1 %v3106_v1 }
  0x75   : > { %2623 = vmatmul.mubr.msk.bf16.gmra.mrb[8].mxu1 %vm504_vm0, %v3344_v18  ;;  %v567_v18 = vpack.c.bf16 %v557_v17, %v556_v58 }
  0x76   : > { %2735 = vmatmul.mubr.msk.bf16.vlgmr.msra.gmra.mrb[0].mxu0 %vm504_vm0, %v3422_v14  ;;  %2626 = vmatprep.mubr.msk.bf16.mxu1 %vm504_vm0, %v3366_v40  ;;  %v2989_v40 = vld [vmem:[%s3652_s4 + $0x118] sm:$0xff]  }
  0x77   : > { %2751 = vmatpush3.bf16.msra.mxu0 %v2985_v29  ;;  %2738 = vmatprep.mubr.msk.bf16.mxu0 %vm504_vm0, %v3437_v23 }
  0x78   : > { %2752 = vmatprep.subr.bf16.mxu0 %v2987_v53 }
  0x7b   : > { %2753 = vmatpush3.bf16.msra.mxu0 %v2987_v53 }
  0x7c   : > { %2754 = vmatprep.subr.bf16.mxu0 %v2988_v47 }
  0x7d   : > { %2627 = vmatmul.mubr.msk.bf16.gmra.mrb[12].mxu1 %vm504_vm0, %v567_v18  ;;  %v2032_v18 = vld [vmem:[%s3557_s21 + $0x50] sm:$0xff] }
  0x7e   : > { %2739 = vmatmul.mubr.msk.bf16.gmra.mrb[4].mxu0 %vm504_vm0, %v3439_v24  ;;  %2638 = vmatprep.mubr.msk.bf16.mxu1 %vm504_vm0, %v1023_v49 }
  0x7f   : > { %2742 = vmatprep.mubr.msk.bf16.mxu0 %vm504_vm0, %v3455_v32  ;;  %2755 = vmatpush3.bf16.msra.mxu0 %v2988_v47 }
  0x80   : > { %2756 = vmatprep.subr.bf16.mxu0 %v2989_v40 }
  0x83   : > { %2757 = vmatpush3.bf16.msra.mxu0 %v2989_v40 }
  0x85   : > { %2639 = vmatmul.mubr.msk.bf16.vlgmr.msra.gmra.mrb[0].mxu1 %vm504_vm0, %v3229_v33 }
  0x86   : > { %2778 = vmatpush3.bf16.msra.mxu1 %v3106_v1  ;;  %2743 = vmatmul.mubr.msk.bf16.gmra.mrb[8].mxu0 %vm504_vm0, %v3460_v34  ;;  %v1519_v1 = vld [vmem:[#allocation2 + $0xda] sm:$0xff] }
  0x87   : > { %2642 = vmatprep.mubr.msk.bf16.mxu1 %vm504_vm0, %v3238_v38  ;;  %2775 = vmatprep.subr.bf16.mxu1 %v3116_v3 }
  0x88   : > { %2746 = vmatprep.mubr.msk.bf16.mxu0 %vm504_vm0, %v1528_v41 }
  0x8a   : > { %2779 = vmatpush3.bf16.msra.mxu1 %v3116_v3  ;;  %v1520_v3 = vld [vmem:[#allocation2 + $0xe2] sm:$0xff] }
  0x8b   : > { %2776 = vmatprep.subr.bf16.mxu1 %v3131_v5 }
  0x8d   : > { %2643 = vmatmul.mubr.msk.bf16.gmra.mrb[4].mxu1 %vm504_vm0, %v3252_v43 }
  0x8e   : > { %2747 = vmatmul.mubr.msk.bf16.gmra.mrb[12].mxu0 %vm504_vm0, %v1529_v52  ;;  %2646 = vmatprep.mubr.msk.bf16.mxu1 %vm504_vm0, %v3283_v57 }
  0x8f   : > { %2758 = vmatprep.mubr.msk.bf16.mxu0 %vm504_vm0, %v3422_v14  ;;  %2780 = vmatpush3.bf16.msra.mxu1 %v3131_v5  ;;  %v1530_v5 = vpack.c.bf16 %v1520_v3, %v1519_v1 }
  0x90   : > { %2777 = vmatprep.subr.bf16.mxu1 %v3144_v7 }
  0x93   : > { %2781 = vmatpush3.bf16.msra.mxu1 %v3144_v7 }
  0x95   : > { %2647 = vmatmul.mubr.msk.bf16.gmra.mrb[8].mxu1 %vm504_vm0, %v3371_v45 }
  0x96   : > { %2759 = vmatmul.mubr.msk.bf16.vlgmr.msra.gmra.mrb[0].mxu0 %vm504_vm0, %v3437_v23  ;;  %2650 = vmatprep.mubr.msk.bf16.mxu1 %vm504_vm0, %v3374_v48 }
  0x97   : > { %2762 = vmatprep.mubr.msk.bf16.mxu0 %vm504_vm0, %v3439_v24 }
  0x9d   : > { %2651 = vmatmul.mubr.msk.bf16.gmra.mrb[12].mxu1 %vm504_vm0, %v3391_v56 }
  0x9e   : > { %2763 = vmatmul.mubr.msk.bf16.gmra.mrb[4].mxu0 %vm504_vm0, %v3455_v32  ;;  %2670 = vmatprep.mubr.msk.bf16.mxu1 %vm504_vm0, %v3371_v45 }
  0x9f   : > { %2766 = vmatprep.mubr.msk.bf16.mxu0 %vm504_vm0, %v3460_v34 }
  0xa5   : > { %2671 = vmatmul.mubr.msk.bf16.vlgmr.msra.gmra.mrb[8].mxu1 %vm504_vm0, %v3374_v48 }
  0xa6   : > { %2767 = vmatmul.mubr.msk.bf16.gmra.mrb[8].mxu0 %vm504_vm0, %v1528_v41  ;;  %2674 = vmatprep.mubr.msk.bf16.mxu1 %vm504_vm0, %v3391_v56  ;;  %v3562_v56 = vld [vmem:[%s3653_s5] ss:$0 sm:$0xff] }
  0xa7   : > { %2770 = vmatprep.mubr.msk.bf16.mxu0 %vm504_vm0, %v1529_v52  ;;  %v2030_v52 = vld [vmem:[%s3557_s21 + $0x40] sm:$0xff] }
  0xad   : > { %2675 = vmatmul.mubr.msk.bf16.gmra.mrb[12].mxu1 %vm504_vm0, %v3396_v60 }
  0xae   : > { %2771 = vmatmul.mubr.msk.bf16.gmra.mrb[12].mxu0 %vm504_vm0, %v1530_v5 }
 0x158   : > { %v2640_v7 = vpop.f32.mrb[0].mxu1 }
 0x159   : > { %v1124_v33 = vpop.f32.mrb[1].mxu1 }
 0x15a   : > { %v2641_v38 = vpop.f32.mrb[2].mxu1 }
 0x15b   : > { %v1127_v43 = vpop.f32.mrb[3].mxu1 }
 0x160   : > { %v2644_v57 = vpop.f32.mrb[4].mxu1 }
 0x161   : > { %v1140_v45 = vpop.f32.mrb[5].mxu1 }
 0x162   : > { %v2645_v48 = vpop.f32.mrb[6].mxu1 }
 0x163   : > { %v1143_v54 = vpop.f32.mrb[7].mxu1 }
 0x169   : > { %v2760_v55 = vpop.f32.mrb[0].mxu0 }
 0x16a   : > { %v2782_v59 = vadd.f32 %v2760_v55, %v2640_v7  ;;  %v1920_v60 = vpop.f32.mrb[1].mxu0  ;;  %v2033_v7 = vld [vmem:[%s3557_s21 + $0x58] sm:$0xff] }
 0x16b   : > { %v2783_v62 = vadd.f32 %v1920_v60, %v1124_v33  ;;  %v2761_v63 = vpop.f32.mrb[2].mxu0 }
 0x16c   : > { %v2008_v0 = vadd.f32 %v2782_v59, %v3562_v56  ;;  %v2784_v2 = vadd.f32 %v2761_v63, %v2641_v38  ;;  %v1923_v4 = vpop.f32.mrb[3].mxu0 }
 0x16d   : > { %v2006_v6 = vadd.f32 %v2783_v62, %v3562_v56  ;;  %v2785_v9 = vadd.f32 %v1923_v4, %v1127_v43 }
 0x16e   : > { %v2040_v10 = vadd.f32 %v2024_v61, %v2008_v0  ;;  %v2009_v11 = vadd.f32 %v2784_v2, %v3562_v56 }
 0x16f   : > { %v2038_v13 = vadd.f32 %v2022_v27, %v2006_v6  ;;  %v2007_v14 = vadd.f32 %v2785_v9, %v3562_v56  ;;  %v2036_v27 = vld [vmem:[%s3557_s21 + $0x70] sm:$0xff]  ;;  %v2034_v9 = vld [vmem:[%s3557_s21 + $0x60] sm:$0xff] }
 0x170   : > { %2057 = vst.msk [vmem:[%s3570_s19 + $0x10] sm:$0xff] %vm2054_vm2, %v2040_v10  ;;  %v2041_v15 = vadd.f32 %v2025_v8, %v2009_v11 }
 0x171   : > { %2055 = vst.msk [vmem:[%s3570_s19] sm:$0xff] %vm2054_vm2, %v2038_v13  ;;  %v2039_v16 = vadd.f32 %v2023_v12, %v2007_v14  ;;  %v2764_v19 = vpop.f32.mrb[4].mxu0  ;;  %v2037_v13 = vld [vmem:[%s3557_s21 + $0x78] sm:$0xff] }
 0x172   : > { %2058 = vst.msk [vmem:[%s3570_s19 + $0x18] sm:$0xff] %vm2054_vm2, %v2041_v15  ;;  %v2786_v20 = vadd.f32 %v2764_v19, %v2644_v57  ;;  %v1936_v21 = vpop.f32.mrb[5].mxu0  ;;  %v2031_v57 = vld [vmem:[%s3557_s21 + $0x48] sm:$0xff] }
 0x173   : > { %2056 = vst.msk [vmem:[%s3570_s19 + $0x8] sm:$0xff] %vm2054_vm2, %v2039_v16  ;;  %v2787_v23 = vadd.f32 %v1936_v21, %v1140_v45  ;;  %v2765_v24 = vpop.f32.mrb[6].mxu0  ;;  %v2035_v19 = vld [vmem:[%s3557_s21 + $0x68] sm:$0xff] }
 0x174   : > { %v2012_v25 = vadd.f32 %v2786_v20, %v3562_v56  ;;  %v2788_v28 = vadd.f32 %v2765_v24, %v2645_v48  ;;  %v1939_v29 = vpop.f32.mrb[7].mxu0 }
 0x175   : > { %v2010_v30 = vadd.f32 %v2787_v23, %v3562_v56  ;;  %v2789_v32 = vadd.f32 %v1939_v29, %v1143_v54 }
 0x176   : > { %v2044_v35 = vadd.f32 %v2028_v22, %v2012_v25  ;;  %v2013_v34 = vadd.f32 %v2788_v28, %v3562_v56 }
 0x177   : > { %v2042_v37 = vadd.f32 %v2026_v26, %v2010_v30  ;;  %v2011_v39 = vadd.f32 %v2789_v32, %v3562_v56 }
 0x178   : > { %2061 = vst.msk [vmem:[%s3570_s19 + $0x30] sm:$0xff] %vm2054_vm2, %v2044_v35  ;;  %v2045_v41 = vadd.f32 %v2029_v31, %v2013_v34  ;;  %v2672_v42 = vpop.f32.mrb[8].mxu1 }
 0x179   : > { %2059 = vst.msk [vmem:[%s3570_s19 + $0x20] sm:$0xff] %vm2054_vm2, %v2042_v37  ;;  %v2043_v53 = vadd.f32 %v2027_v36, %v2011_v39  ;;  %v2768_v58 = vpop.f32.mrb[8].mxu0  ;;  %v1305_v17 = vpop.f32.mrb[9].mxu1 }
 0x17a   : > { %2062 = vst.msk [vmem:[%s3570_s19 + $0x38] sm:$0xff] %vm2054_vm2, %v2045_v41  ;;  %v2790_v44 = vadd.f32 %v2768_v58, %v2672_v42  ;;  %v1952_v46 = vpop.f32.mrb[9].mxu0  ;;  %v2673_v47 = vpop.f32.mrb[10].mxu1 }
 0x17b   : > { %2060 = vst.msk [vmem:[%s3570_s19 + $0x28] sm:$0xff] %vm2054_vm2, %v2043_v53  ;;  %v2791_v49 = vadd.f32 %v1952_v46, %v1305_v17  ;;  %v2769_v40 = vpop.f32.mrb[10].mxu0  ;;  %v1308_v50 = vpop.f32.mrb[11].mxu1 }
 0x17c   : > { %v2016_v51 = vadd.f32 %v2790_v44, %v3562_v56  ;;  %v2792_v1 = vadd.f32 %v2769_v40, %v2673_v47  ;;  %v1955_v3 = vpop.f32.mrb[11].mxu0 }
 0x17d   : > { %v2014_v5 = vadd.f32 %v2791_v49, %v3562_v56  ;;  %v2793_v33 = vadd.f32 %v1955_v3, %v1308_v50 }
 0x17e   : > { %v2048_v38 = vadd.f32 %v2032_v18, %v2016_v51  ;;  %v2017_v43 = vadd.f32 %v2792_v1, %v3562_v56 }
 0x17f   : > { %v2046_v45 = vadd.f32 %v2030_v52, %v2014_v5  ;;  %v2015_v48 = vadd.f32 %v2793_v33, %v3562_v56 }
 0x180   : > { %2065 = vst.msk [vmem:[%s3570_s19 + $0x50] sm:$0xff] %vm2054_vm2, %v2048_v38  ;;  %v2049_v54 = vadd.f32 %v2033_v7, %v2017_v43  ;;  %v2676_v55 = vpop.f32.mrb[12].mxu1 }
 0x181   : > { %2063 = vst.msk [vmem:[%s3570_s19 + $0x40] sm:$0xff] %vm2054_vm2, %v2046_v45  ;;  %v2047_v59 = vadd.f32 %v2031_v57, %v2015_v48  ;;  %v2772_v60 = vpop.f32.mrb[12].mxu0  ;;  %v1321_v61 = vpop.f32.mrb[13].mxu1 }
 0x182   : > { %2066 = vst.msk [vmem:[%s3570_s19 + $0x58] sm:$0xff] %vm2054_vm2, %v2049_v54  ;;  %v2794_v62 = vadd.f32 %v2772_v60, %v2676_v55  ;;  %v1968_v63 = vpop.f32.mrb[13].mxu0  ;;  %v2677_v0 = vpop.f32.mrb[14].mxu1 }
 0x183   : > { %2064 = vst.msk [vmem:[%s3570_s19 + $0x48] sm:$0xff] %vm2054_vm2, %v2047_v59  ;;  %v2795_v2 = vadd.f32 %v1968_v63, %v1321_v61  ;;  %v2773_v4 = vpop.f32.mrb[14].mxu0  ;;  %v1324_v6 = vpop.f32.mrb[15].mxu1 }
 0x184   : > { %v2020_v8 = vadd.f32 %v2794_v62, %v3562_v56  ;;  %v2796_v10 = vadd.f32 %v2773_v4, %v2677_v0  ;;  %v1971_v11 = vpop.f32.mrb[15].mxu0 }
 0x185   : > { %v2018_v12 = vadd.f32 %v2795_v2, %v3562_v56  ;;  %v2797_v14 = vadd.f32 %v1971_v11, %v1324_v6 }
 0x186   : > { %v2052_v15 = vadd.f32 %v2036_v27, %v2020_v8  ;;  %v2021_v16 = vadd.f32 %v2796_v10, %v3562_v56 }
 0x187   : > { %v2050_v20 = vadd.f32 %v2034_v9, %v2018_v12  ;;  %v2019_v21 = vadd.f32 %v2797_v14, %v3562_v56 }
 0x188   : > { %2069 = vst.msk [vmem:[%s3570_s19 + $0x70] sm:$0xff] %vm2054_vm2, %v2052_v15  ;;  %v2053_v22 = vadd.f32 %v2037_v13, %v2021_v16 }
 0x189   : > { %2067 = vst.msk [vmem:[%s3570_s19 + $0x60] sm:$0xff] %vm2054_vm2, %v2050_v20  ;;  %v2051_v23 = vadd.f32 %v2035_v19, %v2019_v21 }
 0x18a   : > { %2070 = vst.msk [vmem:[%s3570_s19 + $0x78] sm:$0xff] %vm2054_vm2, %v2053_v22 }
 0x18b   : > { %2068 = vst.msk [vmem:[%s3570_s19 + $0x68] sm:$0xff] %vm2054_vm2, %v2051_v23 }
 0x18c PF: > { %s16_s25 = sadd.s32 1, %s3028_s25   ;;  %s3656_s21 = smov %s3020_s23 }
 0x18d   : > { %p13_p12 = scmp.ge.s32.totalorder %s16_s25, 6   ;;  %s3657_s22 = smov %s3024_s24 }
 0x18e   : > { %s3658_s23 = smov %s3661_s26  ;;  %s3659_s24 = smov %s3665_s27 }
 0x18f   :  { %15 = sbr.rel (!%p13_p12) target bundleno = 3 (0x3), region = 93 }

// kernel: _lambda_.5
= control target key start
LH: loop header
LB: loop body
LE: loop exit
PB: predicated region body
PF: predicated region fallthrough
CT: control target
= control target key end

     0   :  { %s2481_s18 = smov 0   ;;  %s2483_s19 = smov 0   ;;  %s2932_s0 = inlined_call_operand.vmem [shape: f32[2,16,18,4], index: 0, kind: input, shape index: {}, may-alias: {0,1,2}]   ;;  %s2933_s1 = inlined_call_operand.vmem [shape: f32[2,16,18,4], index: 1, kind: input, shape index: {}, may-alias: {0,1,2}]   ;;  %s2934_s2 = inlined_call_operand.vmem [shape: f32[2,16,18,4], index: 2, kind: input, shape index: {}, may-alias: {0,1,2}]   ;;  %s2935_s3 = inlined_call_operand.vmem [shape: bf16[3,3,4,2], index: 3, kind: input, shape index: {}]   ;;  %s2936_s4 = inlined_call_operand.vmem [shape: f32[1,2], index: 4, kind: input, shape index: {}]   ;;  %s2937_s5 = inlined_call_operand.vmem [shape: f32[2,16,16,2], index: 5, kind: output, shape index: {}]  }
   0x1   :  { %s2485_s20 = smov 0   ;;  %s2487_s21 = smov 0  }
   0x2   :  { %s2489_s22 = smov 0  }
   0x3 LB: > { %s24_s23 = sadd.s32 1, %s2441_s20  ;;  %s27_s24 = sadd.s32 1, %s2445_s21  ;;  %s2449_s22 = sphi %s2489_s22, %s15_s22   ;;  %s2445_s21 = sphi %s2487_s21, %s2942_s21   ;;  %s2441_s20 = sphi %s2485_s20, %s2941_s20   ;;  %s2437_s19 = sphi %s2483_s19, %s2940_s19   ;;  %s2433_s18 = sphi %s2481_s18, %s2939_s18  }
   0x4   : > { %p25_p0 = scmp.ge.s32.totalorder %s24_s23, 2  ;;  %p1873_p1 = scmp.ge.s32.totalorder %s2449_s22, 1 }
   0x5   : > { %p273_p2 = scmp.lt.s32.totalorder %s2449_s22, 5 }
   0x6   : > { %s2944_s23 = smov (%p25_p0, %s24_s23), 0  ;;  %s2946_s24 = smov (!%p25_p0, %s27_s24), %s2445_s21 }
   0x7   : > { %p274_p3 = pnand %p1873_p1, %p273_p2  ;;  %p29_p4 = scmp.ge.s32.totalorder %s2946_s24, 2 }
   0x8   : > { %v1893_v0 = vld [vmem:[%s2935_s3 + $0x6] sm:$0x3] (!%p274_p3)  ;;  %vm529_vm0 = vcmask (!%p274_p3), 1041408   ;;  %v2519_v1 = vld [vmem:[%s2935_s3 + $0x8] sm:$0x3] (!%p274_p3)  ;;  %s2522_s29 = sshll.u32 (!%p274_p3), %s2433_s18, 3 }
   0x9   : > { %s2948_s24 = smov (%p29_p4, %s2946_s24), 0  ;;  %277 = sbr.rel (%p274_p3) target bundleno = 396 (0x18c), region = 40 }
   0xa   : > { %2357 = vmatprep.subr.msk.bf16.mxu1 (!%p274_p3), %vm529_vm0, %v1893_v0  ;;  %2361 = vmatprep.subr.msk.bf16.mxu0 (!%p274_p3), %vm529_vm0, %v2519_v1  ;;  %v531_v2 = vsel (!%p274_p3), %vm529_vm0, %v1893_v0, 0  ;;  %v2530_v3 = vsel (!%p274_p3), %vm529_vm0, %v2519_v1, 0  ;;  %p338_p5 = scmp.lt.s32.totalorder (!%p274_p3), %s2437_s19, 1  ;;  %p340_p6 = scmp.lt.s32.totalorder (!%p274_p3), %s2522_s29, 15  ;;  %v2537_v4 = vld [vmem:[%s2935_s3] sm:$0x3] (!%p274_p3) }
   0xb   : > { %2066 = vmatpush3.bf16.msra.mxu1 (!%p274_p3), %v531_v2  ;;  %2138 = vmatpush3.bf16.msra.mxu0 (!%p274_p3), %v2530_v3  ;;  %v2542_v5 = vld [vmem:[%s2935_s3 + $0xe] sm:$0x3] (!%p274_p3)  ;;  %s1877_s11 = sadd.s32 (!%p274_p3), 4294967295, %s2522_s29  ;;  %vm438_vm1 = vcmask (!%p274_p3), 31744   ;;  %vm441_vm2 = vcmask (!%p274_p3), 25600   ;;  %s1983_s15 = sadd.s32 (!%p274_p3), 8, %s2522_s29 }
   0xc   : > { %2358 = vmatprep.subr.msk.bf16.mxu1 (!%p274_p3), %vm529_vm0, %v2537_v4  ;;  %2363 = vmatprep.subr.msk.bf16.mxu0 (!%p274_p3), %vm529_vm0, %v2542_v5  ;;  %p350_p7 = scmp.gt.s32.totalorder (!%p274_p3), %s1877_s11, 0  ;;  %p1878_p8 = scmp.lt.s32.totalorder (!%p274_p3), %s1877_s11, 15  ;;  %v634_v38 = vsel (!%p274_p3), %vm529_vm0, %v2537_v4, 0  ;;  %v1153_v43 = vsel (!%p274_p3), %vm529_vm0, %v2542_v5, 0  ;;  %v1946_v49 = vld [vmem:[%s2935_s3 + $0x4] sm:$0x3] (!%p274_p3) }
   0xd   : > { %p424_p9 = scmp.gt.s32.totalorder (!%p274_p3), %s2433_s18, 0  ;;  %p2577_p10 = scmp.lt.s32.totalorder (!%p274_p3), %s1983_s15, 15  ;;  %v2678_v50 = vld [vmem:[%s2935_s3 + $0xc] sm:$0x3] (!%p274_p3)  ;;  %vm1705_vm3 = vcmask (!%p274_p3), 15360  }
   0xe   : > { %p431_p11 = scmp.lt.s32.totalorder (!%p274_p3), %s2433_s18, 1 }
  0x10   : > { %s2950_s19 = smov (!%p338_p5, %s2437_s19), 1  ;;  %s2954_s15 = smov (!%p2577_p10, %s1983_s15), 15 }
  0x11   : > { %s2551_s9 = scalar_select %p340_p6, %s2522_s29, 15 }
  0x12   : > { %s2554_s10 = smul.u32 48, %s2950_s19  ;;  %s2956_s15 = smov (!%p2577_p10, %s2954_s15), 15 }
  0x13   : > { %s2367_s12 = smul.u32 3, %s2551_s9 }
  0x14   : > { %s351_s26 = scalar_select %p350_p7, %s1877_s11, 0 }
  0x15   : > { %s344_s13 = sadd.s32 %s2554_s10, %s2367_s12  ;;  %s2370_s11 = smul.u32 3, %s2956_s15 }
  0x16   : > { %s1875_s14 = sshll.u32 %s344_s13, 3  ;;  %s2952_s26 = smov (!%p1878_p8, %s351_s26), 15 }
  0x17   : > { %s2563_s25 = scalar_lea.vmem %s2932_s0, %s1875_s14  ;;  %s2369_s30 = smul.u32 3, %s2952_s26 }
  0x18   : > { %v394_v6 = vld [vmem:[%s2563_s25] sm:$0xff]  ;;  %v395_v7 = vld [vmem:[%s2563_s25 + $0x8] sm:$0xff]  ;;  %v396_v8 = vld [vmem:[%s2563_s25 + $0x10] sm:$0x3]  ;;  %s2598_s28 = scalar_select %p424_p9, 1, 0 }
  0x19   : > { %444 = vst.msk [vmem:[#allocation2 + $0x18] sm:$0xff] %vm438_vm1, %v394_v6  ;;  %445 = vst.msk [vmem:[#allocation2 + $0x20] sm:$0xff] %vm438_vm1, %v395_v7  ;;  %v397_v9 = vld [vmem:[%s2563_s25 + $0x18] sm:$0xff]  ;;  %v398_v10 = vld [vmem:[%s2563_s25 + $0x20] sm:$0xff]  ;;  %s2626_s6 = sadd.s32 %s2369_s30, %s2554_s10  ;;  %s375_s26 = sadd.s32 %s2370_s11, %s2554_s10 }
  0x1a   : > { %446 = vst.msk [vmem:[#allocation2 + $0x28] sm:$0x3] %vm441_vm2, %v396_v8  ;;  %v399_v11 = vld [vmem:[%s2563_s25 + $0x28] sm:$0x3]  ;;  %v400_v12 = vld [vmem:[%s2563_s25 + $0x30] sm:$0xff]  ;;  %v401_v13 = vld [vmem:[%s2563_s25 + $0x38] sm:$0xff]  ;;  %s426_s7 = scvt.s32.f32 %s2598_s28 }
  0x1b   : > { %447 = vst.msk [vmem:[#allocation2 + $0x30] sm:$0xff] %vm438_vm1, %v397_v9  ;;  %448 = vst.msk [vmem:[#allocation2 + $0x38] sm:$0xff] %vm438_vm1, %v398_v10  ;;  %v402_v14 = vld [vmem:[%s2563_s25 + $0x40] sm:$0x3]  ;;  %v403_v15 = vld [vmem:[%s2563_s25 + $0x48] sm:$0xff]  ;;  %s1883_s29 = sshll.u32 %s2626_s6, 3 }
  0x1c   : > { %449 = vst.msk [vmem:[#allocation2 + $0x40] sm:$0x3] %vm441_vm2, %v399_v11  ;;  %452 = vst.msk [vmem:[#allocation2 + $0x58] sm:$0x3] %vm441_vm2, %v402_v14  ;;  %v404_v16 = vld [vmem:[%s2563_s25 + $0x50] sm:$0xff]  ;;  %v406_v18 = vld [vmem:[%s2563_s25 + $0x60] sm:$0xff]  ;;  %s2673_s16 = scalar_lea.vmem %s2933_s1, %s1883_s29  ;;  %v427_v57 = vstv %s426_s7 }
  0x1d   : > { %450 = vst.msk [vmem:[#allocation2 + $0x48] sm:$0xff] %vm438_vm1, %v400_v12  ;;  %451 = vst.msk [vmem:[#allocation2 + $0x50] sm:$0xff] %vm438_vm1, %v401_v13  ;;  %v405_v17 = vld [vmem:[%s2563_s25 + $0x58] sm:$0x3]  ;;  %v407_v19 = vld [vmem:[%s2563_s25 + $0x68] sm:$0xff]  ;;  %s1888_s30 = sshll.u32 %s375_s26, 3 }
  0x1e   : > { %453 = vst.msk [vmem:[#allocation2 + $0x60] sm:$0xff] %vm438_vm1, %v403_v15  ;;  %454 = vst.msk [vmem:[#allocation2 + $0x68] sm:$0xff] %vm438_vm1, %v404_v16  ;;  %v409_v20 = vld [vmem:[%s2563_s25 + $0x78] sm:$0xff]  ;;  %v410_v21 = vld [vmem:[%s2563_s25 + $0x80] sm:$0xff]  ;;  %s2651_s8 = scalar_select %p431_p11, 1, 0 }
  0x1f   : > { %455 = vst.msk [vmem:[#allocation2 + $0x70] sm:$0x3] %vm441_vm2, %v405_v17  ;;  %v412_v22 = vld [vmem:[%s2563_s25 + $0x90] sm:$0xff]  ;;  %v413_v23 = vld [vmem:[%s2563_s25 + $0x98] sm:$0xff]  ;;  %v415_v24 = vld [vmem:[%s2563_s25 + $0xa8] sm:$0xff]  ;;  %s377_s29 = scalar_lea.vmem %s2934_s2, %s1888_s30  ;;  %s1890_s12 = sshll.u32 %s2551_s9, 1 }
  0x20   : > { %456 = vst.msk [vmem:[#allocation2 + $0x78] sm:$0xff] %vm438_vm1, %v406_v18  ;;  %457 = vst.msk [vmem:[#allocation2 + $0x80] sm:$0xff] %vm438_vm1, %v407_v19  ;;  %v416_v25 = vld [vmem:[%s2563_s25 + $0xb0] sm:$0xff]  ;;  %v411_v27 = vld [vmem:[%s2563_s25 + $0x88] sm:$0x3]  ;;  %s433_s27 = scvt.s32.f32 %s2651_s8  ;;  %v1325_v19 = vsel %vm529_vm0, %v1946_v49, 0 }
  0x21   : > { %459 = vst.msk [vmem:[#allocation2 + $0x90] sm:$0xff] %vm438_vm1, %v409_v20  ;;  %460 = vst.msk [vmem:[#allocation2 + $0x98] sm:$0xff] %vm438_vm1, %v410_v21  ;;  %v408_v26 = vld [vmem:[%s2563_s25 + $0x70] sm:$0x3]  ;;  %v414_v28 = vld [vmem:[%s2563_s25 + $0xa0] sm:$0x3] }
  0x22   : > { %462 = vst.msk [vmem:[#allocation2 + $0xa8] sm:$0xff] %vm438_vm1, %v412_v22  ;;  %463 = vst.msk [vmem:[#allocation2 + $0xb0] sm:$0xff] %vm438_vm1, %v413_v23  ;;  %v474_v29 = vld [vmem:[#allocation2 + $0x18] sm:$0xff]  ;;  %v475_v30 = vld [vmem:[#allocation2 + $0x20] sm:$0xff]  ;;  %v434_v0 = vstv %s433_s27  ;;  %s1891_s13 = sshll.u32 %s2950_s19, 5 }
  0x23   : > { %465 = vst.msk [vmem:[#allocation2 + $0xc0] sm:$0xff] %vm438_vm1, %v415_v24  ;;  %466 = vst.msk [vmem:[#allocation2 + $0xc8] sm:$0xff] %vm438_vm1, %v416_v25  ;;  %v856_v31 = vld [vmem:[#allocation2 + $0x19] sm:$0xff]  ;;  %v2638_v32 = vpack.c.bf16 %v475_v30, %v474_v29  ;;  %v857_v33 = vld [vmem:[#allocation2 + $0x21] sm:$0xff]  ;;  %s389_s14 = sadd.s32 %s1891_s13, %s1890_s12 }
  0x24   : > { %458 = vst.msk [vmem:[#allocation2 + $0x88] sm:$0x3] %vm441_vm2, %v408_v26  ;;  %461 = vst.msk [vmem:[#allocation2 + $0xa0] sm:$0x3] %vm441_vm2, %v411_v27  ;;  %v476_v34 = vld [vmem:[#allocation2 + $0x30] sm:$0xff]  ;;  %v477_v35 = vld [vmem:[#allocation2 + $0x38] sm:$0xff]  ;;  %v2643_v36 = vpack.c.bf16 %v857_v33, %v856_v31 }
  0x25   : > { %464 = vst.msk [vmem:[#allocation2 + $0xb8] sm:$0x3] %vm441_vm2, %v414_v28  ;;  %v2645_v37 = vpack.c.bf16 %v477_v35, %v476_v34  ;;  %v858_v39 = vld [vmem:[#allocation2 + $0x31] sm:$0xff]  ;;  %v859_v40 = vld [vmem:[#allocation2 + $0x39] sm:$0xff]  ;;  %v478_v41 = vld [vmem:[#allocation2 + $0x48] sm:$0xff]  ;;  %2067 = vmatprep.mubr.msk.bf16.mxu1 %vm438_vm1, %v2638_v32 }
  0x26   : > { %v2655_v42 = vpack.c.bf16 %v859_v40, %v858_v39  ;;  %v479_v44 = vld [vmem:[#allocation2 + $0x50] sm:$0xff]  ;;  %2139 = vmatprep.mubr.msk.bf16.mxu0 %vm438_vm1, %v2643_v36  ;;  %v480_v51 = vld [vmem:[#allocation2 + $0x60] sm:$0xff]  ;;  %v481_v52 = vld [vmem:[#allocation2 + $0x68] sm:$0xff] }
  0x27   : > { %v860_v45 = vld [vmem:[#allocation2 + $0x49] sm:$0xff]  ;;  %v861_v46 = vld [vmem:[#allocation2 + $0x51] sm:$0xff]  ;;  %2068 = vmatmul.mubr.msk.bf16.vlgmr.msra.gmra.mrb[0].mxu1 %vm438_vm1, %v2645_v37  ;;  %v2663_v47 = vpack.c.bf16 %v479_v44, %v478_v41  ;;  %v862_v53 = vld [vmem:[#allocation2 + $0x61] sm:$0xff]  ;;  %v2691_v58 = vpack.c.bf16 %v481_v52, %v480_v51  ;;  %v739_v41 = vsel %vm529_vm0, %v2678_v50, 0 }
  0x28   : > { %v2665_v48 = vpack.c.bf16 %v861_v46, %v860_v45  ;;  %2084 = vmatpush3.bf16.msra.mxu1 %v634_v38  ;;  %2140 = vmatmul.mubr.msk.bf16.vlgmr.msra.gmra.mrb[0].mxu0 %vm438_vm1, %v2655_v42  ;;  %v863_v54 = vld [vmem:[#allocation2 + $0x69] sm:$0xff]  ;;  %v482_v55 = vld [vmem:[#allocation2 + $0x78] sm:$0xff]  ;;  %v483_v56 = vld [vmem:[#allocation2 + $0x80] sm:$0xff] }
  0x29   : > { %2156 = vmatpush3.bf16.msra.mxu0 %v1153_v43  ;;  %2071 = vmatprep.mubr.msk.bf16.mxu1 %vm438_vm1, %v2663_v47  ;;  %v418_v59 = vld [vmem:[%s2673_s16] sm:$0xff]  ;;  %v2699_v60 = vpack.c.bf16 %v863_v54, %v862_v53  ;;  %v2701_v61 = vpack.c.bf16 %v483_v56, %v482_v55  ;;  %v419_v62 = vld [vmem:[%s2673_s16 + $0x8] sm:$0xff]  ;;  %v417_v4 = vld [vmem:[%s2563_s25 + $0xb8] sm:$0x3] }
  0x2a   : > { %2143 = vmatprep.mubr.msk.bf16.mxu0 %vm438_vm1, %v2665_v48  ;;  %2364 = vmatprep.subr.msk.bf16.mxu0 %vm529_vm0, %v1946_v49  ;;  %v428_v63 = vmul.f32 %v427_v57, %v418_v59  ;;  %v429_v2 = vmul.f32 %v427_v57, %v419_v62  ;;  %467 = vst.msk [vmem:[#allocation2 + $0xd0] sm:$0x3] %vm441_vm2, %v417_v4  ;;  %v421_v5 = vld [vmem:[%s377_s29] sm:$0xff]  ;;  %v422_v6 = vld [vmem:[%s377_s29 + $0x8] sm:$0xff]  ;;  %v423_v7 = vld [vmem:[%s377_s29 + $0x10] sm:$0x3] }
  0x2b   : > { %2359 = vmatprep.subr.msk.bf16.mxu1 %vm529_vm0, %v2678_v50  ;;  %v435_v8 = vmul.f32 %v434_v0, %v421_v5  ;;  %v436_v9 = vmul.f32 %v434_v0, %v422_v6  ;;  %v420_v10 = vld [vmem:[%s2673_s16 + $0x10] sm:$0x3]  ;;  %v485_v12 = vld [vmem:[#allocation2 + $0x98] sm:$0xff]  ;;  %v437_v13 = vmul.f32 %v434_v0, %v423_v7  ;;  %v486_v15 = vld [vmem:[#allocation2 + $0xa8] sm:$0xff]  ;;  %s1892_s16 = sshll.u32 %s389_s14, 3 }
  0x2c   : > { %439 = vst.msk [vmem:[#allocation2] sm:$0xff] %vm438_vm1, %v428_v63  ;;  %440 = vst.msk [vmem:[#allocation2 + $0x8] sm:$0xff] %vm438_vm1, %v429_v2  ;;  %v484_v11 = vld [vmem:[#allocation2 + $0x90] sm:$0xff]  ;;  %v430_v14 = vmul.f32 %v427_v57, %v420_v10  ;;  %v1955_v20 = vld [vmem:[%s2935_s3 + $0xa] sm:$0x3]  ;;  %s2867_s30 = scalar_lea.vmem %s2937_s5, %s1892_s16 }
  0x2d   : > { %v487_v16 = vld [vmem:[#allocation2 + $0xb0] sm:$0xff]  ;;  %469 = vst.msk [vmem:[#allocation2 + $0xd8] sm:$0xff] %vm438_vm1, %v435_v8  ;;  %470 = vst.msk [vmem:[#allocation2 + $0xe0] sm:$0xff] %vm438_vm1, %v436_v9  ;;  %v2721_v17 = vpack.c.bf16 %v485_v12, %v484_v11  ;;  %v488_v21 = vld [vmem:[#allocation2 + $0xc0] sm:$0xff]  ;;  %v1446_v59 = vsel %vm529_vm0, %v1955_v20, 0 }
  0x2e   : > { %471 = vst.msk [vmem:[#allocation2 + $0xe8] sm:$0x3] %vm441_vm2, %v437_v13  ;;  %442 = vst.msk [vmem:[#allocation2 + $0x10] sm:$0x3] %vm441_vm2, %v430_v14  ;;  %v2723_v18 = vpack.c.bf16 %v487_v16, %v486_v15  ;;  %v489_v22 = vld [vmem:[#allocation2 + $0xc8] sm:$0xff]  ;;  %v864_v23 = vld [vmem:[#allocation2 + $0x79] sm:$0xff] }
  0x2f   : > { %2072 = vmatmul.mubr.msk.bf16.gmra.mrb[4].mxu1 %vm438_vm1, %v2691_v58  ;;  %v865_v24 = vld [vmem:[#allocation2 + $0x81] sm:$0xff]  ;;  %v866_v27 = vld [vmem:[#allocation2 + $0x91] sm:$0xff]  ;;  %v867_v28 = vld [vmem:[#allocation2 + $0x99] sm:$0xff]  ;;  %v2738_v29 = vpack.c.bf16 %v489_v22, %v488_v21 }
  0x30   : > { %2144 = vmatmul.mubr.msk.bf16.gmra.mrb[4].mxu0 %vm438_vm1, %v2699_v60  ;;  %2075 = vmatprep.mubr.msk.bf16.mxu1 %vm438_vm1, %v2701_v61  ;;  %v2740_v30 = vpack.c.bf16 %v865_v24, %v864_v23  ;;  %v2742_v33 = vpack.c.bf16 %v867_v28, %v866_v27  ;;  %v868_v34 = vld [vmem:[#allocation2 + $0xa9] sm:$0xff]  ;;  %v869_v35 = vld [vmem:[#allocation2 + $0xb1] sm:$0xff]  ;;  %v870_v38 = vld [vmem:[#allocation2 + $0xc1] sm:$0xff] }
  0x31   : > { %2157 = vmatprep.mubr.msk.bf16.mxu0 %vm438_vm1, %v2655_v42  ;;  %v871_v39 = vld [vmem:[#allocation2 + $0xc9] sm:$0xff]  ;;  %v2751_v40 = vpack.c.bf16 %v869_v35, %v868_v34  ;;  %v1919_v44 = vld [vmem:[%s2935_s3 + $0x2] sm:$0x3]  ;;  %v1270_v52 = vld [vmem:[#allocation2 + $0x1a] sm:$0xff] }
  0x32   : > { %v2755_v43 = vpack.c.bf16 %v871_v39, %v870_v38  ;;  %v1271_v53 = vld [vmem:[#allocation2 + $0x22] sm:$0xff]  ;;  %v1272_v54 = vld [vmem:[#allocation2 + $0x32] sm:$0xff]  ;;  %v1273_v55 = vld [vmem:[#allocation2 + $0x3a] sm:$0xff]  ;;  %v911_v12 = vsel %vm529_vm0, %v1919_v44, 0 }
  0x33   : > { %v472_v25 = vld [vmem:[#allocation2] sm:$0xff]  ;;  %v473_v26 = vld [vmem:[#allocation2 + $0x8] sm:$0xff]  ;;  %v1289_v56 = vpack.c.bf16 %v1271_v53, %v1270_v52  ;;  %v2775_v57 = vpack.c.bf16 %v1273_v55, %v1272_v54  ;;  %v1964_v62 = vld [vmem:[%s2935_s3 + $0x10] sm:$0x3] }
  0x34   : > { %v492_v31 = vpack.c.bf16 %v473_v26, %v472_v25  ;;  %v872_v45 = vld [vmem:[#allocation2 + $0xd9] sm:$0xff]  ;;  %v1268_v49 = vld [vmem:[#allocation2 + $0x2] sm:$0xff]  ;;  %v1274_v63 = vld [vmem:[#allocation2 + $0x4a] sm:$0xff] }
  0x35   : > { %v873_v46 = vld [vmem:[#allocation2 + $0xe1] sm:$0xff]  ;;  %v1269_v50 = vld [vmem:[#allocation2 + $0xa] sm:$0xff]  ;;  %v1275_v0 = vld [vmem:[#allocation2 + $0x52] sm:$0xff] }
  0x36   : > { %v1288_v51 = vpack.c.bf16 %v1269_v50, %v1268_v49  ;;  %v1276_v2 = vld [vmem:[#allocation2 + $0x62] sm:$0xff]  ;;  %v1277_v4 = vld [vmem:[#allocation2 + $0x6a] sm:$0xff]  ;;  %v1291_v5 = vpack.c.bf16 %v1275_v0, %v1274_v63  ;;  %v1278_v7 = vld [vmem:[#allocation2 + $0x7a] sm:$0xff] }
  0x37   : > { %2076 = vmatmul.mubr.msk.bf16.gmra.mrb[8].mxu1 %vm438_vm1, %v2721_v17  ;;  %v1292_v6 = vpack.c.bf16 %v1277_v4, %v1276_v2  ;;  %v1279_v8 = vld [vmem:[#allocation2 + $0x82] sm:$0xff]  ;;  %v1280_v9 = vld [vmem:[#allocation2 + $0x92] sm:$0xff]  ;;  %v1281_v10 = vld [vmem:[#allocation2 + $0x9a] sm:$0xff] }
  0x38   : > { %2158 = vmatmul.mubr.msk.bf16.vlgmr.msra.gmra.mrb[0].mxu0 %vm438_vm1, %v2665_v48  ;;  %2079 = vmatprep.mubr.msk.bf16.mxu1 %vm438_vm1, %v2723_v18  ;;  %v1293_v11 = vpack.c.bf16 %v1279_v8, %v1278_v7  ;;  %v1294_v13 = vpack.c.bf16 %v1281_v10, %v1280_v9  ;;  %v1283_v14 = vld [vmem:[#allocation2 + $0xb2] sm:$0xff]  ;;  %v855_v16 = vld [vmem:[#allocation2 + $0x9] sm:$0xff] }
  0x39   : > { %2174 = vmatpush3.bf16.msra.mxu0 %v1325_v19  ;;  %2161 = vmatprep.mubr.msk.bf16.mxu0 %vm438_vm1, %v2699_v60 }
  0x3a   : > { %2365 = vmatprep.subr.msk.bf16.mxu0 %vm529_vm0, %v1955_v20  ;;  %v1285_v20 = vld [vmem:[#allocation2 + $0xca] sm:$0xff] }
  0x3f   : > { %2080 = vmatmul.mubr.msk.bf16.gmra.mrb[12].mxu1 %vm438_vm1, %v2738_v29 }
  0x40   : > { %2162 = vmatmul.mubr.msk.bf16.gmra.mrb[4].mxu0 %vm438_vm1, %v2740_v30  ;;  %2085 = vmatprep.mubr.msk.bf16.mxu1 %vm438_vm1, %v492_v31 }
  0x41   : > { %2165 = vmatprep.mubr.msk.bf16.mxu0 %vm438_vm1, %v2742_v33 }
  0x47   : > { %2086 = vmatmul.mubr.msk.bf16.vlgmr.msra.gmra.mrb[0].mxu1 %vm438_vm1, %v2638_v32  ;;  %v883_v32 = vpack.c.bf16 %v873_v46, %v872_v45 }
  0x48   : > { %2102 = vmatpush3.bf16.msra.mxu1 %v739_v41  ;;  %2166 = vmatmul.mubr.msk.bf16.gmra.mrb[8].mxu0 %vm438_vm1, %v2751_v40 }
  0x49   : > { %2089 = vmatprep.mubr.msk.bf16.mxu1 %vm438_vm1, %v2645_v37  ;;  %2169 = vmatprep.mubr.msk.bf16.mxu0 %vm438_vm1, %v2755_v43 }
  0x4a   : > { %2360 = vmatprep.subr.msk.bf16.mxu1 %vm529_vm0, %v1919_v44 }
  0x4f   : > { %2090 = vmatmul.mubr.msk.bf16.gmra.mrb[4].mxu1 %vm438_vm1, %v2663_v47 }
  0x50   : > { %2170 = vmatmul.mubr.msk.bf16.gmra.mrb[12].mxu0 %vm438_vm1, %v883_v32  ;;  %2093 = vmatprep.mubr.msk.bf16.mxu1 %vm438_vm1, %v2691_v58 }
  0x51   : > { %2175 = vmatprep.mubr.msk.bf16.mxu0 %vm438_vm1, %v1288_v51 }
  0x57   : > { %2094 = vmatmul.mubr.msk.bf16.gmra.mrb[8].mxu1 %vm438_vm1, %v2701_v61 }
  0x58   : > { %2176 = vmatmul.mubr.msk.bf16.vlgmr.msra.gmra.mrb[0].mxu0 %vm438_vm1, %v1289_v56  ;;  %2097 = vmatprep.mubr.msk.bf16.mxu1 %vm438_vm1, %v2721_v17 }
  0x59   : > { %2192 = vmatpush3.bf16.msra.mxu0 %v1446_v59  ;;  %2179 = vmatprep.mubr.msk.bf16.mxu0 %vm438_vm1, %v2775_v57 }
  0x5a   : > { %2366 = vmatprep.subr.msk.bf16.mxu0 %vm529_vm0, %v1964_v62 }
  0x5f   : > { %2098 = vmatmul.mubr.msk.bf16.gmra.mrb[12].mxu1 %vm438_vm1, %v2723_v18 }
  0x60   : > { %2180 = vmatmul.mubr.msk.bf16.gmra.mrb[4].mxu0 %vm438_vm1, %v1291_v5  ;;  %2103 = vmatprep.mubr.msk.bf16.mxu1 %vm438_vm1, %v2645_v37  ;;  %v1282_v37 = vld [vmem:[#allocation2 + $0xaa] sm:$0xff] }
  0x61   : > { %2183 = vmatprep.mubr.msk.bf16.mxu0 %vm438_vm1, %v1292_v6  ;;  %v1295_v15 = vpack.c.bf16 %v1283_v14, %v1282_v37 }
  0x67   : > { %2104 = vmatmul.mubr.msk.bf16.vlgmr.msra.gmra.mrb[0].mxu1 %vm438_vm1, %v2663_v47  ;;  %v1567_v47 = vsel %vm529_vm0, %v1964_v62, 0 }
  0x68   : > { %2120 = vmatpush3.bf16.msra.mxu1 %v911_v12  ;;  %2184 = vmatmul.mubr.msk.bf16.gmra.mrb[8].mxu0 %vm438_vm1, %v1293_v11 }
  0x69   : > { %2107 = vmatprep.mubr.msk.bf16.mxu1 %vm438_vm1, %v2691_v58  ;;  %2187 = vmatprep.mubr.msk.bf16.mxu0 %vm438_vm1, %v1294_v13  ;;  %v491_v58 = vld [vmem:[#allocation2 + $0xe0] sm:$0xff] }
  0x6a   : > { %2362 = vmatprep.subr.msk.bf16.mxu1 %vm529_vm0, %v2519_v1  ;;  %v490_v1 = vld [vmem:[#allocation2 + $0xd8] sm:$0xff] }
  0x6f   : > { %2108 = vmatmul.mubr.msk.bf16.gmra.mrb[4].mxu1 %vm438_vm1, %v2701_v61  ;;  %v854_v61 = vld [vmem:[#allocation2 + $0x1] sm:$0xff] }
  0x70   : > { %2188 = vmatmul.mubr.msk.bf16.gmra.mrb[12].mxu0 %vm438_vm1, %v1295_v15  ;;  %2111 = vmatprep.mubr.msk.bf16.mxu1 %vm438_vm1, %v2721_v17  ;;  %v501_v17 = vpack.c.bf16 %v491_v58, %v490_v1  ;;  %v874_v19 = vpack.c.bf16 %v855_v16, %v854_v61 }
  0x71   : > { %2193 = vmatprep.mubr.msk.bf16.mxu0 %vm438_vm1, %v1289_v56 }
  0x77   : > { %2112 = vmatmul.mubr.msk.bf16.gmra.mrb[8].mxu1 %vm438_vm1, %v2723_v18  ;;  %v1284_v18 = vld [vmem:[#allocation2 + $0xc2] sm:$0xff] }
  0x78   : > { %2194 = vmatmul.mubr.msk.bf16.vlgmr.msra.gmra.mrb[0].mxu0 %vm438_vm1, %v2775_v57  ;;  %2115 = vmatprep.mubr.msk.bf16.mxu1 %vm438_vm1, %v2738_v29  ;;  %v1296_v21 = vpack.c.bf16 %v1285_v20, %v1284_v18  ;;  %v2862_v29 = vld [vmem:[%s2936_s4] ss:$0 sm:$0xff] }
  0x79   : > { %2210 = vmatpush3.bf16.msra.mxu0 %v1567_v47  ;;  %2197 = vmatprep.mubr.msk.bf16.mxu0 %vm438_vm1, %v1291_v5 }
  0x7f   : > { %2116 = vmatmul.mubr.msk.bf16.gmra.mrb[12].mxu1 %vm438_vm1, %v501_v17 }
  0x80   : > { %2198 = vmatmul.mubr.msk.bf16.gmra.mrb[4].mxu0 %vm438_vm1, %v1292_v6  ;;  %2121 = vmatprep.mubr.msk.bf16.mxu1 %vm438_vm1, %v874_v19 }
  0x81   : > { %2201 = vmatprep.mubr.msk.bf16.mxu0 %vm438_vm1, %v1293_v11 }
  0x87   : > { %2122 = vmatmul.mubr.msk.bf16.vlgmr.msra.gmra.mrb[0].mxu1 %vm438_vm1, %v2643_v36  ;;  %v1287_v36 = vld [vmem:[#allocation2 + $0xe2] sm:$0xff] }
  0x88   : > { %2228 = vmatpush3.bf16.msra.mxu1 %v2530_v3  ;;  %2202 = vmatmul.mubr.msk.bf16.gmra.mrb[8].mxu0 %vm438_vm1, %v1294_v13  ;;  %v1286_v3 = vld [vmem:[#allocation2 + $0xda] sm:$0xff] }
  0x89   : > { %2125 = vmatprep.mubr.msk.bf16.mxu1 %vm438_vm1, %v2655_v42  ;;  %2205 = vmatprep.mubr.msk.bf16.mxu0 %vm438_vm1, %v1295_v15  ;;  %v1297_v42 = vpack.c.bf16 %v1287_v36, %v1286_v3 }
  0x8f   : > { %2126 = vmatmul.mubr.msk.bf16.gmra.mrb[4].mxu1 %vm438_vm1, %v2665_v48 }
  0x90   : > { %2206 = vmatmul.mubr.msk.bf16.gmra.mrb[12].mxu0 %vm438_vm1, %v1296_v21  ;;  %2129 = vmatprep.mubr.msk.bf16.mxu1 %vm438_vm1, %v2699_v60 }
  0x91   : > { %2211 = vmatprep.mubr.msk.bf16.mxu0 %vm438_vm1, %v2775_v57 }
  0x97   : > { %2130 = vmatmul.mubr.msk.bf16.gmra.mrb[8].mxu1 %vm438_vm1, %v2740_v30 }
  0x98   : > { %2212 = vmatmul.mubr.msk.bf16.vlgmr.msra.gmra.mrb[0].mxu0 %vm438_vm1, %v1291_v5  ;;  %2133 = vmatprep.mubr.msk.bf16.mxu1 %vm438_vm1, %v2742_v33 }
  0x99   : > { %2215 = vmatprep.mubr.msk.bf16.mxu0 %vm438_vm1, %v1292_v6 }
  0x9f   : > { %2134 = vmatmul.mubr.msk.bf16.gmra.mrb[12].mxu1 %vm438_vm1, %v2751_v40 }
  0xa0   : > { %2216 = vmatmul.mubr.msk.bf16.gmra.mrb[4].mxu0 %vm438_vm1, %v1293_v11  ;;  %2147 = vmatprep.mubr.msk.bf16.mxu1 %vm438_vm1, %v2740_v30 }
  0xa1   : > { %2219 = vmatprep.mubr.msk.bf16.mxu0 %vm438_vm1, %v1294_v13 }
  0xa7   : > { %2148 = vmatmul.mubr.msk.bf16.vlgmr.msra.gmra.mrb[8].mxu1 %vm438_vm1, %v2742_v33 }
  0xa8   : > { %2220 = vmatmul.mubr.msk.bf16.gmra.mrb[8].mxu0 %vm438_vm1, %v1295_v15  ;;  %2151 = vmatprep.mubr.msk.bf16.mxu1 %vm438_vm1, %v2751_v40 }
  0xa9   : > { %2223 = vmatprep.mubr.msk.bf16.mxu0 %vm438_vm1, %v1296_v21 }
  0xaf   : > { %2152 = vmatmul.mubr.msk.bf16.gmra.mrb[12].mxu1 %vm438_vm1, %v2755_v43 }
  0xb0   : > { %2224 = vmatmul.mubr.msk.bf16.gmra.mrb[12].mxu0 %vm438_vm1, %v1297_v42 }
 0x15a   : > { %v2123_v48 = vpop.f32.mrb[0].mxu1 }
 0x15b   : > { %v947_v60 = vpop.f32.mrb[1].mxu1 }
 0x15c   : > { %v2124_v22 = vpop.f32.mrb[2].mxu1 }
 0x15d   : > { %v950_v23 = vpop.f32.mrb[3].mxu1 }
 0x162   : > { %v2127_v24 = vpop.f32.mrb[4].mxu1 }
 0x163   : > { %v963_v25 = vpop.f32.mrb[5].mxu1 }
 0x164   : > { %v2128_v26 = vpop.f32.mrb[6].mxu1 }
 0x165   : > { %v966_v27 = vpop.f32.mrb[7].mxu1 }
 0x16b   : > { %v2213_v28 = vpop.f32.mrb[0].mxu0 }
 0x16c   : > { %v2229_v30 = vadd.f32 %v2213_v28, %v2123_v48  ;;  %v1603_v31 = vpop.f32.mrb[1].mxu0 }
 0x16d   : > { %v2230_v33 = vadd.f32 %v1603_v31, %v947_v60  ;;  %v2214_v34 = vpop.f32.mrb[2].mxu0 }
 0x16e   : > { %v1691_v35 = vadd.f32 %v2229_v30, %v2862_v29  ;;  %v2231_v38 = vadd.f32 %v2214_v34, %v2124_v22  ;;  %v1606_v39 = vpop.f32.mrb[3].mxu0 }
 0x16f   : > { %v1689_v40 = vadd.f32 %v2230_v33, %v2862_v29  ;;  %v2232_v41 = vadd.f32 %v1606_v39, %v950_v23 }
 0x170   : > { %1708 = vst.msk [vmem:[%s2867_s30 + $0x10] sm:$0xff] %vm1705_vm3, %v1691_v35  ;;  %v1692_v43 = vadd.f32 %v2231_v38, %v2862_v29 }
 0x171   : > { %1706 = vst.msk [vmem:[%s2867_s30] sm:$0xff] %vm1705_vm3, %v1689_v40  ;;  %v1690_v44 = vadd.f32 %v2232_v41, %v2862_v29 }
 0x172   : > { %1709 = vst.msk [vmem:[%s2867_s30 + $0x18] sm:$0xff] %vm1705_vm3, %v1692_v43 }
 0x173   : > { %1707 = vst.msk [vmem:[%s2867_s30 + $0x8] sm:$0xff] %vm1705_vm3, %v1690_v44  ;;  %v2217_v45 = vpop.f32.mrb[4].mxu0 }
 0x174   : > { %v2233_v46 = vadd.f32 %v2217_v45, %v2127_v24  ;;  %v1619_v49 = vpop.f32.mrb[5].mxu0 }
 0x175   : > { %v2234_v50 = vadd.f32 %v1619_v49, %v963_v25  ;;  %v2218_v32 = vpop.f32.mrb[6].mxu0 }
 0x176   : > { %v1695_v51 = vadd.f32 %v2233_v46, %v2862_v29  ;;  %v2235_v52 = vadd.f32 %v2218_v32, %v2128_v26  ;;  %v1622_v53 = vpop.f32.mrb[7].mxu0 }
 0x177   : > { %v1693_v54 = vadd.f32 %v2234_v50, %v2862_v29  ;;  %v2236_v55 = vadd.f32 %v1622_v53, %v966_v27 }
 0x178   : > { %1712 = vst.msk [vmem:[%s2867_s30 + $0x30] sm:$0xff] %vm1705_vm3, %v1695_v51  ;;  %v1696_v56 = vadd.f32 %v2235_v52, %v2862_v29 }
 0x179   : > { %1710 = vst.msk [vmem:[%s2867_s30 + $0x20] sm:$0xff] %vm1705_vm3, %v1693_v54  ;;  %v1694_v57 = vadd.f32 %v2236_v55, %v2862_v29 }
 0x17a   : > { %1713 = vst.msk [vmem:[%s2867_s30 + $0x38] sm:$0xff] %vm1705_vm3, %v1696_v56  ;;  %v2149_v59 = vpop.f32.mrb[8].mxu1 }
 0x17b   : > { %1711 = vst.msk [vmem:[%s2867_s30 + $0x28] sm:$0xff] %vm1705_vm3, %v1694_v57  ;;  %v2221_v62 = vpop.f32.mrb[8].mxu0  ;;  %v1100_v63 = vpop.f32.mrb[9].mxu1 }
 0x17c   : > { %v2237_v0 = vadd.f32 %v2221_v62, %v2149_v59  ;;  %v1635_v2 = vpop.f32.mrb[9].mxu0  ;;  %v2150_v4 = vpop.f32.mrb[10].mxu1 }
 0x17d   : > { %v2238_v5 = vadd.f32 %v1635_v2, %v1100_v63  ;;  %v2222_v6 = vpop.f32.mrb[10].mxu0  ;;  %v1103_v7 = vpop.f32.mrb[11].mxu1 }
 0x17e   : > { %v1699_v8 = vadd.f32 %v2237_v0, %v2862_v29  ;;  %v2239_v9 = vadd.f32 %v2222_v6, %v2150_v4  ;;  %v1638_v10 = vpop.f32.mrb[11].mxu0 }
 0x17f   : > { %v1697_v11 = vadd.f32 %v2238_v5, %v2862_v29  ;;  %v2240_v12 = vadd.f32 %v1638_v10, %v1103_v7 }
 0x180   : > { %1716 = vst.msk [vmem:[%s2867_s30 + $0x50] sm:$0xff] %vm1705_vm3, %v1699_v8  ;;  %v1700_v13 = vadd.f32 %v2239_v9, %v2862_v29 }
 0x181   : > { %1714 = vst.msk [vmem:[%s2867_s30 + $0x40] sm:$0xff] %vm1705_vm3, %v1697_v11  ;;  %v1698_v37 = vadd.f32 %v2240_v12, %v2862_v29 }
 0x182   : > { %1717 = vst.msk [vmem:[%s2867_s30 + $0x58] sm:$0xff] %vm1705_vm3, %v1700_v13  ;;  %v2153_v14 = vpop.f32.mrb[12].mxu1 }
 0x183   : > { %1715 = vst.msk [vmem:[%s2867_s30 + $0x48] sm:$0xff] %vm1705_vm3, %v1698_v37  ;;  %v2225_v15 = vpop.f32.mrb[12].mxu0  ;;  %v1116_v47 = vpop.f32.mrb[13].mxu1 }
 0x184   : > { %v2241_v1 = vadd.f32 %v2225_v15, %v2153_v14  ;;  %v1651_v58 = vpop.f32.mrb[13].mxu0  ;;  %v2154_v61 = vpop.f32.mrb[14].mxu1 }
 0x185   : > { %v2242_v16 = vadd.f32 %v1651_v58, %v1116_v47  ;;  %v2226_v17 = vpop.f32.mrb[14].mxu0  ;;  %v1119_v19 = vpop.f32.mrb[15].mxu1 }
 0x186   : > { %v1703_v18 = vadd.f32 %v2241_v1, %v2862_v29  ;;  %v2243_v20 = vadd.f32 %v2226_v17, %v2154_v61  ;;  %v1654_v21 = vpop.f32.mrb[15].mxu0 }
 0x187   : > { %v1701_v3 = vadd.f32 %v2242_v16, %v2862_v29  ;;  %v2244_v36 = vadd.f32 %v1654_v21, %v1119_v19 }
 0x188   : > { %1720 = vst.msk [vmem:[%s2867_s30 + $0x70] sm:$0xff] %vm1705_vm3, %v1703_v18  ;;  %v1704_v42 = vadd.f32 %v2243_v20, %v2862_v29 }
 0x189   : > { %1718 = vst.msk [vmem:[%s2867_s30 + $0x60] sm:$0xff] %vm1705_vm3, %v1701_v3  ;;  %v1702_v48 = vadd.f32 %v2244_v36, %v2862_v29 }
 0x18a   : > { %1721 = vst.msk [vmem:[%s2867_s30 + $0x78] sm:$0xff] %vm1705_vm3, %v1704_v42 }
 0x18b   : > { %1719 = vst.msk [vmem:[%s2867_s30 + $0x68] sm:$0xff] %vm1705_vm3, %v1702_v48 }
 0x18c PF: > { %s15_s22 = sadd.s32 1, %s2449_s22   ;;  %s2939_s18 = smov %s2441_s20 }
 0x18d   : > { %p12_p12 = scmp.ge.s32.totalorder %s15_s22, 6   ;;  %s2940_s19 = smov %s2445_s21 }
 0x18e   : > { %s2941_s20 = smov %s2944_s23  ;;  %s2942_s21 = smov %s2948_s24 }
 0x18f   :  { %14 = sbr.rel (!%p12_p12) target bundleno = 3 (0x3), region = 86 }

</bundles_post_ra>
